<compile_context>
chip_gen: v7x
topology: tpu7x:2x2x1
jax: 0.10.0
libtpu: 0.0.40
codegen_flags: <defaults>
</compile_context>

<pallas_src>
import functools

import jax
import jax.numpy as jnp
import numpy as np
from jax.experimental import pallas as pl
from jax.experimental.pallas import tpu as pltpu


# ---------------------------------------------------------------------------
# Fused kernel: conv1+ReLU+pool -> conv2+ReLU+pool -> fc1+ReLU -> fc2
# ---------------------------------------------------------------------------
def _fused_cnn_kernel(patches1_ref, w1_ref, b1_ref, w2_ref, b2_ref,
                      wf1_ref, bf1_ref, wf2_ref, bf2_ref,
                      out_ref,
                      xpad2_ref,
                      *, height, width):
    f32 = jnp.float32
    bf16 = jnp.bfloat16
    NB = out_ref.shape[0]
    H, W = height, width
    Ho1, Wo1 = H // 2, W // 2
    Ho2, Wo2 = Ho1 // 2, Wo1 // 2
    C1 = w1_ref.shape[1]                  # 64
    C2 = w2_ref.shape[2]                  # 128

    # ----- conv1 (+bias, ReLU): one bf16 MXU matmul, batch folded into M ----
    a1 = jnp.dot(patches1_ref[...], w1_ref[...], preferred_element_type=f32)
    a1 = jnp.maximum(a1 + b1_ref[...], 0.0)                 # (NB*H*W, C1) f32

    # ----- 2x2 max-pool, stride 2 (channels stay on the lane axis) ----------
    a1 = a1.reshape(NB, Ho1, 2, Wo1, 2, C1)
    p1 = jnp.max(jnp.max(a1, axis=4), axis=2)               # (NB, Ho1, Wo1, C1)

    # ----- conv2 pad=1: zero only the 1-px border, overwrite the interior ---
    # (per-step border zero keeps the scratch correct on every grid step and
    #  on every core when the batch axis is sharded across TensorCores)
    zrow = jnp.zeros((NB, 1, Wo1 + 2, C1), f32)
    zcol = jnp.zeros((NB, Ho1 + 2, 1, C1), f32)
    xpad2_ref[:, 0:1, :, :] = zrow
    xpad2_ref[:, Ho1 + 1:Ho1 + 2, :, :] = zrow
    xpad2_ref[:, :, 0:1, :] = zcol
    xpad2_ref[:, :, Wo1 + 1:Wo1 + 2, :] = zcol
    xpad2_ref[:, 1:Ho1 + 1, 1:Wo1 + 1, :] = p1

    # ----- conv2: 9 per-tap accumulating bf16 matmuls (K=C1 each, no zero K) -
    xp = xpad2_ref[...].astype(bf16)                         # (NB, Ho1+2, Wo1+2, C1)
    taps = [(dy, dx) for dy in range(3) for dx in range(3)]
    acc2 = jnp.zeros((NB * Ho1 * Wo1, C2), f32)
    for t, (dy, dx) in enumerate(taps):
        tap = xp[:, dy:dy + Ho1, dx:dx + Wo1, :].reshape(NB * Ho1 * Wo1, C1)
        acc2 = acc2 + jnp.dot(tap, w2_ref[t], preferred_element_type=f32)
    a2 = jnp.maximum(acc2 + b2_ref[...], 0.0)                # (NB*Ho1*Wo1, C2)

    # ----- 2x2 max-pool, stride 2 --------------------------------------------
    a2 = a2.reshape(NB, Ho2, 2, Wo2, 2, C2)
    p2 = jnp.max(jnp.max(a2, axis=4), axis=2)                # (NB, Ho2, Wo2, C2)
    p2 = p2.reshape(NB, Ho2 * Wo2, C2).astype(bf16)

    # ----- fc1 (+ReLU): flatten folded into per-site accumulating matmuls ----
    # (w_fc1 rows were pre-permuted to the kernel's NHWC order in prepare_params)
    h = jnp.zeros((NB, wf1_ref.shape[2]), f32)
    for s in range(Ho2 * Wo2):
        h = h + jnp.dot(p2[:, s, :], wf1_ref[s], preferred_element_type=f32)
    h = jnp.maximum(h + bf1_ref[...], 0.0)

    # ----- fc2 (dropout = identity in eval mode) -----------------------------
    logits = jnp.dot(h.astype(bf16), wf2_ref[...],
                     preferred_element_type=f32) + bf2_ref[...]
    out_ref[...] = logits.astype(out_ref.dtype)


# ---------------------------------------------------------------------------
# Batch-block / VMEM sizing helpers.
# ---------------------------------------------------------------------------
def _default_batch_block(n):
    """Largest multiple-of-8 divisor of n that still gives >=4 (else >=2) grid steps."""
    divs = [d for d in range(8, n + 1, 8) if n % d == 0]
    if not divs:
        return n
    for min_steps in (4, 2):
        cands = [d for d in divs if n // d >= min_steps]
        if cands:
            return max(cands)
    return n


def _pad_to(a, b):
    return -(-a // b) * b


def _vmem_step_estimate(nb, h, w, c_in, num_classes):
    """Rough per-step VMEM footprint: blocks + scratch + dominant value temps."""
    ho1, wo1 = h // 2, w // 2
    ho2, wo2 = ho1 // 2, wo1 // 2
    patches1 = 2 * nb * h * w * _pad_to(9 * c_in, 128) * 2          # bf16, double-buffered
    xpad2 = nb * (ho1 + 2) * _pad_to(wo1 + 2, 8) * 128 * 4          # f32 scratch
    xp_bf16 = xpad2 // 2
    a1 = nb * h * w * 128 * 4
    a2 = 2 * nb * ho1 * wo1 * 128 * 4
    weights = 2 * 2 * (9 * c_in * 128 + 9 * 64 * 128
                       + ho2 * wo2 * 128 * 128 + 128 * _pad_to(num_classes, 128))
    return patches1 + xpad2 + xp_bf16 + a1 + a2 + weights


def _vmem_capacity_bytes():
    try:
        cap = getattr(pltpu.get_tpu_info(), "vmem_capacity_bytes", None)
        if cap:
            return int(cap)
    except Exception:
        pass
    return 64 * 1024 * 1024        # conservative (v7x-sized) fallback


# ---------------------------------------------------------------------------
# Wrapper: builds conv1 im2col patches (tiny, bf16) and launches the kernel.
# ---------------------------------------------------------------------------
def classifier_cnn_pallas(kparams, x_nchw, *, batch_block=None):
    """Forward pass.  x_nchw: (N, C, H, W) float32 -> (N, num_classes) float32."""
    N, Cin, H, W = x_nchw.shape
    assert H % 4 == 0 and W % 4 == 0, "H and W must be divisible by 4 (two 2x2 pools)"

    num_classes = kparams["w_fc2"].shape[1]
    C1 = kparams["w_conv1"].shape[1]
    Ho1, Wo1 = H // 2, W // 2

    vmem_cap = _vmem_capacity_bytes()
    vmem_limit = min(96 * 1024 * 1024, (vmem_cap * 3) // 4)

    NB = _default_batch_block(N) if batch_block is None else batch_block
    if batch_block is None:
        # Shrink the batch block until the per-step footprint fits comfortably
        # (re-derived per generation: v7x has 64 MiB VMEM vs 128 on v5e/v6e).
        while NB % 16 == 0 and _vmem_step_estimate(NB, H, W, Cin, num_classes) > vmem_limit // 2:
            NB //= 2
    assert N % NB == 0 and (NB == N or NB % 8 == 0)

    # conv1 im2col (only 9*Cin columns) is built once by XLA in bf16; all
    # remaining layers run inside the single fused Pallas kernel.
    x = jnp.transpose(x_nchw, (0, 2, 3, 1)).astype(jnp.float32)       # NHWC
    xp = jnp.pad(x, ((0, 0), (1, 1), (1, 1), (0, 0)))
    patches1 = jnp.concatenate(
        [xp[:, dy:dy + H, dx:dx + W, :] for dy in range(3) for dx in range(3)],
        axis=-1).reshape(N * H * W, 9 * Cin).astype(jnp.bfloat16)

    kernel = functools.partial(_fused_cnn_kernel, height=H, width=W)
    return pl.pallas_call(
        kernel,
        out_shape=jax.ShapeDtypeStruct((N, num_classes), jnp.float32),
        grid=(N // NB,),
        in_specs=[
            pl.BlockSpec((NB * H * W, 9 * Cin), lambda b: (b, 0)),
            pl.BlockSpec(kparams["w_conv1"].shape, lambda b: (0, 0)),
            pl.BlockSpec(kparams["b_conv1"].shape, lambda b: (0, 0)),
            pl.BlockSpec(kparams["w_conv2"].shape, lambda b: (0, 0, 0)),
            pl.BlockSpec(kparams["b_conv2"].shape, lambda b: (0, 0)),
            pl.BlockSpec(kparams["w_fc1"].shape, lambda b: (0, 0, 0)),
            pl.BlockSpec(kparams["b_fc1"].shape, lambda b: (0, 0)),
            pl.BlockSpec(kparams["w_fc2"].shape, lambda b: (0, 0)),
            pl.BlockSpec(kparams["b_fc2"].shape, lambda b: (0, 0)),
        ],
        out_specs=pl.BlockSpec((NB, num_classes), lambda b: (b, 0)),
        scratch_shapes=[
            pltpu.VMEM((NB, Ho1 + 2, Wo1 + 2, C1), jnp.float32),  # padded conv1 output
        ],
        compiler_params=pltpu.CompilerParams(
            dimension_semantics=("parallel",),
            vmem_limit_bytes=vmem_limit,
        ),
    )(patches1, kparams["w_conv1"], kparams["b_conv1"],
      kparams["w_conv2"], kparams["b_conv2"],
      kparams["w_fc1"], kparams["b_fc1"],
      kparams["w_fc2"], kparams["b_fc2"])


classifier_cnn_forward = jax.jit(classifier_cnn_pallas,
                                 static_argnames=("batch_block",))


# ---------------------------------------------------------------------------
# Parameters: PyTorch-layout init + one-time conversion to kernel layout.
# ---------------------------------------------------------------------------
def init_params(key, num_channels, height, width, num_classes):
    """Random parameters in PyTorch layouts (Conv2d: OIHW, Linear: (out, in))."""
    flattened = 128 * (height // 4) * (width // 4)
    ks = jax.random.split(key, 8)
    s = 0.05
    return {
        "conv1_w": jax.random.normal(ks[0], (64, num_channels, 3, 3), jnp.float32) * s,
        "conv1_b": jax.random.normal(ks[1], (64,), jnp.float32) * s,
        "conv2_w": jax.random.normal(ks[2], (128, 64, 3, 3), jnp.float32) * s,
        "conv2_b": jax.random.normal(ks[3], (128,), jnp.float32) * s,
        "fc1_w": jax.random.normal(ks[4], (128, flattened), jnp.float32) * s,
        "fc1_b": jax.random.normal(ks[5], (128,), jnp.float32) * s,
        "fc2_w": jax.random.normal(ks[6], (num_classes, 128), jnp.float32) * s,
        "fc2_b": jax.random.normal(ks[7], (num_classes,), jnp.float32) * s,
    }


def prepare_params(torch_params, height, width):
    """One-time conversion of PyTorch-layout params into the kernel layout."""
    Ho2, Wo2 = height // 4, width // 4
    c1_out, c_in = torch_params["conv1_w"].shape[:2]       # 64, Cin
    c2_out, c2_in = torch_params["conv2_w"].shape[:2]      # 128, 64
    fc1_out = torch_params["fc1_w"].shape[0]               # 128
    bf16 = jnp.bfloat16

    # conv1 weight (O, I, kh, kw) -> im2col layout (kh*kw*I, O).
    w1 = jnp.transpose(torch_params["conv1_w"], (2, 3, 1, 0)).reshape(9 * c_in, c1_out)
    # conv2 weight -> per-tap (9, I, O) for the per-tap accumulating matmuls
    # (no zero padding of K anymore).
    w2 = jnp.transpose(torch_params["conv2_w"], (2, 3, 1, 0)).reshape(9, c2_in, c2_out)
    # fc1: permute rows from PyTorch NCHW-flatten order (c, h, w) to the
    # kernel's per-spatial-site order (h, w) with channels inside each site.
    wf1 = torch_params["fc1_w"].T.reshape(c2_out, Ho2, Wo2, fc1_out)
    wf1 = jnp.transpose(wf1, (1, 2, 0, 3)).reshape(Ho2 * Wo2, c2_out, fc1_out)
    return {
        "w_conv1": w1.astype(bf16),
        "b_conv1": torch_params["conv1_b"].reshape(1, -1).astype(jnp.float32),
        "w_conv2": w2.astype(bf16),
        "b_conv2": torch_params["conv2_b"].reshape(1, -1).astype(jnp.float32),
        "w_fc1": wf1.astype(bf16),
        "b_fc1": torch_params["fc1_b"].reshape(1, -1).astype(jnp.float32),
        "w_fc2": torch_params["fc2_w"].T.astype(bf16),
        "b_fc2": torch_params["fc2_b"].reshape(1, -1).astype(jnp.float32),
    }


# ---------------------------------------------------------------------------
# Pure-JAX (XLA) reference for a correctness sanity check.
# ---------------------------------------------------------------------------
def reference_forward(torch_params, x_nchw):
    hi = jax.lax.Precision.HIGHEST

    def conv(x, w, b):
        y = jax.lax.conv_general_dilated(
            x, w, window_strides=(1, 1), padding=((1, 1), (1, 1)),
            dimension_numbers=("NCHW", "OIHW", "NCHW"), precision=hi)
        return jax.nn.relu(y + b[None, :, None, None])

    def pool(x):
        return jax.lax.reduce_window(x, -jnp.inf, jax.lax.max,
                                     (1, 1, 2, 2), (1, 1, 2, 2), "VALID")

    y = pool(conv(x_nchw.astype(jnp.float32),
                  torch_params["conv1_w"], torch_params["conv1_b"]))
    y = pool(conv(y, torch_params["conv2_w"], torch_params["conv2_b"]))
    y = y.reshape(y.shape[0], -1)
    y = jax.nn.relu(jnp.dot(y, torch_params["fc1_w"].T, precision=hi)
                    + torch_params["fc1_b"])
    return jnp.dot(y, torch_params["fc2_w"].T, precision=hi) + torch_params["fc2_b"]


if __name__ == "__main__":
    num_channels, height, width, num_classes = 4, 16, 16, 10
    batch = 2

    key = jax.random.PRNGKey(0)
    k_params, k_x = jax.random.split(key)
    torch_params = init_params(k_params, num_channels, height, width, num_classes)
    kparams = prepare_params(torch_params, height, width)
    x = jax.random.normal(k_x, (batch, num_channels, height, width), jnp.float32)

    out = classifier_cnn_forward(kparams, x)
    jax.block_until_ready(out)
    assert out.shape == (batch, num_classes), out.shape

    ref = reference_forward(torch_params, x)
    assert np.allclose(np.asarray(out), np.asarray(ref), rtol=5e-2, atol=5e-2), (
        "Pallas output does not match XLA reference")

    print("KERNEL_OK")
</pallas_src>

<mosaic_0001>
module attributes {stable_mosaic.version = 11 : i64} {
  func.func @_fused_cnn_kernel(%arg0: i32, %arg1: memref<512x36xbf16, #tpu.memory_space<vmem>>, %arg2: memref<36x64xbf16, #tpu.memory_space<vmem>>, %arg3: memref<1x64xf32, #tpu.memory_space<vmem>>, %arg4: memref<9x64x128xbf16, #tpu.memory_space<vmem>>, %arg5: memref<1x128xf32, #tpu.memory_space<vmem>>, %arg6: memref<16x128x128xbf16, #tpu.memory_space<vmem>>, %arg7: memref<1x128xf32, #tpu.memory_space<vmem>>, %arg8: memref<128x10xbf16, #tpu.memory_space<vmem>>, %arg9: memref<1x10xf32, #tpu.memory_space<vmem>>, %arg10: memref<2x10xf32, #tpu.memory_space<vmem>>, %arg11: memref<2x10x10x64xf32, #tpu.memory_space<vmem>>) attributes {dimension_semantics = [#tpu.dimension_semantics<parallel>], iteration_bounds = array<i64: 1>, scalar_prefetch = 0 : i64, scratch_operands = 1 : i64, tpu.core_type = #tpu.core_type<tc>, window_params = [{transform_indices = @transform_0, window_bounds = array<i64: 512, 36>}, {pipeline_mode = #tpu.pipeline_mode<synchronous>, transform_indices = @transform_1, window_bounds = array<i64: 36, 64>}, {pipeline_mode = #tpu.pipeline_mode<synchronous>, transform_indices = @transform_2, window_bounds = array<i64: 1, 64>}, {pipeline_mode = #tpu.pipeline_mode<synchronous>, transform_indices = @transform_3, window_bounds = array<i64: 9, 64, 128>}, {pipeline_mode = #tpu.pipeline_mode<synchronous>, transform_indices = @transform_4, window_bounds = array<i64: 1, 128>}, {pipeline_mode = #tpu.pipeline_mode<synchronous>, transform_indices = @transform_5, window_bounds = array<i64: 16, 128, 128>}, {pipeline_mode = #tpu.pipeline_mode<synchronous>, transform_indices = @transform_6, window_bounds = array<i64: 1, 128>}, {pipeline_mode = #tpu.pipeline_mode<synchronous>, transform_indices = @transform_7, window_bounds = array<i64: 128, 10>}, {pipeline_mode = #tpu.pipeline_mode<synchronous>, transform_indices = @transform_8, window_bounds = array<i64: 1, 10>}, {transform_indices = @transform_9, window_bounds = array<i64: 2, 10>}]} {
    %c0 = arith.constant 0 : index
    %c0_0 = arith.constant 0 : index
    %0 = vector.load %arg1[%c0, %c0_0] : memref<512x36xbf16, #tpu.memory_space<vmem>>, vector<512x36xbf16>
    %c0_1 = arith.constant 0 : index
    %c0_2 = arith.constant 0 : index
    %1 = vector.load %arg2[%c0_1, %c0_2] : memref<36x64xbf16, #tpu.memory_space<vmem>>, vector<36x64xbf16>
    %cst = arith.constant dense<0.000000e+00> : vector<512x64xf32>
    %2 = tpu.matmul %0, %1, %cst {dimension_numbers = #tpu.dot_dimension_numbers<[1], [0], [0], [1], [0, 0, 1, 1], [], []>} : vector<512x36xbf16>, vector<36x64xbf16>, vector<512x64xf32> -> vector<512x64xf32>
    %c0_3 = arith.constant 0 : index
    %c0_4 = arith.constant 0 : index
    %3 = vector.load %arg3[%c0_3, %c0_4] : memref<1x64xf32, #tpu.memory_space<vmem>>, vector<1x64xf32>
    %4 = vector.broadcast %3 : vector<1x64xf32> to vector<512x64xf32>
    %5 = arith.addf %2, %4 : vector<512x64xf32>
    %cst_5 = arith.constant 0.000000e+00 : f32
    %6 = vector.broadcast %cst_5 : f32 to vector<512x64xf32>
    %7 = arith.maximumf %5, %6 : vector<512x64xf32>
    %8 = vector.shape_cast %7 : vector<512x64xf32> to vector<2x8x2x8x2x64xf32>
    %cst_6 = arith.constant dense<0xFF800000> : vector<2x8x2x8x64xf32>
    %9 = vector.multi_reduction <maximumf>, %8, %cst_6 [4] : vector<2x8x2x8x2x64xf32> to vector<2x8x2x8x64xf32>
    %cst_7 = arith.constant dense<0xFF800000> : vector<2x8x8x64xf32>
    %10 = vector.multi_reduction <maximumf>, %9, %cst_7 [2] : vector<2x8x2x8x64xf32> to vector<2x8x8x64xf32>
    %cst_8 = arith.constant 0.000000e+00 : f32
    %11 = vector.broadcast %cst_8 : f32 to vector<2x1x10x64xf32>
    %cst_9 = arith.constant 0.000000e+00 : f32
    %12 = vector.broadcast %cst_9 : f32 to vector<2x10x1x64xf32>
    %c0_10 = arith.constant 0 : index
    %c0_11 = arith.constant 0 : index
    %c0_12 = arith.constant 0 : index
    %c0_13 = arith.constant 0 : index
    %13 = vector.load %arg11[%c0_10, %c0_11, %c0_12, %c0_13] : memref<2x10x10x64xf32, #tpu.memory_space<vmem>>, vector<2x1x10x64xf32>
    tpu.vector_store %arg11[%c0_10, %c0_11, %c0_12, %c0_13], %11 {strides = array<i32>} : memref<2x10x10x64xf32, #tpu.memory_space<vmem>>, vector<2x1x10x64xf32>,
    %c0_14 = arith.constant 0 : index
    %c9 = arith.constant 9 : index
    %c0_15 = arith.constant 0 : index
    %c0_16 = arith.constant 0 : index
    %14 = vector.load %arg11[%c0_14, %c9, %c0_15, %c0_16] : memref<2x10x10x64xf32, #tpu.memory_space<vmem>>, vector<2x1x10x64xf32>
    tpu.vector_store %arg11[%c0_14, %c9, %c0_15, %c0_16], %11 {strides = array<i32>} : memref<2x10x10x64xf32, #tpu.memory_space<vmem>>, vector<2x1x10x64xf32>,
    %c0_17 = arith.constant 0 : index
    %c0_18 = arith.constant 0 : index
    %c0_19 = arith.constant 0 : index
    %c0_20 = arith.constant 0 : index
    %15 = vector.load %arg11[%c0_17, %c0_18, %c0_19, %c0_20] : memref<2x10x10x64xf32, #tpu.memory_space<vmem>>, vector<2x10x1x64xf32>
    tpu.vector_store %arg11[%c0_17, %c0_18, %c0_19, %c0_20], %12 {strides = array<i32>} : memref<2x10x10x64xf32, #tpu.memory_space<vmem>>, vector<2x10x1x64xf32>,
    %c0_21 = arith.constant 0 : index
    %c0_22 = arith.constant 0 : index
    %c9_23 = arith.constant 9 : index
    %c0_24 = arith.constant 0 : index
    %16 = vector.load %arg11[%c0_21, %c0_22, %c9_23, %c0_24] : memref<2x10x10x64xf32, #tpu.memory_space<vmem>>, vector<2x10x1x64xf32>
    tpu.vector_store %arg11[%c0_21, %c0_22, %c9_23, %c0_24], %12 {strides = array<i32>} : memref<2x10x10x64xf32, #tpu.memory_space<vmem>>, vector<2x10x1x64xf32>,
    %c0_25 = arith.constant 0 : index
    %c1 = arith.constant 1 : index
    %c1_26 = arith.constant 1 : index
    %c0_27 = arith.constant 0 : index
    %17 = vector.load %arg11[%c0_25, %c1, %c1_26, %c0_27] : memref<2x10x10x64xf32, #tpu.memory_space<vmem>>, vector<2x8x8x64xf32>
    tpu.vector_store %arg11[%c0_25, %c1, %c1_26, %c0_27], %10 {strides = array<i32>} : memref<2x10x10x64xf32, #tpu.memory_space<vmem>>, vector<2x8x8x64xf32>,
    %c0_28 = arith.constant 0 : index
    %c0_29 = arith.constant 0 : index
    %c0_30 = arith.constant 0 : index
    %c0_31 = arith.constant 0 : index
    %18 = vector.load %arg11[%c0_28, %c0_29, %c0_30, %c0_31] : memref<2x10x10x64xf32, #tpu.memory_space<vmem>>, vector<2x10x10x64xf32>
    %19 = arith.truncf %18 : vector<2x10x10x64xf32> to vector<2x10x10x64xbf16>
    %cst_32 = arith.constant 0.000000e+00 : f32
    %20 = vector.broadcast %cst_32 : f32 to vector<128x128xf32>
    %21 = vector.extract_strided_slice %19 {offsets = [0, 0, 0, 0], sizes = [2, 8, 8, 64], strides = [1, 1, 1, 1]} : vector<2x10x10x64xbf16> to vector<2x8x8x64xbf16>
    %22 = vector.shape_cast %21 : vector<2x8x8x64xbf16> to vector<128x64xbf16>
    %c0_33 = arith.constant 0 : index
    %c0_34 = arith.constant 0 : index
    %c0_35 = arith.constant 0 : index
    %23 = vector.load %arg4[%c0_33, %c0_34, %c0_35] : memref<9x64x128xbf16, #tpu.memory_space<vmem>>, vector<1x64x128xbf16>
    %24 = vector.shape_cast %23 : vector<1x64x128xbf16> to vector<64x128xbf16>
    %cst_36 = arith.constant dense<0.000000e+00> : vector<128x128xf32>
    %25 = tpu.matmul %22, %24, %cst_36 {dimension_numbers = #tpu.dot_dimension_numbers<[1], [0], [0], [1], [0, 0, 1, 1], [], []>} : vector<128x64xbf16>, vector<64x128xbf16>, vector<128x128xf32> -> vector<128x128xf32>
    %26 = arith.addf %20, %25 : vector<128x128xf32>
    %27 = vector.extract_strided_slice %19 {offsets = [0, 0, 1, 0], sizes = [2, 8, 8, 64], strides = [1, 1, 1, 1]} : vector<2x10x10x64xbf16> to vector<2x8x8x64xbf16>
    %28 = vector.shape_cast %27 : vector<2x8x8x64xbf16> to vector<128x64xbf16>
    %c1_37 = arith.constant 1 : index
    %c0_38 = arith.constant 0 : index
    %c0_39 = arith.constant 0 : index
    %29 = vector.load %arg4[%c1_37, %c0_38, %c0_39] : memref<9x64x128xbf16, #tpu.memory_space<vmem>>, vector<1x64x128xbf16>
    %30 = vector.shape_cast %29 : vector<1x64x128xbf16> to vector<64x128xbf16>
    %cst_40 = arith.constant dense<0.000000e+00> : vector<128x128xf32>
    %31 = tpu.matmul %28, %30, %cst_40 {dimension_numbers = #tpu.dot_dimension_numbers<[1], [0], [0], [1], [0, 0, 1, 1], [], []>} : vector<128x64xbf16>, vector<64x128xbf16>, vector<128x128xf32> -> vector<128x128xf32>
    %32 = arith.addf %26, %31 : vector<128x128xf32>
    %33 = vector.extract_strided_slice %19 {offsets = [0, 0, 2, 0], sizes = [2, 8, 8, 64], strides = [1, 1, 1, 1]} : vector<2x10x10x64xbf16> to vector<2x8x8x64xbf16>
    %34 = vector.shape_cast %33 : vector<2x8x8x64xbf16> to vector<128x64xbf16>
    %c2 = arith.constant 2 : index
    %c0_41 = arith.constant 0 : index
    %c0_42 = arith.constant 0 : index
    %35 = vector.load %arg4[%c2, %c0_41, %c0_42] : memref<9x64x128xbf16, #tpu.memory_space<vmem>>, vector<1x64x128xbf16>
    %36 = vector.shape_cast %35 : vector<1x64x128xbf16> to vector<64x128xbf16>
    %cst_43 = arith.constant dense<0.000000e+00> : vector<128x128xf32>
    %37 = tpu.matmul %34, %36, %cst_43 {dimension_numbers = #tpu.dot_dimension_numbers<[1], [0], [0], [1], [0, 0, 1, 1], [], []>} : vector<128x64xbf16>, vector<64x128xbf16>, vector<128x128xf32> -> vector<128x128xf32>
    %38 = arith.addf %32, %37 : vector<128x128xf32>
    %39 = vector.extract_strided_slice %19 {offsets = [0, 1, 0, 0], sizes = [2, 8, 8, 64], strides = [1, 1, 1, 1]} : vector<2x10x10x64xbf16> to vector<2x8x8x64xbf16>
    %40 = vector.shape_cast %39 : vector<2x8x8x64xbf16> to vector<128x64xbf16>
    %c3 = arith.constant 3 : index
    %c0_44 = arith.constant 0 : index
    %c0_45 = arith.constant 0 : index
    %41 = vector.load %arg4[%c3, %c0_44, %c0_45] : memref<9x64x128xbf16, #tpu.memory_space<vmem>>, vector<1x64x128xbf16>
    %42 = vector.shape_cast %41 : vector<1x64x128xbf16> to vector<64x128xbf16>
    %cst_46 = arith.constant dense<0.000000e+00> : vector<128x128xf32>
    %43 = tpu.matmul %40, %42, %cst_46 {dimension_numbers = #tpu.dot_dimension_numbers<[1], [0], [0], [1], [0, 0, 1, 1], [], []>} : vector<128x64xbf16>, vector<64x128xbf16>, vector<128x128xf32> -> vector<128x128xf32>
    %44 = arith.addf %38, %43 : vector<128x128xf32>
    %45 = vector.extract_strided_slice %19 {offsets = [0, 1, 1, 0], sizes = [2, 8, 8, 64], strides = [1, 1, 1, 1]} : vector<2x10x10x64xbf16> to vector<2x8x8x64xbf16>
    %46 = vector.shape_cast %45 : vector<2x8x8x64xbf16> to vector<128x64xbf16>
    %c4 = arith.constant 4 : index
    %c0_47 = arith.constant 0 : index
    %c0_48 = arith.constant 0 : index
    %47 = vector.load %arg4[%c4, %c0_47, %c0_48] : memref<9x64x128xbf16, #tpu.memory_space<vmem>>, vector<1x64x128xbf16>
    %48 = vector.shape_cast %47 : vector<1x64x128xbf16> to vector<64x128xbf16>
    %cst_49 = arith.constant dense<0.000000e+00> : vector<128x128xf32>
    %49 = tpu.matmul %46, %48, %cst_49 {dimension_numbers = #tpu.dot_dimension_numbers<[1], [0], [0], [1], [0, 0, 1, 1], [], []>} : vector<128x64xbf16>, vector<64x128xbf16>, vector<128x128xf32> -> vector<128x128xf32>
    %50 = arith.addf %44, %49 : vector<128x128xf32>
    %51 = vector.extract_strided_slice %19 {offsets = [0, 1, 2, 0], sizes = [2, 8, 8, 64], strides = [1, 1, 1, 1]} : vector<2x10x10x64xbf16> to vector<2x8x8x64xbf16>
    %52 = vector.shape_cast %51 : vector<2x8x8x64xbf16> to vector<128x64xbf16>
    %c5 = arith.constant 5 : index
    %c0_50 = arith.constant 0 : index
    %c0_51 = arith.constant 0 : index
    %53 = vector.load %arg4[%c5, %c0_50, %c0_51] : memref<9x64x128xbf16, #tpu.memory_space<vmem>>, vector<1x64x128xbf16>
    %54 = vector.shape_cast %53 : vector<1x64x128xbf16> to vector<64x128xbf16>
    %cst_52 = arith.constant dense<0.000000e+00> : vector<128x128xf32>
    %55 = tpu.matmul %52, %54, %cst_52 {dimension_numbers = #tpu.dot_dimension_numbers<[1], [0], [0], [1], [0, 0, 1, 1], [], []>} : vector<128x64xbf16>, vector<64x128xbf16>, vector<128x128xf32> -> vector<128x128xf32>
    %56 = arith.addf %50, %55 : vector<128x128xf32>
    %57 = vector.extract_strided_slice %19 {offsets = [0, 2, 0, 0], sizes = [2, 8, 8, 64], strides = [1, 1, 1, 1]} : vector<2x10x10x64xbf16> to vector<2x8x8x64xbf16>
    %58 = vector.shape_cast %57 : vector<2x8x8x64xbf16> to vector<128x64xbf16>
    %c6 = arith.constant 6 : index
    %c0_53 = arith.constant 0 : index
    %c0_54 = arith.constant 0 : index
    %59 = vector.load %arg4[%c6, %c0_53, %c0_54] : memref<9x64x128xbf16, #tpu.memory_space<vmem>>, vector<1x64x128xbf16>
    %60 = vector.shape_cast %59 : vector<1x64x128xbf16> to vector<64x128xbf16>
    %cst_55 = arith.constant dense<0.000000e+00> : vector<128x128xf32>
    %61 = tpu.matmul %58, %60, %cst_55 {dimension_numbers = #tpu.dot_dimension_numbers<[1], [0], [0], [1], [0, 0, 1, 1], [], []>} : vector<128x64xbf16>, vector<64x128xbf16>, vector<128x128xf32> -> vector<128x128xf32>
    %62 = arith.addf %56, %61 : vector<128x128xf32>
    %63 = vector.extract_strided_slice %19 {offsets = [0, 2, 1, 0], sizes = [2, 8, 8, 64], strides = [1, 1, 1, 1]} : vector<2x10x10x64xbf16> to vector<2x8x8x64xbf16>
    %64 = vector.shape_cast %63 : vector<2x8x8x64xbf16> to vector<128x64xbf16>
    %c7 = arith.constant 7 : index
    %c0_56 = arith.constant 0 : index
    %c0_57 = arith.constant 0 : index
    %65 = vector.load %arg4[%c7, %c0_56, %c0_57] : memref<9x64x128xbf16, #tpu.memory_space<vmem>>, vector<1x64x128xbf16>
    %66 = vector.shape_cast %65 : vector<1x64x128xbf16> to vector<64x128xbf16>
    %cst_58 = arith.constant dense<0.000000e+00> : vector<128x128xf32>
    %67 = tpu.matmul %64, %66, %cst_58 {dimension_numbers = #tpu.dot_dimension_numbers<[1], [0], [0], [1], [0, 0, 1, 1], [], []>} : vector<128x64xbf16>, vector<64x128xbf16>, vector<128x128xf32> -> vector<128x128xf32>
    %68 = arith.addf %62, %67 : vector<128x128xf32>
    %69 = vector.extract_strided_slice %19 {offsets = [0, 2, 2, 0], sizes = [2, 8, 8, 64], strides = [1, 1, 1, 1]} : vector<2x10x10x64xbf16> to vector<2x8x8x64xbf16>
    %70 = vector.shape_cast %69 : vector<2x8x8x64xbf16> to vector<128x64xbf16>
    %c8 = arith.constant 8 : index
    %c0_59 = arith.constant 0 : index
    %c0_60 = arith.constant 0 : index
    %71 = vector.load %arg4[%c8, %c0_59, %c0_60] : memref<9x64x128xbf16, #tpu.memory_space<vmem>>, vector<1x64x128xbf16>
    %72 = vector.shape_cast %71 : vector<1x64x128xbf16> to vector<64x128xbf16>
    %cst_61 = arith.constant dense<0.000000e+00> : vector<128x128xf32>
    %73 = tpu.matmul %70, %72, %cst_61 {dimension_numbers = #tpu.dot_dimension_numbers<[1], [0], [0], [1], [0, 0, 1, 1], [], []>} : vector<128x64xbf16>, vector<64x128xbf16>, vector<128x128xf32> -> vector<128x128xf32>
    %74 = arith.addf %68, %73 : vector<128x128xf32>
    %c0_62 = arith.constant 0 : index
    %c0_63 = arith.constant 0 : index
    %75 = vector.load %arg5[%c0_62, %c0_63] : memref<1x128xf32, #tpu.memory_space<vmem>>, vector<1x128xf32>
    %76 = vector.broadcast %75 : vector<1x128xf32> to vector<128x128xf32>
    %77 = arith.addf %74, %76 : vector<128x128xf32>
    %cst_64 = arith.constant 0.000000e+00 : f32
    %78 = vector.broadcast %cst_64 : f32 to vector<128x128xf32>
    %79 = arith.maximumf %77, %78 : vector<128x128xf32>
    %80 = vector.shape_cast %79 : vector<128x128xf32> to vector<2x4x2x4x2x128xf32>
    %cst_65 = arith.constant dense<0xFF800000> : vector<2x4x2x4x128xf32>
    %81 = vector.multi_reduction <maximumf>, %80, %cst_65 [4] : vector<2x4x2x4x2x128xf32> to vector<2x4x2x4x128xf32>
    %cst_66 = arith.constant dense<0xFF800000> : vector<2x4x4x128xf32>
    %82 = vector.multi_reduction <maximumf>, %81, %cst_66 [2] : vector<2x4x2x4x128xf32> to vector<2x4x4x128xf32>
    %83 = vector.shape_cast %82 : vector<2x4x4x128xf32> to vector<2x16x128xf32>
    %84 = arith.truncf %83 : vector<2x16x128xf32> to vector<2x16x128xbf16>
    %cst_67 = arith.constant 0.000000e+00 : f32
    %85 = vector.broadcast %cst_67 : f32 to vector<2x128xf32>
    %86 = vector.extract_strided_slice %84 {offsets = [0, 0, 0], sizes = [2, 1, 128], strides = [1, 1, 1]} : vector<2x16x128xbf16> to vector<2x1x128xbf16>
    %87 = vector.shape_cast %86 : vector<2x1x128xbf16> to vector<2x128xbf16>
    %c0_68 = arith.constant 0 : index
    %c0_69 = arith.constant 0 : index
    %c0_70 = arith.constant 0 : index
    %88 = vector.load %arg6[%c0_68, %c0_69, %c0_70] : memref<16x128x128xbf16, #tpu.memory_space<vmem>>, vector<1x128x128xbf16>
    %89 = vector.shape_cast %88 : vector<1x128x128xbf16> to vector<128x128xbf16>
    %cst_71 = arith.constant dense<0.000000e+00> : vector<2x128xf32>
    %90 = tpu.matmul %87, %89, %cst_71 {dimension_numbers = #tpu.dot_dimension_numbers<[1], [0], [0], [1], [0, 0, 1, 1], [], []>} : vector<2x128xbf16>, vector<128x128xbf16>, vector<2x128xf32> -> vector<2x128xf32>
    %91 = arith.addf %85, %90 : vector<2x128xf32>
    %92 = vector.extract_strided_slice %84 {offsets = [0, 1, 0], sizes = [2, 1, 128], strides = [1, 1, 1]} : vector<2x16x128xbf16> to vector<2x1x128xbf16>
    %93 = vector.shape_cast %92 : vector<2x1x128xbf16> to vector<2x128xbf16>
    %c1_72 = arith.constant 1 : index
    %c0_73 = arith.constant 0 : index
    %c0_74 = arith.constant 0 : index
    %94 = vector.load %arg6[%c1_72, %c0_73, %c0_74] : memref<16x128x128xbf16, #tpu.memory_space<vmem>>, vector<1x128x128xbf16>
    %95 = vector.shape_cast %94 : vector<1x128x128xbf16> to vector<128x128xbf16>
    %cst_75 = arith.constant dense<0.000000e+00> : vector<2x128xf32>
    %96 = tpu.matmul %93, %95, %cst_75 {dimension_numbers = #tpu.dot_dimension_numbers<[1], [0], [0], [1], [0, 0, 1, 1], [], []>} : vector<2x128xbf16>, vector<128x128xbf16>, vector<2x128xf32> -> vector<2x128xf32>
    %97 = arith.addf %91, %96 : vector<2x128xf32>
    %98 = vector.extract_strided_slice %84 {offsets = [0, 2, 0], sizes = [2, 1, 128], strides = [1, 1, 1]} : vector<2x16x128xbf16> to vector<2x1x128xbf16>
    %99 = vector.shape_cast %98 : vector<2x1x128xbf16> to vector<2x128xbf16>
    %c2_76 = arith.constant 2 : index
    %c0_77 = arith.constant 0 : index
    %c0_78 = arith.constant 0 : index
    %100 = vector.load %arg6[%c2_76, %c0_77, %c0_78] : memref<16x128x128xbf16, #tpu.memory_space<vmem>>, vector<1x128x128xbf16>
    %101 = vector.shape_cast %100 : vector<1x128x128xbf16> to vector<128x128xbf16>
    %cst_79 = arith.constant dense<0.000000e+00> : vector<2x128xf32>
    %102 = tpu.matmul %99, %101, %cst_79 {dimension_numbers = #tpu.dot_dimension_numbers<[1], [0], [0], [1], [0, 0, 1, 1], [], []>} : vector<2x128xbf16>, vector<128x128xbf16>, vector<2x128xf32> -> vector<2x128xf32>
    %103 = arith.addf %97, %102 : vector<2x128xf32>
    %104 = vector.extract_strided_slice %84 {offsets = [0, 3, 0], sizes = [2, 1, 128], strides = [1, 1, 1]} : vector<2x16x128xbf16> to vector<2x1x128xbf16>
    %105 = vector.shape_cast %104 : vector<2x1x128xbf16> to vector<2x128xbf16>
    %c3_80 = arith.constant 3 : index
    %c0_81 = arith.constant 0 : index
    %c0_82 = arith.constant 0 : index
    %106 = vector.load %arg6[%c3_80, %c0_81, %c0_82] : memref<16x128x128xbf16, #tpu.memory_space<vmem>>, vector<1x128x128xbf16>
    %107 = vector.shape_cast %106 : vector<1x128x128xbf16> to vector<128x128xbf16>
    %cst_83 = arith.constant dense<0.000000e+00> : vector<2x128xf32>
    %108 = tpu.matmul %105, %107, %cst_83 {dimension_numbers = #tpu.dot_dimension_numbers<[1], [0], [0], [1], [0, 0, 1, 1], [], []>} : vector<2x128xbf16>, vector<128x128xbf16>, vector<2x128xf32> -> vector<2x128xf32>
    %109 = arith.addf %103, %108 : vector<2x128xf32>
    %110 = vector.extract_strided_slice %84 {offsets = [0, 4, 0], sizes = [2, 1, 128], strides = [1, 1, 1]} : vector<2x16x128xbf16> to vector<2x1x128xbf16>
    %111 = vector.shape_cast %110 : vector<2x1x128xbf16> to vector<2x128xbf16>
    %c4_84 = arith.constant 4 : index
    %c0_85 = arith.constant 0 : index
    %c0_86 = arith.constant 0 : index
    %112 = vector.load %arg6[%c4_84, %c0_85, %c0_86] : memref<16x128x128xbf16, #tpu.memory_space<vmem>>, vector<1x128x128xbf16>
    %113 = vector.shape_cast %112 : vector<1x128x128xbf16> to vector<128x128xbf16>
    %cst_87 = arith.constant dense<0.000000e+00> : vector<2x128xf32>
    %114 = tpu.matmul %111, %113, %cst_87 {dimension_numbers = #tpu.dot_dimension_numbers<[1], [0], [0], [1], [0, 0, 1, 1], [], []>} : vector<2x128xbf16>, vector<128x128xbf16>, vector<2x128xf32> -> vector<2x128xf32>
    %115 = arith.addf %109, %114 : vector<2x128xf32>
    %116 = vector.extract_strided_slice %84 {offsets = [0, 5, 0], sizes = [2, 1, 128], strides = [1, 1, 1]} : vector<2x16x128xbf16> to vector<2x1x128xbf16>
    %117 = vector.shape_cast %116 : vector<2x1x128xbf16> to vector<2x128xbf16>
    %c5_88 = arith.constant 5 : index
    %c0_89 = arith.constant 0 : index
    %c0_90 = arith.constant 0 : index
    %118 = vector.load %arg6[%c5_88, %c0_89, %c0_90] : memref<16x128x128xbf16, #tpu.memory_space<vmem>>, vector<1x128x128xbf16>
    %119 = vector.shape_cast %118 : vector<1x128x128xbf16> to vector<128x128xbf16>
    %cst_91 = arith.constant dense<0.000000e+00> : vector<2x128xf32>
    %120 = tpu.matmul %117, %119, %cst_91 {dimension_numbers = #tpu.dot_dimension_numbers<[1], [0], [0], [1], [0, 0, 1, 1], [], []>} : vector<2x128xbf16>, vector<128x128xbf16>, vector<2x128xf32> -> vector<2x128xf32>
    %121 = arith.addf %115, %120 : vector<2x128xf32>
    %122 = vector.extract_strided_slice %84 {offsets = [0, 6, 0], sizes = [2, 1, 128], strides = [1, 1, 1]} : vector<2x16x128xbf16> to vector<2x1x128xbf16>
    %123 = vector.shape_cast %122 : vector<2x1x128xbf16> to vector<2x128xbf16>
    %c6_92 = arith.constant 6 : index
    %c0_93 = arith.constant 0 : index
    %c0_94 = arith.constant 0 : index
    %124 = vector.load %arg6[%c6_92, %c0_93, %c0_94] : memref<16x128x128xbf16, #tpu.memory_space<vmem>>, vector<1x128x128xbf16>
    %125 = vector.shape_cast %124 : vector<1x128x128xbf16> to vector<128x128xbf16>
    %cst_95 = arith.constant dense<0.000000e+00> : vector<2x128xf32>
    %126 = tpu.matmul %123, %125, %cst_95 {dimension_numbers = #tpu.dot_dimension_numbers<[1], [0], [0], [1], [0, 0, 1, 1], [], []>} : vector<2x128xbf16>, vector<128x128xbf16>, vector<2x128xf32> -> vector<2x128xf32>
    %127 = arith.addf %121, %126 : vector<2x128xf32>
    %128 = vector.extract_strided_slice %84 {offsets = [0, 7, 0], sizes = [2, 1, 128], strides = [1, 1, 1]} : vector<2x16x128xbf16> to vector<2x1x128xbf16>
    %129 = vector.shape_cast %128 : vector<2x1x128xbf16> to vector<2x128xbf16>
    %c7_96 = arith.constant 7 : index
    %c0_97 = arith.constant 0 : index
    %c0_98 = arith.constant 0 : index
    %130 = vector.load %arg6[%c7_96, %c0_97, %c0_98] : memref<16x128x128xbf16, #tpu.memory_space<vmem>>, vector<1x128x128xbf16>
    %131 = vector.shape_cast %130 : vector<1x128x128xbf16> to vector<128x128xbf16>
    %cst_99 = arith.constant dense<0.000000e+00> : vector<2x128xf32>
    %132 = tpu.matmul %129, %131, %cst_99 {dimension_numbers = #tpu.dot_dimension_numbers<[1], [0], [0], [1], [0, 0, 1, 1], [], []>} : vector<2x128xbf16>, vector<128x128xbf16>, vector<2x128xf32> -> vector<2x128xf32>
    %133 = arith.addf %127, %132 : vector<2x128xf32>
    %134 = vector.extract_strided_slice %84 {offsets = [0, 8, 0], sizes = [2, 1, 128], strides = [1, 1, 1]} : vector<2x16x128xbf16> to vector<2x1x128xbf16>
    %135 = vector.shape_cast %134 : vector<2x1x128xbf16> to vector<2x128xbf16>
    %c8_100 = arith.constant 8 : index
    %c0_101 = arith.constant 0 : index
    %c0_102 = arith.constant 0 : index
    %136 = vector.load %arg6[%c8_100, %c0_101, %c0_102] : memref<16x128x128xbf16, #tpu.memory_space<vmem>>, vector<1x128x128xbf16>
    %137 = vector.shape_cast %136 : vector<1x128x128xbf16> to vector<128x128xbf16>
    %cst_103 = arith.constant dense<0.000000e+00> : vector<2x128xf32>
    %138 = tpu.matmul %135, %137, %cst_103 {dimension_numbers = #tpu.dot_dimension_numbers<[1], [0], [0], [1], [0, 0, 1, 1], [], []>} : vector<2x128xbf16>, vector<128x128xbf16>, vector<2x128xf32> -> vector<2x128xf32>
    %139 = arith.addf %133, %138 : vector<2x128xf32>
    %140 = vector.extract_strided_slice %84 {offsets = [0, 9, 0], sizes = [2, 1, 128], strides = [1, 1, 1]} : vector<2x16x128xbf16> to vector<2x1x128xbf16>
    %141 = vector.shape_cast %140 : vector<2x1x128xbf16> to vector<2x128xbf16>
    %c9_104 = arith.constant 9 : index
    %c0_105 = arith.constant 0 : index
    %c0_106 = arith.constant 0 : index
    %142 = vector.load %arg6[%c9_104, %c0_105, %c0_106] : memref<16x128x128xbf16, #tpu.memory_space<vmem>>, vector<1x128x128xbf16>
    %143 = vector.shape_cast %142 : vector<1x128x128xbf16> to vector<128x128xbf16>
    %cst_107 = arith.constant dense<0.000000e+00> : vector<2x128xf32>
    %144 = tpu.matmul %141, %143, %cst_107 {dimension_numbers = #tpu.dot_dimension_numbers<[1], [0], [0], [1], [0, 0, 1, 1], [], []>} : vector<2x128xbf16>, vector<128x128xbf16>, vector<2x128xf32> -> vector<2x128xf32>
    %145 = arith.addf %139, %144 : vector<2x128xf32>
    %146 = vector.extract_strided_slice %84 {offsets = [0, 10, 0], sizes = [2, 1, 128], strides = [1, 1, 1]} : vector<2x16x128xbf16> to vector<2x1x128xbf16>
    %147 = vector.shape_cast %146 : vector<2x1x128xbf16> to vector<2x128xbf16>
    %c10 = arith.constant 10 : index
    %c0_108 = arith.constant 0 : index
    %c0_109 = arith.constant 0 : index
    %148 = vector.load %arg6[%c10, %c0_108, %c0_109] : memref<16x128x128xbf16, #tpu.memory_space<vmem>>, vector<1x128x128xbf16>
    %149 = vector.shape_cast %148 : vector<1x128x128xbf16> to vector<128x128xbf16>
    %cst_110 = arith.constant dense<0.000000e+00> : vector<2x128xf32>
    %150 = tpu.matmul %147, %149, %cst_110 {dimension_numbers = #tpu.dot_dimension_numbers<[1], [0], [0], [1], [0, 0, 1, 1], [], []>} : vector<2x128xbf16>, vector<128x128xbf16>, vector<2x128xf32> -> vector<2x128xf32>
    %151 = arith.addf %145, %150 : vector<2x128xf32>
    %152 = vector.extract_strided_slice %84 {offsets = [0, 11, 0], sizes = [2, 1, 128], strides = [1, 1, 1]} : vector<2x16x128xbf16> to vector<2x1x128xbf16>
    %153 = vector.shape_cast %152 : vector<2x1x128xbf16> to vector<2x128xbf16>
    %c11 = arith.constant 11 : index
    %c0_111 = arith.constant 0 : index
    %c0_112 = arith.constant 0 : index
    %154 = vector.load %arg6[%c11, %c0_111, %c0_112] : memref<16x128x128xbf16, #tpu.memory_space<vmem>>, vector<1x128x128xbf16>
    %155 = vector.shape_cast %154 : vector<1x128x128xbf16> to vector<128x128xbf16>
    %cst_113 = arith.constant dense<0.000000e+00> : vector<2x128xf32>
    %156 = tpu.matmul %153, %155, %cst_113 {dimension_numbers = #tpu.dot_dimension_numbers<[1], [0], [0], [1], [0, 0, 1, 1], [], []>} : vector<2x128xbf16>, vector<128x128xbf16>, vector<2x128xf32> -> vector<2x128xf32>
    %157 = arith.addf %151, %156 : vector<2x128xf32>
    %158 = vector.extract_strided_slice %84 {offsets = [0, 12, 0], sizes = [2, 1, 128], strides = [1, 1, 1]} : vector<2x16x128xbf16> to vector<2x1x128xbf16>
    %159 = vector.shape_cast %158 : vector<2x1x128xbf16> to vector<2x128xbf16>
    %c12 = arith.constant 12 : index
    %c0_114 = arith.constant 0 : index
    %c0_115 = arith.constant 0 : index
    %160 = vector.load %arg6[%c12, %c0_114, %c0_115] : memref<16x128x128xbf16, #tpu.memory_space<vmem>>, vector<1x128x128xbf16>
    %161 = vector.shape_cast %160 : vector<1x128x128xbf16> to vector<128x128xbf16>
    %cst_116 = arith.constant dense<0.000000e+00> : vector<2x128xf32>
    %162 = tpu.matmul %159, %161, %cst_116 {dimension_numbers = #tpu.dot_dimension_numbers<[1], [0], [0], [1], [0, 0, 1, 1], [], []>} : vector<2x128xbf16>, vector<128x128xbf16>, vector<2x128xf32> -> vector<2x128xf32>
    %163 = arith.addf %157, %162 : vector<2x128xf32>
    %164 = vector.extract_strided_slice %84 {offsets = [0, 13, 0], sizes = [2, 1, 128], strides = [1, 1, 1]} : vector<2x16x128xbf16> to vector<2x1x128xbf16>
    %165 = vector.shape_cast %164 : vector<2x1x128xbf16> to vector<2x128xbf16>
    %c13 = arith.constant 13 : index
    %c0_117 = arith.constant 0 : index
    %c0_118 = arith.constant 0 : index
    %166 = vector.load %arg6[%c13, %c0_117, %c0_118] : memref<16x128x128xbf16, #tpu.memory_space<vmem>>, vector<1x128x128xbf16>
    %167 = vector.shape_cast %166 : vector<1x128x128xbf16> to vector<128x128xbf16>
    %cst_119 = arith.constant dense<0.000000e+00> : vector<2x128xf32>
    %168 = tpu.matmul %165, %167, %cst_119 {dimension_numbers = #tpu.dot_dimension_numbers<[1], [0], [0], [1], [0, 0, 1, 1], [], []>} : vector<2x128xbf16>, vector<128x128xbf16>, vector<2x128xf32> -> vector<2x128xf32>
    %169 = arith.addf %163, %168 : vector<2x128xf32>
    %170 = vector.extract_strided_slice %84 {offsets = [0, 14, 0], sizes = [2, 1, 128], strides = [1, 1, 1]} : vector<2x16x128xbf16> to vector<2x1x128xbf16>
    %171 = vector.shape_cast %170 : vector<2x1x128xbf16> to vector<2x128xbf16>
    %c14 = arith.constant 14 : index
    %c0_120 = arith.constant 0 : index
    %c0_121 = arith.constant 0 : index
    %172 = vector.load %arg6[%c14, %c0_120, %c0_121] : memref<16x128x128xbf16, #tpu.memory_space<vmem>>, vector<1x128x128xbf16>
    %173 = vector.shape_cast %172 : vector<1x128x128xbf16> to vector<128x128xbf16>
    %cst_122 = arith.constant dense<0.000000e+00> : vector<2x128xf32>
    %174 = tpu.matmul %171, %173, %cst_122 {dimension_numbers = #tpu.dot_dimension_numbers<[1], [0], [0], [1], [0, 0, 1, 1], [], []>} : vector<2x128xbf16>, vector<128x128xbf16>, vector<2x128xf32> -> vector<2x128xf32>
    %175 = arith.addf %169, %174 : vector<2x128xf32>
    %176 = vector.extract_strided_slice %84 {offsets = [0, 15, 0], sizes = [2, 1, 128], strides = [1, 1, 1]} : vector<2x16x128xbf16> to vector<2x1x128xbf16>
    %177 = vector.shape_cast %176 : vector<2x1x128xbf16> to vector<2x128xbf16>
    %c15 = arith.constant 15 : index
    %c0_123 = arith.constant 0 : index
    %c0_124 = arith.constant 0 : index
    %178 = vector.load %arg6[%c15, %c0_123, %c0_124] : memref<16x128x128xbf16, #tpu.memory_space<vmem>>, vector<1x128x128xbf16>
    %179 = vector.shape_cast %178 : vector<1x128x128xbf16> to vector<128x128xbf16>
    %cst_125 = arith.constant dense<0.000000e+00> : vector<2x128xf32>
    %180 = tpu.matmul %177, %179, %cst_125 {dimension_numbers = #tpu.dot_dimension_numbers<[1], [0], [0], [1], [0, 0, 1, 1], [], []>} : vector<2x128xbf16>, vector<128x128xbf16>, vector<2x128xf32> -> vector<2x128xf32>
    %181 = arith.addf %175, %180 : vector<2x128xf32>
    %c0_126 = arith.constant 0 : index
    %c0_127 = arith.constant 0 : index
    %182 = vector.load %arg7[%c0_126, %c0_127] : memref<1x128xf32, #tpu.memory_space<vmem>>, vector<1x128xf32>
    %183 = vector.broadcast %182 : vector<1x128xf32> to vector<2x128xf32>
    %184 = arith.addf %181, %183 : vector<2x128xf32>
    %cst_128 = arith.constant 0.000000e+00 : f32
    %185 = vector.broadcast %cst_128 : f32 to vector<2x128xf32>
    %186 = arith.maximumf %184, %185 : vector<2x128xf32>
    %187 = arith.truncf %186 : vector<2x128xf32> to vector<2x128xbf16>
    %c0_129 = arith.constant 0 : index
    %c0_130 = arith.constant 0 : index
    %188 = vector.load %arg8[%c0_129, %c0_130] : memref<128x10xbf16, #tpu.memory_space<vmem>>, vector<128x10xbf16>
    %cst_131 = arith.constant dense<0.000000e+00> : vector<2x10xf32>
    %189 = tpu.matmul %187, %188, %cst_131 {dimension_numbers = #tpu.dot_dimension_numbers<[1], [0], [0], [1], [0, 0, 1, 1], [], []>} : vector<2x128xbf16>, vector<128x10xbf16>, vector<2x10xf32> -> vector<2x10xf32>
    %c0_132 = arith.constant 0 : index
    %c0_133 = arith.constant 0 : index
    %190 = vector.load %arg9[%c0_132, %c0_133] : memref<1x10xf32, #tpu.memory_space<vmem>>, vector<1x10xf32>
    %191 = vector.broadcast %190 : vector<1x10xf32> to vector<2x10xf32>
    %192 = arith.addf %189, %191 : vector<2x10xf32>
    %c0_134 = arith.constant 0 : index
    %c0_135 = arith.constant 0 : index
    %193 = vector.load %arg10[%c0_134, %c0_135] : memref<2x10xf32, #tpu.memory_space<vmem>>, vector<2x10xf32>
    tpu.vector_store %arg10[%c0_134, %c0_135], %192 {strides = array<i32>} : memref<2x10xf32, #tpu.memory_space<vmem>>, vector<2x10xf32>,
    return
  }
  func.func @transform_0(%arg0: i32) -> (i32, i32) {
    %c0_i32 = arith.constant 0 : i32
    %c0_i32_0 = arith.constant 0 : i32
    return %arg0, %c0_i32 : i32, i32
  }
  func.func @transform_1(%arg0: i32) -> (i32, i32) {
    %c0_i32 = arith.constant 0 : i32
    %c0_i32_0 = arith.constant 0 : i32
    %c0_i32_1 = arith.constant 0 : i32
    return %c0_i32, %c0_i32_0 : i32, i32
  }
  func.func @transform_2(%arg0: i32) -> (i32, i32) {
    %c0_i32 = arith.constant 0 : i32
    %c0_i32_0 = arith.constant 0 : i32
    %c0_i32_1 = arith.constant 0 : i32
    return %c0_i32, %c0_i32_0 : i32, i32
  }
  func.func @transform_3(%arg0: i32) -> (i32, i32, i32) {
    %c0_i32 = arith.constant 0 : i32
    %c0_i32_0 = arith.constant 0 : i32
    %c0_i32_1 = arith.constant 0 : i32
    %c0_i32_2 = arith.constant 0 : i32
    return %c0_i32, %c0_i32_0, %c0_i32_1 : i32, i32, i32
  }
  func.func @transform_4(%arg0: i32) -> (i32, i32) {
    %c0_i32 = arith.constant 0 : i32
    %c0_i32_0 = arith.constant 0 : i32
    %c0_i32_1 = arith.constant 0 : i32
    return %c0_i32, %c0_i32_0 : i32, i32
  }
  func.func @transform_5(%arg0: i32) -> (i32, i32, i32) {
    %c0_i32 = arith.constant 0 : i32
    %c0_i32_0 = arith.constant 0 : i32
    %c0_i32_1 = arith.constant 0 : i32
    %c0_i32_2 = arith.constant 0 : i32
    return %c0_i32, %c0_i32_0, %c0_i32_1 : i32, i32, i32
  }
  func.func @transform_6(%arg0: i32) -> (i32, i32) {
    %c0_i32 = arith.constant 0 : i32
    %c0_i32_0 = arith.constant 0 : i32
    %c0_i32_1 = arith.constant 0 : i32
    return %c0_i32, %c0_i32_0 : i32, i32
  }
  func.func @transform_7(%arg0: i32) -> (i32, i32) {
    %c0_i32 = arith.constant 0 : i32
    %c0_i32_0 = arith.constant 0 : i32
    %c0_i32_1 = arith.constant 0 : i32
    return %c0_i32, %c0_i32_0 : i32, i32
  }
  func.func @transform_8(%arg0: i32) -> (i32, i32) {
    %c0_i32 = arith.constant 0 : i32
    %c0_i32_0 = arith.constant 0 : i32
    %c0_i32_1 = arith.constant 0 : i32
    return %c0_i32, %c0_i32_0 : i32, i32
  }
  func.func @transform_9(%arg0: i32) -> (i32, i32) {
    %c0_i32 = arith.constant 0 : i32
    %c0_i32_0 = arith.constant 0 : i32
    return %arg0, %c0_i32 : i32, i32
  }
}

</mosaic_0001>

<bundles_post_ra>
// kernel: classifier_cnn_pallas.1
= control target key start
LH: loop header
LB: loop body
LE: loop exit
PB: predicated region body
PF: predicated region fallthrough
CT: control target
= control target key end

     0   :  { %vm285_vm0 = vcmask 293888   ;;  %vm382_vm1 = vcmask 1041408   ;;  %s15195_s0 = inlined_call_operand.vmem [shape: bf16[512,36], index: 0, kind: input, shape index: {}]   ;;  %s15196_s1 = inlined_call_operand.vmem [shape: bf16[36,64], index: 1, kind: input, shape index: {}]   ;;  %s15197_s2 = inlined_call_operand.vmem [shape: f32[1,64], index: 2, kind: input, shape index: {}]   ;;  %s15198_s3 = inlined_call_operand.vmem [shape: bf16[9,64,128], index: 3, kind: input, shape index: {}]   ;;  %s15199_s4 = inlined_call_operand.vmem [shape: f32[1,128], index: 4, kind: input, shape index: {}]   ;;  %s15200_s5 = inlined_call_operand.vmem [shape: bf16[16,128,128], index: 5, kind: input, shape index: {}]   ;;  %s15201_s6 = inlined_call_operand.vmem [shape: f32[1,128], index: 6, kind: input, shape index: {}]   ;;  %s15202_s7 = inlined_call_operand.vmem [shape: bf16[128,10], index: 7, kind: input, shape index: {}]   ;;  %s15203_s8 = inlined_call_operand.vmem [shape: f32[1,10], index: 8, kind: input, shape index: {}]   ;;  %s15204_s9 = inlined_call_operand.hbm [shape: f32[2,10], index: 9, kind: output, shape index: {}]  }
   0x1   :  { %v11409_v0 = vld [vmem:[%s15196_s1] sm:$0xff]   ;;  %v11410_v1 = vld [vmem:[%s15196_s1 + $0x8] sm:$0xff]   ;;  %v11411_v2 = vld [vmem:[%s15196_s1 + $0x10] ss:$0 sps:$4 sm:$0x33]  }
   0x2   :  { %10650 = vmatprep.subr.bf16.mxu0 %v11409_v0  ;;  %v11412_v3 = vld [vmem:[%s15195_s0] sm:$0xff]   ;;  %v384_v4 = vsel %vm382_vm1, %v11411_v2, 0  ;;  %v11413_v5 = vld [vmem:[%s15195_s0 + $0x8] sm:$0xff]   ;;  %v11414_v6 = vld [vmem:[%s15195_s0 + $0x10] sm:$0xff]  }
   0x3   :  { %10651 = vmatpush3.bf16.msra.mxu0 %v11409_v0  ;;  %10656 = vmatprep.mubr.msk.bf16.mxu0 %vm285_vm0, %v11412_v3  ;;  %v11415_v7 = vld [vmem:[%s15195_s0 + $0x18] sm:$0xff]   ;;  %v11416_v8 = vld [vmem:[%s15195_s0 + $0x20] sm:$0xff]   ;;  %v11417_v9 = vld [vmem:[%s15195_s0 + $0x28] sm:$0xff]  }
   0x4   :  { %10652 = vmatprep.subr.bf16.mxu0 %v11410_v1  ;;  %v11418_v10 = vld [vmem:[%s15195_s0 + $0x30] sm:$0xff]   ;;  %v11419_v11 = vld [vmem:[%s15195_s0 + $0x38] sm:$0xff]   ;;  %v11420_v12 = vld [vmem:[%s15195_s0 + $0x40] sm:$0xff]  }
   0x5   :  { %v11421_v13 = vld [vmem:[%s15195_s0 + $0x48] sm:$0xff]   ;;  %v11422_v14 = vld [vmem:[%s15195_s0 + $0x50] sm:$0xff]   ;;  %v11423_v15 = vld [vmem:[%s15195_s0 + $0x58] sm:$0xff]  }
   0x6   :  { %v11424_v16 = vld [vmem:[%s15195_s0 + $0x60] sm:$0xff]   ;;  %v11425_v17 = vld [vmem:[%s15195_s0 + $0x68] sm:$0xff]   ;;  %v11426_v18 = vld [vmem:[%s15195_s0 + $0x70] sm:$0xff]  }
   0x7   :  { %10653 = vmatpush3.bf16.msra.mxu0 %v11410_v1  ;;  %v11427_v19 = vld [vmem:[%s15195_s0 + $0x78] sm:$0xff]   ;;  %v11428_v20 = vld [vmem:[%s15195_s0 + $0x80] sm:$0xff]   ;;  %v11429_v21 = vld [vmem:[%s15195_s0 + $0x88] sm:$0xff]  }
   0x8   :  { %11404 = vmatprep.subr.msk.bf16.mxu0 %vm382_vm1, %v11411_v2  ;;  %v11430_v22 = vld [vmem:[%s15195_s0 + $0x90] sm:$0xff]   ;;  %v11431_v23 = vld [vmem:[%s15195_s0 + $0x98] sm:$0xff]   ;;  %v11432_v24 = vld [vmem:[%s15195_s0 + $0xa0] sm:$0xff]  }
   0x9   :  { %v11433_v25 = vld [vmem:[%s15195_s0 + $0xa8] sm:$0xff]   ;;  %v11434_v26 = vld [vmem:[%s15195_s0 + $0xb0] sm:$0xff]   ;;  %v11435_v27 = vld [vmem:[%s15195_s0 + $0xb8] sm:$0xff]  }
   0xa   :  { %v11436_v28 = vld [vmem:[%s15195_s0 + $0xc0] sm:$0xff]   ;;  %v11437_v29 = vld [vmem:[%s15195_s0 + $0xc8] sm:$0xff]   ;;  %v11438_v30 = vld [vmem:[%s15195_s0 + $0xd0] sm:$0xff]  }
   0xb   :  { %10655 = vmatpush3.bf16.msra.mxu0 %v384_v4  ;;  %v11439_v31 = vld [vmem:[%s15195_s0 + $0xd8] sm:$0xff]   ;;  %v11440_v32 = vld [vmem:[%s15195_s0 + $0xe0] sm:$0xff]   ;;  %v11441_v33 = vld [vmem:[%s15195_s0 + $0xe8] sm:$0xff]  }
   0xc   :  { %v11442_v34 = vld [vmem:[%s15195_s0 + $0xf0] sm:$0xff]   ;;  %v11443_v35 = vld [vmem:[%s15195_s0 + $0xf8] sm:$0xff]  }
   0xe   :  { %10657 = vmatmul.mubr.msk.bf16.vlgmr.msra.gmra.mrb[0].mxu0 %vm285_vm0, %v11413_v5 }
   0xf   :  { %10660 = vmatprep.mubr.msk.bf16.mxu0 %vm285_vm0, %v11414_v6 }
  0x16   :  { %10661 = vmatmul.mubr.msk.bf16.gmra.mrb[4].mxu0 %vm285_vm0, %v11415_v7 }
  0x17   :  { %10664 = vmatprep.mubr.msk.bf16.mxu0 %vm285_vm0, %v11416_v8 }
  0x1e   :  { %10665 = vmatmul.mubr.msk.bf16.gmra.mrb[8].mxu0 %vm285_vm0, %v11417_v9 }
  0x1f   :  { %10668 = vmatprep.mubr.msk.bf16.mxu0 %vm285_vm0, %v11418_v10 }
  0x26   :  { %10669 = vmatmul.mubr.msk.bf16.gmra.mrb[12].mxu0 %vm285_vm0, %v11419_v11 }
  0x27   :  { %10672 = vmatprep.mubr.msk.bf16.mxu0 %vm285_vm0, %v11420_v12 }
  0x2e   :  { %10673 = vmatmul.mubr.msk.bf16.gmra.mrb[16].mxu0 %vm285_vm0, %v11421_v13 }
  0x2f   :  { %10676 = vmatprep.mubr.msk.bf16.mxu0 %vm285_vm0, %v11422_v14 }
  0x36   :  { %10677 = vmatmul.mubr.msk.bf16.gmra.mrb[20].mxu0 %vm285_vm0, %v11423_v15 }
  0x37   :  { %10680 = vmatprep.mubr.msk.bf16.mxu0 %vm285_vm0, %v11424_v16 }
  0x3e   :  { %10681 = vmatmul.mubr.msk.bf16.gmra.mrb[24].mxu0 %vm285_vm0, %v11425_v17 }
  0x3f   :  { %10684 = vmatprep.mubr.msk.bf16.mxu0 %vm285_vm0, %v11426_v18 }
  0x46   :  { %10685 = vmatmul.mubr.msk.bf16.gmra.mrb[28].mxu0 %vm285_vm0, %v11427_v19 }
  0x47   :  { %10688 = vmatprep.mubr.msk.bf16.mxu0 %vm285_vm0, %v11428_v20 }
  0x4e   :  { %10689 = vmatmul.mubr.msk.bf16.gmra.mrb[32].mxu0 %vm285_vm0, %v11429_v21 }
  0x4f   :  { %10692 = vmatprep.mubr.msk.bf16.mxu0 %vm285_vm0, %v11430_v22 }
  0x56   :  { %10693 = vmatmul.mubr.msk.bf16.gmra.mrb[36].mxu0 %vm285_vm0, %v11431_v23 }
  0x57   :  { %10696 = vmatprep.mubr.msk.bf16.mxu0 %vm285_vm0, %v11432_v24 }
  0x5e   :  { %10697 = vmatmul.mubr.msk.bf16.gmra.mrb[40].mxu0 %vm285_vm0, %v11433_v25 }
  0x5f   :  { %10700 = vmatprep.mubr.msk.bf16.mxu0 %vm285_vm0, %v11434_v26 }
  0x66   :  { %10701 = vmatmul.mubr.msk.bf16.gmra.mrb[44].mxu0 %vm285_vm0, %v11435_v27 }
  0x67   :  { %10704 = vmatprep.mubr.msk.bf16.mxu0 %vm285_vm0, %v11436_v28 }
  0x6e   :  { %10705 = vmatmul.mubr.msk.bf16.gmra.mrb[48].mxu0 %vm285_vm0, %v11437_v29 }
  0x6f   :  { %10708 = vmatprep.mubr.msk.bf16.mxu0 %vm285_vm0, %v11438_v30 }
  0x76   :  { %10709 = vmatmul.mubr.msk.bf16.gmra.mrb[52].mxu0 %vm285_vm0, %v11439_v31 }
  0x77   :  { %10712 = vmatprep.mubr.msk.bf16.mxu0 %vm285_vm0, %v11440_v32 }
  0x7e   :  { %10713 = vmatmul.mubr.msk.bf16.gmra.mrb[56].mxu0 %vm285_vm0, %v11441_v33 }
  0x7f   :  { %10716 = vmatprep.mubr.msk.bf16.mxu0 %vm285_vm0, %v11442_v34 }
  0x86   :  { %10717 = vmatmul.mubr.msk.bf16.gmra.mrb[60].mxu0 %vm285_vm0, %v11443_v35 }
  0x87   :  { %14 = vsyncpa [#allocation4], 0  ;;  %v11655_v36 = vmov 1983009808   ;;  %v807_v38 = vlaneseq  ;;  %v11851_v41 = vld [vmem:[%s15197_s2] ss:$0 sm:$0xff] }
  0x88   :  { %v805_v37 = vunpack.c.l.s4 %v11655_v36  ;;  %vm2147_vm2 = vcmask 517120   ;;  %vm3940_vm3 = vcmask 523264   ;;  %vm4503_vm4 = vcmask 1041409   ;;  %s11658_s17 = smov [#allocation3]  }
  0x89   :  { %v808_v40 = vshrl.u32 %v807_v38, 7  ;;  %vm4505_vm5 = vcmask 1042434   ;;  %vm4507_vm6 = vcmask 1043459   ;;  %vm4509_vm7 = vcmask 1044484   ;;  %s9555_s18 = sshll.u32 %s11658_s17, 4  ;;  %s9556_s18 = int_to_ptr.vmem [resolvable:$true] %s9555_s18 }
  0x8a   :  { %v806_v39 = vunpack.c.0.s8 %v805_v37  ;;  %vm4511_vm8 = vcmask 1045509   ;;  %vm4513_vm9 = vcmask 1046534   ;;  %vm4515_vm10 = vcmask 1047559   ;;  %p11636_p1 = scmp.lt.s32.totalorder %s9556_s18, %s9556_s18 }
  0x8b   :  { %vm4334_vm11 = vcmask 516096   ;;  %vm4803_vm12 = vsmask.f32 3328  ;;  %vm4804_vm13 = vsmask.f32 7440  ;;  %vm5361_vm14 = vcmask 1042432  }
  0x8c   :  { %v11854_v44 = vsub.s32 %v806_v39, %v808_v40  ;;  %vm5362_vm15 = vcmask 1046532   ;;  %vm12680_vm0 = vmor %vm4803_vm12, %vm4804_vm13 }
  0xe1   :  { %v10658_v42 = vpop.f32.mrb[0].mxu0 }
  0xe2   :  { %v429_v43 = vadd.f32 %v10658_v42, %v11851_v41  ;;  %v420_v45 = vpop.f32.mrb[1].mxu0 }
  0xe3   :  { %v421_v46 = vadd.f32 %v11851_v41, %v420_v45  ;;  %v10659_v47 = vpop.f32.mrb[2].mxu0 }
  0xe4   :  { %v677_v48 = vmax.f32 %v429_v43, 0.0  ;;  %v432_v49 = vadd.f32 %v10659_v47, %v11851_v41  ;;  %v423_v50 = vpop.f32.mrb[3].mxu0 }
  0xe5   :  { %v675_v51 = vmax.f32 %v421_v46, 0.0  ;;  %v424_v52 = vadd.f32 %v11851_v41, %v423_v50 }
  0xe6   :  { %v837_v53 = vcombine.high %v677_v48, %v677_v48  ;;  %v844_v54 = vrot.slane %v677_v48, %v11854_v44  ;;  %v11860_v55 = vmax.f32 %v432_v49, 0.0 }
  0xe7   :  { %v803_v56 = vcombine.high %v675_v51, %v675_v51  ;;  %v810_v57 = vrot.slane %v675_v51, %v11854_v44  ;;  %v11863_v58 = vmax.f32 %v424_v52, 0.0 }
  0xe8   :  { %v851_v59 = vrot.slane %v837_v53, %v11854_v44  ;;  %v852_v60 = vcombine.high %v844_v54, %v844_v54  ;;  %v2204_v61 = vsel %vm2147_vm2, %v844_v54, -inf  ;;  %v854_v62 = vcombine.high %v11860_v55, %v11860_v55 }
  0xe9   :  { %v2205_v63 = vrot.slane %v2204_v61, 4  ;;  %v817_v0 = vrot.slane %v803_v56, %v11854_v44  ;;  %v818_v1 = vcombine.high %v810_v57, %v810_v57  ;;  %v2148_v2 = vsel %vm2147_vm2, %v810_v57, -inf  ;;  %v11871_v3 = vpop.f32.mrb[4].mxu0 }
  0xea   :  { %v853_v4 = vcombine.high %v851_v59, %v851_v59  ;;  %v2211_v5 = vsel %vm2147_vm2, %v852_v60, -inf  ;;  %v2218_v6 = vsel %vm2147_vm2, %v851_v59, -inf  ;;  %v2149_v7 = vrot.slane %v2148_v2, 4  ;;  %v11875_v8 = vpop.f32.mrb[5].mxu0 }
  0xeb   :  { %v2206_v9 = vmax.f32 %v2204_v61, %v2205_v63  ;;  %v2212_v10 = vrot.slane %v2211_v5, 4  ;;  %v2219_v11 = vrot.slane %v2218_v6, 4  ;;  %v819_v12 = vcombine.high %v817_v0, %v817_v0  ;;  %v11877_v13 = vpop.f32.mrb[6].mxu0 }
  0xec   :  { %v2225_v14 = vsel %vm2147_vm2, %v853_v4, -inf  ;;  %v2150_v15 = vmax.f32 %v2148_v2, %v2149_v7  ;;  %v2155_v16 = vsel %vm2147_vm2, %v818_v1, -inf  ;;  %v2162_v17 = vsel %vm2147_vm2, %v817_v0, -inf  ;;  %v11882_v18 = vpop.f32.mrb[7].mxu0 }
  0xed   :  { %v2207_v19 = vrot.slane %v2206_v9, 2  ;;  %v2213_v20 = vmax.f32 %v2211_v5, %v2212_v10  ;;  %v2220_v21 = vmax.f32 %v2218_v6, %v2219_v11  ;;  %v2226_v22 = vrot.slane %v2225_v14, 4 }
  0xee   :  { %v2151_v23 = vrot.slane %v2150_v15, 2  ;;  %v2156_v24 = vrot.slane %v2155_v16, 4  ;;  %v2163_v25 = vrot.slane %v2162_v17, 4  ;;  %v2169_v26 = vsel %vm2147_vm2, %v819_v12, -inf }
  0xef   :  { %v2208_v27 = vmax.f32 %v2206_v9, %v2207_v19  ;;  %v2214_v28 = vrot.slane %v2213_v20, 2  ;;  %v2221_v29 = vrot.slane %v2220_v21, 2  ;;  %v2227_v30 = vmax.f32 %v2225_v14, %v2226_v22 }
  0xf0   :  { %v2152_v31 = vmax.f32 %v2150_v15, %v2151_v23  ;;  %v2157_v32 = vmax.f32 %v2155_v16, %v2156_v24  ;;  %v2164_v33 = vmax.f32 %v2162_v17, %v2163_v25  ;;  %v2170_v34 = vrot.slane %v2169_v26, 4 }
  0xf1   :  { %v2209_v35 = vrot.slane %v2208_v27, 1  ;;  %v2215_v36 = vmax.f32 %v2213_v20, %v2214_v28  ;;  %v2222_v37 = vmax.f32 %v2220_v21, %v2221_v29  ;;  %v2228_v38 = vrot.slane %v2227_v30, 2  ;;  %v11885_v39 = vpop.f32.mrb[8].mxu0 }
  0xf2   :  { %v2153_v40 = vrot.slane %v2152_v31, 1  ;;  %v2158_v42 = vrot.slane %v2157_v32, 2  ;;  %v2165_v43 = vrot.slane %v2164_v33, 2  ;;  %v2171_v45 = vmax.f32 %v2169_v26, %v2170_v34  ;;  %v11887_v46 = vpop.f32.mrb[9].mxu0 }
  0xf3   :  { %v2210_v47 = vmax.f32 %v2208_v27, %v2209_v35  ;;  %v2216_v48 = vrot.slane %v2215_v36, 1  ;;  %v2223_v49 = vrot.slane %v2222_v37, 1  ;;  %v2229_v50 = vmax.f32 %v2227_v30, %v2228_v38  ;;  %v11889_v51 = vpop.f32.mrb[10].mxu0 }
  0xf4   :  { %v2154_v52 = vmax.f32 %v2152_v31, %v2153_v40  ;;  %v2159_v53 = vmax.f32 %v2157_v32, %v2158_v42  ;;  %v2166_v54 = vmax.f32 %v2164_v33, %v2165_v43  ;;  %v2172_v56 = vrot.slane %v2171_v45, 2  ;;  %v11891_v57 = vpop.f32.mrb[11].mxu0 }
  0xf5   :  { %v2217_v59 = vmax.f32 %v2215_v36, %v2216_v48  ;;  %v2224_v60 = vmax.f32 %v2222_v37, %v2223_v49  ;;  %v2230_v61 = vrot.slane %v2229_v50, 1  ;;  %v3942_v63 = vsel %vm3940_vm3, %v2210_v47, -inf }
  0xf6   :  { %v2160_v0 = vrot.slane %v2159_v53, 1  ;;  %v2167_v1 = vrot.slane %v2166_v54, 1  ;;  %v2173_v2 = vmax.f32 %v2171_v45, %v2172_v56  ;;  %v3941_v4 = vsel %vm3940_vm3, %v2154_v52, -inf }
  0xf7   :  { %v2231_v5 = vmax.f32 %v2229_v50, %v2230_v61  ;;  %v3945_v6 = vsel %vm3940_vm3, %v2217_v59, -inf  ;;  %v3948_v7 = vsel %vm3940_vm3, %v2224_v60, -inf  ;;  %v3943_v9 = vmax.f32 %v3941_v4, %v3942_v63 }
  0xf8   :  { %v2161_v10 = vmax.f32 %v2159_v53, %v2160_v0  ;;  %v2168_v11 = vmax.f32 %v2166_v54, %v2167_v1  ;;  %v2174_v12 = vrot.slane %v2173_v2, 1  ;;  %v861_v14 = vrot.slane %v11860_v55, %v11854_v44 }
  0xf9   :  { %v11900_v15 = vsel %vm3940_vm3, %v2231_v5, -inf  ;;  %v868_v16 = vrot.slane %v854_v62, %v11854_v44  ;;  %v820_v17 = vcombine.high %v11863_v58, %v11863_v58  ;;  %v827_v19 = vrot.slane %v11863_v58, %v11854_v44  ;;  %v11910_v20 = vpop.f32.mrb[12].mxu0 }
  0xfa   :  { %v2175_v21 = vmax.f32 %v2173_v2, %v2174_v12  ;;  %v3944_v22 = vsel %vm3940_vm3, %v2161_v10, -inf  ;;  %v3947_v23 = vsel %vm3940_vm3, %v2168_v11, -inf  ;;  %v869_v24 = vcombine.high %v861_v14, %v861_v14  ;;  %v11914_v25 = vpop.f32.mrb[13].mxu0 }
  0xfb   :  { %v3946_v26 = vmax.f32 %v3944_v22, %v3945_v6  ;;  %v3949_v27 = vmax.f32 %v3947_v23, %v3948_v7  ;;  %v870_v55 = vcombine.high %v868_v16, %v868_v16  ;;  %v2232_v62 = vsel %vm2147_vm2, %v861_v14, -inf  ;;  %v11917_v28 = vpop.f32.mrb[14].mxu0 }
  0xfc   :  { %v11920_v29 = vsel %vm3940_vm3, %v2175_v21, -inf  ;;  %v2233_v58 = vrot.slane %v2232_v62, 4  ;;  %v2239_v30 = vsel %vm2147_vm2, %v869_v24, -inf  ;;  %v2246_v31 = vsel %vm2147_vm2, %v868_v16, -inf  ;;  %v11924_v32 = vpop.f32.mrb[15].mxu0 }
  0xfd   :  { %v3952_v33 = vmax.f32 %v11920_v29, %v11900_v15  ;;  %v4504_v34 = vsel %vm4503_vm4, %v3946_v26, %v3943_v9  ;;  %v2240_v35 = vrot.slane %v2239_v30, 4  ;;  %v2247_v36 = vrot.slane %v2246_v31, 4 }
  0xfe   :  { %v4506_v37 = vsel %vm4505_vm5, %v3949_v27, %v4504_v34  ;;  %v2234_v38 = vmax.f32 %v2232_v62, %v2233_v58  ;;  %v2253_v40 = vsel %vm2147_vm2, %v870_v55, -inf  ;;  %v834_v42 = vrot.slane %v820_v17, %v11854_v44 }
  0xff   :  { %v2241_v43 = vmax.f32 %v2239_v30, %v2240_v35  ;;  %v2248_v45 = vmax.f32 %v2246_v31, %v2247_v36  ;;  %v2254_v47 = vrot.slane %v2253_v40, 4  ;;  %v835_v48 = vcombine.high %v827_v19, %v827_v19 }
 0x100   :  { %v2235_v49 = vrot.slane %v2234_v38, 2  ;;  %v836_v50 = vcombine.high %v834_v42, %v834_v42  ;;  %v2176_v52 = vsel %vm2147_vm2, %v827_v19, -inf  ;;  %v2190_v53 = vsel %vm2147_vm2, %v834_v42, -inf }
 0x101   :  { %v2242_v54 = vrot.slane %v2241_v43, 2  ;;  %v2249_v56 = vrot.slane %v2248_v45, 2  ;;  %v2255_v59 = vmax.f32 %v2253_v40, %v2254_v47  ;;  %v2177_v60 = vrot.slane %v2176_v52, 4  ;;  %v11936_v12 = vpop.f32.mrb[16].mxu0 }
 0x102   :  { %v2236_v61 = vmax.f32 %v2234_v38, %v2235_v49  ;;  %v2183_v63 = vsel %vm2147_vm2, %v835_v48, -inf  ;;  %v2191_v0 = vrot.slane %v2190_v53, 4  ;;  %v2197_v1 = vsel %vm2147_vm2, %v836_v50, -inf  ;;  %v11938_v24 = vpop.f32.mrb[17].mxu0 }
 0x103   :  { %v2243_v2 = vmax.f32 %v2241_v43, %v2242_v54  ;;  %v2250_v4 = vmax.f32 %v2248_v45, %v2249_v56  ;;  %v2256_v5 = vrot.slane %v2255_v59, 2  ;;  %v2178_v6 = vmax.f32 %v2176_v52, %v2177_v60 }
 0x104   :  { %v2237_v7 = vrot.slane %v2236_v61, 1  ;;  %v2184_v9 = vrot.slane %v2183_v63, 4  ;;  %v2192_v10 = vmax.f32 %v2190_v53, %v2191_v0  ;;  %v2198_v11 = vrot.slane %v2197_v1, 4 }
 0x105   :  { %v2244_v14 = vrot.slane %v2243_v2, 1  ;;  %v2251_v15 = vrot.slane %v2250_v4, 1  ;;  %v2257_v16 = vmax.f32 %v2255_v59, %v2256_v5  ;;  %v2179_v17 = vrot.slane %v2178_v6, 2 }
 0x106   :  { %v2238_v19 = vmax.f32 %v2236_v61, %v2237_v7  ;;  %v2185_v21 = vmax.f32 %v2183_v63, %v2184_v9  ;;  %v2193_v22 = vrot.slane %v2192_v10, 2  ;;  %v2199_v23 = vmax.f32 %v2197_v1, %v2198_v11 }
 0x107   :  { %v2245_v26 = vmax.f32 %v2243_v2, %v2244_v14  ;;  %v2252_v27 = vmax.f32 %v2250_v4, %v2251_v15  ;;  %v2258_v55 = vrot.slane %v2257_v16, 1  ;;  %v2180_v62 = vmax.f32 %v2178_v6, %v2179_v17 }
 0x108   :  { %v3954_v29 = vsel %vm3940_vm3, %v2238_v19, -inf  ;;  %v2186_v58 = vrot.slane %v2185_v21, 2  ;;  %v2194_v30 = vmax.f32 %v2192_v10, %v2193_v22  ;;  %v2200_v31 = vrot.slane %v2199_v23, 2 }
 0x109   :  { %v2259_v34 = vmax.f32 %v2257_v16, %v2258_v55  ;;  %v3957_v35 = vsel %vm3940_vm3, %v2245_v26, -inf  ;;  %v3960_v36 = vsel %vm3940_vm3, %v2252_v27, -inf  ;;  %v2181_v38 = vrot.slane %v2180_v62, 1 }
 0x10a   :  { %v2187_v40 = vmax.f32 %v2185_v21, %v2186_v58  ;;  %v2195_v42 = vrot.slane %v2194_v30, 1  ;;  %v2201_v43 = vmax.f32 %v2199_v23, %v2200_v31  ;;  %v4508_v45 = vsel %vm4507_vm6, %v3952_v33, %v4506_v37 }
 0x10b   :  { %v3963_v47 = vsel %vm3940_vm3, %v2259_v34, -inf  ;;  %v2182_v48 = vmax.f32 %v2180_v62, %v2181_v38  ;;  %v445_v49 = vadd.f32 %v11871_v3, %v11851_v41  ;;  %v437_v50 = vadd.f32 %v11851_v41, %v11875_v8 }
 0x10c   :  { %v2188_v52 = vrot.slane %v2187_v40, 1  ;;  %v2196_v53 = vmax.f32 %v2194_v30, %v2195_v42  ;;  %v2202_v54 = vrot.slane %v2201_v43, 1  ;;  %v11951_v56 = vadd.f32 %v11877_v13, %v11851_v41 }
 0x10d   :  { %v3953_v59 = vsel %vm3940_vm3, %v2182_v48, -inf  ;;  %v681_v33 = vmax.f32 %v445_v49, 0.0  ;;  %v679_v37 = vmax.f32 %v437_v50, 0.0  ;;  %v11956_v60 = vadd.f32 %v11851_v41, %v11882_v18 }
 0x10e   :  { %v2189_v61 = vmax.f32 %v2187_v40, %v2188_v52  ;;  %v2203_v3 = vmax.f32 %v2201_v43, %v2202_v54  ;;  %v3955_v63 = vmax.f32 %v3953_v59, %v3954_v29  ;;  %v3959_v8 = vsel %vm3940_vm3, %v2196_v53, -inf  ;;  %v11972_v29 = vpop.f32.mrb[18].mxu0 }
 0x10f   :  { %v3961_v0 = vmax.f32 %v3959_v8, %v3960_v36  ;;  %v905_v1 = vcombine.high %v681_v33, %v681_v33  ;;  %v912_v2 = vrot.slane %v681_v33, %v11854_v44  ;;  %v871_v4 = vcombine.high %v679_v37, %v679_v37 }
 0x110   :  { %v3956_v13 = vsel %vm3940_vm3, %v2189_v61, -inf  ;;  %v3962_v5 = vsel %vm3940_vm3, %v2203_v3, -inf  ;;  %v4510_v6 = vsel %vm4509_vm7, %v3955_v63, %v4508_v45  ;;  %v878_v7 = vrot.slane %v679_v37, %v11854_v44 }
 0x111   :  { %v3958_v18 = vmax.f32 %v3956_v13, %v3957_v35  ;;  %v3964_v9 = vmax.f32 %v3962_v5, %v3963_v47  ;;  %v919_v10 = vrot.slane %v905_v1, %v11854_v44  ;;  %v920_v11 = vcombine.high %v912_v2, %v912_v2 }
 0x112   :  { %v2316_v14 = vsel %vm2147_vm2, %v912_v2, -inf  ;;  %v885_v15 = vrot.slane %v871_v4, %v11854_v44  ;;  %v886_v16 = vcombine.high %v878_v7, %v878_v7  ;;  %v2260_v17 = vsel %vm2147_vm2, %v878_v7, -inf  ;;  %v11980_v7 = vpop.f32.mrb[19].mxu0 }
 0x113   :  { %v4512_v19 = vsel %vm4511_vm8, %v3958_v18, %v4510_v6  ;;  %v921_v21 = vcombine.high %v919_v10, %v919_v10  ;;  %v2317_v22 = vrot.slane %v2316_v14, 4  ;;  %v2323_v23 = vsel %vm2147_vm2, %v920_v11, -inf }
 0x114   :  { %v4514_v26 = vsel %vm4513_vm9, %v3961_v0, %v4512_v19  ;;  %v2324_v27 = vrot.slane %v2323_v23, 4  ;;  %v2330_v55 = vsel %vm2147_vm2, %v919_v10, -inf  ;;  %v887_v62 = vcombine.high %v885_v15, %v885_v15 }
 0x115   :  { %v4516_v58 = vsel %vm4515_vm10, %v3964_v9, %v4514_v26  ;;  %v2318_v30 = vmax.f32 %v2316_v14, %v2317_v22  ;;  %v2331_v31 = vrot.slane %v2330_v55, 4  ;;  %v2337_v34 = vsel %vm2147_vm2, %v921_v21, -inf }
 0x116   :  { %4639 = vst.msk [vmem:[#allocation2 + $0x11] sm:$0xff] %vm3940_vm3, %v4516_v58  ;;  %v2325_v35 = vmax.f32 %v2323_v23, %v2324_v27  ;;  %v2338_v36 = vrot.slane %v2337_v34, 4  ;;  %v2261_v38 = vrot.slane %v2260_v17, 4  ;;  %v2267_v40 = vsel %vm2147_vm2, %v886_v16, -inf }
 0x117   :  { %v2319_v42 = vrot.slane %v2318_v30, 2  ;;  %v2332_v43 = vmax.f32 %v2330_v55, %v2331_v31  ;;  %v2268_v45 = vrot.slane %v2267_v40, 4  ;;  %v2274_v47 = vsel %vm2147_vm2, %v885_v15, -inf }
 0x118   :  { %v2326_v48 = vrot.slane %v2325_v35, 2  ;;  %v2339_v49 = vmax.f32 %v2337_v34, %v2338_v36  ;;  %v2262_v50 = vmax.f32 %v2260_v17, %v2261_v38  ;;  %v2275_v52 = vrot.slane %v2274_v47, 4 }
 0x119   :  { %v2320_v53 = vmax.f32 %v2318_v30, %v2319_v42  ;;  %v2333_v54 = vrot.slane %v2332_v43, 2  ;;  %v2269_v59 = vmax.f32 %v2267_v40, %v2268_v45  ;;  %v2281_v33 = vsel %vm2147_vm2, %v887_v62, -inf }
 0x11a   :  { %v2327_v37 = vmax.f32 %v2325_v35, %v2326_v48  ;;  %v2340_v61 = vrot.slane %v2339_v49, 2  ;;  %v2263_v3 = vrot.slane %v2262_v50, 2  ;;  %v2276_v63 = vmax.f32 %v2274_v47, %v2275_v52 }
 0x11b   :  { %v2321_v8 = vrot.slane %v2320_v53, 1  ;;  %v2334_v0 = vmax.f32 %v2332_v43, %v2333_v54  ;;  %v2270_v1 = vrot.slane %v2269_v59, 2  ;;  %v2282_v2 = vrot.slane %v2281_v33, 4 }
 0x11c   :  { %v2328_v4 = vrot.slane %v2327_v37, 1  ;;  %v2341_v13 = vmax.f32 %v2339_v49, %v2340_v61  ;;  %v2264_v5 = vmax.f32 %v2262_v50, %v2263_v3  ;;  %v2277_v6 = vrot.slane %v2276_v63, 2 }
 0x11d   :  { %v2322_v18 = vmax.f32 %v2320_v53, %v2321_v8  ;;  %v2335_v9 = vrot.slane %v2334_v0, 1  ;;  %v2271_v10 = vmax.f32 %v2269_v59, %v2270_v1  ;;  %v2283_v11 = vmax.f32 %v2281_v33, %v2282_v2 }
 0x11e   :  { %v2329_v14 = vmax.f32 %v2327_v37, %v2328_v4  ;;  %v2342_v15 = vrot.slane %v2341_v13, 1  ;;  %v2265_v16 = vrot.slane %v2264_v5, 1  ;;  %v2278_v17 = vmax.f32 %v2276_v63, %v2277_v6 }
 0x11f   :  { %v2336_v19 = vmax.f32 %v2334_v0, %v2335_v9  ;;  %v3966_v21 = vsel %vm3940_vm3, %v2322_v18, -inf  ;;  %v2272_v22 = vrot.slane %v2271_v10, 1  ;;  %v2284_v23 = vrot.slane %v2283_v11, 2 }
 0x120   :  { %v2343_v26 = vmax.f32 %v2341_v13, %v2342_v15  ;;  %v3969_v27 = vsel %vm3940_vm3, %v2329_v14, -inf  ;;  %v2266_v55 = vmax.f32 %v2264_v5, %v2265_v16  ;;  %v2279_v62 = vrot.slane %v2278_v17, 1 }
 0x121   :  { %v3972_v58 = vsel %vm3940_vm3, %v2336_v19, -inf  ;;  %v2273_v30 = vmax.f32 %v2271_v10, %v2272_v22  ;;  %v2285_v31 = vmax.f32 %v2283_v11, %v2284_v23  ;;  %v682_v34 = vmax.f32 %v11951_v56, 0.0 }
 0x122   :  { %v11987_v35 = vsel %vm3940_vm3, %v2343_v26, -inf  ;;  %v2280_v36 = vmax.f32 %v2278_v17, %v2279_v62  ;;  %v3965_v38 = vsel %vm3940_vm3, %v2266_v55, -inf  ;;  %v680_v40 = vmax.f32 %v11956_v60, 0.0 }
 0x123   :  { %v2286_v42 = vrot.slane %v2285_v31, 1  ;;  %v3967_v43 = vmax.f32 %v3965_v38, %v3966_v21  ;;  %v3968_v45 = vsel %vm3940_vm3, %v2273_v30, -inf  ;;  %v922_v47 = vcombine.high %v682_v34, %v682_v34  ;;  %v12012_v38 = vpop.f32.mrb[20].mxu0 }
 0x124   :  { %v3970_v48 = vmax.f32 %v3968_v45, %v3969_v27  ;;  %v3971_v49 = vsel %vm3940_vm3, %v2280_v36, -inf  ;;  %v929_v50 = vrot.slane %v682_v34, %v11854_v44  ;;  %v888_v52 = vcombine.high %v680_v40, %v680_v40 }
 0x125   :  { %v2287_v56 = vmax.f32 %v2285_v31, %v2286_v42  ;;  %v3973_v53 = vmax.f32 %v3971_v49, %v3972_v58  ;;  %v936_v54 = vrot.slane %v922_v47, %v11854_v44  ;;  %v895_v59 = vrot.slane %v680_v40, %v11854_v44 }
 0x126   :  { %v4517_v33 = vsel %vm4503_vm4, %v3970_v48, %v3967_v43  ;;  %v937_v60 = vcombine.high %v929_v50, %v929_v50  ;;  %v2344_v37 = vsel %vm2147_vm2, %v929_v50, -inf  ;;  %v902_v61 = vrot.slane %v888_v52, %v11854_v44  ;;  %v12014_v52 = vpop.f32.mrb[21].mxu0 }
 0x127   :  { %v12000_v3 = vsel %vm3940_vm3, %v2287_v56, -inf  ;;  %v4518_v63 = vsel %vm4505_vm5, %v3973_v53, %v4517_v33  ;;  %v938_v8 = vcombine.high %v936_v54, %v936_v54  ;;  %v2345_v0 = vrot.slane %v2344_v37, 4 }
 0x128   :  { %v3976_v1 = vmax.f32 %v12000_v3, %v11987_v35  ;;  %v2351_v2 = vsel %vm2147_vm2, %v937_v60, -inf  ;;  %v2358_v4 = vsel %vm2147_vm2, %v936_v54, -inf  ;;  %v903_v13 = vcombine.high %v895_v59, %v895_v59 }
 0x129   :  { %v2346_v5 = vmax.f32 %v2344_v37, %v2345_v0  ;;  %v2352_v6 = vrot.slane %v2351_v2, 4  ;;  %v2359_v18 = vrot.slane %v2358_v4, 4  ;;  %v2365_v9 = vsel %vm2147_vm2, %v938_v8, -inf }
 0x12a   :  { %v2366_v10 = vrot.slane %v2365_v9, 4  ;;  %v904_v11 = vcombine.high %v902_v61, %v902_v61  ;;  %v2288_v14 = vsel %vm2147_vm2, %v895_v59, -inf  ;;  %v2295_v15 = vsel %vm2147_vm2, %v903_v13, -inf }
 0x12b   :  { %v2347_v16 = vrot.slane %v2346_v5, 2  ;;  %v2353_v17 = vmax.f32 %v2351_v2, %v2352_v6  ;;  %v2360_v19 = vmax.f32 %v2358_v4, %v2359_v18  ;;  %v2289_v21 = vrot.slane %v2288_v14, 4 }
 0x12c   :  { %v2367_v22 = vmax.f32 %v2365_v9, %v2366_v10  ;;  %v2296_v23 = vrot.slane %v2295_v15, 4  ;;  %v2302_v26 = vsel %vm2147_vm2, %v902_v61, -inf  ;;  %v2309_v27 = vsel %vm2147_vm2, %v904_v11, -inf }
 0x12d   :  { %v2348_v55 = vmax.f32 %v2346_v5, %v2347_v16  ;;  %v2354_v62 = vrot.slane %v2353_v17, 2  ;;  %v2361_v58 = vrot.slane %v2360_v19, 2  ;;  %v2290_v30 = vmax.f32 %v2288_v14, %v2289_v21 }
 0x12e   :  { %v2368_v31 = vrot.slane %v2367_v22, 2  ;;  %v2297_v34 = vmax.f32 %v2295_v15, %v2296_v23  ;;  %v2303_v35 = vrot.slane %v2302_v26, 4  ;;  %v2310_v36 = vrot.slane %v2309_v27, 4 }
 0x12f   :  { %v2349_v40 = vrot.slane %v2348_v55, 1  ;;  %v2355_v42 = vmax.f32 %v2353_v17, %v2354_v62  ;;  %v2362_v43 = vmax.f32 %v2360_v19, %v2361_v58  ;;  %v2291_v45 = vrot.slane %v2290_v30, 2 }
 0x130   :  { %v2369_v47 = vmax.f32 %v2367_v22, %v2368_v31  ;;  %v2298_v48 = vrot.slane %v2297_v34, 2  ;;  %v2304_v49 = vmax.f32 %v2302_v26, %v2303_v35  ;;  %v2311_v50 = vmax.f32 %v2309_v27, %v2310_v36 }
 0x131   :  { %v2350_v56 = vmax.f32 %v2348_v55, %v2349_v40  ;;  %v2356_v53 = vrot.slane %v2355_v42, 1  ;;  %v2363_v54 = vrot.slane %v2362_v43, 1  ;;  %v2292_v59 = vmax.f32 %v2290_v30, %v2291_v45 }
 0x132   :  { %v2370_v33 = vrot.slane %v2369_v47, 1  ;;  %v2299_v60 = vmax.f32 %v2297_v34, %v2298_v48  ;;  %v2305_v37 = vrot.slane %v2304_v49, 2  ;;  %v2312_v61 = vrot.slane %v2311_v50, 2 }
 0x133   :  { %v2357_v3 = vmax.f32 %v2355_v42, %v2356_v53  ;;  %v2364_v8 = vmax.f32 %v2362_v43, %v2363_v54  ;;  %v3978_v0 = vsel %vm3940_vm3, %v2350_v56, -inf  ;;  %v2293_v2 = vrot.slane %v2292_v59, 1 }
 0x134   :  { %v2371_v4 = vmax.f32 %v2369_v47, %v2370_v33  ;;  %v2300_v13 = vrot.slane %v2299_v60, 1  ;;  %v2306_v5 = vmax.f32 %v2304_v49, %v2305_v37  ;;  %v2313_v6 = vmax.f32 %v2311_v50, %v2312_v61 }
 0x135   :  { %v3981_v18 = vsel %vm3940_vm3, %v2357_v3, -inf  ;;  %v3984_v9 = vsel %vm3940_vm3, %v2364_v8, -inf  ;;  %v2294_v10 = vmax.f32 %v2292_v59, %v2293_v2  ;;  %v4519_v11 = vsel %vm4507_vm6, %v3976_v1, %v4518_v63 }
 0x136   :  { %v3987_v14 = vsel %vm3940_vm3, %v2371_v4, -inf  ;;  %v2301_v15 = vmax.f32 %v2299_v60, %v2300_v13  ;;  %v2307_v16 = vrot.slane %v2306_v5, 1  ;;  %v2314_v17 = vrot.slane %v2313_v6, 1 }
 0x137   :  { %v3977_v19 = vsel %vm3940_vm3, %v2294_v10, -inf  ;;  %v461_v21 = vadd.f32 %v11885_v39, %v11851_v41  ;;  %v453_v22 = vadd.f32 %v11851_v41, %v11887_v46  ;;  %v464_v23 = vadd.f32 %v11889_v51, %v11851_v41 }
 0x138   :  { %v2308_v26 = vmax.f32 %v2306_v5, %v2307_v16  ;;  %v2315_v27 = vmax.f32 %v2313_v6, %v2314_v17  ;;  %v3979_v55 = vmax.f32 %v3977_v19, %v3978_v0  ;;  %v3980_v63 = vsel %vm3940_vm3, %v2301_v15, -inf }
 0x139   :  { %v3982_v1 = vmax.f32 %v3980_v63, %v3981_v18  ;;  %v685_v62 = vmax.f32 %v461_v21, 0.0  ;;  %v683_v58 = vmax.f32 %v453_v22, 0.0  ;;  %v12029_v30 = vmax.f32 %v464_v23, 0.0 }
 0x13a   :  { %v3983_v31 = vsel %vm3940_vm3, %v2308_v26, -inf  ;;  %v3986_v39 = vsel %vm3940_vm3, %v2315_v27, -inf  ;;  %v4520_v34 = vsel %vm4509_vm7, %v3979_v55, %v4519_v11  ;;  %v456_v46 = vadd.f32 %v11851_v41, %v11891_v57 }
 0x13b   :  { %v3985_v51 = vmax.f32 %v3983_v31, %v3984_v9  ;;  %v3988_v35 = vmax.f32 %v3986_v39, %v3987_v14  ;;  %v4521_v36 = vsel %vm4511_vm8, %v3982_v1, %v4520_v34  ;;  %v973_v40 = vcombine.high %v685_v62, %v685_v62  ;;  %v12059_v14 = vpop.f32.mrb[22].mxu0 }
 0x13c   :  { %v980_v42 = vrot.slane %v685_v62, %v11854_v44  ;;  %v939_v43 = vcombine.high %v683_v58, %v683_v58  ;;  %v946_v45 = vrot.slane %v683_v58, %v11854_v44  ;;  %v990_v47 = vcombine.high %v12029_v30, %v12029_v30 }
 0x13d   :  { %v4522_v48 = vsel %vm4513_vm9, %v3985_v51, %v4521_v36  ;;  %v987_v49 = vrot.slane %v973_v40, %v11854_v44  ;;  %v12045_v57 = vrot.slane %v12029_v30, %v11854_v44  ;;  %v12047_v50 = vmax.f32 %v456_v46, 0.0  ;;  %v12062_v36 = vpop.f32.mrb[23].mxu0 }
 0x13e   :  { %v4523_v56 = vsel %vm4515_vm10, %v3988_v35, %v4522_v48  ;;  %v988_v53 = vcombine.high %v980_v42, %v980_v42  ;;  %v2428_v54 = vsel %vm2147_vm2, %v980_v42, -inf  ;;  %v953_v59 = vrot.slane %v939_v43, %v11854_v44 }
 0x13f   :  { %4640 = vst.msk [vmem:[#allocation2 + $0x21] sm:$0xff] %vm3940_vm3, %v4523_v56  ;;  %v989_v33 = vcombine.high %v987_v49, %v987_v49  ;;  %v2429_v60 = vrot.slane %v2428_v54, 4  ;;  %v2442_v37 = vsel %vm2147_vm2, %v987_v49, -inf  ;;  %v954_v61 = vcombine.high %v946_v45, %v946_v45 }
 0x140   :  { %v2435_v3 = vsel %vm2147_vm2, %v988_v53, -inf  ;;  %v2443_v8 = vrot.slane %v2442_v37, 4  ;;  %v955_v0 = vcombine.high %v953_v59, %v953_v59  ;;  %v2372_v2 = vsel %vm2147_vm2, %v946_v45, -inf }
 0x141   :  { %v2430_v4 = vmax.f32 %v2428_v54, %v2429_v60  ;;  %v2436_v13 = vrot.slane %v2435_v3, 4  ;;  %v2449_v5 = vsel %vm2147_vm2, %v989_v33, -inf  ;;  %v2373_v6 = vrot.slane %v2372_v2, 4 }
 0x142   :  { %v2444_v18 = vmax.f32 %v2442_v37, %v2443_v8  ;;  %v2450_v9 = vrot.slane %v2449_v5, 4  ;;  %v2379_v10 = vsel %vm2147_vm2, %v954_v61, -inf  ;;  %v2386_v11 = vsel %vm2147_vm2, %v953_v59, -inf }
 0x143   :  { %v2431_v15 = vrot.slane %v2430_v4, 2  ;;  %v2437_v16 = vmax.f32 %v2435_v3, %v2436_v13  ;;  %v2374_v17 = vmax.f32 %v2372_v2, %v2373_v6  ;;  %v2380_v19 = vrot.slane %v2379_v10, 4 }
 0x144   :  { %v2445_v21 = vrot.slane %v2444_v18, 2  ;;  %v2451_v22 = vmax.f32 %v2449_v5, %v2450_v9  ;;  %v2387_v23 = vrot.slane %v2386_v11, 4  ;;  %v2393_v26 = vsel %vm2147_vm2, %v955_v0, -inf }
 0x145   :  { %v2432_v27 = vmax.f32 %v2430_v4, %v2431_v15  ;;  %v2438_v55 = vrot.slane %v2437_v16, 2  ;;  %v2375_v63 = vrot.slane %v2374_v17, 2  ;;  %v2381_v1 = vmax.f32 %v2379_v10, %v2380_v19 }
 0x146   :  { %v2446_v62 = vmax.f32 %v2444_v18, %v2445_v21  ;;  %v2452_v58 = vrot.slane %v2451_v22, 2  ;;  %v2388_v31 = vmax.f32 %v2386_v11, %v2387_v23  ;;  %v2394_v39 = vrot.slane %v2393_v26, 4 }
 0x147   :  { %v2433_v34 = vrot.slane %v2432_v27, 1  ;;  %v2439_v46 = vmax.f32 %v2437_v16, %v2438_v55  ;;  %v2376_v51 = vmax.f32 %v2374_v17, %v2375_v63  ;;  %v2382_v35 = vrot.slane %v2381_v1, 2 }
 0x148   :  { %v2447_v40 = vrot.slane %v2446_v62, 1  ;;  %v2453_v42 = vmax.f32 %v2451_v22, %v2452_v58  ;;  %v2389_v43 = vrot.slane %v2388_v31, 2  ;;  %v2395_v45 = vmax.f32 %v2393_v26, %v2394_v39 }
 0x149   :  { %v2434_v48 = vmax.f32 %v2432_v27, %v2433_v34  ;;  %v2440_v49 = vrot.slane %v2439_v46, 1  ;;  %v2377_v56 = vrot.slane %v2376_v51, 1  ;;  %v2383_v53 = vmax.f32 %v2381_v1, %v2382_v35 }
 0x14a   :  { %v2448_v54 = vmax.f32 %v2446_v62, %v2447_v40  ;;  %v2454_v59 = vrot.slane %v2453_v42, 1  ;;  %v2390_v33 = vmax.f32 %v2388_v31, %v2389_v43  ;;  %v2396_v60 = vrot.slane %v2395_v45, 2 }
 0x14b   :  { %v2441_v37 = vmax.f32 %v2439_v46, %v2440_v49  ;;  %v3990_v61 = vsel %vm3940_vm3, %v2434_v48, -inf  ;;  %v2378_v3 = vmax.f32 %v2376_v51, %v2377_v56  ;;  %v2384_v8 = vrot.slane %v2383_v53, 1 }
 0x14c   :  { %v2455_v0 = vmax.f32 %v2453_v42, %v2454_v59  ;;  %v3996_v2 = vsel %vm3940_vm3, %v2448_v54, -inf  ;;  %v2391_v4 = vrot.slane %v2390_v33, 1  ;;  %v2397_v13 = vmax.f32 %v2395_v45, %v2396_v60 }
 0x14d   :  { %v3993_v5 = vsel %vm3940_vm3, %v2441_v37, -inf  ;;  %v2385_v6 = vmax.f32 %v2383_v53, %v2384_v8  ;;  %v3989_v18 = vsel %vm3940_vm3, %v2378_v3, -inf  ;;  %v1004_v9 = vrot.slane %v990_v47, %v11854_v44 }
 0x14e   :  { %v3999_v10 = vsel %vm3940_vm3, %v2455_v0, -inf  ;;  %v2392_v11 = vmax.f32 %v2390_v33, %v2391_v4  ;;  %v2398_v15 = vrot.slane %v2397_v13, 1  ;;  %v3991_v16 = vmax.f32 %v3989_v18, %v3990_v61 }
 0x14f   :  { %v3992_v17 = vsel %vm3940_vm3, %v2385_v6, -inf  ;;  %v1005_v19 = vcombine.high %v12045_v57, %v12045_v57  ;;  %v1006_v21 = vcombine.high %v1004_v9, %v1004_v9  ;;  %v2456_v22 = vsel %vm2147_vm2, %v12045_v57, -inf }
 0x150   :  { %v2399_v23 = vmax.f32 %v2397_v13, %v2398_v15  ;;  %v3994_v26 = vmax.f32 %v3992_v17, %v3993_v5  ;;  %v3995_v27 = vsel %vm3940_vm3, %v2392_v11, -inf  ;;  %v2457_v30 = vrot.slane %v2456_v22, 4 }
 0x151   :  { %v3997_v47 = vmax.f32 %v3995_v27, %v3996_v2  ;;  %v2463_v55 = vsel %vm2147_vm2, %v1005_v19, -inf  ;;  %v2470_v63 = vsel %vm2147_vm2, %v1004_v9, -inf  ;;  %v2477_v1 = vsel %vm2147_vm2, %v1006_v21, -inf }
 0x152   :  { %v3998_v62 = vsel %vm3940_vm3, %v2399_v23, -inf  ;;  %v4524_v58 = vsel %vm4503_vm4, %v3994_v26, %v3991_v16  ;;  %v2458_v31 = vmax.f32 %v2456_v22, %v2457_v30  ;;  %v2464_v39 = vrot.slane %v2463_v55, 4 }
 0x153   :  { %v4000_v34 = vmax.f32 %v3998_v62, %v3999_v10  ;;  %v4525_v57 = vsel %vm4505_vm5, %v3997_v47, %v4524_v58  ;;  %v2471_v46 = vrot.slane %v2470_v63, 4  ;;  %v2478_v51 = vrot.slane %v2477_v1, 4  ;;  %v12098_v10 = vpop.f32.mrb[24].mxu0 }
 0x154   :  { %v2459_v35 = vrot.slane %v2458_v31, 2  ;;  %v2465_v40 = vmax.f32 %v2463_v55, %v2464_v39  ;;  %v956_v42 = vcombine.high %v12047_v50, %v12047_v50  ;;  %v963_v43 = vrot.slane %v12047_v50, %v11854_v44  ;;  %v12102_v55 = vpop.f32.mrb[25].mxu0 }
 0x155   :  { %v2472_v45 = vmax.f32 %v2470_v63, %v2471_v46  ;;  %v2479_v48 = vmax.f32 %v2477_v1, %v2478_v51  ;;  %v12090_v49 = vsel %vm4507_vm6, %v4000_v34, %v4525_v57  ;;  %v477_v56 = vadd.f32 %v11910_v20, %v11851_v41 }
 0x156   :  { %v2460_v53 = vmax.f32 %v2458_v31, %v2459_v35  ;;  %v2466_v54 = vrot.slane %v2465_v40, 2  ;;  %v970_v59 = vrot.slane %v956_v42, %v11854_v44  ;;  %v971_v33 = vcombine.high %v963_v43, %v963_v43 }
 0x157   :  { %v2473_v60 = vrot.slane %v2472_v45, 2  ;;  %v2480_v37 = vrot.slane %v2479_v48, 2  ;;  %v2400_v61 = vsel %vm2147_vm2, %v963_v43, -inf  ;;  %v689_v3 = vmax.f32 %v477_v56, 0.0 }
 0x158   :  { %v2461_v8 = vrot.slane %v2460_v53, 1  ;;  %v2467_v50 = vmax.f32 %v2465_v40, %v2466_v54  ;;  %v972_v0 = vcombine.high %v970_v59, %v970_v59  ;;  %v2401_v2 = vrot.slane %v2400_v61, 4 }
 0x159   :  { %v2474_v4 = vmax.f32 %v2472_v45, %v2473_v60  ;;  %v2481_v13 = vmax.f32 %v2479_v48, %v2480_v37  ;;  %v2407_v5 = vsel %vm2147_vm2, %v971_v33, -inf  ;;  %v2414_v41 = vsel %vm2147_vm2, %v970_v59, -inf  ;;  %v12112_v45 = vld [vmem:[%s15197_s2] ss:$0 sm:$0xff] }
 0x15a   :  { %v2462_v20 = vmax.f32 %v2460_v53, %v2461_v8  ;;  %v2468_v6 = vrot.slane %v2467_v50, 1  ;;  %v2402_v18 = vmax.f32 %v2400_v61, %v2401_v2  ;;  %v2408_v9 = vrot.slane %v2407_v5, 4 }
 0x15b   :  { %v2475_v11 = vrot.slane %v2474_v4, 1  ;;  %v2482_v15 = vrot.slane %v2481_v13, 1  ;;  %v2415_v16 = vrot.slane %v2414_v41, 4  ;;  %v2421_v17 = vsel %vm2147_vm2, %v972_v0, -inf }
 0x15c   :  { %v2469_v19 = vmax.f32 %v2467_v50, %v2468_v6  ;;  %v4002_v21 = vsel %vm3940_vm3, %v2462_v20, -inf  ;;  %v2403_v22 = vrot.slane %v2402_v18, 2  ;;  %v2409_v23 = vmax.f32 %v2407_v5, %v2408_v9 }
 0x15d   :  { %v2476_v26 = vmax.f32 %v2474_v4, %v2475_v11  ;;  %v2483_v27 = vmax.f32 %v2481_v13, %v2482_v15  ;;  %v2416_v30 = vmax.f32 %v2414_v41, %v2415_v16  ;;  %v2422_v47 = vrot.slane %v2421_v17, 4 }
 0x15e   :  { %v4005_v63 = vsel %vm3940_vm3, %v2469_v19, -inf  ;;  %v2404_v1 = vmax.f32 %v2402_v18, %v2403_v22  ;;  %v2410_v62 = vrot.slane %v2409_v23, 2  ;;  %v1041_v58 = vcombine.high %v689_v3, %v689_v3 }
 0x15f   :  { %v4008_v31 = vsel %vm3940_vm3, %v2476_v26, -inf  ;;  %v4011_v39 = vsel %vm3940_vm3, %v2483_v27, -inf  ;;  %v2417_v34 = vrot.slane %v2416_v30, 2  ;;  %v2423_v57 = vmax.f32 %v2421_v17, %v2422_v47 }
 0x160   :  { %v2405_v46 = vrot.slane %v2404_v1, 1  ;;  %v2411_v51 = vmax.f32 %v2409_v23, %v2410_v62  ;;  %v1048_v35 = vrot.slane %v689_v3, %v11854_v44  ;;  %v1055_v40 = vrot.slane %v1041_v58, %v11854_v44  ;;  %v12130_v62 = vpop.f32.mrb[26].mxu0 }
 0x161   :  { %v2418_v42 = vmax.f32 %v2416_v30, %v2417_v34  ;;  %v2424_v43 = vrot.slane %v2423_v57, 2  ;;  %v469_v48 = vadd.f32 %v12112_v45, %v11914_v25  ;;  %v480_v56 = vadd.f32 %v12112_v45, %v11917_v28 }
 0x162   :  { %v2406_v53 = vmax.f32 %v2404_v1, %v2405_v46  ;;  %v2412_v54 = vrot.slane %v2411_v51, 1  ;;  %v1056_v59 = vcombine.high %v1048_v35, %v1048_v35  ;;  %v1057_v33 = vcombine.high %v1055_v40, %v1055_v40 }
 0x163   :  { %v2419_v60 = vrot.slane %v2418_v42, 1  ;;  %v2425_v37 = vmax.f32 %v2423_v57, %v2424_v43  ;;  %v2540_v61 = vsel %vm2147_vm2, %v1048_v35, -inf  ;;  %v2554_v3 = vsel %vm2147_vm2, %v1055_v40, -inf }
 0x164   :  { %v2413_v8 = vmax.f32 %v2411_v51, %v2412_v54  ;;  %v4001_v50 = vsel %vm3940_vm3, %v2406_v53, -inf  ;;  %v2541_v0 = vrot.slane %v2540_v61, 4  ;;  %v2547_v2 = vsel %vm2147_vm2, %v1056_v59, -inf }
 0x165   :  { %v2420_v25 = vmax.f32 %v2418_v42, %v2419_v60  ;;  %v2426_v4 = vrot.slane %v2425_v37, 1  ;;  %v4003_v13 = vmax.f32 %v4001_v50, %v4002_v21  ;;  %v2548_v28 = vrot.slane %v2547_v2, 4 }
 0x166   :  { %v4004_v5 = vsel %vm3940_vm3, %v2413_v8, -inf  ;;  %v2542_v41 = vmax.f32 %v2540_v61, %v2541_v0  ;;  %v2555_v20 = vrot.slane %v2554_v3, 4  ;;  %v2561_v6 = vsel %vm2147_vm2, %v1057_v33, -inf }
 0x167   :  { %v2427_v18 = vmax.f32 %v2425_v37, %v2426_v4  ;;  %v4006_v9 = vmax.f32 %v4004_v5, %v4005_v63  ;;  %v4007_v11 = vsel %vm3940_vm3, %v2420_v25, -inf  ;;  %v4527_v15 = vsel %vm4509_vm7, %v4003_v13, %v12090_v49 }
 0x168   :  { %v4009_v16 = vmax.f32 %v4007_v11, %v4008_v31  ;;  %v2543_v17 = vrot.slane %v2542_v41, 2  ;;  %v2549_v19 = vmax.f32 %v2547_v2, %v2548_v28  ;;  %v2556_v22 = vmax.f32 %v2554_v3, %v2555_v20 }
 0x169   :  { %v4010_v21 = vsel %vm3940_vm3, %v2427_v18, -inf  ;;  %v4528_v23 = vsel %vm4511_vm8, %v4006_v9, %v4527_v15  ;;  %v2562_v26 = vrot.slane %v2561_v6, 4  ;;  %v687_v27 = vmax.f32 %v469_v48, 0.0 }
 0x16a   :  { %v4012_v30 = vmax.f32 %v4010_v21, %v4011_v39  ;;  %v4529_v47 = vsel %vm4513_vm9, %v4009_v16, %v4528_v23  ;;  %v2544_v1 = vmax.f32 %v2542_v41, %v2543_v17  ;;  %v2550_v63 = vrot.slane %v2549_v19, 2 }
 0x16b   :  { %v2557_v58 = vrot.slane %v2556_v22, 2  ;;  %v2563_v34 = vmax.f32 %v2561_v6, %v2562_v26  ;;  %v1007_v49 = vcombine.high %v687_v27, %v687_v27  ;;  %v1014_v31 = vrot.slane %v687_v27, %v11854_v44  ;;  %v12151_v26 = vpop.f32.mrb[27].mxu0 }
 0x16c   :  { %v4530_v57 = vsel %vm4515_vm10, %v4012_v30, %v4529_v47  ;;  %v2545_v46 = vrot.slane %v2544_v1, 1  ;;  %v2551_v51 = vmax.f32 %v2549_v19, %v2550_v63  ;;  %v690_v35 = vmax.f32 %v480_v56, 0.0 }
 0x16d   :  { %4641 = vst.msk [vmem:[#allocation2 + $0x31] sm:$0xff] %vm3940_vm3, %v4530_v57  ;;  %v2558_v40 = vmax.f32 %v2556_v22, %v2557_v58  ;;  %v2564_v39 = vrot.slane %v2563_v34, 2  ;;  %v1021_v42 = vrot.slane %v1007_v49, %v11854_v44  ;;  %v1022_v43 = vcombine.high %v1014_v31, %v1014_v31 }
 0x16e   :  { %v2546_v48 = vmax.f32 %v2544_v1, %v2545_v46  ;;  %v2552_v53 = vrot.slane %v2551_v51, 1  ;;  %v2484_v54 = vsel %vm2147_vm2, %v1014_v31, -inf  ;;  %v1058_v59 = vcombine.high %v690_v35, %v690_v35 }
 0x16f   :  { %v2559_v33 = vrot.slane %v2558_v40, 1  ;;  %v2565_v60 = vmax.f32 %v2563_v34, %v2564_v39  ;;  %v1023_v37 = vcombine.high %v1021_v42, %v1021_v42  ;;  %v2485_v61 = vrot.slane %v2484_v54, 4 }
 0x170   :  { %v2553_v3 = vmax.f32 %v2551_v51, %v2552_v53  ;;  %v12138_v8 = vsel %vm3940_vm3, %v2546_v48, -inf  ;;  %v2491_v56 = vsel %vm2147_vm2, %v1022_v43, -inf  ;;  %v2498_v50 = vsel %vm2147_vm2, %v1021_v42, -inf }
 0x171   :  { %v2560_v0 = vmax.f32 %v2558_v40, %v2559_v33  ;;  %v2566_v2 = vrot.slane %v2565_v60, 1  ;;  %v2486_v25 = vmax.f32 %v2484_v54, %v2485_v61  ;;  %v2492_v4 = vrot.slane %v2491_v56, 4 }
 0x172   :  { %v4017_v13 = vsel %vm3940_vm3, %v2553_v3, -inf  ;;  %v2499_v28 = vrot.slane %v2498_v50, 4  ;;  %v2505_v5 = vsel %vm2147_vm2, %v1023_v37, -inf  ;;  %v1065_v41 = vrot.slane %v690_v35, %v11854_v44 }
 0x173   :  { %v2567_v20 = vmax.f32 %v2565_v60, %v2566_v2  ;;  %v4020_v6 = vsel %vm3940_vm3, %v2560_v0, -inf  ;;  %v2487_v18 = vrot.slane %v2486_v25, 2  ;;  %v2493_v9 = vmax.f32 %v2491_v56, %v2492_v4 }
 0x174   :  { %v2500_v11 = vmax.f32 %v2498_v50, %v2499_v28  ;;  %v2506_v15 = vrot.slane %v2505_v5, 4  ;;  %v1072_v16 = vrot.slane %v1058_v59, %v11854_v44  ;;  %v1073_v17 = vcombine.high %v1065_v41, %v1065_v41  ;;  %v11444_v28 = vld [vmem:[%s15198_s3 + $0x20] sm:$0xff]  }
 0x175   :  { %v12148_v19 = vsel %vm3940_vm3, %v2567_v20, -inf  ;;  %v2488_v22 = vmax.f32 %v2486_v25, %v2487_v18  ;;  %v2494_v21 = vrot.slane %v2493_v9, 2  ;;  %v2568_v23 = vsel %vm2147_vm2, %v1065_v41, -inf  ;;  %10720 = vmatprep.subr.bf16.mxu1 %v11444_v28 }
 0x176   :  { %v2501_v27 = vrot.slane %v2500_v11, 2  ;;  %v2507_v30 = vmax.f32 %v2505_v5, %v2506_v15  ;;  %v1074_v47 = vcombine.high %v1072_v16, %v1072_v16  ;;  %v2569_v1 = vrot.slane %v2568_v23, 4  ;;  %10721 = vmatpush3.bf16.msra.mxu1 %v11444_v28 }
 0x177   :  { %v2489_v63 = vrot.slane %v2488_v22, 1  ;;  %v2495_v58 = vmax.f32 %v2493_v9, %v2494_v21  ;;  %v2575_v34 = vsel %vm2147_vm2, %v1073_v17, -inf  ;;  %v2582_v49 = vsel %vm2147_vm2, %v1072_v16, -inf }
 0x178   :  { %v2502_v31 = vmax.f32 %v2500_v11, %v2501_v27  ;;  %v2508_v57 = vrot.slane %v2507_v30, 2  ;;  %v2570_v46 = vmax.f32 %v2568_v23, %v2569_v1  ;;  %v2576_v51 = vrot.slane %v2575_v34, 4 }
 0x179   :  { %v2490_v35 = vmax.f32 %v2488_v22, %v2489_v63  ;;  %v2496_v40 = vrot.slane %v2495_v58, 1  ;;  %v2583_v39 = vrot.slane %v2582_v49, 4  ;;  %v2589_v42 = vsel %vm2147_vm2, %v1074_v47, -inf }
 0x17a   :  { %v2503_v43 = vrot.slane %v2502_v31, 1  ;;  %v2509_v48 = vmax.f32 %v2507_v30, %v2508_v57  ;;  %v2571_v53 = vrot.slane %v2570_v46, 2  ;;  %v2577_v54 = vmax.f32 %v2575_v34, %v2576_v51 }
 0x17b   :  { %v2497_v59 = vmax.f32 %v2495_v58, %v2496_v40  ;;  %v4013_v33 = vsel %vm3940_vm3, %v2490_v35, -inf  ;;  %v2584_v60 = vmax.f32 %v2582_v49, %v2583_v39  ;;  %v2590_v37 = vrot.slane %v2589_v42, 4 }
 0x17c   :  { %v2504_v61 = vmax.f32 %v2502_v31, %v2503_v43  ;;  %v2510_v3 = vrot.slane %v2509_v48, 1  ;;  %v4015_v56 = vmax.f32 %v4013_v33, %v12138_v8  ;;  %v2572_v50 = vmax.f32 %v2570_v46, %v2571_v53 }
 0x17d   :  { %v4016_v0 = vsel %vm3940_vm3, %v2497_v59, -inf  ;;  %v2578_v2 = vrot.slane %v2577_v54, 2  ;;  %v2585_v25 = vrot.slane %v2584_v60, 2  ;;  %v2591_v4 = vmax.f32 %v2589_v42, %v2590_v37 }
 0x17e   :  { %v2511_v5 = vmax.f32 %v2509_v48, %v2510_v3  ;;  %v4018_v41 = vmax.f32 %v4016_v0, %v4017_v13  ;;  %v4019_v20 = vsel %vm3940_vm3, %v2504_v61, -inf  ;;  %v2573_v18 = vrot.slane %v2572_v50, 1 }
 0x17f   :  { %v4021_v9 = vmax.f32 %v4019_v20, %v4020_v6  ;;  %v2579_v11 = vmax.f32 %v2577_v54, %v2578_v2  ;;  %v2586_v15 = vmax.f32 %v2584_v60, %v2585_v25  ;;  %v2592_v16 = vrot.slane %v2591_v4, 2 }
 0x180   :  { %v4022_v8 = vsel %vm3940_vm3, %v2511_v5, -inf  ;;  %v4531_v17 = vsel %vm4503_vm4, %v4018_v41, %v4015_v56  ;;  %v2574_v22 = vmax.f32 %v2572_v50, %v2573_v18  ;;  %v472_v21 = vadd.f32 %v12112_v45, %v11924_v32 }
 0x181   :  { %v4024_v23 = vmax.f32 %v4022_v8, %v12148_v19  ;;  %v4532_v13 = vsel %vm4505_vm5, %v4021_v9, %v4531_v17  ;;  %v2580_v27 = vrot.slane %v2579_v11, 1  ;;  %v2587_v30 = vrot.slane %v2586_v15, 1 }
 0x182   :  { %v2593_v6 = vmax.f32 %v2591_v4, %v2592_v16  ;;  %v12170_v47 = vsel %vm3940_vm3, %v2574_v22, -inf  ;;  %v688_v1 = vmax.f32 %v472_v21, 0.0  ;;  %v493_v63 = vadd.f32 %v12112_v45, %v11936_v12 }
 0x183   :  { %v2581_v58 = vmax.f32 %v2579_v11, %v2580_v27  ;;  %v2588_v34 = vmax.f32 %v2586_v15, %v2587_v30  ;;  %v12175_v49 = vsel %vm4507_vm6, %v4024_v23, %v4532_v13  ;;  %v485_v32 = vadd.f32 %v12112_v45, %v11938_v24 }
 0x184   :  { %v2594_v19 = vrot.slane %v2593_v6, 1  ;;  %v1024_v31 = vcombine.high %v688_v1, %v688_v1  ;;  %v1031_v57 = vrot.slane %v688_v1, %v11854_v44  ;;  %v693_v46 = vmax.f32 %v493_v63, 0.0 }
 0x185   :  { %v12181_v51 = vsel %vm3940_vm3, %v2581_v58, -inf  ;;  %v12184_v35 = vsel %vm3940_vm3, %v2588_v34, -inf  ;;  %v12186_v12 = vmax.f32 %v485_v32, 0.0  ;;  %v12190_v40 = vadd.f32 %v12112_v45, %v11972_v29 }
 0x186   :  { %v2595_v39 = vmax.f32 %v2593_v6, %v2594_v19  ;;  %v1038_v24 = vrot.slane %v1024_v31, %v11854_v44  ;;  %v1039_v42 = vcombine.high %v1031_v57, %v1031_v57  ;;  %v2512_v43 = vsel %vm2147_vm2, %v1031_v57, -inf }
 0x187   :  { %v2513_v48 = vrot.slane %v2512_v43, 4  ;;  %v1109_v53 = vcombine.high %v693_v46, %v693_v46  ;;  %v1116_v54 = vrot.slane %v693_v46, %v11854_v44  ;;  %v1075_v59 = vcombine.high %v12186_v12, %v12186_v12 }
 0x188   :  { %v12198_v33 = vsel %vm3940_vm3, %v2595_v39, -inf  ;;  %v1040_v60 = vcombine.high %v1038_v24, %v1038_v24  ;;  %v2519_v29 = vsel %vm2147_vm2, %v1039_v42, -inf  ;;  %v2526_v37 = vsel %vm2147_vm2, %v1038_v24, -inf }
 0x189   :  { %v2514_v61 = vmax.f32 %v2512_v43, %v2513_v48  ;;  %v2520_v3 = vrot.slane %v2519_v29, 4  ;;  %v2527_v56 = vrot.slane %v2526_v37, 4  ;;  %v1123_v50 = vrot.slane %v1109_v53, %v11854_v44 }
 0x18a   :  { %v2533_v0 = vsel %vm2147_vm2, %v1040_v60, -inf  ;;  %v1124_v2 = vcombine.high %v1116_v54, %v1116_v54  ;;  %v2652_v25 = vsel %vm2147_vm2, %v1116_v54, -inf  ;;  %v12207_v4 = vrot.slane %v12186_v12, %v11854_v44 }
 0x18b   :  { %v2515_v28 = vrot.slane %v2514_v61, 2  ;;  %v2521_v5 = vmax.f32 %v2519_v29, %v2520_v3  ;;  %v2528_v41 = vmax.f32 %v2526_v37, %v2527_v56  ;;  %v2534_v20 = vrot.slane %v2533_v0, 4 }
 0x18c   :  { %v1125_v18 = vcombine.high %v1123_v50, %v1123_v50  ;;  %v2653_v9 = vrot.slane %v2652_v25, 4  ;;  %v2659_v11 = vsel %vm2147_vm2, %v1124_v2, -inf  ;;  %v2666_v15 = vsel %vm2147_vm2, %v1123_v50, -inf }
 0x18d   :  { %v2516_v16 = vmax.f32 %v2514_v61, %v2515_v28  ;;  %v2522_v8 = vrot.slane %v2521_v5, 2  ;;  %v2529_v17 = vrot.slane %v2528_v41, 2  ;;  %v2535_v22 = vmax.f32 %v2533_v0, %v2534_v20 }
 0x18e   :  { %v2654_v21 = vmax.f32 %v2652_v25, %v2653_v9  ;;  %v2660_v23 = vrot.slane %v2659_v11, 4  ;;  %v2667_v13 = vrot.slane %v2666_v15, 4  ;;  %v2673_v27 = vsel %vm2147_vm2, %v1125_v18, -inf }
 0x18f   :  { %v2517_v30 = vrot.slane %v2516_v16, 1  ;;  %v2523_v6 = vmax.f32 %v2521_v5, %v2522_v8  ;;  %v2530_v1 = vmax.f32 %v2528_v41, %v2529_v17  ;;  %v2536_v63 = vrot.slane %v2535_v22, 2 }
 0x190   :  { %v2655_v58 = vrot.slane %v2654_v21, 2  ;;  %v2661_v34 = vmax.f32 %v2659_v11, %v2660_v23  ;;  %v2668_v32 = vmax.f32 %v2666_v15, %v2667_v13  ;;  %v2674_v19 = vrot.slane %v2673_v27, 4 }
 0x191   :  { %v2518_v31 = vmax.f32 %v2516_v16, %v2517_v30  ;;  %v2524_v57 = vrot.slane %v2523_v6, 1  ;;  %v2531_v46 = vrot.slane %v2530_v1, 1  ;;  %v2537_v39 = vmax.f32 %v2535_v22, %v2536_v63 }
 0x192   :  { %v2656_v24 = vmax.f32 %v2654_v21, %v2655_v58  ;;  %v2662_v42 = vrot.slane %v2661_v34, 2  ;;  %v2669_v43 = vrot.slane %v2668_v32, 2  ;;  %v2675_v48 = vmax.f32 %v2673_v27, %v2674_v19 }
 0x193   :  { %v2525_v53 = vmax.f32 %v2523_v6, %v2524_v57  ;;  %v2532_v54 = vmax.f32 %v2530_v1, %v2531_v46  ;;  %v2538_v60 = vrot.slane %v2537_v39, 1  ;;  %v4025_v29 = vsel %vm3940_vm3, %v2518_v31, -inf }
 0x194   :  { %v4027_v37 = vmax.f32 %v4025_v29, %v12170_v47  ;;  %v2657_v61 = vrot.slane %v2656_v24, 1  ;;  %v2663_v3 = vmax.f32 %v2661_v34, %v2662_v42  ;;  %v2670_v56 = vmax.f32 %v2668_v32, %v2669_v43 }
 0x195   :  { %v2539_v50 = vmax.f32 %v2537_v39, %v2538_v60  ;;  %v4028_v0 = vsel %vm3940_vm3, %v2525_v53, -inf  ;;  %v4031_v2 = vsel %vm3940_vm3, %v2532_v54, -inf  ;;  %v2676_v25 = vrot.slane %v2675_v48, 2 }
 0x196   :  { %v4030_v28 = vmax.f32 %v4028_v0, %v12181_v51  ;;  %v4033_v5 = vmax.f32 %v4031_v2, %v12184_v35  ;;  %v4534_v41 = vsel %vm4509_vm7, %v4027_v37, %v12175_v49  ;;  %v2658_v20 = vmax.f32 %v2656_v24, %v2657_v61 }
 0x197   :  { %v4034_v18 = vsel %vm3940_vm3, %v2539_v50, -inf  ;;  %v2664_v47 = vrot.slane %v2663_v3, 1  ;;  %v2671_v9 = vrot.slane %v2670_v56, 1  ;;  %v2677_v11 = vmax.f32 %v2675_v48, %v2676_v25 }
 0x198   :  { %v4036_v15 = vmax.f32 %v4034_v18, %v12198_v33  ;;  %v4535_v16 = vsel %vm4511_vm8, %v4030_v28, %v4534_v41  ;;  %v12224_v8 = vsel %vm3940_vm3, %v2658_v20, -inf  ;;  %v1089_v51 = vrot.slane %v1075_v59, %v11854_v44 }
 0x199   :  { %v4536_v49 = vsel %vm4513_vm9, %v4033_v5, %v4535_v16  ;;  %v2665_v35 = vmax.f32 %v2663_v3, %v2664_v47  ;;  %v2672_v17 = vmax.f32 %v2670_v56, %v2671_v9  ;;  %v2678_v22 = vrot.slane %v2677_v11, 1 }
 0x19a   :  { %v4537_v21 = vsel %vm4515_vm10, %v4036_v15, %v4536_v49  ;;  %v1090_v33 = vcombine.high %v12207_v4, %v12207_v4  ;;  %v1091_v23 = vcombine.high %v1089_v51, %v1089_v51  ;;  %v2596_v13 = vsel %vm2147_vm2, %v12207_v4, -inf }
 0x19b   :  { %4642 = vst.msk [vmem:[#allocation2 + $0x41] sm:$0xff] %vm3940_vm3, %v4537_v21  ;;  %v2679_v27 = vmax.f32 %v2677_v11, %v2678_v22  ;;  %v12238_v12 = vsel %vm3940_vm3, %v2665_v35, -inf  ;;  %v12241_v59 = vsel %vm3940_vm3, %v2672_v17, -inf  ;;  %v2597_v30 = vrot.slane %v2596_v13, 4 }
 0x19c   :  { %v2603_v6 = vsel %vm2147_vm2, %v1090_v33, -inf  ;;  %v2610_v1 = vsel %vm2147_vm2, %v1089_v51, -inf  ;;  %v2617_v63 = vsel %vm2147_vm2, %v1091_v23, -inf  ;;  %v694_v58 = vmax.f32 %v12190_v40, 0.0  ;;  %v12261_v23 = vpop.f32.mrb[28].mxu0 }
 0x19d   :  { %v12248_v4 = vsel %vm3940_vm3, %v2679_v27, -inf  ;;  %v2598_v34 = vmax.f32 %v2596_v13, %v2597_v30  ;;  %v2604_v32 = vrot.slane %v2603_v6, 4  ;;  %v2611_v19 = vrot.slane %v2610_v1, 4 }
 0x19e   :  { %v2618_v31 = vrot.slane %v2617_v63, 4  ;;  %v1126_v57 = vcombine.high %v694_v58, %v694_v58  ;;  %v1133_v46 = vrot.slane %v694_v58, %v11854_v44  ;;  %v488_v39 = vadd.f32 %v12112_v45, %v11980_v7 }
 0x19f   :  { %v2599_v24 = vrot.slane %v2598_v34, 2  ;;  %v2605_v42 = vmax.f32 %v2603_v6, %v2604_v32  ;;  %v2612_v43 = vmax.f32 %v2610_v1, %v2611_v19  ;;  %v509_v48 = vadd.f32 %v12112_v45, %v12012_v38 }
 0x1a0   :  { %v2619_v40 = vmax.f32 %v2617_v63, %v2618_v31  ;;  %v1140_v53 = vrot.slane %v1126_v57, %v11854_v44  ;;  %v1141_v54 = vcombine.high %v1133_v46, %v1133_v46  ;;  %v2680_v60 = vsel %vm2147_vm2, %v1133_v46, -inf }
 0x1a1   :  { %v2600_v29 = vmax.f32 %v2598_v34, %v2599_v24  ;;  %v2606_v37 = vrot.slane %v2605_v42, 2  ;;  %v2613_v61 = vrot.slane %v2612_v43, 2  ;;  %v2681_v3 = vrot.slane %v2680_v60, 4 }
 0x1a2   :  { %v2620_v56 = vrot.slane %v2619_v40, 2  ;;  %v1142_v50 = vcombine.high %v1140_v53, %v1140_v53  ;;  %v2687_v7 = vsel %vm2147_vm2, %v1141_v54, -inf  ;;  %v2694_v0 = vsel %vm2147_vm2, %v1140_v53, -inf }
 0x1a3   :  { %v2601_v2 = vrot.slane %v2600_v29, 1  ;;  %v2607_v25 = vmax.f32 %v2605_v42, %v2606_v37  ;;  %v2614_v28 = vmax.f32 %v2612_v43, %v2613_v61  ;;  %v2682_v38 = vmax.f32 %v2680_v60, %v2681_v3 }
 0x1a4   :  { %v2621_v5 = vmax.f32 %v2619_v40, %v2620_v56  ;;  %v2688_v41 = vrot.slane %v2687_v7, 4  ;;  %v2695_v20 = vrot.slane %v2694_v0, 4  ;;  %v2701_v18 = vsel %vm2147_vm2, %v1142_v50, -inf  ;;  %v12279_v56 = vpop.f32.mrb[29].mxu0 }
 0x1a5   :  { %v2602_v47 = vmax.f32 %v2600_v29, %v2601_v2  ;;  %v2608_v9 = vrot.slane %v2607_v25, 1  ;;  %v2615_v11 = vrot.slane %v2614_v28, 1  ;;  %v2683_v15 = vrot.slane %v2682_v38, 2  ;;  %v12285_v2 = vpop.f32.mrb[30].mxu0 }
 0x1a6   :  { %v2622_v16 = vrot.slane %v2621_v5, 1  ;;  %v2689_v51 = vmax.f32 %v2687_v7, %v2688_v41  ;;  %v2696_v49 = vmax.f32 %v2694_v0, %v2695_v20  ;;  %v2702_v35 = vrot.slane %v2701_v18, 4 }
 0x1a7   :  { %v2609_v17 = vmax.f32 %v2607_v25, %v2608_v9  ;;  %v2616_v22 = vmax.f32 %v2614_v28, %v2615_v11  ;;  %v4037_v21 = vsel %vm3940_vm3, %v2602_v47, -inf  ;;  %v2684_v33 = vmax.f32 %v2682_v38, %v2683_v15  ;;  %v12296_v9 = vpop.f32.mrb[31].mxu0 }
 0x1a8   :  { %v2623_v13 = vmax.f32 %v2621_v5, %v2622_v16  ;;  %v4039_v27 = vmax.f32 %v4037_v21, %v12224_v8  ;;  %v2690_v30 = vrot.slane %v2689_v51, 2  ;;  %v2697_v6 = vrot.slane %v2696_v49, 2 }
 0x1a9   :  { %v4040_v1 = vsel %vm3940_vm3, %v2609_v17, -inf  ;;  %v4043_v63 = vsel %vm3940_vm3, %v2616_v22, -inf  ;;  %v2685_v58 = vrot.slane %v2684_v33, 1  ;;  %v2703_v34 = vmax.f32 %v2701_v18, %v2702_v35 }
 0x1aa   :  { %v4042_v32 = vmax.f32 %v4040_v1, %v12238_v12  ;;  %v4045_v19 = vmax.f32 %v4043_v63, %v12241_v59  ;;  %v4046_v31 = vsel %vm3940_vm3, %v2623_v13, -inf  ;;  %v2691_v57 = vmax.f32 %v2689_v51, %v2690_v30 }
 0x1ab   :  { %v4048_v46 = vmax.f32 %v4046_v31, %v12248_v4  ;;  %v2686_v24 = vmax.f32 %v2684_v33, %v2685_v58  ;;  %v2698_v42 = vmax.f32 %v2696_v49, %v2697_v6  ;;  %v2704_v8 = vrot.slane %v2703_v34, 2 }
 0x1ac   :  { %v4538_v43 = vsel %vm4503_vm4, %v4042_v32, %v4039_v27  ;;  %v2692_v40 = vrot.slane %v2691_v57, 1  ;;  %v692_v53 = vmax.f32 %v488_v39, 0.0  ;;  %v697_v54 = vmax.f32 %v509_v48, 0.0  ;;  %v11445_v39 = vld [vmem:[%s15198_s3 + $0x28] sm:$0xff]  }
 0x1ad   :  { %v4539_v60 = vsel %vm4505_vm5, %v4045_v19, %v4538_v43  ;;  %v2699_v29 = vrot.slane %v2698_v42, 1  ;;  %v2705_v37 = vmax.f32 %v2703_v34, %v2704_v8  ;;  %v12273_v12 = vsel %vm3940_vm3, %v2686_v24, -inf  ;;  %10722 = vmatprep.subr.bf16.mxu1 %v11445_v39 }
 0x1ae   :  { %v2693_v59 = vmax.f32 %v2691_v57, %v2692_v40  ;;  %v1092_v61 = vcombine.high %v692_v53, %v692_v53  ;;  %v1099_v3 = vrot.slane %v692_v53, %v11854_v44  ;;  %v12277_v4 = vsel %vm4507_vm6, %v4048_v46, %v4539_v60  ;;  %10723 = vmatpush3.bf16.msra.mxu1 %v11445_v39 }
 0x1af   :  { %v2700_v48 = vmax.f32 %v2698_v42, %v2699_v29  ;;  %v2706_v50 = vrot.slane %v2705_v37, 1  ;;  %v1177_v7 = vcombine.high %v697_v54, %v697_v54  ;;  %v1184_v0 = vrot.slane %v697_v54, %v11854_v44 }
 0x1b0   :  { %v12288_v25 = vsel %vm3940_vm3, %v2693_v59, -inf  ;;  %v1106_v28 = vrot.slane %v1092_v61, %v11854_v44  ;;  %v1107_v38 = vcombine.high %v1099_v3, %v1099_v3  ;;  %v2624_v5 = vsel %vm2147_vm2, %v1099_v3, -inf }
 0x1b1   :  { %v2707_v41 = vmax.f32 %v2705_v37, %v2706_v50  ;;  %v12293_v20 = vsel %vm3940_vm3, %v2700_v48, -inf  ;;  %v2625_v18 = vrot.slane %v2624_v5, 4  ;;  %v1191_v47 = vrot.slane %v1177_v7, %v11854_v44  ;;  %v11446_v37 = vld [vmem:[%s15198_s3 + $0x30] sm:$0xff]  }
 0x1b2   :  { %v1108_v11 = vcombine.high %v1106_v28, %v1106_v28  ;;  %v2631_v15 = vsel %vm2147_vm2, %v1107_v38, -inf  ;;  %v2638_v16 = vsel %vm2147_vm2, %v1106_v28, -inf  ;;  %v1192_v51 = vcombine.high %v1184_v0, %v1184_v0  ;;  %10724 = vmatprep.subr.bf16.mxu1 %v11446_v37 }
 0x1b3   :  { %v12301_v49 = vsel %vm3940_vm3, %v2707_v41, -inf  ;;  %v2626_v35 = vmax.f32 %v2624_v5, %v2625_v18  ;;  %v2632_v17 = vrot.slane %v2631_v15, 4  ;;  %v2639_v22 = vrot.slane %v2638_v16, 4  ;;  %10725 = vmatpush3.bf16.msra.mxu1 %v11446_v37 }
 0x1b4   :  { %v2645_v21 = vsel %vm2147_vm2, %v1108_v11, -inf  ;;  %v1193_v33 = vcombine.high %v1191_v47, %v1191_v47  ;;  %v2764_v13 = vsel %vm2147_vm2, %v1184_v0, -inf  ;;  %v2771_v27 = vsel %vm2147_vm2, %v1192_v51, -inf }
 0x1b5   :  { %v2627_v30 = vrot.slane %v2626_v35, 2  ;;  %v2633_v6 = vmax.f32 %v2631_v15, %v2632_v17  ;;  %v2640_v1 = vmax.f32 %v2638_v16, %v2639_v22  ;;  %v2646_v63 = vrot.slane %v2645_v21, 4  ;;  %v12312_v16 = vpop.f32.mrb[32].mxu0 }
 0x1b6   :  { %v2765_v58 = vrot.slane %v2764_v13, 4  ;;  %v2772_v34 = vrot.slane %v2771_v27, 4  ;;  %v2778_v32 = vsel %vm2147_vm2, %v1191_v47, -inf  ;;  %v2785_v19 = vsel %vm2147_vm2, %v1193_v33, -inf }
 0x1b7   :  { %v2628_v31 = vmax.f32 %v2626_v35, %v2627_v30  ;;  %v2634_v57 = vrot.slane %v2633_v6, 2  ;;  %v2641_v46 = vrot.slane %v2640_v1, 2  ;;  %v2647_v24 = vmax.f32 %v2645_v21, %v2646_v63 }
 0x1b8   :  { %v2766_v42 = vmax.f32 %v2764_v13, %v2765_v58  ;;  %v2773_v8 = vmax.f32 %v2771_v27, %v2772_v34  ;;  %v2779_v43 = vrot.slane %v2778_v32, 4  ;;  %v2786_v40 = vrot.slane %v2785_v19, 4 }
 0x1b9   :  { %v2629_v53 = vrot.slane %v2628_v31, 1  ;;  %v2635_v54 = vmax.f32 %v2633_v6, %v2634_v57  ;;  %v2642_v60 = vmax.f32 %v2640_v1, %v2641_v46  ;;  %v2648_v29 = vrot.slane %v2647_v24, 2 }
 0x1ba   :  { %v2767_v59 = vrot.slane %v2766_v42, 2  ;;  %v2774_v61 = vrot.slane %v2773_v8, 2  ;;  %v2780_v3 = vmax.f32 %v2778_v32, %v2779_v43  ;;  %v2787_v39 = vmax.f32 %v2785_v19, %v2786_v40 }
 0x1bb   :  { %v2630_v48 = vmax.f32 %v2628_v31, %v2629_v53  ;;  %v2636_v50 = vrot.slane %v2635_v54, 1  ;;  %v2643_v7 = vrot.slane %v2642_v60, 1  ;;  %v2649_v0 = vmax.f32 %v2647_v24, %v2648_v29 }
 0x1bc   :  { %v2768_v28 = vmax.f32 %v2766_v42, %v2767_v59  ;;  %v2775_v38 = vmax.f32 %v2773_v8, %v2774_v61  ;;  %v2781_v5 = vrot.slane %v2780_v3, 2  ;;  %v2788_v41 = vrot.slane %v2787_v39, 2 }
 0x1bd   :  { %v2637_v18 = vmax.f32 %v2635_v54, %v2636_v50  ;;  %v2644_v47 = vmax.f32 %v2642_v60, %v2643_v7  ;;  %v2650_v11 = vrot.slane %v2649_v0, 1  ;;  %v4049_v15 = vsel %vm3940_vm3, %v2630_v48, -inf }
 0x1be   :  { %v4051_v51 = vmax.f32 %v4049_v15, %v12273_v12  ;;  %v2769_v35 = vrot.slane %v2768_v28, 1  ;;  %v2776_v17 = vrot.slane %v2775_v38, 1  ;;  %v2782_v22 = vmax.f32 %v2780_v3, %v2781_v5  ;;  %v12364_v3 = vpop.f32.mrb[33].mxu0 }
 0x1bf   :  { %v2651_v21 = vmax.f32 %v2649_v0, %v2650_v11  ;;  %v4052_v33 = vsel %vm3940_vm3, %v2637_v18, -inf  ;;  %v4055_v13 = vsel %vm3940_vm3, %v2644_v47, -inf  ;;  %v2789_v27 = vmax.f32 %v2787_v39, %v2788_v41 }
 0x1c0   :  { %v4054_v30 = vmax.f32 %v4052_v33, %v12288_v25  ;;  %v4057_v6 = vmax.f32 %v4055_v13, %v12293_v20  ;;  %v4541_v1 = vsel %vm4509_vm7, %v4051_v51, %v12277_v4  ;;  %v2770_v63 = vmax.f32 %v2768_v28, %v2769_v35 }
 0x1c1   :  { %v4058_v58 = vsel %vm3940_vm3, %v2651_v21, -inf  ;;  %v2777_v12 = vmax.f32 %v2775_v38, %v2776_v17  ;;  %v2783_v34 = vrot.slane %v2782_v22, 1  ;;  %v2790_v32 = vrot.slane %v2789_v27, 1 }
 0x1c2   :  { %v4060_v19 = vmax.f32 %v4058_v58, %v12301_v49  ;;  %v4542_v31 = vsel %vm4511_vm8, %v4054_v30, %v4541_v1  ;;  %v12325_v57 = vsel %vm3940_vm3, %v2770_v63, -inf  ;;  %v501_v25 = vadd.f32 %v12112_v45, %v12014_v52  ;;  %v12383_v63 = vpop.f32.mrb[34].mxu0 }
 0x1c3   :  { %v4543_v20 = vsel %vm4513_vm9, %v4057_v6, %v4542_v31  ;;  %v2784_v46 = vmax.f32 %v2782_v22, %v2783_v34  ;;  %v2791_v4 = vmax.f32 %v2789_v27, %v2790_v32  ;;  %v12331_v24 = vsel %vm3940_vm3, %v2777_v12, -inf }
 0x1c4   :  { %v4544_v42 = vsel %vm4515_vm10, %v4060_v19, %v4543_v20  ;;  %v695_v8 = vmax.f32 %v501_v25, 0.0  ;;  %v512_v49 = vadd.f32 %v12112_v45, %v12059_v14  ;;  %v504_v43 = vadd.f32 %v12112_v45, %v12062_v36 }
 0x1c5   :  { %4643 = vst.msk [vmem:[#allocation2 + $0x51] sm:$0xff] %vm3940_vm3, %v4544_v42  ;;  %v12340_v52 = vsel %vm3940_vm3, %v2784_v46, -inf  ;;  %v12343_v40 = vsel %vm3940_vm3, %v2791_v4, -inf  ;;  %v525_v53 = vadd.f32 %v12112_v45, %v12098_v10  ;;  %v517_v54 = vadd.f32 %v12112_v45, %v12102_v55 }
 0x1c6   :  { %v1143_v60 = vcombine.high %v695_v8, %v695_v8  ;;  %v1150_v14 = vrot.slane %v695_v8, %v11854_v44  ;;  %v698_v29 = vmax.f32 %v512_v49, 0.0  ;;  %v12350_v37 = vmax.f32 %v504_v43, 0.0 }
 0x1c7   :  { %v12352_v36 = vmax.f32 %v525_v53, 0.0  ;;  %v12354_v59 = vmax.f32 %v517_v54, 0.0  ;;  %v12358_v61 = vadd.f32 %v12112_v45, %v12130_v62  ;;  %v12362_v10 = vadd.f32 %v12112_v45, %v12151_v26 }
 0x1c8   :  { %v1157_v55 = vrot.slane %v1143_v60, %v11854_v44  ;;  %v1158_v39 = vcombine.high %v1150_v14, %v1150_v14  ;;  %v2708_v48 = vsel %vm2147_vm2, %v1150_v14, -inf  ;;  %v1194_v50 = vcombine.high %v698_v29, %v698_v29 }
 0x1c9   :  { %v2709_v7 = vrot.slane %v2708_v48, 4  ;;  %v1201_v0 = vrot.slane %v698_v29, %v11854_v44  ;;  %v1160_v28 = vcombine.high %v12350_v37, %v12350_v37  ;;  %v12373_v62 = vrot.slane %v12350_v37, %v11854_v44  ;;  %v12410_v37 = vpop.f32.mrb[35].mxu0 }
 0x1ca   :  { %v1159_v45 = vcombine.high %v1157_v55, %v1157_v55  ;;  %v2715_v26 = vsel %vm2147_vm2, %v1158_v39, -inf  ;;  %v2722_v38 = vsel %vm2147_vm2, %v1157_v55, -inf  ;;  %v1208_v5 = vrot.slane %v1194_v50, %v11854_v44 }
 0x1cb   :  { %v2710_v41 = vmax.f32 %v2708_v48, %v2709_v7  ;;  %v2716_v18 = vrot.slane %v2715_v26, 4  ;;  %v2723_v47 = vrot.slane %v2722_v38, 4  ;;  %v1209_v11 = vcombine.high %v1201_v0, %v1201_v0 }
 0x1cc   :  { %v2729_v15 = vsel %vm2147_vm2, %v1159_v45, -inf  ;;  %v1210_v51 = vcombine.high %v1208_v5, %v1208_v5  ;;  %v2792_v35 = vsel %vm2147_vm2, %v1201_v0, -inf  ;;  %v2806_v17 = vsel %vm2147_vm2, %v1208_v5, -inf }
 0x1cd   :  { %v2711_v22 = vrot.slane %v2710_v41, 2  ;;  %v2717_v21 = vmax.f32 %v2715_v26, %v2716_v18  ;;  %v2724_v33 = vmax.f32 %v2722_v38, %v2723_v47  ;;  %v2730_v13 = vrot.slane %v2729_v15, 4 }
 0x1ce   :  { %v2793_v27 = vrot.slane %v2792_v35, 4  ;;  %v2799_v30 = vsel %vm2147_vm2, %v1209_v11, -inf  ;;  %v2807_v6 = vrot.slane %v2806_v17, 4  ;;  %v2813_v1 = vsel %vm2147_vm2, %v1210_v51, -inf }
 0x1cf   :  { %v2712_v58 = vmax.f32 %v2710_v41, %v2711_v22  ;;  %v2718_v12 = vrot.slane %v2717_v21, 2  ;;  %v2725_v34 = vrot.slane %v2724_v33, 2  ;;  %v2731_v32 = vmax.f32 %v2729_v15, %v2730_v13  ;;  %v11447_v13 = vld [vmem:[%s15198_s3 + $0x38] sm:$0xff]  }
 0x1d0   :  { %v2794_v19 = vmax.f32 %v2792_v35, %v2793_v27  ;;  %v2800_v31 = vrot.slane %v2799_v30, 4  ;;  %v2808_v25 = vmax.f32 %v2806_v17, %v2807_v6  ;;  %v2814_v20 = vrot.slane %v2813_v1, 4  ;;  %10726 = vmatprep.subr.bf16.mxu1 %v11447_v13 }
 0x1d1   :  { %v2713_v46 = vrot.slane %v2712_v58, 1  ;;  %v2719_v4 = vmax.f32 %v2717_v21, %v2718_v12  ;;  %v2726_v42 = vmax.f32 %v2724_v33, %v2725_v34  ;;  %v2732_v8 = vrot.slane %v2731_v32, 2  ;;  %10727 = vmatpush3.bf16.msra.mxu1 %v11447_v13 }
 0x1d2   :  { %v2795_v49 = vrot.slane %v2794_v19, 2  ;;  %v2801_v43 = vmax.f32 %v2799_v30, %v2800_v31  ;;  %v2809_v53 = vrot.slane %v2808_v25, 2  ;;  %v2815_v54 = vmax.f32 %v2813_v1, %v2814_v20 }
 0x1d3   :  { %v2714_v60 = vmax.f32 %v2712_v58, %v2713_v46  ;;  %v2720_v14 = vrot.slane %v2719_v4, 1  ;;  %v2727_v29 = vrot.slane %v2726_v42, 1  ;;  %v2733_v55 = vmax.f32 %v2731_v32, %v2732_v8 }
 0x1d4   :  { %v2796_v39 = vmax.f32 %v2794_v19, %v2795_v49  ;;  %v2802_v48 = vrot.slane %v2801_v43, 2  ;;  %v2810_v50 = vmax.f32 %v2808_v25, %v2809_v53  ;;  %v2816_v7 = vrot.slane %v2815_v54, 2 }
 0x1d5   :  { %v2721_v0 = vmax.f32 %v2719_v4, %v2720_v14  ;;  %v2728_v45 = vmax.f32 %v2726_v42, %v2727_v29  ;;  %v2734_v26 = vrot.slane %v2733_v55, 1  ;;  %v4061_v38 = vsel %vm3940_vm3, %v2714_v60, -inf }
 0x1d6   :  { %v4063_v5 = vmax.f32 %v4061_v38, %v12325_v57  ;;  %v2797_v41 = vrot.slane %v2796_v39, 1  ;;  %v2803_v18 = vmax.f32 %v2801_v43, %v2802_v48  ;;  %v2811_v47 = vrot.slane %v2810_v50, 1 }
 0x1d7   :  { %v2735_v11 = vmax.f32 %v2733_v55, %v2734_v26  ;;  %v4064_v15 = vsel %vm3940_vm3, %v2721_v0, -inf  ;;  %v4067_v51 = vsel %vm3940_vm3, %v2728_v45, -inf  ;;  %v2817_v35 = vmax.f32 %v2815_v54, %v2816_v7 }
 0x1d8   :  { %v4066_v17 = vmax.f32 %v4064_v15, %v12331_v24  ;;  %v4069_v22 = vmax.f32 %v4067_v51, %v12340_v52  ;;  %v2798_v21 = vmax.f32 %v2796_v39, %v2797_v41  ;;  %v2804_v33 = vrot.slane %v2803_v18, 1 }
 0x1d9   :  { %v4070_v57 = vsel %vm3940_vm3, %v2735_v11, -inf  ;;  %v2812_v27 = vmax.f32 %v2810_v50, %v2811_v47  ;;  %v2818_v30 = vrot.slane %v2817_v35, 1  ;;  %v1174_v6 = vrot.slane %v1160_v28, %v11854_v44 }
 0x1da   :  { %v4072_v1 = vmax.f32 %v4070_v57, %v12343_v40  ;;  %v4545_v24 = vsel %vm4503_vm4, %v4066_v17, %v4063_v5  ;;  %v2805_v52 = vmax.f32 %v2803_v18, %v2804_v33  ;;  %v12402_v58 = vsel %vm3940_vm3, %v2798_v21, -inf }
 0x1db   :  { %v4546_v12 = vsel %vm4505_vm5, %v4069_v22, %v4545_v24  ;;  %v2819_v34 = vmax.f32 %v2817_v35, %v2818_v30  ;;  %v12406_v32 = vsel %vm3940_vm3, %v2812_v27, -inf  ;;  %v1175_v19 = vcombine.high %v12373_v62, %v12373_v62 }
 0x1dc   :  { %v12413_v40 = vsel %vm3940_vm3, %v2805_v52, -inf  ;;  %v1176_v28 = vcombine.high %v1174_v6, %v1174_v6  ;;  %v2736_v31 = vsel %vm2147_vm2, %v12373_v62, -inf  ;;  %v2750_v25 = vsel %vm2147_vm2, %v1174_v6, -inf }
 0x1dd   :  { %v12419_v20 = vsel %vm3940_vm3, %v2819_v34, -inf  ;;  %v2737_v46 = vrot.slane %v2736_v31, 4  ;;  %v2743_v4 = vsel %vm2147_vm2, %v1175_v19, -inf  ;;  %v2751_v42 = vrot.slane %v2750_v25, 4 }
 0x1de   :  { %v2744_v8 = vrot.slane %v2743_v4, 4  ;;  %v2757_v49 = vsel %vm2147_vm2, %v1176_v28, -inf  ;;  %v4547_v43 = vsel %vm4507_vm6, %v4072_v1, %v4546_v12  ;;  %v1245_v53 = vcombine.high %v12352_v36, %v12352_v36 }
 0x1df   :  { %v2738_v54 = vmax.f32 %v2736_v31, %v2737_v46  ;;  %v2752_v60 = vmax.f32 %v2750_v25, %v2751_v42  ;;  %v2758_v62 = vrot.slane %v2757_v49, 4  ;;  %v1252_v14 = vrot.slane %v12352_v36, %v11854_v44  ;;  %v12441_v42 = vpop.f32.mrb[36].mxu0 }
 0x1e0   :  { %v2745_v29 = vmax.f32 %v2743_v4, %v2744_v8  ;;  %v1259_v55 = vrot.slane %v1245_v53, %v11854_v44  ;;  %v1211_v39 = vcombine.high %v12354_v59, %v12354_v59  ;;  %v12433_v48 = vrot.slane %v12354_v59, %v11854_v44 }
 0x1e1   :  { %v2739_v50 = vrot.slane %v2738_v54, 2  ;;  %v2753_v7 = vrot.slane %v2752_v60, 2  ;;  %v2759_v0 = vmax.f32 %v2757_v49, %v2758_v62  ;;  %v1260_v45 = vcombine.high %v1252_v14, %v1252_v14 }
 0x1e2   :  { %v2746_v26 = vrot.slane %v2745_v29, 2  ;;  %v1261_v38 = vcombine.high %v1259_v55, %v1259_v55  ;;  %v2876_v5 = vsel %vm2147_vm2, %v1252_v14, -inf  ;;  %v2890_v36 = vsel %vm2147_vm2, %v1259_v55, -inf }
 0x1e3   :  { %v2740_v41 = vmax.f32 %v2738_v54, %v2739_v50  ;;  %v2754_v18 = vmax.f32 %v2752_v60, %v2753_v7  ;;  %v2760_v47 = vrot.slane %v2759_v0, 2  ;;  %v2877_v11 = vrot.slane %v2876_v5, 4 }
 0x1e4   :  { %v2747_v15 = vmax.f32 %v2745_v29, %v2746_v26  ;;  %v2883_v51 = vsel %vm2147_vm2, %v1260_v45, -inf  ;;  %v2891_v35 = vrot.slane %v2890_v36, 4  ;;  %v2897_v59 = vsel %vm2147_vm2, %v1261_v38, -inf }
 0x1e5   :  { %v2741_v17 = vrot.slane %v2740_v41, 1  ;;  %v2755_v22 = vrot.slane %v2754_v18, 1  ;;  %v2761_v21 = vmax.f32 %v2759_v0, %v2760_v47  ;;  %v2878_v33 = vmax.f32 %v2876_v5, %v2877_v11  ;;  %v12459_v47 = vpop.f32.mrb[37].mxu0 }
 0x1e6   :  { %v2748_v13 = vrot.slane %v2747_v15, 1  ;;  %v2884_v57 = vrot.slane %v2883_v51, 4  ;;  %v2892_v27 = vmax.f32 %v2890_v36, %v2891_v35  ;;  %v2898_v30 = vrot.slane %v2897_v59, 4 }
 0x1e7   :  { %v2742_v6 = vmax.f32 %v2740_v41, %v2741_v17  ;;  %v2756_v1 = vmax.f32 %v2754_v18, %v2755_v22  ;;  %v2762_v24 = vrot.slane %v2761_v21, 1  ;;  %v2879_v52 = vrot.slane %v2878_v33, 2 }
 0x1e8   :  { %v2749_v12 = vmax.f32 %v2747_v15, %v2748_v13  ;;  %v2885_v34 = vmax.f32 %v2883_v51, %v2884_v57  ;;  %v2893_v19 = vrot.slane %v2892_v27, 2  ;;  %v2899_v28 = vmax.f32 %v2897_v59, %v2898_v30 }
 0x1e9   :  { %v2763_v31 = vmax.f32 %v2761_v21, %v2762_v24  ;;  %v4073_v25 = vsel %vm3940_vm3, %v2742_v6, -inf  ;;  %v4079_v46 = vsel %vm3940_vm3, %v2756_v1, -inf  ;;  %v2880_v4 = vmax.f32 %v2878_v33, %v2879_v52 }
 0x1ea   :  { %v4075_v8 = vmax.f32 %v4073_v25, %v12402_v58  ;;  %v4076_v49 = vsel %vm3940_vm3, %v2749_v12, -inf  ;;  %v4081_v53 = vmax.f32 %v4079_v46, %v12406_v32  ;;  %v2886_v54 = vrot.slane %v2885_v34, 2 }
 0x1eb   :  { %v4078_v60 = vmax.f32 %v4076_v49, %v12413_v40  ;;  %v4082_v62 = vsel %vm3940_vm3, %v2763_v31, -inf  ;;  %v2881_v14 = vrot.slane %v2880_v4, 1  ;;  %v2894_v29 = vmax.f32 %v2892_v27, %v2893_v19 }
 0x1ec   :  { %v4084_v55 = vmax.f32 %v4082_v62, %v12419_v20  ;;  %v4548_v50 = vsel %vm4509_vm7, %v4075_v8, %v4547_v43  ;;  %v2887_v7 = vmax.f32 %v2885_v34, %v2886_v54  ;;  %v2900_v0 = vrot.slane %v2899_v28, 2 }
 0x1ed   :  { %v4549_v45 = vsel %vm4511_vm8, %v4078_v60, %v4548_v50  ;;  %v2882_v58 = vmax.f32 %v2880_v4, %v2881_v14  ;;  %v2895_v26 = vrot.slane %v2894_v29, 1  ;;  %v1225_v38 = vrot.slane %v1211_v39, %v11854_v44 }
 0x1ee   :  { %v4550_v32 = vsel %vm4513_vm9, %v4081_v53, %v4549_v45  ;;  %v2888_v5 = vrot.slane %v2887_v7, 1  ;;  %v2901_v40 = vmax.f32 %v2899_v28, %v2900_v0  ;;  %v1226_v36 = vcombine.high %v12433_v48, %v12433_v48 }
 0x1ef   :  { %v4551_v41 = vsel %vm4515_vm10, %v4084_v55, %v4550_v32  ;;  %v2896_v20 = vmax.f32 %v2894_v29, %v2895_v26  ;;  %v12457_v43 = vsel %vm3940_vm3, %v2882_v58, -inf  ;;  %v1227_v18 = vcombine.high %v1225_v38, %v1225_v38 }
 0x1f0   :  { %4644 = vst.msk [vmem:[#allocation2 + $0x61] sm:$0xff] %vm3940_vm3, %v4551_v41  ;;  %v2889_v11 = vmax.f32 %v2887_v7, %v2888_v5  ;;  %v2902_v39 = vrot.slane %v2901_v40, 1  ;;  %v2820_v15 = vsel %vm2147_vm2, %v12433_v48, -inf  ;;  %v2827_v51 = vsel %vm2147_vm2, %v1226_v36, -inf }
 0x1f1   :  { %v12466_v35 = vsel %vm3940_vm3, %v2896_v20, -inf  ;;  %v2821_v59 = vrot.slane %v2820_v15, 4  ;;  %v2828_v17 = vrot.slane %v2827_v51, 4  ;;  %v2834_v22 = vsel %vm2147_vm2, %v1225_v38, -inf }
 0x1f2   :  { %v2903_v21 = vmax.f32 %v2901_v40, %v2902_v39  ;;  %v12470_v33 = vsel %vm3940_vm3, %v2889_v11, -inf  ;;  %v2835_v13 = vrot.slane %v2834_v22, 4  ;;  %v2841_v57 = vsel %vm2147_vm2, %v1227_v18, -inf  ;;  %v12503_v11 = vpop.f32.mrb[38].mxu0 }
 0x1f3   :  { %v2822_v27 = vmax.f32 %v2820_v15, %v2821_v59  ;;  %v2829_v30 = vmax.f32 %v2827_v51, %v2828_v17  ;;  %v2842_v6 = vrot.slane %v2841_v57, 4  ;;  %v702_v48 = vmax.f32 %v12358_v61, 0.0 }
 0x1f4   :  { %v12475_v1 = vsel %vm3940_vm3, %v2903_v21, -inf  ;;  %v2836_v24 = vmax.f32 %v2834_v22, %v2835_v13  ;;  %v700_v52 = vmax.f32 %v12362_v10, 0.0  ;;  %v15205_v31 = vmov 0.0  }
 0x1f5   :  { %v2823_v12 = vrot.slane %v2822_v27, 2  ;;  %v2830_v34 = vrot.slane %v2829_v30, 2  ;;  %v2843_v19 = vmax.f32 %v2841_v57, %v2842_v6  ;;  %v1262_v28 = vcombine.high %v702_v48, %v702_v48  ;;  %4325 = vst.msk [vmem:[#allocation2] sm:$0xff] %vm3940_vm3, %v15205_v31  ;;  %4327 = vst.msk [vmem:[#allocation2 + $0xa0] sm:$0xff] %vm3940_vm3, %v15205_v31  ;;  %10936 = vmatprep.subr.bf16.mxu0 %v15205_v31 }
 0x1f6   :  { %4326 = vst.msk [vmem:[#allocation2 + $0x8] sm:$0x3] %vm2147_vm2, %v15205_v31  ;;  %4328 = vst.msk [vmem:[#allocation2 + $0xa8] sm:$0x3] %vm2147_vm2, %v15205_v31  ;;  %v2837_v61 = vrot.slane %v2836_v24, 2  ;;  %v1269_v10 = vrot.slane %v702_v48, %v11854_v44  ;;  %v1228_v25 = vcombine.high %v700_v52, %v700_v52  ;;  %v1235_v46 = vrot.slane %v700_v52, %v11854_v44 }
 0x1f7   :  { %4330 = vst.msk [vmem:[#allocation2 + $0x90] sm:$0xff] %vm3940_vm3, %v15205_v31  ;;  %4332 = vst.msk [vmem:[#allocation2 + $0x130] sm:$0xff] %vm3940_vm3, %v15205_v31  ;;  %v2824_v4 = vmax.f32 %v2822_v27, %v2823_v12  ;;  %v2831_v8 = vmax.f32 %v2829_v30, %v2830_v34  ;;  %v2844_v49 = vrot.slane %v2843_v19, 2  ;;  %v1276_v53 = vrot.slane %v1262_v28, %v11854_v44 }
 0x1f8   :  { %4331 = vst.msk [vmem:[#allocation2 + $0x98] sm:$0x3] %vm2147_vm2, %v15205_v31  ;;  %4333 = vst.msk [vmem:[#allocation2 + $0x138] sm:$0x3] %vm2147_vm2, %v15205_v31  ;;  %v2838_v54 = vmax.f32 %v2836_v24, %v2837_v61  ;;  %v1277_v60 = vcombine.high %v1269_v10, %v1269_v10  ;;  %v2904_v62 = vsel %vm2147_vm2, %v1269_v10, -inf  ;;  %v1242_v14 = vrot.slane %v1228_v25, %v11854_v44 }
 0x1f9   :  { %v2825_v29 = vrot.slane %v2824_v4, 1  ;;  %v2832_v55 = vrot.slane %v2831_v8, 1  ;;  %v2845_v50 = vmax.f32 %v2843_v19, %v2844_v49  ;;  %v1278_v7 = vcombine.high %v1276_v53, %v1276_v53  ;;  %4335 = vst.msk [vmem:[#allocation2] sm:$0x1] %vm4334_vm11, %v15205_v31  ;;  %4336 = vst.msk [vmem:[#allocation2 + $0x10] sm:$0x1] %vm4334_vm11, %v15205_v31 }
 0x1fa   :  { %v2839_v0 = vrot.slane %v2838_v54, 1  ;;  %v2905_v45 = vrot.slane %v2904_v62, 4  ;;  %v2911_v58 = vsel %vm2147_vm2, %v1277_v60, -inf  ;;  %v2918_v26 = vsel %vm2147_vm2, %v1276_v53, -inf  ;;  %4337 = vst.msk [vmem:[#allocation2 + $0x20] sm:$0x1] %vm4334_vm11, %v15205_v31 }
 0x1fb   :  { %v2826_v38 = vmax.f32 %v2824_v4, %v2825_v29  ;;  %v2833_v32 = vmax.f32 %v2831_v8, %v2832_v55  ;;  %v2846_v5 = vrot.slane %v2845_v50, 1  ;;  %v2912_v40 = vrot.slane %v2911_v58, 4  ;;  %4338 = vst.msk [vmem:[#allocation2 + $0x30] sm:$0x1] %vm4334_vm11, %v15205_v31  ;;  %4339 = vst.msk [vmem:[#allocation2 + $0x40] sm:$0x1] %vm4334_vm11, %v15205_v31 }
 0x1fc   :  { %v2840_v36 = vmax.f32 %v2838_v54, %v2839_v0  ;;  %v2906_v41 = vmax.f32 %v2904_v62, %v2905_v45  ;;  %v2919_v20 = vrot.slane %v2918_v26, 4  ;;  %v2925_v18 = vsel %vm2147_vm2, %v1278_v7, -inf  ;;  %4355 = vst.msk [vmem:[#allocation2 + $0x9] sm:$0x1] %vm4334_vm11, %v15205_v31  ;;  %4356 = vst.msk [vmem:[#allocation2 + $0x19] sm:$0x1] %vm4334_vm11, %v15205_v31 }
 0x1fd   :  { %v2847_v39 = vmax.f32 %v2845_v50, %v2846_v5  ;;  %v4085_v15 = vsel %vm3940_vm3, %v2826_v38, -inf  ;;  %v4088_v51 = vsel %vm3940_vm3, %v2833_v32, -inf  ;;  %v2913_v59 = vmax.f32 %v2911_v58, %v2912_v40  ;;  %4357 = vst.msk [vmem:[#allocation2 + $0x29] sm:$0x1] %vm4334_vm11, %v15205_v31  ;;  %4358 = vst.msk [vmem:[#allocation2 + $0x39] sm:$0x1] %vm4334_vm11, %v15205_v31 }
 0x1fe   :  { %v4087_v17 = vmax.f32 %v4085_v15, %v12457_v43  ;;  %v4090_v22 = vmax.f32 %v4088_v51, %v12470_v33  ;;  %v4091_v21 = vsel %vm3940_vm3, %v2840_v36, -inf  ;;  %v2907_v13 = vrot.slane %v2906_v41, 2  ;;  %4359 = vst.msk [vmem:[#allocation2 + $0x49] sm:$0x1] %vm4334_vm11, %v15205_v31  ;;  %4340 = vst.msk [vmem:[#allocation2 + $0x50] sm:$0x1] %vm4334_vm11, %v15205_v31 }
 0x1ff   :  { %v4093_v57 = vmax.f32 %v4091_v21, %v12466_v35  ;;  %v4094_v27 = vsel %vm3940_vm3, %v2847_v39, -inf  ;;  %v2914_v30 = vrot.slane %v2913_v59, 2  ;;  %v2920_v6 = vmax.f32 %v2918_v26, %v2919_v20  ;;  %v12516_v35 = vpop.f32.mrb[39].mxu0  ;;  %4341 = vst.msk [vmem:[#allocation2 + $0x60] sm:$0x1] %vm4334_vm11, %v15205_v31 }
 0x200   :  { %v4096_v48 = vmax.f32 %v4094_v27, %v12475_v1  ;;  %v4552_v24 = vsel %vm4503_vm4, %v4090_v22, %v4087_v17  ;;  %v2908_v52 = vmax.f32 %v2906_v41, %v2907_v13  ;;  %v2926_v12 = vrot.slane %v2925_v18, 4  ;;  %4342 = vst.msk [vmem:[#allocation2 + $0x70] sm:$0x1] %vm4334_vm11, %v15205_v31  ;;  %4343 = vst.msk [vmem:[#allocation2 + $0x80] sm:$0x1] %vm4334_vm11, %v15205_v31 }
 0x201   :  { %v4553_v34 = vsel %vm4505_vm5, %v4093_v57, %v4552_v24  ;;  %v2915_v43 = vmax.f32 %v2913_v59, %v2914_v30  ;;  %v2921_v19 = vrot.slane %v2920_v6, 2  ;;  %v1243_v33 = vcombine.high %v1235_v46, %v1235_v46  ;;  %4346 = vst.msk [vmem:[#allocation2 + $0xb0] sm:$0x1] %vm4334_vm11, %v15205_v31  ;;  %4347 = vst.msk [vmem:[#allocation2 + $0xc0] sm:$0x1] %vm4334_vm11, %v15205_v31 }
 0x202   :  { %v2927_v28 = vmax.f32 %v2925_v18, %v2926_v12  ;;  %v1244_v61 = vcombine.high %v1242_v14, %v1242_v14  ;;  %v2848_v10 = vsel %vm2147_vm2, %v1235_v46, -inf  ;;  %v2862_v53 = vsel %vm2147_vm2, %v1242_v14, -inf  ;;  %4348 = vst.msk [vmem:[#allocation2 + $0xd0] sm:$0x1] %vm4334_vm11, %v15205_v31  ;;  %4349 = vst.msk [vmem:[#allocation2 + $0xe0] sm:$0x1] %vm4334_vm11, %v15205_v31 }
 0x203   :  { %v2922_v25 = vmax.f32 %v2920_v6, %v2921_v19  ;;  %v2849_v4 = vrot.slane %v2848_v10, 4  ;;  %v2855_v8 = vsel %vm2147_vm2, %v1243_v33, -inf  ;;  %v2909_v54 = vrot.slane %v2908_v52, 1  ;;  %4350 = vst.msk [vmem:[#allocation2 + $0xf0] sm:$0x1] %vm4334_vm11, %v15205_v31 }
 0x204   :  { %v2928_v1 = vrot.slane %v2927_v28, 2  ;;  %v2856_v49 = vrot.slane %v2855_v8, 4  ;;  %v2916_v60 = vrot.slane %v2915_v43, 1  ;;  %v2863_v29 = vrot.slane %v2862_v53, 4  ;;  %4351 = vst.msk [vmem:[#allocation2 + $0x100] sm:$0x1] %vm4334_vm11, %v15205_v31 }
 0x205   :  { %v2850_v62 = vmax.f32 %v2848_v10, %v2849_v4  ;;  %v2923_v55 = vrot.slane %v2922_v25, 1  ;;  %v2869_v0 = vsel %vm2147_vm2, %v1244_v61, -inf  ;;  %v12522_v32 = vsel %vm4507_vm6, %v4096_v48, %v4553_v34  ;;  %4352 = vst.msk [vmem:[#allocation2 + $0x110] sm:$0x1] %vm4334_vm11, %v15205_v31  ;;  %4353 = vst.msk [vmem:[#allocation2 + $0x120] sm:$0x1] %vm4334_vm11, %v15205_v31 }
 0x206   :  { %v2929_v50 = vmax.f32 %v2927_v28, %v2928_v1  ;;  %v2857_v7 = vmax.f32 %v2855_v8, %v2856_v49  ;;  %v2864_v45 = vmax.f32 %v2862_v53, %v2863_v29  ;;  %v2870_v38 = vrot.slane %v2869_v0, 4  ;;  %4360 = vst.msk [vmem:[#allocation2 + $0x59] sm:$0x1] %vm4334_vm11, %v15205_v31  ;;  %4361 = vst.msk [vmem:[#allocation2 + $0x69] sm:$0x1] %vm4334_vm11, %v15205_v31  ;;  %v4657_v8 = vld [vmem:[#allocation2 + $0x10] sm:$0xff] }
 0x207   :  { %v2851_v46 = vrot.slane %v2850_v62, 2  ;;  %v2910_v5 = vmax.f32 %v2908_v52, %v2909_v54  ;;  %v2917_v36 = vmax.f32 %v2915_v43, %v2916_v60  ;;  %v2924_v41 = vmax.f32 %v2922_v25, %v2923_v55  ;;  %4362 = vst.msk [vmem:[#allocation2 + $0x79] sm:$0x1] %vm4334_vm11, %v15205_v31  ;;  %4363 = vst.msk [vmem:[#allocation2 + $0x89] sm:$0x1] %vm4334_vm11, %v15205_v31  ;;  %v4655_v25 = vld [vmem:[#allocation2] sm:$0xff] }
 0x208   :  { %v2930_v58 = vrot.slane %v2929_v50, 1  ;;  %v2858_v26 = vrot.slane %v2857_v7, 2  ;;  %v2865_v14 = vrot.slane %v2864_v45, 2  ;;  %v2871_v18 = vmax.f32 %v2869_v0, %v2870_v38  ;;  %4366 = vst.msk [vmem:[#allocation2 + $0xb9] sm:$0x1] %vm4334_vm11, %v15205_v31 }
 0x209   :  { %v2852_v40 = vmax.f32 %v2850_v62, %v2851_v46  ;;  %4367 = vst.msk [vmem:[#allocation2 + $0xc9] sm:$0x1] %vm4334_vm11, %v15205_v31  ;;  %4368 = vst.msk [vmem:[#allocation2 + $0xd9] sm:$0x1] %vm4334_vm11, %v15205_v31  ;;  %v4098_v22 = vsel %vm3940_vm3, %v2910_v5, -inf  ;;  %v4101_v30 = vsel %vm3940_vm3, %v2917_v36, -inf  ;;  %v12634_v55 = vpack.c.bf16 %v4655_v25, %v4655_v25 }
 0x20a   :  { %v2859_v20 = vmax.f32 %v2857_v7, %v2858_v26  ;;  %4369 = vst.msk [vmem:[#allocation2 + $0xe9] sm:$0x1] %vm4334_vm11, %v15205_v31  ;;  %4370 = vst.msk [vmem:[#allocation2 + $0xf9] sm:$0x1] %vm4334_vm11, %v15205_v31  ;;  %v2931_v39 = vmax.f32 %v2929_v50, %v2930_v58  ;;  %v2866_v51 = vmax.f32 %v2864_v45, %v2865_v14  ;;  %v2872_v17 = vrot.slane %v2871_v18, 2  ;;  %v4659_v62 = vld [vmem:[#allocation2 + $0x20] sm:$0xff] }
 0x20b   :  { %4371 = vst.msk [vmem:[#allocation2 + $0x109] sm:$0x1] %vm4334_vm11, %v15205_v31  ;;  %4372 = vst.msk [vmem:[#allocation2 + $0x119] sm:$0x1] %vm4334_vm11, %v15205_v31  ;;  %v2853_v15 = vrot.slane %v2852_v40, 1  ;;  %v4104_v6 = vsel %vm3940_vm3, %v2924_v41, -inf }
 0x20c   :  { %4373 = vst.msk [vmem:[#allocation2 + $0x129] sm:$0x1] %vm4334_vm11, %v15205_v31  ;;  %4344 = vst.msk [vmem:[#allocation2 + $0x90] sm:$0x1] %vm4334_vm11, %v15205_v31  ;;  %v2860_v59 = vrot.slane %v2859_v20, 1  ;;  %v2867_v13 = vrot.slane %v2866_v51, 1  ;;  %v2873_v24 = vmax.f32 %v2871_v18, %v2872_v17 }
 0x20d   :  { %4345 = vst.msk [vmem:[#allocation2 + $0xa0] sm:$0x1] %vm4334_vm11, %v15205_v31  ;;  %4354 = vst.msk [vmem:[#allocation2 + $0x130] sm:$0x1] %vm4334_vm11, %v15205_v31  ;;  %v2854_v21 = vmax.f32 %v2852_v40, %v2853_v15  ;;  %v12608_v57 = vld [vmem:[%s15197_s2] ss:$0 sm:$0xff] }
 0x20e   :  { %4364 = vst.msk [vmem:[#allocation2 + $0x99] sm:$0x1] %vm4334_vm11, %v15205_v31  ;;  %4365 = vst.msk [vmem:[#allocation2 + $0xa9] sm:$0x1] %vm4334_vm11, %v15205_v31  ;;  %v541_v27 = vadd.f32 %v12608_v57, %v12261_v23  ;;  %v2861_v48 = vmax.f32 %v2859_v20, %v2860_v59  ;;  %v4107_v52 = vsel %vm3940_vm3, %v2931_v39, -inf  ;;  %v2868_v12 = vmax.f32 %v2866_v51, %v2867_v13  ;;  %v4661_v7 = vld [vmem:[#allocation2 + $0x30] sm:$0xff] }
 0x20f   :  { %4374 = vst.msk [vmem:[#allocation2 + $0x139] sm:$0x1] %vm4334_vm11, %v15205_v31  ;;  %v4097_v34 = vsel %vm3940_vm3, %v2854_v21, -inf  ;;  %v2874_v19 = vrot.slane %v2873_v24, 1  ;;  %v12621_v23 = vadd.f32 %v12608_v57, %v12279_v56  ;;  %v4656_v4 = vld [vmem:[#allocation2 + $0x8] sm:$0x3]  ;;  %v12626_v1 = vadd.f32 %v12608_v57, %v12285_v2  ;;  %vm12707_vm11 = vmor %vm5361_vm14, %vm5362_vm15 }
 0x210   :  { %v12616_v43 = vmax.f32 %v541_v27, 0.0  ;;  %v4099_v33 = vmax.f32 %v4097_v34, %v4098_v22  ;;  %v4100_v28 = vsel %vm3940_vm3, %v2861_v48, -inf  ;;  %v4103_v10 = vsel %vm3940_vm3, %v2868_v12, -inf  ;;  %v4658_v60 = vld [vmem:[#allocation2 + $0x18] sm:$0x3]  ;;  %v4663_v26 = vld [vmem:[#allocation2 + $0x40] sm:$0xff] }
 0x211   :  { %v4102_v61 = vmax.f32 %v4100_v28, %v4101_v30  ;;  %v12630_v49 = vadd.f32 %v12608_v57, %v12296_v9  ;;  %v2875_v53 = vmax.f32 %v2873_v24, %v2874_v19  ;;  %v4105_v54 = vmax.f32 %v4103_v10, %v4104_v6  ;;  %v4660_v29 = vld [vmem:[#allocation2 + $0x28] sm:$0x3]  ;;  %v4662_v0 = vld [vmem:[#allocation2 + $0x38] sm:$0x3]  ;;  %v12671_v6 = vpop.f32.mrb[40].mxu0 }
 0x212   :  { %v4555_v56 = vsel %vm4509_vm7, %v4099_v33, %v12522_v32  ;;  %v12637_v2 = vpack.c.bf16 %v4657_v8, %v4657_v8  ;;  %v1313_v9 = vcombine.high %v12616_v43, %v12616_v43  ;;  %v12643_v46 = vrot.slane %v12616_v43, %v11854_v44  ;;  %v4664_v40 = vld [vmem:[#allocation2 + $0x48] sm:$0x3]  ;;  %v12675_v34 = vpop.f32.mrb[41].mxu0 }
 0x213   :  { %v4556_v50 = vsel %vm4511_vm8, %v4102_v61, %v4555_v56  ;;  %v4106_v45 = vsel %vm3940_vm3, %v2875_v53, -inf  ;;  %v12647_v38 = vpack.c.bf16 %v4656_v4, %v4656_v4  ;;  %v12649_v32 = vpack.c.bf16 %v4659_v62, %v4659_v62 }
 0x214   :  { %v4557_v58 = vsel %vm4513_vm9, %v4105_v54, %v4556_v50  ;;  %v4108_v5 = vmax.f32 %v4106_v45, %v4107_v52  ;;  %v12651_v14 = vpack.c.bf16 %v4658_v60, %v4658_v60  ;;  %v12653_v36 = vpack.c.bf16 %v4660_v29, %v4660_v29 }
 0x215   :  { %v12655_v41 = vpack.c.bf16 %v4661_v7, %v4661_v7  ;;  %v12657_v20 = vpack.c.bf16 %v4662_v0, %v4662_v0  ;;  %v4807_v18 = vshrl.u32 %v12634_v55, 16  ;;  %v4810_v39 = vshll.u32 %v12634_v55, 16 }
 0x216   :  { %v4816_v15 = vshll.u32 %v12647_v38, 16  ;;  %v4558_v51 = vsel %vm4515_vm10, %v4108_v5, %v4557_v58  ;;  %v12663_v59 = vpack.c.bf16 %v4663_v26, %v4663_v26  ;;  %v4821_v17 = vshrl.u32 %v12637_v2, 16 }
 0x217   :  { %v4824_v22 = vshll.u32 %v12637_v2, 16  ;;  %4645 = vst.msk [vmem:[#allocation2 + $0x71] sm:$0xff] %vm3940_vm3, %v4558_v51  ;;  %v12668_v21 = vpack.c.bf16 %v4664_v40, %v4664_v40  ;;  %v4809_v13 = vrot.slane %v4807_v18, 4  ;;  %v4812_v27 = vrot.slane %v4810_v39, 5 }
 0x218   :  { %v4835_v30 = vshrl.u32 %v12649_v32, 16  ;;  %v4823_v48 = vrot.slane %v4821_v17, 4  ;;  %v4830_v52 = vshll.u32 %v12651_v14, 16  ;;  %v4838_v12 = vshll.u32 %v12649_v32, 16 }
 0x219   :  { %v4826_v24 = vrot.slane %v4824_v22, 5  ;;  %v4813_v19 = vor.u32 %v4812_v27, %v4809_v13  ;;  %v4818_v33 = vrot.slane %v4816_v15, 5  ;;  %v4849_v61 = vshrl.u32 %v12655_v41, 16 }
 0x21a   :  { %v4837_v28 = vrot.slane %v4835_v30, 4  ;;  %v4840_v4 = vrot.slane %v4838_v12, 5  ;;  %v4844_v8 = vshll.u32 %v12653_v36, 16  ;;  %v4852_v53 = vshll.u32 %v12655_v41, 16 }
 0x21b   :  { %v4827_v25 = vor.u32 %v4826_v24, %v4823_v48  ;;  %v4814_v54 = vrot.slane %v4813_v19, 4  ;;  %v4851_v56 = vrot.slane %v4849_v61, 4  ;;  %v4858_v60 = vshll.u32 %v12657_v20, 16  ;;  %v11487_v19 = vld [vmem:[%s15200_s5 + $0x70] sm:$0xff]  }
 0x21c   :  { %v4863_v62 = vshrl.u32 %v12663_v59, 16  ;;  %v4832_v50 = vrot.slane %v4830_v52, 5  ;;  %v4841_v7 = vor.u32 %v4840_v4, %v4837_v28  ;;  %v4854_v0 = vrot.slane %v4852_v53, 5 }
 0x21d   :  { %v4828_v29 = vrot.slane %v4827_v25, 4  ;;  %v4819_v45 = vsel %vm12680_vm0, %v4814_v54, %v4818_v33  ;;  %v4866_v26 = vshll.u32 %v12663_v59, 16  ;;  %v4872_v5 = vshll.u32 %v12668_v21, 16 }
 0x21e   :  { %v4865_v58 = vrot.slane %v4863_v62, 4  ;;  %v4842_v18 = vrot.slane %v4841_v7, 4  ;;  %v4846_v39 = vrot.slane %v4844_v8, 5  ;;  %v4855_v15 = vor.u32 %v4854_v0, %v4851_v56 }
 0x21f   :  { %v12694_v40 = vsel %vm12680_vm0, %v4828_v29, %v4832_v50  ;;  %v4860_v51 = vrot.slane %v4858_v60, 5  ;;  %v4868_v17 = vrot.slane %v4866_v26, 5  ;;  %v703_v13 = vmax.f32 %v12621_v23, 0.0 }
 0x220   :  { %15224 = vst [vmem:[#allocation6_spill] sm:$0xff] %v12694_v40  ;;  %v9671_v22 = vcombine.low %v4819_v45, %v12694_v40  ;;  %v12700_v27 = vsel %vm12680_vm0, %v4842_v18, %v4846_v39  ;;  %v4856_v30 = vrot.slane %v4855_v15, 4  ;;  %v9713_v48 = vrot.slane %v12649_v32, 9  ;;  %v12745_v39 = vpop.f32.mrb[42].mxu0 }
 0x221   :  { %15225 = vst [vmem:[#allocation7_spill] sm:$0xff] %v12700_v27  ;;  %v5374_v24 = vrot.slane %v12653_v36, 5  ;;  %v4869_v52 = vor.u32 %v4868_v17, %v4865_v58  ;;  %v4874_v12 = vrot.slane %v4872_v5, 5  ;;  %v1327_v32 = vrot.slane %v1313_v9, %v11854_v44 }
 0x222   :  { %10728 = vmatprep.mubr.msk.bf16.mxu1 %vm3940_vm3, %v9671_v22  ;;  %v12719_v36 = vsel %vm12680_vm0, %v4856_v30, %v4860_v51  ;;  %v1328_v28 = vcombine.high %v12643_v46, %v12643_v46  ;;  %v2988_v61 = vsel %vm2147_vm2, %v12643_v46, -inf  ;;  %v1279_v54 = vcombine.high %v703_v13, %v703_v13 }
 0x223   :  { %15228 = vst [vmem:[#allocation8_spill] sm:$0xff] %v12719_v36  ;;  %v12723_v33 = vsel %vm12707_vm11, %v9713_v48, %v5374_v24  ;;  %v4870_v25 = vrot.slane %v4869_v52, 4  ;;  %v12731_v4 = vcombine.low %v12700_v27, %v12719_v36  ;;  %v1329_v43 = vcombine.high %v1327_v32, %v1327_v32 }
 0x224   :  { %v2989_v9 = vrot.slane %v2988_v61, 4  ;;  %v2995_v8 = vsel %vm2147_vm2, %v1328_v28, -inf  ;;  %v3002_v53 = vsel %vm2147_vm2, %v1327_v32, -inf  ;;  %v1286_v56 = vrot.slane %v703_v13, %v11854_v44 }
 0x225   :  { %15229 = vst [vmem:[#allocation9_spill] sm:$0xff] %v12731_v4  ;;  %v2996_v62 = vrot.slane %v2995_v8, 4  ;;  %v3003_v29 = vrot.slane %v3002_v53, 4  ;;  %v706_v50 = vmax.f32 %v12626_v1, 0.0  ;;  %10729 = vmatmul.mubr.msk.bf16.vlgmr.msra.gmra.mrb[0].mxu1 %vm3940_vm3, %v12731_v4  ;;  %v12741_v46 = vsel %vm12680_vm0, %v4870_v25, %v4874_v12 }
 0x226   :  { %v2990_v60 = vmax.f32 %v2988_v61, %v2989_v9  ;;  %15230 = vst [vmem:[#allocation10_spill] sm:$0xff] %v12741_v46  ;;  %v3009_v7 = vsel %vm2147_vm2, %v1329_v43, -inf  ;;  %v1293_v0 = vrot.slane %v1279_v54, %v11854_v44  ;;  %v1294_v45 = vcombine.high %v1286_v56, %v1286_v56 }
 0x227   :  { %v2997_v26 = vmax.f32 %v2995_v8, %v2996_v62  ;;  %v3004_v5 = vmax.f32 %v3002_v53, %v3003_v29  ;;  %v3010_v18 = vrot.slane %v3009_v7, 4  ;;  %v2932_v1 = vsel %vm2147_vm2, %v1286_v56, -inf }
 0x228   :  { %v2991_v58 = vrot.slane %v2990_v60, 2  ;;  %v1295_v15 = vcombine.high %v1293_v0, %v1293_v0  ;;  %v2939_v51 = vsel %vm2147_vm2, %v1294_v45, -inf  ;;  %v2946_v17 = vsel %vm2147_vm2, %v1293_v0, -inf }
 0x229   :  { %v2998_v13 = vrot.slane %v2997_v26, 2  ;;  %v3005_v30 = vrot.slane %v3004_v5, 2  ;;  %v3011_v48 = vmax.f32 %v3009_v7, %v3010_v18  ;;  %v2933_v24 = vrot.slane %v2932_v1, 4  ;;  %v12751_v18 = vpop.f32.mrb[43].mxu0 }
 0x22a   :  { %v2992_v22 = vmax.f32 %v2990_v60, %v2991_v58  ;;  %v2940_v52 = vrot.slane %v2939_v51, 4  ;;  %v2947_v12 = vrot.slane %v2946_v17, 4  ;;  %v2953_v32 = vsel %vm2147_vm2, %v1295_v15, -inf }
 0x22b   :  { %v2999_v61 = vmax.f32 %v2997_v26, %v2998_v13  ;;  %v3006_v25 = vmax.f32 %v3004_v5, %v3005_v30  ;;  %v3012_v43 = vrot.slane %v3011_v48, 2  ;;  %v2934_v9 = vmax.f32 %v2932_v1, %v2933_v24 }
 0x22c   :  { %v2993_v28 = vrot.slane %v2992_v22, 1  ;;  %v2941_v8 = vmax.f32 %v2939_v51, %v2940_v52  ;;  %v2948_v53 = vmax.f32 %v2946_v17, %v2947_v12  ;;  %v2954_v54 = vrot.slane %v2953_v32, 4 }
 0x22d   :  { %v3000_v62 = vrot.slane %v2999_v61, 1  ;;  %v3007_v29 = vrot.slane %v3006_v25, 1  ;;  %v3013_v60 = vmax.f32 %v3011_v48, %v3012_v43  ;;  %v2935_v0 = vrot.slane %v2934_v9, 2 }
 0x22e   :  { %v2994_v56 = vmax.f32 %v2992_v22, %v2993_v28  ;;  %v2942_v45 = vrot.slane %v2941_v8, 2  ;;  %v2949_v7 = vrot.slane %v2948_v53, 2  ;;  %v2955_v58 = vmax.f32 %v2953_v32, %v2954_v54 }
 0x22f   :  { %v3001_v31 = vmax.f32 %v2999_v61, %v3000_v62  ;;  %v3008_v15 = vmax.f32 %v3006_v25, %v3007_v29  ;;  %v3014_v23 = vrot.slane %v3013_v60, 1  ;;  %v2936_v5 = vmax.f32 %v2934_v9, %v2935_v0 }
 0x230   :  { %v4110_v26 = vsel %vm3940_vm3, %v2994_v56, -inf  ;;  %v2943_v1 = vmax.f32 %v2941_v8, %v2942_v45  ;;  %v2950_v51 = vmax.f32 %v2948_v53, %v2949_v7  ;;  %v2956_v17 = vrot.slane %v2955_v58, 2 }
 0x231   :  { %v3015_v13 = vmax.f32 %v3013_v60, %v3014_v23  ;;  %v4113_v22 = vsel %vm3940_vm3, %v3001_v31, -inf  ;;  %v4116_v30 = vsel %vm3940_vm3, %v3008_v15, -inf  ;;  %v1330_v48 = vcombine.high %v706_v50, %v706_v50 }
 0x232   :  { %v2937_v24 = vrot.slane %v2936_v5, 1  ;;  %v2944_v52 = vrot.slane %v2943_v1, 1  ;;  %v2951_v12 = vrot.slane %v2950_v51, 1  ;;  %v2957_v32 = vmax.f32 %v2955_v58, %v2956_v17 }
 0x233   :  { %v4119_v28 = vsel %vm3940_vm3, %v3015_v13, -inf  ;;  %v1337_v61 = vrot.slane %v706_v50, %v11854_v44  ;;  %v1344_v25 = vrot.slane %v1330_v48, %v11854_v44  ;;  %v704_v43 = vmax.f32 %v12630_v49, 0.0 }
 0x234   :  { %v2938_v9 = vmax.f32 %v2936_v5, %v2937_v24  ;;  %v2945_v8 = vmax.f32 %v2943_v1, %v2944_v52  ;;  %v2952_v23 = vmax.f32 %v2950_v51, %v2951_v12  ;;  %v2958_v53 = vrot.slane %v2957_v32, 1 }
 0x235   :  { %v1345_v31 = vcombine.high %v1337_v61, %v1337_v61  ;;  %v1346_v54 = vcombine.high %v1344_v25, %v1344_v25  ;;  %v3016_v56 = vsel %vm2147_vm2, %v1337_v61, -inf  ;;  %v3030_v62 = vsel %vm2147_vm2, %v1344_v25, -inf }
 0x236   :  { %v2959_v29 = vmax.f32 %v2957_v32, %v2958_v53  ;;  %v4109_v60 = vsel %vm3940_vm3, %v2938_v9, -inf  ;;  %v4112_v0 = vsel %vm3940_vm3, %v2945_v8, -inf  ;;  %v4115_v50 = vsel %vm3940_vm3, %v2952_v23, -inf }
 0x237   :  { %v4111_v45 = vmax.f32 %v4109_v60, %v4110_v26  ;;  %v4114_v7 = vmax.f32 %v4112_v0, %v4113_v22  ;;  %v4117_v49 = vmax.f32 %v4115_v50, %v4116_v30  ;;  %v3017_v58 = vrot.slane %v3016_v56, 4 }
 0x238   :  { %v4118_v15 = vsel %vm3940_vm3, %v2959_v29, -inf  ;;  %v3023_v5 = vsel %vm2147_vm2, %v1345_v31, -inf  ;;  %v3031_v1 = vrot.slane %v3030_v62, 4  ;;  %v3037_v51 = vsel %vm2147_vm2, %v1346_v54, -inf }
 0x239   :  { %v4120_v17 = vmax.f32 %v4118_v15, %v4119_v28  ;;  %v4559_v13 = vsel %vm4503_vm4, %v4114_v7, %v4111_v45  ;;  %v3018_v48 = vmax.f32 %v3016_v56, %v3017_v58  ;;  %v3024_v24 = vrot.slane %v3023_v5, 4 }
 0x23a   :  { %v4560_v52 = vsel %vm4505_vm5, %v4117_v49, %v4559_v13  ;;  %v3032_v12 = vmax.f32 %v3030_v62, %v3031_v1  ;;  %v3038_v32 = vrot.slane %v3037_v51, 4  ;;  %v1296_v26 = vcombine.high %v704_v43, %v704_v43 }
 0x23b   :  { %v3019_v22 = vrot.slane %v3018_v48, 2  ;;  %v3025_v30 = vmax.f32 %v3023_v5, %v3024_v24  ;;  %v1303_v61 = vrot.slane %v704_v43, %v11854_v44  ;;  %v12772_v25 = vsel %vm4507_vm6, %v4120_v17, %v4560_v52 }
 0x23c   :  { %v3033_v9 = vrot.slane %v3032_v12, 2  ;;  %v3039_v8 = vmax.f32 %v3037_v51, %v3038_v32  ;;  %v1310_v28 = vrot.slane %v1296_v26, %v11854_v44  ;;  %v557_v23 = vadd.f32 %v12608_v57, %v12312_v16 }
 0x23d   :  { %v3020_v53 = vmax.f32 %v3018_v48, %v3019_v22  ;;  %v3026_v31 = vrot.slane %v3025_v30, 2  ;;  %v1311_v54 = vcombine.high %v1303_v61, %v1303_v61  ;;  %v2960_v56 = vsel %vm2147_vm2, %v1303_v61, -inf }
 0x23e   :  { %v3034_v62 = vmax.f32 %v3032_v12, %v3033_v9  ;;  %v3040_v29 = vrot.slane %v3039_v8, 2  ;;  %v1312_v60 = vcombine.high %v1310_v28, %v1310_v28  ;;  %v2961_v0 = vrot.slane %v2960_v56, 4 }
 0x23f   :  { %v3021_v43 = vrot.slane %v3020_v53, 1  ;;  %v3027_v50 = vmax.f32 %v3025_v30, %v3026_v31  ;;  %v2967_v45 = vsel %vm2147_vm2, %v1311_v54, -inf  ;;  %v2974_v7 = vsel %vm2147_vm2, %v1310_v28, -inf }
 0x240   :  { %v3035_v49 = vrot.slane %v3034_v62, 1  ;;  %v3041_v58 = vmax.f32 %v3039_v8, %v3040_v29  ;;  %v2962_v15 = vmax.f32 %v2960_v56, %v2961_v0  ;;  %v2968_v5 = vrot.slane %v2967_v45, 4 }
 0x241   :  { %v3022_v16 = vmax.f32 %v3020_v53, %v3021_v43  ;;  %v3028_v1 = vrot.slane %v3027_v50, 1  ;;  %v2975_v51 = vrot.slane %v2974_v7, 4  ;;  %v2981_v17 = vsel %vm2147_vm2, %v1312_v60, -inf }
 0x242   :  { %v3036_v13 = vmax.f32 %v3034_v62, %v3035_v49  ;;  %v3042_v48 = vrot.slane %v3041_v58, 1  ;;  %v2963_v24 = vrot.slane %v2962_v15, 2  ;;  %v2969_v52 = vmax.f32 %v2967_v45, %v2968_v5 }
 0x243   :  { %v3029_v12 = vmax.f32 %v3027_v50, %v3028_v1  ;;  %v4122_v32 = vsel %vm3940_vm3, %v3022_v16, -inf  ;;  %v2976_v26 = vmax.f32 %v2974_v7, %v2975_v51  ;;  %v2982_v22 = vrot.slane %v2981_v17, 4 }
 0x244   :  { %v3043_v30 = vmax.f32 %v3041_v58, %v3042_v48  ;;  %v4128_v61 = vsel %vm3940_vm3, %v3036_v13, -inf  ;;  %v2964_v9 = vmax.f32 %v2962_v15, %v2963_v24  ;;  %v2970_v8 = vrot.slane %v2969_v52, 2 }
 0x245   :  { %v4125_v28 = vsel %vm3940_vm3, %v3029_v12, -inf  ;;  %v2977_v53 = vrot.slane %v2976_v26, 2  ;;  %v2983_v31 = vmax.f32 %v2981_v17, %v2982_v22  ;;  %v709_v54 = vmax.f32 %v557_v23, 0.0 }
 0x246   :  { %v4131_v56 = vsel %vm3940_vm3, %v3043_v30, -inf  ;;  %v2965_v62 = vrot.slane %v2964_v9, 1  ;;  %v2971_v29 = vmax.f32 %v2969_v52, %v2970_v8  ;;  %v549_v60 = vadd.f32 %v12608_v57, %v12364_v3 }
 0x247   :  { %v2978_v0 = vmax.f32 %v2976_v26, %v2977_v53  ;;  %v2984_v43 = vrot.slane %v2983_v31, 2  ;;  %v1381_v50 = vcombine.high %v709_v54, %v709_v54  ;;  %v1388_v45 = vrot.slane %v709_v54, %v11854_v44 }
 0x248   :  { %v2966_v7 = vmax.f32 %v2964_v9, %v2965_v62  ;;  %v2972_v49 = vrot.slane %v2971_v29, 1  ;;  %v707_v58 = vmax.f32 %v549_v60, 0.0  ;;  %v12790_v15 = vadd.f32 %v12608_v57, %v12383_v63 }
 0x249   :  { %v2979_v23 = vrot.slane %v2978_v0, 1  ;;  %v2985_v5 = vmax.f32 %v2983_v31, %v2984_v43  ;;  %v1395_v16 = vrot.slane %v1381_v50, %v11854_v44  ;;  %v1396_v1 = vcombine.high %v1388_v45, %v1388_v45 }
 0x24a   :  { %v2973_v51 = vmax.f32 %v2971_v29, %v2972_v49  ;;  %v4121_v3 = vsel %vm3940_vm3, %v2966_v7, -inf  ;;  %v3100_v17 = vsel %vm2147_vm2, %v1388_v45, -inf  ;;  %v1347_v13 = vcombine.high %v707_v58, %v707_v58 }
 0x24b   :  { %v2980_v48 = vmax.f32 %v2978_v0, %v2979_v23  ;;  %v2986_v24 = vrot.slane %v2985_v5, 1  ;;  %v4123_v52 = vmax.f32 %v4121_v3, %v4122_v32  ;;  %v1397_v12 = vcombine.high %v1395_v16, %v1395_v16 }
 0x24c   :  { %v4124_v26 = vsel %vm3940_vm3, %v2973_v51, -inf  ;;  %v3101_v22 = vrot.slane %v3100_v17, 4  ;;  %v3107_v63 = vsel %vm2147_vm2, %v1396_v1, -inf  ;;  %v3114_v30 = vsel %vm2147_vm2, %v1395_v16, -inf }
 0x24d   :  { %v2987_v9 = vmax.f32 %v2985_v5, %v2986_v24  ;;  %v4126_v8 = vmax.f32 %v4124_v26, %v4125_v28  ;;  %v4127_v53 = vsel %vm3940_vm3, %v2980_v48, -inf  ;;  %v4562_v31 = vsel %vm4509_vm7, %v4123_v52, %v12772_v25 }
 0x24e   :  { %v4129_v54 = vmax.f32 %v4127_v53, %v4128_v61  ;;  %v3102_v62 = vmax.f32 %v3100_v17, %v3101_v22  ;;  %v3108_v29 = vrot.slane %v3107_v63, 4  ;;  %v3115_v60 = vrot.slane %v3114_v30, 4 }
 0x24f   :  { %v4130_v32 = vsel %vm3940_vm3, %v2987_v9, -inf  ;;  %v4563_v0 = vsel %vm4511_vm8, %v4126_v8, %v4562_v31  ;;  %v3121_v43 = vsel %vm2147_vm2, %v1397_v12, -inf  ;;  %v1354_v50 = vrot.slane %v707_v58, %v11854_v44 }
 0x250   :  { %v4132_v45 = vmax.f32 %v4130_v32, %v4131_v56  ;;  %v4564_v28 = vsel %vm4513_vm9, %v4129_v54, %v4563_v0  ;;  %v3103_v7 = vrot.slane %v3102_v62, 2  ;;  %v3109_v49 = vmax.f32 %v3107_v63, %v3108_v29 }
 0x251   :  { %v3116_v23 = vmax.f32 %v3114_v30, %v3115_v60  ;;  %v3122_v5 = vrot.slane %v3121_v43, 4  ;;  %v1361_v25 = vrot.slane %v1347_v13, %v11854_v44  ;;  %v1362_v61 = vcombine.high %v1354_v50, %v1354_v50  ;;  %v12812_v13 = vpop.f32.mrb[44].mxu0 }
 0x252   :  { %v4565_v16 = vsel %vm4515_vm10, %v4132_v45, %v4564_v28  ;;  %v3104_v1 = vmax.f32 %v3102_v62, %v3103_v7  ;;  %v3110_v51 = vrot.slane %v3109_v49, 2  ;;  %v3044_v3 = vsel %vm2147_vm2, %v1354_v50, -inf  ;;  %v12814_v8 = vpop.f32.mrb[45].mxu0 }
 0x253   :  { %4646 = vst.msk [vmem:[#allocation2 + $0x81] sm:$0xff] %vm3940_vm3, %v4565_v16  ;;  %v3117_v17 = vrot.slane %v3116_v23, 2  ;;  %v3123_v58 = vmax.f32 %v3121_v43, %v3122_v5  ;;  %v1363_v56 = vcombine.high %v1361_v25, %v1361_v25  ;;  %v3045_v48 = vrot.slane %v3044_v3, 4  ;;  %v12817_v29 = vpop.f32.mrb[46].mxu0 }
 0x254   :  { %v3105_v24 = vrot.slane %v3104_v1, 1  ;;  %v3111_v52 = vmax.f32 %v3109_v49, %v3110_v51  ;;  %v3051_v12 = vsel %vm2147_vm2, %v1362_v61, -inf  ;;  %v3058_v26 = vsel %vm2147_vm2, %v1361_v25, -inf }
 0x255   :  { %v3118_v22 = vmax.f32 %v3116_v23, %v3117_v17  ;;  %v3124_v63 = vrot.slane %v3123_v58, 2  ;;  %v3046_v30 = vmax.f32 %v3044_v3, %v3045_v48  ;;  %v3052_v9 = vrot.slane %v3051_v12, 4 }
 0x256   :  { %v3106_v53 = vmax.f32 %v3104_v1, %v3105_v24  ;;  %v3112_v31 = vrot.slane %v3111_v52, 1  ;;  %v3059_v54 = vrot.slane %v3058_v26, 4  ;;  %v3065_v62 = vsel %vm2147_vm2, %v1363_v56, -inf }
 0x257   :  { %v3119_v60 = vrot.slane %v3118_v22, 1  ;;  %v3125_v32 = vmax.f32 %v3123_v58, %v3124_v63  ;;  %v3047_v0 = vrot.slane %v3046_v30, 2  ;;  %v3053_v43 = vmax.f32 %v3051_v12, %v3052_v9  ;;  %v12827_v9 = vpop.f32.mrb[47].mxu0 }
 0x258   :  { %v3113_v50 = vmax.f32 %v3111_v52, %v3112_v31  ;;  %v4134_v45 = vsel %vm3940_vm3, %v3106_v53, -inf  ;;  %v3060_v28 = vmax.f32 %v3058_v26, %v3059_v54  ;;  %v3066_v7 = vrot.slane %v3065_v62, 4 }
 0x259   :  { %v3120_v49 = vmax.f32 %v3118_v22, %v3119_v60  ;;  %v3126_v23 = vrot.slane %v3125_v32, 1  ;;  %v3048_v5 = vmax.f32 %v3046_v30, %v3047_v0  ;;  %v3054_v25 = vrot.slane %v3053_v43, 2 }
 0x25a   :  { %v4137_v61 = vsel %vm3940_vm3, %v3113_v50, -inf  ;;  %v3061_v16 = vrot.slane %v3060_v28, 2  ;;  %v3067_v1 = vmax.f32 %v3065_v62, %v3066_v7  ;;  %v710_v51 = vmax.f32 %v12790_v15, 0.0 }
 0x25b   :  { %v3127_v3 = vmax.f32 %v3125_v32, %v3126_v23  ;;  %v4140_v17 = vsel %vm3940_vm3, %v3120_v49, -inf  ;;  %v3049_v58 = vrot.slane %v3048_v5, 1  ;;  %v3055_v56 = vmax.f32 %v3053_v43, %v3054_v25 }
 0x25c   :  { %v3062_v48 = vmax.f32 %v3060_v28, %v3061_v16  ;;  %v3068_v24 = vrot.slane %v3067_v1, 2  ;;  %v1398_v52 = vcombine.high %v710_v51, %v710_v51  ;;  %v1405_v12 = vrot.slane %v710_v51, %v11854_v44 }
 0x25d   :  { %v4143_v26 = vsel %vm3940_vm3, %v3127_v3, -inf  ;;  %v3050_v22 = vmax.f32 %v3048_v5, %v3049_v58  ;;  %v3056_v63 = vrot.slane %v3055_v56, 1  ;;  %v552_v30 = vadd.f32 %v12608_v57, %v12410_v37 }
 0x25e   :  { %v3063_v15 = vrot.slane %v3062_v48, 1  ;;  %v3069_v53 = vmax.f32 %v3067_v1, %v3068_v24  ;;  %v1412_v31 = vrot.slane %v1398_v52, %v11854_v44  ;;  %v1413_v54 = vcombine.high %v1405_v12, %v1405_v12 }
 0x25f   :  { %v3057_v62 = vmax.f32 %v3055_v56, %v3056_v63  ;;  %v4133_v60 = vsel %vm3940_vm3, %v3050_v22, -inf  ;;  %v3128_v32 = vsel %vm2147_vm2, %v1405_v12, -inf  ;;  %v708_v0 = vmax.f32 %v552_v30, 0.0 }
 0x260   :  { %v3064_v43 = vmax.f32 %v3062_v48, %v3063_v15  ;;  %v3070_v50 = vrot.slane %v3069_v53, 1  ;;  %v4135_v28 = vmax.f32 %v4133_v60, %v4134_v45  ;;  %v1414_v7 = vcombine.high %v1412_v31, %v1412_v31 }
 0x261   :  { %v4136_v49 = vsel %vm3940_vm3, %v3057_v62, -inf  ;;  %v3129_v37 = vrot.slane %v3128_v32, 4  ;;  %v3135_v23 = vsel %vm2147_vm2, %v1413_v54, -inf  ;;  %v3142_v5 = vsel %vm2147_vm2, %v1412_v31, -inf }
 0x262   :  { %v3071_v25 = vmax.f32 %v3069_v53, %v3070_v50  ;;  %v4138_v16 = vmax.f32 %v4136_v49, %v4137_v61  ;;  %v4139_v1 = vsel %vm3940_vm3, %v3064_v43, -inf  ;;  %v3136_v51 = vrot.slane %v3135_v23, 4 }
 0x263   :  { %v4141_v3 = vmax.f32 %v4139_v1, %v4140_v17  ;;  %v3130_v58 = vmax.f32 %v3128_v32, %v3129_v37  ;;  %v3143_v56 = vrot.slane %v3142_v5, 4  ;;  %v3149_v48 = vsel %vm2147_vm2, %v1414_v7, -inf }
 0x264   :  { %v4142_v45 = vsel %vm3940_vm3, %v3071_v25, -inf  ;;  %v4566_v24 = vsel %vm4503_vm4, %v4138_v16, %v4135_v28  ;;  %v3137_v52 = vmax.f32 %v3135_v23, %v3136_v51  ;;  %v3150_v12 = vrot.slane %v3149_v48, 4 }
 0x265   :  { %v4144_v22 = vmax.f32 %v4142_v45, %v4143_v26  ;;  %v4567_v63 = vsel %vm4505_vm5, %v4141_v3, %v4566_v24  ;;  %v3131_v30 = vrot.slane %v3130_v58, 2  ;;  %v3144_v15 = vmax.f32 %v3142_v5, %v3143_v56 }
 0x266   :  { %v3138_v61 = vrot.slane %v3137_v52, 2  ;;  %v3151_v53 = vmax.f32 %v3149_v48, %v3150_v12  ;;  %v1364_v31 = vcombine.high %v708_v0, %v708_v0  ;;  %v1371_v17 = vrot.slane %v708_v0, %v11854_v44 }
 0x267   :  { %v3132_v54 = vmax.f32 %v3130_v58, %v3131_v30  ;;  %v3145_v62 = vrot.slane %v3144_v15, 2  ;;  %v12842_v60 = vsel %vm4507_vm6, %v4144_v22, %v4567_v63  ;;  %v573_v32 = vadd.f32 %v12608_v57, %v12441_v42  ;;  %v12850_v58 = vpop.f32.mrb[48].mxu0 }
 0x268   :  { %v3139_v43 = vmax.f32 %v3137_v52, %v3138_v61  ;;  %v3152_v50 = vrot.slane %v3151_v53, 2  ;;  %v1378_v26 = vrot.slane %v1364_v31, %v11854_v44  ;;  %v1379_v28 = vcombine.high %v1371_v17, %v1371_v17 }
 0x269   :  { %v3133_v7 = vrot.slane %v3132_v54, 1  ;;  %v3146_v49 = vmax.f32 %v3144_v15, %v3145_v62  ;;  %v3072_v37 = vsel %vm2147_vm2, %v1371_v17, -inf  ;;  %v713_v23 = vmax.f32 %v573_v32, 0.0 }
 0x26a   :  { %v3140_v5 = vrot.slane %v3139_v43, 1  ;;  %v3153_v0 = vmax.f32 %v3151_v53, %v3152_v50  ;;  %v1380_v25 = vcombine.high %v1378_v26, %v1378_v26  ;;  %v3073_v16 = vrot.slane %v3072_v37, 4 }
 0x26b   :  { %v3134_v1 = vmax.f32 %v3132_v54, %v3133_v7  ;;  %v3147_v51 = vrot.slane %v3146_v49, 1  ;;  %v3079_v3 = vsel %vm2147_vm2, %v1379_v28, -inf  ;;  %v3086_v42 = vsel %vm2147_vm2, %v1378_v26, -inf }
 0x26c   :  { %v3141_v56 = vmax.f32 %v3139_v43, %v3140_v5  ;;  %v3154_v48 = vrot.slane %v3153_v0, 1  ;;  %v3074_v45 = vmax.f32 %v3072_v37, %v3073_v16  ;;  %v3080_v24 = vrot.slane %v3079_v3, 4 }
 0x26d   :  { %v3148_v52 = vmax.f32 %v3146_v49, %v3147_v51  ;;  %v4146_v12 = vsel %vm3940_vm3, %v3134_v1, -inf  ;;  %v3087_v22 = vrot.slane %v3086_v42, 4  ;;  %v3093_v63 = vsel %vm2147_vm2, %v1380_v25, -inf }
 0x26e   :  { %v3155_v30 = vmax.f32 %v3153_v0, %v3154_v48  ;;  %v4149_v15 = vsel %vm3940_vm3, %v3141_v56, -inf  ;;  %v3075_v61 = vrot.slane %v3074_v45, 2  ;;  %v3081_v53 = vmax.f32 %v3079_v3, %v3080_v24 }
 0x26f   :  { %v4152_v31 = vsel %vm3940_vm3, %v3148_v52, -inf  ;;  %v3088_v17 = vmax.f32 %v3086_v42, %v3087_v22  ;;  %v3094_v54 = vrot.slane %v3093_v63, 4  ;;  %v1449_v62 = vcombine.high %v713_v23, %v713_v23 }
 0x270   :  { %v4155_v32 = vsel %vm3940_vm3, %v3155_v30, -inf  ;;  %v3076_v43 = vmax.f32 %v3074_v45, %v3075_v61  ;;  %v3082_v50 = vrot.slane %v3081_v53, 2  ;;  %v1456_v26 = vrot.slane %v713_v23, %v11854_v44 }
 0x271   :  { %v3089_v28 = vrot.slane %v3088_v17, 2  ;;  %v3095_v7 = vmax.f32 %v3093_v63, %v3094_v54  ;;  %v1463_v49 = vrot.slane %v1449_v62, %v11854_v44  ;;  %v565_v37 = vadd.f32 %v12608_v57, %v12459_v47  ;;  %v12864_v47 = vpop.f32.mrb[49].mxu0 }
 0x272   :  { %v3077_v5 = vrot.slane %v3076_v43, 1  ;;  %v3083_v0 = vmax.f32 %v3081_v53, %v3082_v50  ;;  %v1464_v25 = vcombine.high %v1456_v26, %v1456_v26  ;;  %v3212_v16 = vsel %vm2147_vm2, %v1456_v26, -inf }
 0x273   :  { %v3090_v1 = vmax.f32 %v3088_v17, %v3089_v28  ;;  %v3096_v51 = vrot.slane %v3095_v7, 2  ;;  %v1465_v3 = vcombine.high %v1463_v49, %v1463_v49  ;;  %v3213_v42 = vrot.slane %v3212_v16, 4 }
 0x274   :  { %v3078_v56 = vmax.f32 %v3076_v43, %v3077_v5  ;;  %v3084_v48 = vrot.slane %v3083_v0, 1  ;;  %v3219_v23 = vsel %vm2147_vm2, %v1464_v25, -inf  ;;  %v3226_v45 = vsel %vm2147_vm2, %v1463_v49, -inf }
 0x275   :  { %v3091_v24 = vrot.slane %v3090_v1, 1  ;;  %v3097_v52 = vmax.f32 %v3095_v7, %v3096_v51  ;;  %v3214_v22 = vmax.f32 %v3212_v16, %v3213_v42  ;;  %v3220_v63 = vrot.slane %v3219_v23, 4 }
 0x276   :  { %v3085_v30 = vmax.f32 %v3083_v0, %v3084_v48  ;;  %v4145_v61 = vsel %vm3940_vm3, %v3078_v56, -inf  ;;  %v3227_v53 = vrot.slane %v3226_v45, 4  ;;  %v3233_v17 = vsel %vm2147_vm2, %v1465_v3, -inf }
 0x277   :  { %v3092_v54 = vmax.f32 %v3090_v1, %v3091_v24  ;;  %v3098_v62 = vrot.slane %v3097_v52, 1  ;;  %v4147_v43 = vmax.f32 %v4145_v61, %v4146_v12  ;;  %v3215_v50 = vrot.slane %v3214_v22, 2 }
 0x278   :  { %v4148_v26 = vsel %vm3940_vm3, %v3085_v30, -inf  ;;  %v3221_v28 = vmax.f32 %v3219_v23, %v3220_v63  ;;  %v3228_v49 = vmax.f32 %v3226_v45, %v3227_v53  ;;  %v3234_v5 = vrot.slane %v3233_v17, 4  ;;  %v12875_v63 = vpop.f32.mrb[50].mxu0 }
 0x279   :  { %v3099_v7 = vmax.f32 %v3097_v52, %v3098_v62  ;;  %v4150_v25 = vmax.f32 %v4148_v26, %v4149_v15  ;;  %v4151_v16 = vsel %vm3940_vm3, %v3092_v54, -inf  ;;  %v4569_v0 = vsel %vm4509_vm7, %v4147_v43, %v12842_v60 }
 0x27a   :  { %v4153_v51 = vmax.f32 %v4151_v16, %v4152_v31  ;;  %v3216_v42 = vmax.f32 %v3214_v22, %v3215_v50  ;;  %v3222_v56 = vrot.slane %v3221_v28, 2  ;;  %v3229_v3 = vrot.slane %v3228_v49, 2 }
 0x27b   :  { %v4154_v1 = vsel %vm3940_vm3, %v3099_v7, -inf  ;;  %v4570_v12 = vsel %vm4511_vm8, %v4150_v25, %v4569_v0  ;;  %v3235_v48 = vmax.f32 %v3233_v17, %v3234_v5  ;;  %v711_v24 = vmax.f32 %v565_v37, 0.0 }
 0x27c   :  { %v4156_v23 = vmax.f32 %v4154_v1, %v4155_v32  ;;  %v4571_v45 = vsel %vm4513_vm9, %v4153_v51, %v4570_v12  ;;  %v3217_v52 = vrot.slane %v3216_v42, 1  ;;  %v3223_v15 = vmax.f32 %v3221_v28, %v3222_v56 }
 0x27d   :  { %v3230_v30 = vmax.f32 %v3228_v49, %v3229_v3  ;;  %v3236_v61 = vrot.slane %v3235_v48, 2  ;;  %v1415_v60 = vcombine.high %v711_v24, %v711_v24  ;;  %v1422_v31 = vrot.slane %v711_v24, %v11854_v44 }
 0x27e   :  { %v4572_v22 = vsel %vm4515_vm10, %v4156_v23, %v4571_v45  ;;  %v3218_v53 = vmax.f32 %v3216_v42, %v3217_v52  ;;  %v3224_v54 = vrot.slane %v3223_v15, 1  ;;  %v576_v17 = vadd.f32 %v12608_v57, %v12503_v11 }
 0x27f   :  { %4647 = vst.msk [vmem:[#allocation2 + $0xb1] sm:$0xff] %vm3940_vm3, %v4572_v22  ;;  %v3231_v32 = vrot.slane %v3230_v30, 1  ;;  %v3237_v37 = vmax.f32 %v3235_v48, %v3236_v61  ;;  %v1429_v62 = vrot.slane %v1415_v60, %v11854_v44  ;;  %v1430_v43 = vcombine.high %v1422_v31, %v1422_v31 }
 0x280   :  { %v3225_v50 = vmax.f32 %v3223_v15, %v3224_v54  ;;  %v12884_v26 = vsel %vm3940_vm3, %v3218_v53, -inf  ;;  %v3156_v28 = vsel %vm2147_vm2, %v1422_v31, -inf  ;;  %v714_v49 = vmax.f32 %v576_v17, 0.0 }
 0x281   :  { %v3232_v5 = vmax.f32 %v3230_v30, %v3231_v32  ;;  %v3238_v7 = vrot.slane %v3237_v37, 1  ;;  %v1431_v25 = vcombine.high %v1429_v62, %v1429_v62  ;;  %v3157_v16 = vrot.slane %v3156_v28, 4 }
 0x282   :  { %v12888_v11 = vsel %vm3940_vm3, %v3225_v50, -inf  ;;  %v3163_v57 = vsel %vm2147_vm2, %v1430_v43, -inf  ;;  %v3170_v0 = vsel %vm2147_vm2, %v1429_v62, -inf  ;;  %v1466_v51 = vcombine.high %v714_v49, %v714_v49 }
 0x283   :  { %v3239_v42 = vmax.f32 %v3237_v37, %v3238_v7  ;;  %v12893_v56 = vsel %vm3940_vm3, %v3232_v5, -inf  ;;  %v3158_v3 = vmax.f32 %v3156_v28, %v3157_v16  ;;  %v3164_v1 = vrot.slane %v3163_v57, 4 }
 0x284   :  { %v3171_v12 = vrot.slane %v3170_v0, 4  ;;  %v3177_v48 = vsel %vm2147_vm2, %v1431_v25, -inf  ;;  %v1473_v24 = vrot.slane %v714_v49, %v11854_v44  ;;  %v1480_v23 = vrot.slane %v1466_v51, %v11854_v44  ;;  %v12905_v25 = vpop.f32.mrb[51].mxu0 }
 0x285   :  { %v12899_v45 = vsel %vm3940_vm3, %v3239_v42, -inf  ;;  %v3159_v52 = vrot.slane %v3158_v3, 2  ;;  %v3165_v15 = vmax.f32 %v3163_v57, %v3164_v1  ;;  %v3178_v30 = vrot.slane %v3177_v48, 4 }
 0x286   :  { %v3172_v61 = vmax.f32 %v3170_v0, %v3171_v12  ;;  %v1481_v60 = vcombine.high %v1473_v24, %v1473_v24  ;;  %v1482_v31 = vcombine.high %v1480_v23, %v1480_v23  ;;  %v3240_v22 = vsel %vm2147_vm2, %v1473_v24, -inf }
 0x287   :  { %v3160_v53 = vmax.f32 %v3158_v3, %v3159_v52  ;;  %v3166_v54 = vrot.slane %v3165_v15, 2  ;;  %v3179_v17 = vmax.f32 %v3177_v48, %v3178_v30  ;;  %v3241_v32 = vrot.slane %v3240_v22, 4 }
 0x288   :  { %v3173_v37 = vrot.slane %v3172_v61, 2  ;;  %v3247_v62 = vsel %vm2147_vm2, %v1481_v60, -inf  ;;  %v3254_v43 = vsel %vm2147_vm2, %v1480_v23, -inf  ;;  %v3261_v50 = vsel %vm2147_vm2, %v1482_v31, -inf }
 0x289   :  { %v3161_v28 = vrot.slane %v3160_v53, 1  ;;  %v3167_v49 = vmax.f32 %v3165_v15, %v3166_v54  ;;  %v3180_v5 = vrot.slane %v3179_v17, 2  ;;  %v3242_v7 = vmax.f32 %v3240_v22, %v3241_v32 }
 0x28a   :  { %v3174_v16 = vmax.f32 %v3172_v61, %v3173_v37  ;;  %v3248_v57 = vrot.slane %v3247_v62, 4  ;;  %v3255_v0 = vrot.slane %v3254_v43, 4  ;;  %v3262_v51 = vrot.slane %v3261_v50, 4 }
 0x28b   :  { %v3162_v42 = vmax.f32 %v3160_v53, %v3161_v28  ;;  %v3168_v3 = vrot.slane %v3167_v49, 1  ;;  %v3181_v1 = vmax.f32 %v3179_v17, %v3180_v5  ;;  %v3243_v12 = vrot.slane %v3242_v7, 2 }
 0x28c   :  { %v3175_v48 = vrot.slane %v3174_v16, 1  ;;  %v3249_v24 = vmax.f32 %v3247_v62, %v3248_v57  ;;  %v3256_v52 = vmax.f32 %v3254_v43, %v3255_v0  ;;  %v3263_v23 = vmax.f32 %v3261_v50, %v3262_v51 }
 0x28d   :  { %v3169_v30 = vmax.f32 %v3167_v49, %v3168_v3  ;;  %v3182_v60 = vrot.slane %v3181_v1, 1  ;;  %v4157_v15 = vsel %vm3940_vm3, %v3162_v42, -inf  ;;  %v3244_v31 = vmax.f32 %v3242_v7, %v3243_v12 }
 0x28e   :  { %v3176_v22 = vmax.f32 %v3174_v16, %v3175_v48  ;;  %v4159_v54 = vmax.f32 %v4157_v15, %v12884_v26  ;;  %v3250_v61 = vrot.slane %v3249_v24, 2  ;;  %v3257_v32 = vrot.slane %v3256_v52, 2 }
 0x28f   :  { %v3183_v37 = vmax.f32 %v3181_v1, %v3182_v60  ;;  %v4160_v53 = vsel %vm3940_vm3, %v3169_v30, -inf  ;;  %v3245_v28 = vrot.slane %v3244_v31, 1  ;;  %v3264_v17 = vrot.slane %v3263_v23, 2 }
 0x290   :  { %v4162_v5 = vmax.f32 %v4160_v53, %v12888_v11  ;;  %v4163_v62 = vsel %vm3940_vm3, %v3176_v22, -inf  ;;  %v3251_v43 = vmax.f32 %v3249_v24, %v3250_v61  ;;  %v3258_v50 = vmax.f32 %v3256_v52, %v3257_v32 }
 0x291   :  { %v4165_v49 = vmax.f32 %v4163_v62, %v12893_v56  ;;  %v4166_v7 = vsel %vm3940_vm3, %v3183_v37, -inf  ;;  %v3246_v16 = vmax.f32 %v3244_v31, %v3245_v28  ;;  %v3265_v57 = vmax.f32 %v3263_v23, %v3264_v17  ;;  %v12923_v56 = vld [vmem:[%s15197_s2] ss:$0 sm:$0xff] }
 0x292   :  { %v4168_v26 = vmax.f32 %v4166_v7, %v12899_v45  ;;  %v4573_v0 = vsel %vm4503_vm4, %v4162_v5, %v4159_v54  ;;  %v3252_v51 = vrot.slane %v3251_v43, 1  ;;  %v3259_v42 = vrot.slane %v3258_v50, 1 }
 0x293   :  { %v4574_v3 = vsel %vm4505_vm5, %v4165_v49, %v4573_v0  ;;  %v3266_v1 = vrot.slane %v3265_v57, 1  ;;  %v12918_v11 = vsel %vm3940_vm3, %v3246_v16, -inf  ;;  %v568_v12 = vadd.f32 %v12923_v56, %v12516_v35 }
 0x294   :  { %v3253_v48 = vmax.f32 %v3251_v43, %v3252_v51  ;;  %v3260_v45 = vmax.f32 %v3258_v50, %v3259_v42  ;;  %v12928_v24 = vsel %vm4507_vm6, %v4168_v26, %v4574_v3  ;;  %v589_v52 = vadd.f32 %v12923_v56, %v12671_v6 }
 0x295   :  { %v3267_v23 = vmax.f32 %v3265_v57, %v3266_v1  ;;  %v712_v30 = vmax.f32 %v568_v12, 0.0  ;;  %v581_v60 = vadd.f32 %v12923_v56, %v12675_v34  ;;  %v592_v15 = vadd.f32 %v12923_v56, %v12745_v39 }
 0x296   :  { %v12937_v31 = vsel %vm3940_vm3, %v3253_v48, -inf  ;;  %v12940_v35 = vsel %vm3940_vm3, %v3260_v45, -inf  ;;  %v717_v22 = vmax.f32 %v589_v52, 0.0  ;;  %v584_v54 = vadd.f32 %v12923_v56, %v12751_v18 }
 0x297   :  { %v12945_v6 = vsel %vm3940_vm3, %v3267_v23, -inf  ;;  %v1432_v61 = vcombine.high %v712_v30, %v712_v30  ;;  %v1439_v32 = vrot.slane %v712_v30, %v11854_v44  ;;  %v12948_v34 = vmax.f32 %v581_v60, 0.0 }
 0x298   :  { %v1517_v37 = vcombine.high %v717_v22, %v717_v22  ;;  %v1524_v39 = vrot.slane %v717_v22, %v11854_v44  ;;  %v12951_v53 = vmax.f32 %v592_v15, 0.0  ;;  %v12953_v28 = vmax.f32 %v584_v54, 0.0 }
 0x299   :  { %v1446_v17 = vrot.slane %v1432_v61, %v11854_v44  ;;  %v1447_v5 = vcombine.high %v1439_v32, %v1439_v32  ;;  %v3184_v18 = vsel %vm2147_vm2, %v1439_v32, -inf }
 0x29a   :  { %v3185_v43 = vrot.slane %v3184_v18, 4  ;;  %v1531_v50 = vrot.slane %v1517_v37, %v11854_v44  ;;  %v1532_v49 = vcombine.high %v1524_v39, %v1524_v39  ;;  %v3324_v7 = vsel %vm2147_vm2, %v1524_v39, -inf }
 0x29b   :  { %v1448_v16 = vcombine.high %v1446_v17, %v1446_v17  ;;  %v3191_v57 = vsel %vm2147_vm2, %v1447_v5, -inf  ;;  %v3198_v26 = vsel %vm2147_vm2, %v1446_v17, -inf  ;;  %v3325_v0 = vrot.slane %v3324_v7, 4 }
 0x29c   :  { %v3186_v51 = vmax.f32 %v3184_v18, %v3185_v43  ;;  %v3192_v42 = vrot.slane %v3191_v57, 4  ;;  %v3199_v3 = vrot.slane %v3198_v26, 4  ;;  %v1533_v1 = vcombine.high %v1531_v50, %v1531_v50 }
 0x29d   :  { %v3205_v12 = vsel %vm2147_vm2, %v1448_v16, -inf  ;;  %v3326_v48 = vmax.f32 %v3324_v7, %v3325_v0  ;;  %v3331_v45 = vsel %vm2147_vm2, %v1532_v49, -inf  ;;  %v3338_v52 = vsel %vm2147_vm2, %v1531_v50, -inf }
 0x29e   :  { %v3187_v23 = vrot.slane %v3186_v51, 2  ;;  %v3193_v30 = vmax.f32 %v3191_v57, %v3192_v42  ;;  %v3200_v60 = vmax.f32 %v3198_v26, %v3199_v3  ;;  %v3206_v15 = vrot.slane %v3205_v12, 4 }
 0x29f   :  { %v3327_v22 = vrot.slane %v3326_v48, 2  ;;  %v3332_v54 = vrot.slane %v3331_v45, 4  ;;  %v3339_v61 = vrot.slane %v3338_v52, 4  ;;  %v3345_v32 = vsel %vm2147_vm2, %v1533_v1, -inf }
 0x2a0   :  { %v3188_v37 = vmax.f32 %v3186_v51, %v3187_v23  ;;  %v3194_v39 = vrot.slane %v3193_v30, 2  ;;  %v3201_v17 = vrot.slane %v3200_v60, 2  ;;  %v3207_v5 = vmax.f32 %v3205_v12, %v3206_v15 }
 0x2a1   :  { %v3328_v18 = vmax.f32 %v3326_v48, %v3327_v22  ;;  %v3333_v43 = vmax.f32 %v3331_v45, %v3332_v54  ;;  %v3340_v7 = vmax.f32 %v3338_v52, %v3339_v61  ;;  %v3346_v16 = vrot.slane %v3345_v32, 4 }
 0x2a2   :  { %v3189_v49 = vrot.slane %v3188_v37, 1  ;;  %v3195_v0 = vmax.f32 %v3193_v30, %v3194_v39  ;;  %v3202_v50 = vmax.f32 %v3200_v60, %v3201_v17  ;;  %v3208_v62 = vrot.slane %v3207_v5, 2 }
 0x2a3   :  { %v3329_v57 = vrot.slane %v3328_v18, 1  ;;  %v3334_v26 = vrot.slane %v3333_v43, 2  ;;  %v3341_v42 = vrot.slane %v3340_v7, 2  ;;  %v3347_v3 = vmax.f32 %v3345_v32, %v3346_v16 }
 0x2a4   :  { %v3190_v4 = vmax.f32 %v3188_v37, %v3189_v49  ;;  %v3196_v36 = vrot.slane %v3195_v0, 1  ;;  %v3203_v27 = vrot.slane %v3202_v50, 1  ;;  %v3209_v1 = vmax.f32 %v3207_v5, %v3208_v62 }
 0x2a5   :  { %v3330_v51 = vmax.f32 %v3328_v18, %v3329_v57  ;;  %v3335_v23 = vmax.f32 %v3333_v43, %v3334_v26  ;;  %v3342_v40 = vmax.f32 %v3340_v7, %v3341_v42  ;;  %v3348_v12 = vrot.slane %v3347_v3, 2 }
 0x2a6   :  { %v3197_v48 = vmax.f32 %v3195_v0, %v3196_v36  ;;  %v3204_v45 = vmax.f32 %v3202_v50, %v3203_v27  ;;  %v3210_v52 = vrot.slane %v3209_v1, 1  ;;  %v4169_v15 = vsel %vm3940_vm3, %v3190_v4, -inf }
 0x2a7   :  { %v4171_v30 = vmax.f32 %v4169_v15, %v12918_v11  ;;  %v3336_v60 = vrot.slane %v3335_v23, 1  ;;  %v3343_v22 = vrot.slane %v3342_v40, 1  ;;  %v3349_v54 = vmax.f32 %v3347_v3, %v3348_v12 }
 0x2a8   :  { %v3211_v61 = vmax.f32 %v3209_v1, %v3210_v52  ;;  %v4172_v32 = vsel %vm3940_vm3, %v3197_v48, -inf  ;;  %v4175_v37 = vsel %vm3940_vm3, %v3204_v45, -inf  ;;  %v12972_v62 = vsel %vm3940_vm3, %v3330_v51, -inf }
 0x2a9   :  { %v4174_v39 = vmax.f32 %v4172_v32, %v12937_v31  ;;  %v4177_v27 = vmax.f32 %v4175_v37, %v12940_v35  ;;  %v4576_v36 = vsel %vm4509_vm7, %v4171_v30, %v12928_v24  ;;  %v3337_v4 = vmax.f32 %v3335_v23, %v3336_v60  ;;  %v13009_v60 = vpop.f32.mrb[52].mxu0 }
 0x2aa   :  { %v4178_v11 = vsel %vm3940_vm3, %v3211_v61, -inf  ;;  %v3344_v17 = vmax.f32 %v3342_v40, %v3343_v22  ;;  %v3350_v5 = vrot.slane %v3349_v54, 1  ;;  %v1490_v18 = vrot.slane %v12948_v34, %v11854_v44 }
 0x2ab   :  { %v4180_v43 = vmax.f32 %v4178_v11, %v12945_v6  ;;  %v4577_v7 = vsel %vm4511_vm8, %v4174_v39, %v4576_v36  ;;  %v12984_v16 = vsel %vm3940_vm3, %v3337_v4, -inf  ;;  %v15231_v31 = vcombine.high %v12948_v34, %v12948_v34 }
 0x2ac   :  { %v4578_v35 = vsel %vm4513_vm9, %v4177_v27, %v4577_v7  ;;  %v3351_v49 = vmax.f32 %v3349_v54, %v3350_v5  ;;  %v12992_v40 = vsel %vm3940_vm3, %v3344_v17, -inf  ;;  %v1498_v0 = vcombine.high %v1490_v18, %v1490_v18 }
 0x2ad   :  { %v1497_v24 = vrot.slane %v15231_v31, %v11854_v44  ;;  %v4579_v50 = vsel %vm4515_vm10, %v4180_v43, %v4578_v35  ;;  %v3268_v57 = vsel %vm2147_vm2, %v1490_v18, -inf  ;;  %v1534_v12 = vcombine.high %v12951_v53, %v12951_v53 }
 0x2ae   :  { %4648 = vst.msk [vmem:[#allocation2 + $0xc1] sm:$0xff] %vm3940_vm3, %v4579_v50  ;;  %v12999_v42 = vsel %vm3940_vm3, %v3351_v49, -inf  ;;  %v3269_v34 = vrot.slane %v3268_v57, 4  ;;  %v3275_v3 = vsel %vm2147_vm2, %v1498_v0, -inf  ;;  %v1541_v48 = vrot.slane %v12951_v53, %v11854_v44 }
 0x2af   :  { %v1499_v6 = vcombine.high %v1497_v24, %v1497_v24  ;;  %v3282_v26 = vsel %vm2147_vm2, %v1497_v24, -inf  ;;  %v3276_v51 = vrot.slane %v3275_v3, 4  ;;  %v1500_v30 = vcombine.high %v12953_v28, %v12953_v28 }
 0x2b0   :  { %v3283_v1 = vrot.slane %v3282_v26, 4  ;;  %v3270_v45 = vmax.f32 %v3268_v57, %v3269_v34  ;;  %v1548_v54 = vrot.slane %v1534_v12, %v11854_v44  ;;  %v1549_v61 = vcombine.high %v1541_v48, %v1541_v48 }
 0x2b1   :  { %v3289_v23 = vsel %vm2147_vm2, %v1499_v6, -inf  ;;  %v3277_v22 = vmax.f32 %v3275_v3, %v3276_v51  ;;  %v3352_v32 = vsel %vm2147_vm2, %v1541_v48, -inf  ;;  %v13016_v51 = vpop.f32.mrb[53].mxu0 }
 0x2b2   :  { %v3284_v52 = vmax.f32 %v3282_v26, %v3283_v1  ;;  %v3290_v15 = vrot.slane %v3289_v23, 4  ;;  %v3271_v37 = vrot.slane %v3270_v45, 2  ;;  %v3353_v36 = vrot.slane %v3352_v32, 4 }
 0x2b3   :  { %v3278_v4 = vrot.slane %v3277_v22, 2  ;;  %v1550_v53 = vcombine.high %v1548_v54, %v1548_v54  ;;  %v3359_v11 = vsel %vm2147_vm2, %v1549_v61, -inf  ;;  %v3366_v17 = vsel %vm2147_vm2, %v1548_v54, -inf }
 0x2b4   :  { %v3285_v39 = vrot.slane %v3284_v52, 2  ;;  %v3291_v27 = vmax.f32 %v3289_v23, %v3290_v15  ;;  %v3272_v5 = vmax.f32 %v3270_v45, %v3271_v37  ;;  %v3354_v7 = vmax.f32 %v3352_v32, %v3353_v36 }
 0x2b5   :  { %v3279_v31 = vmax.f32 %v3277_v22, %v3278_v4  ;;  %v3360_v24 = vrot.slane %v3359_v11, 4  ;;  %v3367_v35 = vrot.slane %v3366_v17, 4  ;;  %v3373_v49 = vsel %vm2147_vm2, %v1550_v53, -inf }
 0x2b6   :  { %v3286_v18 = vmax.f32 %v3284_v52, %v3285_v39  ;;  %v3292_v43 = vrot.slane %v3291_v27, 2  ;;  %v3273_v0 = vrot.slane %v3272_v5, 1  ;;  %v3355_v57 = vrot.slane %v3354_v7, 2  ;;  %v13018_v52 = vpop.f32.mrb[54].mxu0 }
 0x2b7   :  { %v3280_v26 = vrot.slane %v3279_v31, 1  ;;  %v3361_v34 = vmax.f32 %v3359_v11, %v3360_v24  ;;  %v3368_v3 = vmax.f32 %v3366_v17, %v3367_v35  ;;  %v3374_v1 = vrot.slane %v3373_v49, 4  ;;  %v13020_v32 = vpop.f32.mrb[55].mxu0 }
 0x2b8   :  { %v3287_v50 = vrot.slane %v3286_v18, 1  ;;  %v3293_v6 = vmax.f32 %v3291_v27, %v3292_v43  ;;  %v3274_v23 = vmax.f32 %v3272_v5, %v3273_v0  ;;  %v3356_v45 = vmax.f32 %v3354_v7, %v3355_v57 }
 0x2b9   :  { %v3281_v15 = vmax.f32 %v3279_v31, %v3280_v26  ;;  %v3362_v22 = vrot.slane %v3361_v34, 2  ;;  %v3369_v54 = vrot.slane %v3368_v3, 2  ;;  %v3375_v61 = vmax.f32 %v3373_v49, %v3374_v1 }
 0x2ba   :  { %v3288_v12 = vmax.f32 %v3286_v18, %v3287_v50  ;;  %v3294_v48 = vrot.slane %v3293_v6, 1  ;;  %v4181_v39 = vsel %vm3940_vm3, %v3274_v23, -inf  ;;  %v3357_v36 = vrot.slane %v3356_v45, 1 }
 0x2bb   :  { %v4183_v4 = vmax.f32 %v4181_v39, %v12972_v62  ;;  %v4184_v53 = vsel %vm3940_vm3, %v3281_v15, -inf  ;;  %v3363_v17 = vmax.f32 %v3361_v34, %v3362_v22  ;;  %v3370_v7 = vmax.f32 %v3368_v3, %v3369_v54 }
 0x2bc   :  { %v3295_v37 = vmax.f32 %v3293_v6, %v3294_v48  ;;  %v4187_v27 = vsel %vm3940_vm3, %v3288_v12, -inf  ;;  %v4186_v5 = vmax.f32 %v4184_v53, %v12984_v16  ;;  %v3358_v43 = vmax.f32 %v3356_v45, %v3357_v36 }
 0x2bd   :  { %v4189_v11 = vmax.f32 %v4187_v27, %v12992_v40  ;;  %v3364_v24 = vrot.slane %v3363_v17, 1  ;;  %v3376_v35 = vrot.slane %v3375_v61, 2  ;;  %v1507_v49 = vrot.slane %v12953_v28, %v11854_v44  ;;  %v4665_v28 = vld [vmem:[#allocation2 + $0x50] sm:$0xff] }
 0x2be   :  { %v4190_v18 = vsel %vm3940_vm3, %v3295_v37, -inf  ;;  %v4580_v62 = vsel %vm4503_vm4, %v4186_v5, %v4183_v4  ;;  %v3371_v0 = vrot.slane %v3370_v7, 1  ;;  %v13034_v50 = vsel %vm3940_vm3, %v3358_v43, -inf }
 0x2bf   :  { %v4192_v31 = vmax.f32 %v4190_v18, %v12999_v42  ;;  %v1514_v40 = vrot.slane %v1500_v30, %v11854_v44  ;;  %v4581_v16 = vsel %vm4505_vm5, %v4189_v11, %v4580_v62  ;;  %v3365_v6 = vmax.f32 %v3363_v17, %v3364_v24  ;;  %v4666_v30 = vld [vmem:[#allocation2 + $0x58] sm:$0x3] }
 0x2c0   :  { %v3377_v57 = vmax.f32 %v3375_v61, %v3376_v35  ;;  %v1515_v26 = vcombine.high %v1507_v49, %v1507_v49  ;;  %v3372_v34 = vmax.f32 %v3370_v7, %v3371_v0  ;;  %v3296_v3 = vsel %vm2147_vm2, %v1507_v49, -inf }
 0x2c1   :  { %v1516_v42 = vcombine.high %v1514_v40, %v1514_v40  ;;  %v3310_v1 = vsel %vm2147_vm2, %v1514_v40, -inf  ;;  %v13041_v12 = vsel %vm3940_vm3, %v3365_v6, -inf  ;;  %v3297_v48 = vrot.slane %v3296_v3, 4 }
 0x2c2   :  { %v3378_v23 = vrot.slane %v3377_v57, 1  ;;  %v3303_v45 = vsel %vm2147_vm2, %v1515_v26, -inf  ;;  %v13045_v15 = vsel %vm3940_vm3, %v3372_v34, -inf  ;;  %v3311_v54 = vrot.slane %v3310_v1, 4 }
 0x2c3   :  { %v3304_v22 = vrot.slane %v3303_v45, 4  ;;  %v3317_v61 = vsel %vm2147_vm2, %v1516_v42, -inf  ;;  %v3298_v39 = vmax.f32 %v3296_v3, %v3297_v48  ;;  %v4582_v36 = vsel %vm4507_vm6, %v4192_v31, %v4581_v16  ;;  %v13059_v42 = vpop.f32.mrb[56].mxu0 }
 0x2c4   :  { %v3379_v37 = vmax.f32 %v3377_v57, %v3378_v23  ;;  %v3318_v27 = vrot.slane %v3317_v61, 4  ;;  %v3312_v53 = vmax.f32 %v3310_v1, %v3311_v54  ;;  %v13049_v11 = vpack.c.bf16 %v4665_v28, %v4665_v28 }
 0x2c5   :  { %v3305_v4 = vmax.f32 %v3303_v45, %v3304_v22  ;;  %v13051_v17 = vpack.c.bf16 %v4666_v30, %v4666_v30  ;;  %v3299_v18 = vrot.slane %v3298_v39, 2  ;;  %v605_v7 = vadd.f32 %v12923_v56, %v12812_v13 }
 0x2c6   :  { %v4203_v5 = vsel %vm3940_vm3, %v3379_v37, -inf  ;;  %v3319_v43 = vmax.f32 %v3317_v61, %v3318_v27  ;;  %v3313_v35 = vrot.slane %v3312_v53, 2  ;;  %v4877_v49 = vshrl.u32 %v13049_v11, 16 }
 0x2c7   :  { %v3306_v24 = vrot.slane %v3305_v4, 2  ;;  %v4880_v62 = vshll.u32 %v13049_v11, 16  ;;  %v3300_v31 = vmax.f32 %v3298_v39, %v3299_v18  ;;  %v4886_v40 = vshll.u32 %v13051_v17, 16  ;;  %v13065_v39 = vpop.f32.mrb[57].mxu0 }
 0x2c8   :  { %v3320_v0 = vrot.slane %v3319_v43, 2  ;;  %v721_v16 = vmax.f32 %v605_v7, 0.0  ;;  %v3314_v57 = vmax.f32 %v3312_v53, %v3313_v35  ;;  %v4879_v26 = vrot.slane %v4877_v49, 4 }
 0x2c9   :  { %v3307_v6 = vmax.f32 %v3305_v4, %v3306_v24  ;;  %v4882_v34 = vrot.slane %v4880_v62, 5  ;;  %v3301_v3 = vrot.slane %v3300_v31, 1  ;;  %v4888_v13 = vrot.slane %v4886_v40, 5 }
 0x2ca   :  { %v3321_v1 = vmax.f32 %v3319_v43, %v3320_v0  ;;  %v1585_v28 = vcombine.high %v721_v16, %v721_v16  ;;  %v3315_v48 = vrot.slane %v3314_v57, 1  ;;  %v1592_v30 = vrot.slane %v721_v16, %v11854_v44 }
 0x2cb   :  { %v3308_v23 = vrot.slane %v3307_v6, 1  ;;  %v4883_v45 = vor.u32 %v4882_v34, %v4879_v26  ;;  %v3302_v22 = vmax.f32 %v3300_v31, %v3301_v3  ;;  %v597_v37 = vadd.f32 %v12923_v56, %v12814_v8 }
 0x2cc   :  { %v3322_v54 = vrot.slane %v3321_v1, 1  ;;  %v1599_v61 = vrot.slane %v1585_v28, %v11854_v44  ;;  %v3316_v4 = vmax.f32 %v3314_v57, %v3315_v48  ;;  %v1600_v18 = vcombine.high %v1592_v30, %v1592_v30 }
 0x2cd   :  { %v3309_v27 = vmax.f32 %v3307_v6, %v3308_v23  ;;  %v4884_v53 = vrot.slane %v4883_v45, 4  ;;  %v4193_v7 = vsel %vm3940_vm3, %v3302_v22, -inf  ;;  %v3436_v35 = vsel %vm2147_vm2, %v1592_v30, -inf }
 0x2ce   :  { %v3323_v43 = vmax.f32 %v3321_v1, %v3322_v54  ;;  %v1601_v24 = vcombine.high %v1599_v61, %v1599_v61  ;;  %v4195_v49 = vmax.f32 %v4193_v7, %v13034_v50  ;;  %v4199_v31 = vsel %vm3940_vm3, %v3316_v4, -inf }
 0x2cf   :  { %v4196_v62 = vsel %vm3940_vm3, %v3309_v27, -inf  ;;  %v13074_v8 = vsel %vm12680_vm0, %v4884_v53, %v4888_v13  ;;  %v4201_v40 = vmax.f32 %v4199_v31, %v13045_v15  ;;  %v3437_v26 = vrot.slane %v3436_v35, 4 }
 0x2d0   :  { %15232 = vst [vmem:[#allocation11_spill] sm:$0xff] %v13074_v8  ;;  %v4198_v0 = vmax.f32 %v4196_v62, %v13041_v12  ;;  %v4202_v16 = vsel %vm3940_vm3, %v3323_v43, -inf  ;;  %v13081_v6 = vcombine.low %v12741_v46, %v13074_v8  ;;  %v4583_v50 = vsel %vm4509_vm7, %v4195_v49, %v4582_v36 }
 0x2d1   :  { %v4204_v57 = vmax.f32 %v4202_v16, %v4203_v5  ;;  %v3443_v34 = vsel %vm2147_vm2, %v1600_v18, -inf  ;;  %v3450_v15 = vsel %vm2147_vm2, %v1599_v61, -inf  ;;  %v3457_v1 = vsel %vm2147_vm2, %v1601_v24, -inf }
 0x2d2   :  { %15233 = vst [vmem:[#allocation12_spill] sm:$0xff] %v13081_v6  ;;  %v4584_v3 = vsel %vm4511_vm8, %v4198_v0, %v4583_v50  ;;  %10732 = vmatprep.mubr.msk.bf16.mxu1 %vm3940_vm3, %v13081_v6  ;;  %v3444_v12 = vrot.slane %v3443_v34, 4  ;;  %v3438_v28 = vmax.f32 %v3436_v35, %v3437_v26  ;;  %v3451_v23 = vrot.slane %v3450_v15, 4 }
 0x2d3   :  { %v4585_v13 = vsel %vm4513_vm9, %v4201_v40, %v4584_v3  ;;  %v3458_v5 = vrot.slane %v3457_v1, 4  ;;  %v719_v45 = vmax.f32 %v597_v37, 0.0  ;;  %v608_v30 = vadd.f32 %v12923_v56, %v12817_v29 }
 0x2d4   :  { %v4586_v36 = vsel %vm4515_vm10, %v4204_v57, %v4585_v13  ;;  %v3445_v48 = vmax.f32 %v3443_v34, %v3444_v12  ;;  %v3439_v22 = vrot.slane %v3438_v28, 2  ;;  %v3452_v54 = vmax.f32 %v3450_v15, %v3451_v23 }
 0x2d5   :  { %4649 = vst.msk [vmem:[#allocation2 + $0xd1] sm:$0xff] %vm3940_vm3, %v4586_v36  ;;  %v3459_v27 = vmax.f32 %v3457_v1, %v3458_v5  ;;  %v600_v61 = vadd.f32 %v12923_v56, %v12827_v9  ;;  %v1551_v53 = vcombine.high %v719_v45, %v719_v45  ;;  %v1558_v18 = vrot.slane %v719_v45, %v11854_v44 }
 0x2d6   :  { %v3446_v4 = vrot.slane %v3445_v48, 2  ;;  %v722_v43 = vmax.f32 %v608_v30, 0.0  ;;  %v3440_v7 = vmax.f32 %v3438_v28, %v3439_v22  ;;  %v3453_v24 = vrot.slane %v3452_v54, 2  ;;  %v13106_v22 = vpop.f32.mrb[58].mxu0 }
 0x2d7   :  { %v3460_v35 = vrot.slane %v3459_v27, 2  ;;  %v13098_v37 = vmax.f32 %v600_v61, 0.0  ;;  %v1565_v29 = vrot.slane %v1551_v53, %v11854_v44  ;;  %v1566_v62 = vcombine.high %v1558_v18, %v1558_v18 }
 0x2d8   :  { %v3447_v49 = vmax.f32 %v3445_v48, %v3446_v4  ;;  %v3380_v31 = vsel %vm2147_vm2, %v1558_v18, -inf  ;;  %v3441_v0 = vrot.slane %v3440_v7, 1  ;;  %v3454_v40 = vmax.f32 %v3452_v54, %v3453_v24 }
 0x2d9   :  { %v3461_v16 = vmax.f32 %v3459_v27, %v3460_v35  ;;  %v3381_v9 = vrot.slane %v3380_v31, 4  ;;  %v1567_v50 = vcombine.high %v1565_v29, %v1565_v29  ;;  %v3387_v26 = vsel %vm2147_vm2, %v1566_v62, -inf }
 0x2da   :  { %v3448_v57 = vrot.slane %v3447_v49, 1  ;;  %v3394_v34 = vsel %vm2147_vm2, %v1565_v29, -inf  ;;  %v3442_v3 = vmax.f32 %v3440_v7, %v3441_v0  ;;  %v3455_v12 = vrot.slane %v3454_v40, 1 }
 0x2db   :  { %v3462_v15 = vrot.slane %v3461_v16, 1  ;;  %v3382_v1 = vmax.f32 %v3380_v31, %v3381_v9  ;;  %v3388_v28 = vrot.slane %v3387_v26, 4  ;;  %v3395_v23 = vrot.slane %v3394_v34, 4  ;;  %v13119_v9 = vpop.f32.mrb[59].mxu0 }
 0x2dc   :  { %v3449_v13 = vmax.f32 %v3447_v49, %v3448_v57  ;;  %v3401_v5 = vsel %vm2147_vm2, %v1567_v50, -inf  ;;  %v3456_v36 = vmax.f32 %v3454_v40, %v3455_v12  ;;  %v4206_v45 = vsel %vm3940_vm3, %v3442_v3, -inf }
 0x2dd   :  { %v3463_v48 = vmax.f32 %v3461_v16, %v3462_v15  ;;  %v3383_v30 = vrot.slane %v3382_v1, 2  ;;  %v3389_v27 = vmax.f32 %v3387_v26, %v3388_v28  ;;  %v3396_v61 = vmax.f32 %v3394_v34, %v3395_v23 }
 0x2de   :  { %v4209_v54 = vsel %vm3940_vm3, %v3449_v13, -inf  ;;  %v3402_v4 = vrot.slane %v3401_v5, 4  ;;  %v4212_v53 = vsel %vm3940_vm3, %v3456_v36, -inf  ;;  %v1602_v24 = vcombine.high %v722_v43, %v722_v43 }
 0x2df   :  { %v13111_v18 = vsel %vm3940_vm3, %v3463_v48, -inf  ;;  %v3384_v7 = vmax.f32 %v3382_v1, %v3383_v30  ;;  %v3390_v35 = vrot.slane %v3389_v27, 2  ;;  %v3397_v49 = vrot.slane %v3396_v61, 2 }
 0x2e0   :  { %v3403_v29 = vmax.f32 %v3401_v5, %v3402_v4  ;;  %v1609_v62 = vrot.slane %v722_v43, %v11854_v44  ;;  %v1616_v0 = vrot.slane %v1602_v24, %v11854_v44  ;;  %v1568_v40 = vcombine.high %v13098_v37, %v13098_v37 }
 0x2e1   :  { %v3385_v31 = vrot.slane %v3384_v7, 1  ;;  %v1575_v16 = vrot.slane %v13098_v37, %v11854_v44  ;;  %v3391_v57 = vmax.f32 %v3389_v27, %v3390_v35  ;;  %v3398_v50 = vmax.f32 %v3396_v61, %v3397_v49 }
 0x2e2   :  { %v3404_v26 = vrot.slane %v3403_v29, 2  ;;  %v1617_v34 = vcombine.high %v1609_v62, %v1609_v62  ;;  %v1618_v12 = vcombine.high %v1616_v0, %v1616_v0  ;;  %v3464_v15 = vsel %vm2147_vm2, %v1609_v62, -inf }
 0x2e3   :  { %v3386_v3 = vmax.f32 %v3384_v7, %v3385_v31  ;;  %v3478_v43 = vsel %vm2147_vm2, %v1616_v0, -inf  ;;  %v3392_v1 = vrot.slane %v3391_v57, 1  ;;  %v3399_v13 = vrot.slane %v3398_v50, 1 }
 0x2e4   :  { %v3405_v28 = vmax.f32 %v3403_v29, %v3404_v26  ;;  %v3465_v23 = vrot.slane %v3464_v15, 4  ;;  %v3471_v37 = vsel %vm2147_vm2, %v1617_v34, -inf  ;;  %v3479_v36 = vrot.slane %v3478_v43, 4 }
 0x2e5   :  { %v4205_v5 = vsel %vm3940_vm3, %v3386_v3, -inf  ;;  %v3485_v48 = vsel %vm2147_vm2, %v1618_v12, -inf  ;;  %v3393_v30 = vmax.f32 %v3391_v57, %v3392_v1  ;;  %v3400_v27 = vmax.f32 %v3398_v50, %v3399_v13 }
 0x2e6   :  { %v3406_v61 = vrot.slane %v3405_v28, 1  ;;  %v4207_v4 = vmax.f32 %v4205_v5, %v4206_v45  ;;  %v3466_v7 = vmax.f32 %v3464_v15, %v3465_v23  ;;  %v3472_v24 = vrot.slane %v3471_v37, 4 }
 0x2e7   :  { %v3480_v35 = vmax.f32 %v3478_v43, %v3479_v36  ;;  %v3486_v49 = vrot.slane %v3485_v48, 4  ;;  %v4208_v31 = vsel %vm3940_vm3, %v3393_v30, -inf  ;;  %v4211_v29 = vsel %vm3940_vm3, %v3400_v27, -inf }
 0x2e8   :  { %v3407_v62 = vmax.f32 %v3405_v28, %v3406_v61  ;;  %v1582_v0 = vrot.slane %v1568_v40, %v11854_v44  ;;  %v4210_v26 = vmax.f32 %v4208_v31, %v4209_v54  ;;  %v4213_v34 = vmax.f32 %v4211_v29, %v4212_v53 }
 0x2e9   :  { %v3467_v3 = vrot.slane %v3466_v7, 2  ;;  %v3473_v6 = vmax.f32 %v3471_v37, %v3472_v24  ;;  %v3481_v50 = vrot.slane %v3480_v35, 2  ;;  %v3487_v12 = vmax.f32 %v3485_v48, %v3486_v49 }
 0x2ea   :  { %v4214_v57 = vsel %vm3940_vm3, %v3407_v62, -inf  ;;  %v1583_v45 = vcombine.high %v1575_v16, %v1575_v16  ;;  %v4587_v43 = vsel %vm4503_vm4, %v4210_v26, %v4207_v4  ;;  %v1584_v40 = vcombine.high %v1582_v0, %v1582_v0 }
 0x2eb   :  { %v4216_v15 = vmax.f32 %v4214_v57, %v13111_v18  ;;  %v3468_v1 = vmax.f32 %v3466_v7, %v3467_v3  ;;  %v3474_v13 = vrot.slane %v3473_v6, 2  ;;  %v4588_v28 = vsel %vm4505_vm5, %v4213_v34, %v4587_v43 }
 0x2ec   :  { %v3482_v23 = vmax.f32 %v3480_v35, %v3481_v50  ;;  %v3488_v5 = vrot.slane %v3487_v12, 2  ;;  %v3408_v37 = vsel %vm2147_vm2, %v1575_v16, -inf  ;;  %v3415_v36 = vsel %vm2147_vm2, %v1583_v45, -inf }
 0x2ed   :  { %v3469_v54 = vrot.slane %v3468_v1, 1  ;;  %v3475_v53 = vmax.f32 %v3473_v6, %v3474_v13  ;;  %v3409_v27 = vrot.slane %v3408_v37, 4  ;;  %v3416_v61 = vrot.slane %v3415_v36, 4 }
 0x2ee   :  { %v3483_v30 = vrot.slane %v3482_v23, 1  ;;  %v3489_v48 = vmax.f32 %v3487_v12, %v3488_v5  ;;  %v3422_v4 = vsel %vm2147_vm2, %v1582_v0, -inf  ;;  %v3429_v7 = vsel %vm2147_vm2, %v1584_v40, -inf }
 0x2ef   :  { %v3470_v18 = vmax.f32 %v3468_v1, %v3469_v54  ;;  %v3476_v24 = vrot.slane %v3475_v53, 1  ;;  %v3410_v62 = vmax.f32 %v3408_v37, %v3409_v27  ;;  %v3417_v31 = vmax.f32 %v3415_v36, %v3416_v61 }
 0x2f0   :  { %v3484_v49 = vmax.f32 %v3482_v23, %v3483_v30  ;;  %v3490_v35 = vrot.slane %v3489_v48, 1  ;;  %v3423_v16 = vrot.slane %v3422_v4, 4  ;;  %v3430_v26 = vrot.slane %v3429_v7, 4 }
 0x2f1   :  { %v3477_v29 = vmax.f32 %v3475_v53, %v3476_v24  ;;  %v4218_v6 = vsel %vm3940_vm3, %v3470_v18, -inf  ;;  %v3411_v57 = vrot.slane %v3410_v62, 2  ;;  %v3418_v50 = vrot.slane %v3417_v31, 2 }
 0x2f2   :  { %v3491_v34 = vmax.f32 %v3489_v48, %v3490_v35  ;;  %v4224_v3 = vsel %vm3940_vm3, %v3484_v49, -inf  ;;  %v3424_v45 = vmax.f32 %v3422_v4, %v3423_v16  ;;  %v3431_v0 = vmax.f32 %v3429_v7, %v3430_v26 }
 0x2f3   :  { %v4221_v12 = vsel %vm3940_vm3, %v3477_v29, -inf  ;;  %v4589_v43 = vsel %vm4507_vm6, %v4216_v15, %v4588_v28  ;;  %v3412_v13 = vmax.f32 %v3410_v62, %v3411_v57  ;;  %v3419_v23 = vmax.f32 %v3417_v31, %v3418_v50 }
 0x2f4   :  { %v4227_v1 = vsel %vm3940_vm3, %v3491_v34, -inf  ;;  %v621_v5 = vadd.f32 %v12923_v56, %v12850_v58  ;;  %v3425_v40 = vrot.slane %v3424_v45, 2  ;;  %v3432_v54 = vrot.slane %v3431_v0, 2 }
 0x2f5   :  { %v613_v53 = vadd.f32 %v12923_v56, %v12864_v47  ;;  %v624_v37 = vadd.f32 %v12923_v56, %v12875_v63  ;;  %v3413_v36 = vrot.slane %v3412_v13, 1  ;;  %v3420_v30 = vrot.slane %v3419_v23, 1 }
 0x2f6   :  { %v725_v48 = vmax.f32 %v621_v5, 0.0  ;;  %v13150_v15 = vadd.f32 %v12923_v56, %v12905_v25  ;;  %v3426_v28 = vmax.f32 %v3424_v45, %v3425_v40  ;;  %v3433_v27 = vmax.f32 %v3431_v0, %v3432_v54 }
 0x2f7   :  { %v723_v61 = vmax.f32 %v613_v53, 0.0  ;;  %v13152_v18 = vmax.f32 %v624_v37, 0.0  ;;  %v3414_v58 = vmax.f32 %v3412_v13, %v3413_v36  ;;  %v3421_v24 = vmax.f32 %v3419_v23, %v3420_v30 }
 0x2f8   :  { %v1653_v4 = vcombine.high %v725_v48, %v725_v48  ;;  %v1660_v47 = vrot.slane %v725_v48, %v11854_v44  ;;  %v3427_v7 = vrot.slane %v3426_v28, 1  ;;  %v3434_v49 = vrot.slane %v3433_v27, 1 }
 0x2f9   :  { %v1619_v63 = vcombine.high %v723_v61, %v723_v61  ;;  %v1626_v35 = vrot.slane %v723_v61, %v11854_v44  ;;  %v4217_v62 = vsel %vm3940_vm3, %v3414_v58, -inf  ;;  %v4220_v25 = vsel %vm3940_vm3, %v3421_v24, -inf }
 0x2fa   :  { %v1667_v56 = vrot.slane %v1653_v4, %v11854_v44  ;;  %v1668_v31 = vcombine.high %v1660_v47, %v1660_v47  ;;  %v3428_v29 = vmax.f32 %v3426_v28, %v3427_v7  ;;  %v3435_v16 = vmax.f32 %v3433_v27, %v3434_v49 }
 0x2fb   :  { %v4219_v26 = vmax.f32 %v4217_v62, %v4218_v6  ;;  %v4222_v34 = vmax.f32 %v4220_v25, %v4221_v12  ;;  %v3548_v50 = vsel %vm2147_vm2, %v1660_v47, -inf  ;;  %v1633_v48 = vrot.slane %v1619_v63, %v11854_v44 }
 0x2fc   :  { %v1669_v57 = vcombine.high %v1667_v56, %v1667_v56  ;;  %v3555_v45 = vsel %vm2147_vm2, %v1668_v31, -inf  ;;  %v3562_v0 = vsel %vm2147_vm2, %v1667_v56, -inf  ;;  %v4223_v13 = vsel %vm3940_vm3, %v3428_v29, -inf }
 0x2fd   :  { %v4226_v23 = vsel %vm3940_vm3, %v3435_v16, -inf  ;;  %v4590_v5 = vsel %vm4509_vm7, %v4219_v26, %v4589_v43  ;;  %v3549_v40 = vrot.slane %v3548_v50, 4  ;;  %v4225_v54 = vmax.f32 %v4223_v13, %v4224_v3 }
 0x2fe   :  { %v4228_v53 = vmax.f32 %v4226_v23, %v4227_v1  ;;  %v4591_v37 = vsel %vm4511_vm8, %v4222_v34, %v4590_v5  ;;  %v3556_v6 = vrot.slane %v3555_v45, 4  ;;  %v3563_v36 = vrot.slane %v3562_v0, 4 }
 0x2ff   :  { %v3550_v12 = vmax.f32 %v3548_v50, %v3549_v40  ;;  %v3569_v30 = vsel %vm2147_vm2, %v1669_v57, -inf  ;;  %v4592_v28 = vsel %vm4513_vm9, %v4225_v54, %v4591_v37  ;;  %v1634_v58 = vcombine.high %v1626_v35, %v1626_v35 }
 0x300   :  { %v3557_v27 = vmax.f32 %v3555_v45, %v3556_v6  ;;  %v3570_v61 = vrot.slane %v3569_v30, 4  ;;  %v4593_v24 = vsel %vm4515_vm10, %v4228_v53, %v4592_v28  ;;  %v3564_v4 = vmax.f32 %v3562_v0, %v3563_v36 }
 0x301   :  { %v3551_v43 = vrot.slane %v3550_v12, 2  ;;  %v1635_v3 = vcombine.high %v1633_v48, %v1633_v48  ;;  %4650 = vst.msk [vmem:[#allocation2 + $0xe1] sm:$0xff] %vm3940_vm3, %v4593_v24  ;;  %v3492_v7 = vsel %vm2147_vm2, %v1626_v35, -inf  ;;  %v3499_v49 = vsel %vm2147_vm2, %v1634_v58, -inf }
 0x302   :  { %v3558_v1 = vrot.slane %v3557_v27, 2  ;;  %v3571_v47 = vmax.f32 %v3569_v30, %v3570_v61  ;;  %v3565_v63 = vrot.slane %v3564_v4, 2  ;;  %v3493_v25 = vrot.slane %v3492_v7, 4 }
 0x303   :  { %v3552_v62 = vmax.f32 %v3550_v12, %v3551_v43  ;;  %v3500_v56 = vrot.slane %v3499_v49, 4  ;;  %v3506_v16 = vsel %vm2147_vm2, %v1633_v48, -inf  ;;  %v3513_v26 = vsel %vm2147_vm2, %v1635_v3, -inf }
 0x304   :  { %v3559_v31 = vmax.f32 %v3557_v27, %v3558_v1  ;;  %v3572_v29 = vrot.slane %v3571_v47, 2  ;;  %v3566_v57 = vmax.f32 %v3564_v4, %v3565_v63  ;;  %v3494_v50 = vmax.f32 %v3492_v7, %v3493_v25  ;;  %v13180_v7 = vpop.f32.mrb[60].mxu0 }
 0x305   :  { %v3553_v34 = vrot.slane %v3552_v62, 1  ;;  %v3501_v45 = vmax.f32 %v3499_v49, %v3500_v56  ;;  %v3507_v23 = vrot.slane %v3506_v16, 4  ;;  %v3514_v35 = vrot.slane %v3513_v26, 4  ;;  %v13185_v56 = vpop.f32.mrb[61].mxu0 }
 0x306   :  { %v3560_v0 = vrot.slane %v3559_v31, 1  ;;  %v3573_v13 = vmax.f32 %v3571_v47, %v3572_v29  ;;  %v3567_v40 = vrot.slane %v3566_v57, 1  ;;  %v3495_v54 = vrot.slane %v3494_v50, 2 }
 0x307   :  { %v3554_v5 = vmax.f32 %v3552_v62, %v3553_v34  ;;  %v3502_v53 = vrot.slane %v3501_v45, 2  ;;  %v3508_v12 = vmax.f32 %v3506_v16, %v3507_v23  ;;  %v3515_v36 = vmax.f32 %v3513_v26, %v3514_v35 }
 0x308   :  { %v3561_v37 = vmax.f32 %v3559_v31, %v3560_v0  ;;  %v3574_v6 = vrot.slane %v3573_v13, 1  ;;  %v3568_v30 = vmax.f32 %v3566_v57, %v3567_v40  ;;  %v3496_v28 = vmax.f32 %v3494_v50, %v3495_v54 }
 0x309   :  { %v4230_v48 = vsel %vm3940_vm3, %v3554_v5, -inf  ;;  %v3503_v27 = vmax.f32 %v3501_v45, %v3502_v53  ;;  %v3509_v24 = vrot.slane %v3508_v12, 2  ;;  %v3516_v43 = vrot.slane %v3515_v36, 2 }
 0x30a   :  { %v3575_v61 = vmax.f32 %v3573_v13, %v3574_v6  ;;  %v4233_v58 = vsel %vm3940_vm3, %v3561_v37, -inf  ;;  %v4236_v4 = vsel %vm3940_vm3, %v3568_v30, -inf  ;;  %v3497_v3 = vrot.slane %v3496_v28, 1 }
 0x30b   :  { %v3504_v1 = vrot.slane %v3503_v27, 1  ;;  %v1670_v47 = vcombine.high %v13152_v18, %v13152_v18  ;;  %v3510_v62 = vmax.f32 %v3508_v12, %v3509_v24  ;;  %v3517_v63 = vmax.f32 %v3515_v36, %v3516_v43 }
 0x30c   :  { %v4239_v49 = vsel %vm3940_vm3, %v3575_v61, -inf  ;;  %v1677_v25 = vrot.slane %v13152_v18, %v11854_v44  ;;  %v3498_v31 = vmax.f32 %v3496_v28, %v3497_v3  ;;  %v724_v26 = vmax.f32 %v13150_v15, 0.0  ;;  %v13192_v18 = vpop.f32.mrb[62].mxu0  ;;  %v4667_v61 = vld [vmem:[#allocation2 + $0x60] sm:$0xff] }
 0x30d   :  { %v3505_v29 = vmax.f32 %v3503_v27, %v3504_v1  ;;  %v1684_v16 = vrot.slane %v1670_v47, %v11854_v44  ;;  %v3511_v34 = vrot.slane %v3510_v62, 1  ;;  %v3518_v57 = vrot.slane %v3517_v63, 1 }
 0x30e   :  { %v1685_v50 = vcombine.high %v1677_v25, %v1677_v25  ;;  %v3576_v45 = vsel %vm2147_vm2, %v1677_v25, -inf  ;;  %v4229_v0 = vsel %vm3940_vm3, %v3498_v31, -inf  ;;  %v1636_v47 = vcombine.high %v724_v26, %v724_v26 }
 0x30f   :  { %v4232_v13 = vsel %vm3940_vm3, %v3505_v29, -inf  ;;  %v1686_v23 = vcombine.high %v1684_v16, %v1684_v16  ;;  %v3577_v35 = vrot.slane %v3576_v45, 4  ;;  %v3512_v5 = vmax.f32 %v3510_v62, %v3511_v34 }
 0x310   :  { %v3519_v40 = vmax.f32 %v3517_v63, %v3518_v57  ;;  %v4231_v54 = vmax.f32 %v4229_v0, %v4230_v48  ;;  %v4234_v53 = vmax.f32 %v4232_v13, %v4233_v58  ;;  %v3583_v15 = vsel %vm2147_vm2, %v1685_v50, -inf }
 0x311   :  { %v3578_v37 = vmax.f32 %v3576_v45, %v3577_v35  ;;  %v3590_v6 = vsel %vm2147_vm2, %v1684_v16, -inf  ;;  %v3597_v12 = vsel %vm2147_vm2, %v1686_v23, -inf  ;;  %v4235_v36 = vsel %vm3940_vm3, %v3512_v5, -inf  ;;  %v13204_v16 = vpop.f32.mrb[63].mxu0 }
 0x312   :  { %v4238_v30 = vsel %vm3940_vm3, %v3519_v40, -inf  ;;  %v4594_v28 = vsel %vm4503_vm4, %v4234_v53, %v4231_v54  ;;  %v3584_v27 = vrot.slane %v3583_v15, 4  ;;  %v4237_v24 = vmax.f32 %v4235_v36, %v4236_v4 }
 0x313   :  { %v4240_v43 = vmax.f32 %v4238_v30, %v4239_v49  ;;  %v3579_v3 = vrot.slane %v3578_v37, 2  ;;  %v3591_v48 = vrot.slane %v3590_v6, 4  ;;  %v3598_v1 = vrot.slane %v3597_v12, 4  ;;  %v4668_v30 = vld [vmem:[#allocation2 + $0x68] sm:$0x3] }
 0x314   :  { %v3585_v58 = vmax.f32 %v3583_v15, %v3584_v27  ;;  %v1643_v62 = vrot.slane %v724_v26, %v11854_v44  ;;  %v4595_v63 = vsel %vm4505_vm5, %v4237_v24, %v4594_v28  ;;  %v13202_v29 = vpack.c.bf16 %v4667_v61, %v4667_v61 }
 0x315   :  { %v3580_v25 = vmax.f32 %v3578_v37, %v3579_v3  ;;  %v3592_v31 = vmax.f32 %v3590_v6, %v3591_v48  ;;  %v3599_v57 = vmax.f32 %v3597_v12, %v3598_v1  ;;  %v1650_v4 = vrot.slane %v1636_v47, %v11854_v44  ;;  %v4669_v1 = vld [vmem:[#allocation2 + $0x70] sm:$0xff] }
 0x316   :  { %v3586_v34 = vrot.slane %v3585_v58, 2  ;;  %v1651_v49 = vcombine.high %v1643_v62, %v1643_v62  ;;  %v3520_v0 = vsel %vm2147_vm2, %v1643_v62, -inf  ;;  %v13209_v13 = vsel %vm4507_vm6, %v4240_v43, %v4595_v63 }
 0x317   :  { %v3581_v50 = vrot.slane %v3580_v25, 1  ;;  %v3593_v45 = vrot.slane %v3592_v31, 2  ;;  %v3600_v23 = vrot.slane %v3599_v57, 2  ;;  %v1652_v35 = vcombine.high %v1650_v4, %v1650_v4 }
 0x318   :  { %v3587_v26 = vmax.f32 %v3585_v58, %v3586_v34  ;;  %v3521_v5 = vrot.slane %v3520_v0, 4  ;;  %v3527_v53 = vsel %vm2147_vm2, %v1651_v49, -inf  ;;  %v3534_v37 = vsel %vm2147_vm2, %v1650_v4, -inf }
 0x319   :  { %v3582_v40 = vmax.f32 %v3580_v25, %v3581_v50  ;;  %v3594_v54 = vmax.f32 %v3592_v31, %v3593_v45  ;;  %v3601_v6 = vmax.f32 %v3599_v57, %v3600_v23  ;;  %v3528_v36 = vrot.slane %v3527_v53, 4  ;;  %v4670_v25 = vld [vmem:[#allocation2 + $0x78] sm:$0x3] }
 0x31a   :  { %v3588_v15 = vrot.slane %v3587_v26, 1  ;;  %v3522_v12 = vmax.f32 %v3520_v0, %v3521_v5  ;;  %v3535_v61 = vrot.slane %v3534_v37, 4  ;;  %v3541_v24 = vsel %vm2147_vm2, %v1652_v35, -inf }
 0x31b   :  { %v3595_v28 = vrot.slane %v3594_v54, 1  ;;  %v4242_v27 = vsel %vm3940_vm3, %v3582_v40, -inf  ;;  %v3602_v3 = vrot.slane %v3601_v6, 1  ;;  %v3529_v58 = vmax.f32 %v3527_v53, %v3528_v36 }
 0x31c   :  { %v3589_v43 = vmax.f32 %v3587_v26, %v3588_v15  ;;  %v3523_v48 = vrot.slane %v3522_v12, 2  ;;  %v3536_v62 = vmax.f32 %v3534_v37, %v3535_v61  ;;  %v3542_v63 = vrot.slane %v3541_v24, 4 }
 0x31d   :  { %v3596_v47 = vmax.f32 %v3594_v54, %v3595_v28  ;;  %v13215_v31 = vpack.c.bf16 %v4668_v30, %v4668_v30  ;;  %v3603_v34 = vmax.f32 %v3601_v6, %v3602_v3  ;;  %v3530_v49 = vrot.slane %v3529_v58, 2 }
 0x31e   :  { %v4245_v57 = vsel %vm3940_vm3, %v3589_v43, -inf  ;;  %v3524_v4 = vmax.f32 %v3522_v12, %v3523_v48  ;;  %v3537_v45 = vrot.slane %v3536_v62, 2  ;;  %v3543_v0 = vmax.f32 %v3541_v24, %v3542_v63 }
 0x31f   :  { %v4248_v50 = vsel %vm3940_vm3, %v3596_v47, -inf  ;;  %v13219_v26 = vpack.c.bf16 %v4669_v1, %v4669_v1  ;;  %v4251_v23 = vsel %vm3940_vm3, %v3603_v34, -inf  ;;  %v3531_v5 = vmax.f32 %v3529_v58, %v3530_v49 }
 0x320   :  { %v3525_v35 = vrot.slane %v3524_v4, 1  ;;  %v13222_v40 = vpack.c.bf16 %v4670_v25, %v4670_v25  ;;  %v3538_v54 = vmax.f32 %v3536_v62, %v3537_v45  ;;  %v3544_v53 = vrot.slane %v3543_v0, 2  ;;  %v13235_v45 = vld [vmem:[%s15197_s2] ss:$0 sm:$0xff] }
 0x321   :  { %15234 = vst [vmem:[#allocation13_spill] sm:$0xff] %v13219_v26  ;;  %v4891_v37 = vshrl.u32 %v13202_v29, 16  ;;  %v4894_v15 = vshll.u32 %v13202_v29, 16  ;;  %v3532_v12 = vrot.slane %v3531_v5, 1  ;;  %v4900_v36 = vshll.u32 %v13215_v31, 16 }
 0x322   :  { %15235 = vst [vmem:[#allocation14_spill] sm:$0xff] %v13222_v40  ;;  %v3526_v6 = vmax.f32 %v3524_v4, %v3525_v35  ;;  %v4905_v30 = vshrl.u32 %v13219_v26, 16  ;;  %v3539_v28 = vrot.slane %v3538_v54, 1  ;;  %v3545_v61 = vmax.f32 %v3543_v0, %v3544_v53 }
 0x323   :  { %v4893_v24 = vrot.slane %v4891_v37, 4  ;;  %v4896_v43 = vrot.slane %v4894_v15, 5  ;;  %v3533_v3 = vmax.f32 %v3531_v5, %v3532_v12  ;;  %v4902_v58 = vrot.slane %v4900_v36, 5 }
 0x324   :  { %v4241_v48 = vsel %vm3940_vm3, %v3526_v6, -inf  ;;  %v4907_v1 = vrot.slane %v4905_v30, 4  ;;  %v3540_v47 = vmax.f32 %v3538_v54, %v3539_v28  ;;  %v3546_v62 = vrot.slane %v3545_v61, 1 }
 0x325   :  { %v4243_v63 = vmax.f32 %v4241_v48, %v4242_v27  ;;  %v4897_v25 = vor.u32 %v4896_v43, %v4893_v24  ;;  %v4244_v34 = vsel %vm3940_vm3, %v3533_v3, -inf  ;;  %v4908_v4 = vshll.u32 %v13219_v26, 16 }
 0x326   :  { %v4914_v49 = vshll.u32 %v13222_v40, 16  ;;  %v637_v0 = vadd.f32 %v13235_v45, %v13009_v60  ;;  %v3547_v35 = vmax.f32 %v3545_v61, %v3546_v62  ;;  %v4246_v5 = vmax.f32 %v4244_v34, %v4245_v57 }
 0x327   :  { %v4247_v54 = vsel %vm3940_vm3, %v3540_v47, -inf  ;;  %v4597_v27 = vsel %vm4509_vm7, %v4243_v63, %v13209_v13  ;;  %v4898_v37 = vrot.slane %v4897_v25, 4  ;;  %v4910_v15 = vrot.slane %v4908_v4, 5 }
 0x328   :  { %v4249_v53 = vmax.f32 %v4247_v54, %v4248_v50  ;;  %v4916_v6 = vrot.slane %v4914_v49, 5  ;;  %v4250_v12 = vsel %vm3940_vm3, %v3547_v35, -inf  ;;  %v4598_v36 = vsel %vm4511_vm8, %v4246_v5, %v4597_v27 }
 0x329   :  { %v729_v30 = vmax.f32 %v637_v0, 0.0  ;;  %v629_v28 = vadd.f32 %v13235_v45, %v13016_v51  ;;  %v4252_v60 = vmax.f32 %v4250_v12, %v4251_v23  ;;  %v13249_v61 = vsel %vm12680_vm0, %v4898_v37, %v4902_v58 }
 0x32a   :  { %v4599_v57 = vsel %vm4513_vm9, %v4249_v53, %v4598_v36  ;;  %15236 = vst [vmem:[#allocation15_spill] sm:$0xff] %v13249_v61  ;;  %v4911_v13 = vor.u32 %v4910_v15, %v4907_v1  ;;  %v640_v3 = vadd.f32 %v13235_v45, %v13018_v52  ;;  %v13257_v51 = vadd.f32 %v13235_v45, %v13020_v32 }
 0x32b   :  { %v1721_v50 = vcombine.high %v729_v30, %v729_v30  ;;  %v1728_v24 = vrot.slane %v729_v30, %v11854_v44  ;;  %v727_v43 = vmax.f32 %v629_v28, 0.0  ;;  %v4600_v48 = vsel %vm4515_vm10, %v4252_v60, %v4599_v57 }
 0x32c   :  { %v4912_v47 = vrot.slane %v4911_v13, 4  ;;  %v13261_v23 = vadd.f32 %v13235_v45, %v13059_v42  ;;  %4651 = vst.msk [vmem:[#allocation2 + $0xf1] sm:$0xff] %vm3940_vm3, %v4600_v48  ;;  %v13271_v34 = vmax.f32 %v640_v3, 0.0 }
 0x32d   :  { %v1735_v58 = vrot.slane %v1721_v50, %v11854_v44  ;;  %v1736_v1 = vcombine.high %v1728_v24, %v1728_v24  ;;  %v3660_v62 = vsel %vm2147_vm2, %v1728_v24, -inf  ;;  %v1687_v63 = vcombine.high %v727_v43, %v727_v43 }
 0x32e   :  { %v13268_v52 = vsel %vm12680_vm0, %v4912_v47, %v4916_v6  ;;  %v3661_v25 = vrot.slane %v3660_v62, 4  ;;  %v1694_v32 = vrot.slane %v727_v43, %v11854_v44  ;;  %v1738_v6 = vcombine.high %v13271_v34, %v13271_v34 }
 0x32f   :  { %15237 = vst [vmem:[#allocation16_spill] sm:$0xff] %v13268_v52  ;;  %v13275_v42 = vcombine.low %v13249_v61, %v13268_v52  ;;  %v1737_v4 = vcombine.high %v1735_v58, %v1735_v58  ;;  %v3667_v49 = vsel %vm2147_vm2, %v1736_v1, -inf  ;;  %v3674_v0 = vsel %vm2147_vm2, %v1735_v58, -inf }
 0x330   :  { %v3662_v35 = vmax.f32 %v3660_v62, %v3661_v25  ;;  %v3668_v5 = vrot.slane %v3667_v49, 4  ;;  %v3675_v54 = vrot.slane %v3674_v0, 4  ;;  %v1701_v27 = vrot.slane %v1687_v63, %v11854_v44 }
 0x331   :  { %15238 = vst [vmem:[#allocation17_spill] sm:$0xff] %v13275_v42  ;;  %10733 = vmatmul.mubr.msk.bf16.gmra.mrb[4].mxu1 %vm3940_vm3, %v13275_v42  ;;  %v3681_v53 = vsel %vm2147_vm2, %v1737_v4, -inf  ;;  %v1702_v37 = vcombine.high %v1694_v32, %v1694_v32  ;;  %v3604_v15 = vsel %vm2147_vm2, %v1694_v32, -inf }
 0x332   :  { %v3663_v12 = vrot.slane %v3662_v35, 2  ;;  %v3669_v36 = vmax.f32 %v3667_v49, %v3668_v5  ;;  %v3676_v30 = vmax.f32 %v3674_v0, %v3675_v54  ;;  %v3682_v28 = vrot.slane %v3681_v53, 4 }
 0x333   :  { %v1703_v60 = vcombine.high %v1701_v27, %v1701_v27  ;;  %v3605_v57 = vrot.slane %v3604_v15, 4  ;;  %v3611_v13 = vsel %vm2147_vm2, %v1702_v37, -inf  ;;  %v3618_v50 = vsel %vm2147_vm2, %v1701_v27, -inf }
 0x334   :  { %v3664_v24 = vmax.f32 %v3662_v35, %v3663_v12  ;;  %v3670_v43 = vrot.slane %v3669_v36, 2  ;;  %v3677_v3 = vrot.slane %v3676_v30, 2  ;;  %v3683_v48 = vmax.f32 %v3681_v53, %v3682_v28 }
 0x335   :  { %v3606_v47 = vmax.f32 %v3604_v15, %v3605_v57  ;;  %v3612_v58 = vrot.slane %v3611_v13, 4  ;;  %v3619_v1 = vrot.slane %v3618_v50, 4  ;;  %v3625_v62 = vsel %vm2147_vm2, %v1703_v60, -inf }
 0x336   :  { %v3665_v63 = vrot.slane %v3664_v24, 1  ;;  %v3671_v25 = vmax.f32 %v3669_v36, %v3670_v43  ;;  %v3678_v32 = vmax.f32 %v3676_v30, %v3677_v3  ;;  %v3684_v4 = vrot.slane %v3683_v48, 2 }
 0x337   :  { %v3607_v49 = vrot.slane %v3606_v47, 2  ;;  %v3613_v0 = vmax.f32 %v3611_v13, %v3612_v58  ;;  %v3620_v5 = vmax.f32 %v3618_v50, %v3619_v1  ;;  %v3626_v54 = vrot.slane %v3625_v62, 4 }
 0x338   :  { %v3666_v37 = vmax.f32 %v3664_v24, %v3665_v63  ;;  %v3672_v42 = vrot.slane %v3671_v25, 1  ;;  %v3679_v27 = vrot.slane %v3678_v32, 1  ;;  %v3685_v35 = vmax.f32 %v3683_v48, %v3684_v4 }
 0x339   :  { %v3608_v12 = vmax.f32 %v3606_v47, %v3607_v49  ;;  %v3614_v52 = vrot.slane %v3613_v0, 2  ;;  %v3621_v53 = vrot.slane %v3620_v5, 2  ;;  %v3627_v15 = vmax.f32 %v3625_v62, %v3626_v54 }
 0x33a   :  { %v3673_v28 = vmax.f32 %v3671_v25, %v3672_v42  ;;  %v3680_v57 = vmax.f32 %v3678_v32, %v3679_v27  ;;  %v3686_v8 = vrot.slane %v3685_v35, 1  ;;  %v4254_v60 = vsel %vm3940_vm3, %v3666_v37, -inf  ;;  %v11449_v32 = vld [vmem:[%s15198_s3 + $0x8] sm:$0xff]  }
 0x33b   :  { %v3609_v36 = vrot.slane %v3608_v12, 1  ;;  %v3615_v30 = vmax.f32 %v3613_v0, %v3614_v52  ;;  %v3622_v43 = vmax.f32 %v3620_v5, %v3621_v53  ;;  %v3628_v3 = vrot.slane %v3627_v15, 2 }
 0x33c   :  { %v3687_v13 = vmax.f32 %v3685_v35, %v3686_v8  ;;  %v4257_v50 = vsel %vm3940_vm3, %v3673_v28, -inf  ;;  %v4260_v24 = vsel %vm3940_vm3, %v3680_v57, -inf  ;;  %v1745_v48 = vrot.slane %v13271_v34, %v11854_v44  ;;  %v11448_v8 = vld [vmem:[%s15198_s3] sm:$0xff]  }
 0x33d   :  { %v3610_v47 = vmax.f32 %v3608_v12, %v3609_v36  ;;  %v3616_v58 = vrot.slane %v3615_v30, 1  ;;  %v3623_v1 = vrot.slane %v3622_v43, 1  ;;  %v3629_v42 = vmax.f32 %v3627_v15, %v3628_v3  ;;  %10744 = vmatprep.subr.bf16.mxu1 %v11448_v8 }
 0x33e   :  { %v4263_v62 = vsel %vm3940_vm3, %v3687_v13, -inf  ;;  %v1752_v63 = vrot.slane %v1738_v6, %v11854_v44  ;;  %v1753_v25 = vcombine.high %v1745_v48, %v1745_v48  ;;  %v3688_v52 = vsel %vm2147_vm2, %v1745_v48, -inf  ;;  %10745 = vmatpush3.bf16.msra.mxu1 %v11448_v8  ;;  %v11450_v13 = vld [vmem:[%s15198_s3 + $0x10] sm:$0xff]  }
 0x33f   :  { %v3617_v34 = vmax.f32 %v3615_v30, %v3616_v58  ;;  %v3624_v4 = vmax.f32 %v3622_v43, %v3623_v1  ;;  %v3630_v49 = vrot.slane %v3629_v42, 1  ;;  %v4253_v0 = vsel %vm3940_vm3, %v3610_v47, -inf  ;;  %10746 = vmatprep.subr.bf16.mxu1 %v11449_v32 }
 0x340   :  { %v4255_v5 = vmax.f32 %v4253_v0, %v4254_v60  ;;  %v1754_v54 = vcombine.high %v1752_v63, %v1752_v63  ;;  %v3689_v37 = vrot.slane %v3688_v52, 4  ;;  %v3695_v6 = vsel %vm2147_vm2, %v1753_v25, -inf }
 0x341   :  { %v3631_v27 = vmax.f32 %v3629_v42, %v3630_v49  ;;  %v4256_v35 = vsel %vm3940_vm3, %v3617_v34, -inf  ;;  %v4259_v12 = vsel %vm3940_vm3, %v3624_v4, -inf  ;;  %v3696_v53 = vrot.slane %v3695_v6, 4 }
 0x342   :  { %v4258_v15 = vmax.f32 %v4256_v35, %v4257_v50  ;;  %v4261_v28 = vmax.f32 %v4259_v12, %v4260_v24  ;;  %v3690_v57 = vmax.f32 %v3688_v52, %v3689_v37  ;;  %v3702_v36 = vsel %vm2147_vm2, %v1752_v63, -inf  ;;  %10747 = vmatpush3.bf16.msra.mxu1 %v11449_v32 }
 0x343   :  { %v4262_v60 = vsel %vm3940_vm3, %v3631_v27, -inf  ;;  %v3697_v30 = vmax.f32 %v3695_v6, %v3696_v53  ;;  %v3703_v43 = vrot.slane %v3702_v36, 4  ;;  %v3709_v3 = vsel %vm2147_vm2, %v1754_v54, -inf  ;;  %10748 = vmatprep.subr.bf16.mxu1 %v11450_v13 }
 0x344   :  { %v4264_v48 = vmax.f32 %v4262_v60, %v4263_v62  ;;  %v4601_v47 = vsel %vm4503_vm4, %v4258_v15, %v4255_v5  ;;  %v3691_v58 = vrot.slane %v3690_v57, 2  ;;  %v3710_v50 = vrot.slane %v3709_v3, 4  ;;  %v11451_v62 = vld [vmem:[%s15198_s3 + $0x18] sm:$0xff]  }
 0x345   :  { %v4602_v24 = vsel %vm4505_vm5, %v4261_v28, %v4601_v47  ;;  %v3698_v1 = vrot.slane %v3697_v30, 2  ;;  %v3704_v42 = vmax.f32 %v3702_v36, %v3703_v43  ;;  %v728_v63 = vmax.f32 %v13257_v51, 0.0 }
 0x346   :  { %v3692_v25 = vmax.f32 %v3690_v57, %v3691_v58  ;;  %v3711_v52 = vmax.f32 %v3709_v3, %v3710_v50  ;;  %v13317_v8 = vsel %vm4507_vm6, %v4264_v48, %v4602_v24  ;;  %v733_v34 = vmax.f32 %v13261_v23, 0.0  ;;  %10749 = vmatpush3.bf16.msra.mxu1 %v11450_v13  ;;  %v11452_v57 = vld [vmem:[%s15198_s3 + $0x40] sm:$0xff]  }
 0x347   :  { %v3699_v4 = vmax.f32 %v3697_v30, %v3698_v1  ;;  %v3705_v49 = vrot.slane %v3704_v42, 2  ;;  %v1704_v0 = vcombine.high %v728_v63, %v728_v63  ;;  %v1711_v5 = vrot.slane %v728_v63, %v11854_v44  ;;  %10750 = vmatprep.subr.bf16.mxu1 %v11451_v62 }
 0x348   :  { %v3693_v54 = vrot.slane %v3692_v25, 1  ;;  %v3712_v51 = vrot.slane %v3711_v52, 2  ;;  %v1789_v32 = vcombine.high %v733_v34, %v733_v34  ;;  %v1796_v37 = vrot.slane %v733_v34, %v11854_v44 }
 0x349   :  { %v3700_v6 = vrot.slane %v3699_v4, 1  ;;  %v3706_v27 = vmax.f32 %v3704_v42, %v3705_v49  ;;  %v1718_v35 = vrot.slane %v1704_v0, %v11854_v44  ;;  %v1719_v23 = vcombine.high %v1711_v5, %v1711_v5 }
 0x34a   :  { %v3694_v12 = vmax.f32 %v3692_v25, %v3693_v54  ;;  %v3713_v53 = vmax.f32 %v3711_v52, %v3712_v51  ;;  %v3632_v15 = vsel %vm2147_vm2, %v1711_v5, -inf  ;;  %v1803_v28 = vrot.slane %v1789_v32, %v11854_v44  ;;  %10751 = vmatpush3.bf16.msra.mxu1 %v11451_v62 }
 0x34b   :  { %v3701_v36 = vmax.f32 %v3699_v4, %v3700_v6  ;;  %v3707_v60 = vrot.slane %v3706_v27, 1  ;;  %v1720_v30 = vcombine.high %v1718_v35, %v1718_v35  ;;  %v3633_v43 = vrot.slane %v3632_v15, 4  ;;  %10768 = vmatprep.subr.bf16.mxu1 %v11452_v57 }
 0x34c   :  { %v3714_v3 = vrot.slane %v3713_v53, 1  ;;  %v4266_v48 = vsel %vm3940_vm3, %v3694_v12, -inf  ;;  %v3639_v13 = vsel %vm2147_vm2, %v1719_v23, -inf  ;;  %v3646_v47 = vsel %vm2147_vm2, %v1718_v35, -inf }
 0x34d   :  { %v3708_v58 = vmax.f32 %v3706_v27, %v3707_v60  ;;  %v13335_v50 = vsel %vm3940_vm3, %v3701_v36, -inf  ;;  %v3634_v24 = vmax.f32 %v3632_v15, %v3633_v43  ;;  %v3640_v1 = vrot.slane %v3639_v13, 4 }
 0x34e   :  { %v3715_v42 = vmax.f32 %v3713_v53, %v3714_v3  ;;  %v3647_v63 = vrot.slane %v3646_v47, 4  ;;  %v3653_v25 = vsel %vm2147_vm2, %v1720_v30, -inf  ;;  %v1804_v52 = vcombine.high %v1796_v37, %v1796_v37 }
 0x34f   :  { %v4272_v34 = vsel %vm3940_vm3, %v3708_v58, -inf  ;;  %v3635_v4 = vrot.slane %v3634_v24, 2  ;;  %v3641_v49 = vmax.f32 %v3639_v13, %v3640_v1  ;;  %v3654_v0 = vrot.slane %v3653_v25, 4 }
 0x350   :  { %v4275_v5 = vsel %vm3940_vm3, %v3715_v42, -inf  ;;  %v3648_v54 = vmax.f32 %v3646_v47, %v3647_v63  ;;  %v1805_v51 = vcombine.high %v1803_v28, %v1803_v28  ;;  %v3772_v32 = vsel %vm2147_vm2, %v1796_v37, -inf }
 0x351   :  { %v3636_v6 = vmax.f32 %v3634_v24, %v3635_v4  ;;  %v3642_v27 = vrot.slane %v3641_v49, 2  ;;  %v3655_v62 = vmax.f32 %v3653_v25, %v3654_v0  ;;  %v3773_v35 = vrot.slane %v3772_v32, 4 }
 0x352   :  { %v3649_v23 = vrot.slane %v3648_v54, 2  ;;  %v3779_v12 = vsel %vm2147_vm2, %v1804_v52, -inf  ;;  %v3786_v53 = vsel %vm2147_vm2, %v1803_v28, -inf  ;;  %v3793_v15 = vsel %vm2147_vm2, %v1805_v51, -inf }
 0x353   :  { %v3637_v57 = vrot.slane %v3636_v6, 1  ;;  %v3643_v36 = vmax.f32 %v3641_v49, %v3642_v27  ;;  %v3656_v60 = vrot.slane %v3655_v62, 2  ;;  %v3774_v30 = vmax.f32 %v3772_v32, %v3773_v35 }
 0x354   :  { %v3650_v43 = vmax.f32 %v3648_v54, %v3649_v23  ;;  %v3780_v3 = vrot.slane %v3779_v12, 4  ;;  %v3787_v13 = vrot.slane %v3786_v53, 4  ;;  %v3794_v47 = vrot.slane %v3793_v15, 4 }
 0x355   :  { %v3638_v37 = vmax.f32 %v3636_v6, %v3637_v57  ;;  %v3644_v58 = vrot.slane %v3643_v36, 1  ;;  %v3657_v24 = vmax.f32 %v3655_v62, %v3656_v60  ;;  %v3775_v1 = vrot.slane %v3774_v30, 2 }
 0x356   :  { %v3651_v42 = vrot.slane %v3650_v43, 1  ;;  %v3781_v63 = vmax.f32 %v3779_v12, %v3780_v3  ;;  %v3788_v25 = vmax.f32 %v3786_v53, %v3787_v13  ;;  %v3795_v52 = vmax.f32 %v3793_v15, %v3794_v47 }
 0x357   :  { %v3645_v4 = vmax.f32 %v3643_v36, %v3644_v58  ;;  %v3658_v28 = vrot.slane %v3657_v24, 1  ;;  %v4265_v0 = vsel %vm3940_vm3, %v3638_v37, -inf  ;;  %v3776_v51 = vmax.f32 %v3774_v30, %v3775_v1  ;;  %v13352_v37 = vld [vmem:[#allocation2 + $0xa0] sm:$0xff] }
 0x358   :  { %v3652_v49 = vmax.f32 %v3650_v43, %v3651_v42  ;;  %v4267_v27 = vmax.f32 %v4265_v0, %v4266_v48  ;;  %v3782_v32 = vrot.slane %v3781_v63, 2  ;;  %v3789_v54 = vrot.slane %v3788_v25, 2 }
 0x359   :  { %v3659_v35 = vmax.f32 %v3657_v24, %v3658_v28  ;;  %v4268_v23 = vsel %vm3940_vm3, %v3645_v4, -inf  ;;  %v3777_v6 = vrot.slane %v3776_v51, 1  ;;  %v3796_v57 = vrot.slane %v3795_v52, 2  ;;  %v13366_v28 = vld [vmem:[#allocation2 + $0xb0] sm:$0xff] }
 0x35a   :  { %v4270_v62 = vmax.f32 %v4268_v23, %v13335_v50  ;;  %v4271_v12 = vsel %vm3940_vm3, %v3652_v49, -inf  ;;  %v4604_v53 = vsel %vm4509_vm7, %v4267_v27, %v13317_v8  ;;  %v3783_v15 = vmax.f32 %v3781_v63, %v3782_v32  ;;  %15239 = vst [vmem:[#allocation18_spill] sm:$0xff] %v13366_v28 }
 0x35b   :  { %v4273_v36 = vmax.f32 %v4271_v12, %v4272_v34  ;;  %v4274_v60 = vsel %vm3940_vm3, %v3659_v35, -inf  ;;  %v3778_v30 = vmax.f32 %v3776_v51, %v3777_v6  ;;  %v3790_v48 = vmax.f32 %v3788_v25, %v3789_v54  ;;  %v4676_v34 = vld [vmem:[#allocation2 + $0xa8] sm:$0x3] }
 0x35c   :  { %v4276_v43 = vmax.f32 %v4274_v60, %v4275_v5  ;;  %v4605_v3 = vsel %vm4511_vm8, %v4270_v62, %v4604_v53  ;;  %v3784_v13 = vrot.slane %v3783_v15, 1  ;;  %v3797_v47 = vmax.f32 %v3795_v52, %v3796_v57 }
 0x35d   :  { %v4606_v50 = vsel %vm4513_vm9, %v4273_v36, %v4605_v3  ;;  %v3791_v58 = vrot.slane %v3790_v48, 1  ;;  %v13356_v24 = vsel %vm3940_vm3, %v3778_v30, -inf  ;;  %v645_v8 = vadd.f32 %v13235_v45, %v13065_v39 }
 0x35e   :  { %v4607_v1 = vsel %vm4515_vm10, %v4276_v43, %v4606_v50  ;;  %v3785_v42 = vmax.f32 %v3783_v15, %v3784_v13  ;;  %v3798_v5 = vrot.slane %v3797_v47, 1  ;;  %v656_v63 = vadd.f32 %v13235_v45, %v13106_v22 }
 0x35f   :  { %4652 = vst.msk [vmem:[#allocation2 + $0x101] sm:$0xff] %vm3940_vm3, %v4607_v1  ;;  %v3792_v25 = vmax.f32 %v3790_v48, %v3791_v58  ;;  %v731_v52 = vmax.f32 %v645_v8, 0.0  ;;  %v648_v4 = vadd.f32 %v13235_v45, %v13119_v9  ;;  %v13370_v39 = vpack.c.bf16 %v13352_v37, %v13352_v37 }
 0x360   :  { %v3799_v0 = vmax.f32 %v3797_v47, %v3798_v5  ;;  %v13373_v51 = vsel %vm3940_vm3, %v3785_v42, -inf  ;;  %v734_v49 = vmax.f32 %v656_v63, 0.0  ;;  %v13375_v27 = vpack.c.bf16 %v4676_v34, %v4676_v34 }
 0x361   :  { %v13378_v22 = vsel %vm3940_vm3, %v3792_v25, -inf  ;;  %v1755_v32 = vcombine.high %v731_v52, %v731_v52  ;;  %v1762_v54 = vrot.slane %v731_v52, %v11854_v44  ;;  %v13381_v9 = vmax.f32 %v648_v4, 0.0 }
 0x362   :  { %v13384_v35 = vsel %vm3940_vm3, %v3799_v0, -inf  ;;  %v1806_v23 = vcombine.high %v734_v49, %v734_v49  ;;  %v1813_v6 = vrot.slane %v734_v49, %v11854_v44  ;;  %v13389_v57 = vpack.c.bf16 %v13366_v28, %v13366_v28 }
 0x363   :  { %v1769_v62 = vrot.slane %v1755_v32, %v11854_v44  ;;  %v1770_v12 = vcombine.high %v1762_v54, %v1762_v54  ;;  %v3716_v53 = vsel %vm2147_vm2, %v1762_v54, -inf }
 0x364   :  { %v3717_v36 = vrot.slane %v3716_v53, 4  ;;  %v1820_v60 = vrot.slane %v1806_v23, %v11854_v44  ;;  %v1821_v30 = vcombine.high %v1813_v6, %v1813_v6  ;;  %v3800_v48 = vsel %vm2147_vm2, %v1813_v6, -inf }
 0x365   :  { %v1771_v43 = vcombine.high %v1769_v62, %v1769_v62  ;;  %v3723_v3 = vsel %vm2147_vm2, %v1770_v12, -inf  ;;  %v3730_v13 = vsel %vm2147_vm2, %v1769_v62, -inf  ;;  %v3801_v47 = vrot.slane %v3800_v48, 4 }
 0x366   :  { %v3718_v50 = vmax.f32 %v3716_v53, %v3717_v36  ;;  %v3724_v58 = vrot.slane %v3723_v3, 4  ;;  %v3731_v8 = vrot.slane %v3730_v13, 4  ;;  %v1822_v34 = vcombine.high %v1820_v60, %v1820_v60 }
 0x367   :  { %v3737_v1 = vsel %vm2147_vm2, %v1771_v43, -inf  ;;  %v3802_v42 = vmax.f32 %v3800_v48, %v3801_v47  ;;  %v3807_v5 = vsel %vm2147_vm2, %v1821_v30, -inf  ;;  %v3814_v63 = vsel %vm2147_vm2, %v1820_v60, -inf }
 0x368   :  { %v3719_v25 = vrot.slane %v3718_v50, 2  ;;  %v3725_v52 = vmax.f32 %v3723_v3, %v3724_v58  ;;  %v3732_v4 = vmax.f32 %v3730_v13, %v3731_v8  ;;  %v3738_v0 = vrot.slane %v3737_v1, 4 }
 0x369   :  { %v3803_v49 = vrot.slane %v3802_v42, 2  ;;  %v3808_v32 = vrot.slane %v3807_v5, 4  ;;  %v3815_v54 = vrot.slane %v3814_v63, 4  ;;  %v3821_v23 = vsel %vm2147_vm2, %v1822_v34, -inf }
 0x36a   :  { %v3720_v6 = vmax.f32 %v3718_v50, %v3719_v25  ;;  %v3726_v62 = vrot.slane %v3725_v52, 2  ;;  %v3733_v12 = vrot.slane %v3732_v4, 2  ;;  %v3739_v53 = vmax.f32 %v3737_v1, %v3738_v0 }
 0x36b   :  { %v3804_v36 = vmax.f32 %v3802_v42, %v3803_v49  ;;  %v3809_v43 = vmax.f32 %v3807_v5, %v3808_v32  ;;  %v3816_v48 = vmax.f32 %v3814_v63, %v3815_v54  ;;  %v3822_v47 = vrot.slane %v3821_v23, 4 }
 0x36c   :  { %v3721_v30 = vrot.slane %v3720_v6, 1  ;;  %v3727_v15 = vmax.f32 %v3725_v52, %v3726_v62  ;;  %v3734_v60 = vmax.f32 %v3732_v4, %v3733_v12  ;;  %v3740_v61 = vrot.slane %v3739_v53, 2 }
 0x36d   :  { %v3805_v3 = vrot.slane %v3804_v36, 1  ;;  %v3810_v13 = vrot.slane %v3809_v43, 2  ;;  %v3817_v58 = vrot.slane %v3816_v48, 2  ;;  %v3823_v8 = vmax.f32 %v3821_v23, %v3822_v47 }
 0x36e   :  { %v3722_v46 = vmax.f32 %v3720_v6, %v3721_v30  ;;  %v3728_v40 = vrot.slane %v3727_v15, 1  ;;  %v3735_v26 = vrot.slane %v3734_v60, 1  ;;  %v3741_v34 = vmax.f32 %v3739_v53, %v3740_v61 }
 0x36f   :  { %v3806_v50 = vmax.f32 %v3804_v36, %v3805_v3  ;;  %v3811_v25 = vmax.f32 %v3809_v43, %v3810_v13  ;;  %v3818_v28 = vmax.f32 %v3816_v48, %v3817_v58  ;;  %v3824_v1 = vrot.slane %v3823_v8, 2  ;;  %v4678_v43 = vld [vmem:[#allocation2 + $0xb8] sm:$0x3] }
 0x370   :  { %v3729_v42 = vmax.f32 %v3727_v15, %v3728_v40  ;;  %v3736_v5 = vmax.f32 %v3734_v60, %v3735_v26  ;;  %v3742_v63 = vrot.slane %v3741_v34, 1  ;;  %v4277_v0 = vsel %vm3940_vm3, %v3722_v46, -inf }
 0x371   :  { %v4279_v52 = vmax.f32 %v4277_v0, %v13356_v24  ;;  %v3812_v4 = vrot.slane %v3811_v25, 1  ;;  %v3819_v49 = vrot.slane %v3818_v28, 1  ;;  %v3825_v32 = vmax.f32 %v3823_v8, %v3824_v1 }
 0x372   :  { %v3743_v54 = vmax.f32 %v3741_v34, %v3742_v63  ;;  %v4280_v23 = vsel %vm3940_vm3, %v3729_v42, -inf  ;;  %v4283_v6 = vsel %vm3940_vm3, %v3736_v5, -inf  ;;  %v13408_v61 = vsel %vm3940_vm3, %v3806_v50, -inf }
 0x373   :  { %v4282_v62 = vmax.f32 %v4280_v23, %v13373_v51  ;;  %v4285_v26 = vmax.f32 %v4283_v6, %v13378_v22  ;;  %v3813_v40 = vmax.f32 %v3811_v25, %v3812_v4  ;;  %v3820_v15 = vmax.f32 %v3818_v28, %v3819_v49 }
 0x374   :  { %v4286_v46 = vsel %vm3940_vm3, %v3743_v54, -inf  ;;  %v3826_v24 = vrot.slane %v3825_v32, 1  ;;  %v1779_v12 = vrot.slane %v13381_v9, %v11854_v44  ;;  %v15240_v53 = vcombine.high %v13381_v9, %v13381_v9 }
 0x375   :  { %v4288_v48 = vmax.f32 %v4286_v46, %v13384_v35  ;;  %v4608_v51 = vsel %vm4503_vm4, %v4282_v62, %v4279_v52  ;;  %v13422_v22 = vsel %vm3940_vm3, %v3813_v40, -inf  ;;  %v13425_v28 = vsel %vm3940_vm3, %v3820_v15, -inf }
 0x376   :  { %v1786_v36 = vrot.slane %v15240_v53, %v11854_v44  ;;  %v4609_v47 = vsel %vm4505_vm5, %v4285_v26, %v4608_v51  ;;  %v3827_v30 = vmax.f32 %v3825_v32, %v3826_v24  ;;  %v1787_v60 = vcombine.high %v1779_v12, %v1779_v12 }
 0x377   :  { %v3744_v13 = vsel %vm2147_vm2, %v1779_v12, -inf  ;;  %v13431_v58 = vsel %vm4507_vm6, %v4288_v48, %v4609_v47  ;;  %v13433_v35 = vpack.c.bf16 %v4678_v43, %v4678_v43  ;;  %v4919_v5 = vshrl.u32 %v13370_v39, 16 }
 0x378   :  { %v1788_v3 = vcombine.high %v1786_v36, %v1786_v36  ;;  %v3758_v9 = vsel %vm2147_vm2, %v1786_v36, -inf  ;;  %v13436_v8 = vsel %vm3940_vm3, %v3827_v30, -inf  ;;  %v3745_v34 = vrot.slane %v3744_v13, 4 }
 0x379   :  { %v3751_v50 = vsel %vm2147_vm2, %v1787_v60, -inf  ;;  %v3759_v25 = vrot.slane %v3758_v9, 4  ;;  %v4922_v63 = vshll.u32 %v13370_v39, 16  ;;  %v4928_v49 = vshll.u32 %v13375_v27, 16 }
 0x37a   :  { %v3752_v1 = vrot.slane %v3751_v50, 4  ;;  %v3765_v42 = vsel %vm2147_vm2, %v1788_v3, -inf  ;;  %v3746_v0 = vmax.f32 %v3744_v13, %v3745_v34  ;;  %v4921_v54 = vrot.slane %v4919_v5, 4 }
 0x37b   :  { %v3760_v52 = vmax.f32 %v3758_v9, %v3759_v25  ;;  %v3766_v4 = vrot.slane %v3765_v42, 4  ;;  %v4924_v23 = vrot.slane %v4922_v63, 5  ;;  %v4933_v6 = vshrl.u32 %v13389_v57, 16 }
 0x37c   :  { %v3753_v32 = vmax.f32 %v3751_v50, %v3752_v1  ;;  %v3747_v62 = vrot.slane %v3746_v0, 2  ;;  %v4930_v15 = vrot.slane %v4928_v49, 5  ;;  %v4936_v53 = vshll.u32 %v13389_v57, 16 }
 0x37d   :  { %v3761_v26 = vrot.slane %v3760_v52, 2  ;;  %v3767_v40 = vmax.f32 %v3765_v42, %v3766_v4  ;;  %v4925_v24 = vor.u32 %v4924_v23, %v4921_v54  ;;  %v4935_v12 = vrot.slane %v4933_v6, 4 }
 0x37e   :  { %v3754_v46 = vrot.slane %v3753_v32, 2  ;;  %v3748_v36 = vmax.f32 %v3746_v0, %v3747_v62  ;;  %v4942_v51 = vshll.u32 %v13433_v35, 16  ;;  %v4938_v60 = vrot.slane %v4936_v53, 5 }
 0x37f   :  { %v3762_v43 = vmax.f32 %v3760_v52, %v3761_v26  ;;  %v3768_v48 = vrot.slane %v3767_v40, 2  ;;  %v4926_v30 = vrot.slane %v4925_v24, 4  ;;  %v669_v3 = vadd.f32 %v13235_v45, %v13180_v7 }
 0x380   :  { %v3755_v47 = vmax.f32 %v3753_v32, %v3754_v46  ;;  %v3749_v13 = vrot.slane %v3748_v36, 1  ;;  %v4944_v50 = vrot.slane %v4942_v51, 5  ;;  %v4939_v42 = vor.u32 %v4938_v60, %v4935_v12 }
 0x381   :  { %v3763_v9 = vrot.slane %v3762_v43, 1  ;;  %v3769_v34 = vmax.f32 %v3767_v40, %v3768_v48  ;;  %v4931_v1 = vsel %vm12680_vm0, %v4926_v30, %v4930_v15  ;;  %v737_v5 = vmax.f32 %v669_v3, 0.0 }
 0x382   :  { %v3756_v25 = vrot.slane %v3755_v47, 1  ;;  %v3750_v63 = vmax.f32 %v3748_v36, %v3749_v13  ;;  %v661_v4 = vadd.f32 %v13235_v45, %v13185_v56  ;;  %v4940_v32 = vrot.slane %v4939_v42, 4 }
 0x383   :  { %v3764_v0 = vmax.f32 %v3762_v43, %v3763_v9  ;;  %v3770_v52 = vrot.slane %v3769_v34, 1  ;;  %v1857_v54 = vcombine.high %v737_v5, %v737_v5  ;;  %v1864_v7 = vrot.slane %v737_v5, %v11854_v44 }
 0x384   :  { %v3757_v49 = vmax.f32 %v3755_v47, %v3756_v25  ;;  %v4289_v6 = vsel %vm3940_vm3, %v3750_v63, -inf  ;;  %v735_v26 = vmax.f32 %v661_v4, 0.0  ;;  %v13460_v56 = vsel %vm12680_vm0, %v4940_v32, %v4944_v50 }
 0x385   :  { %v3771_v23 = vmax.f32 %v3769_v34, %v3770_v52  ;;  %v4295_v62 = vsel %vm3940_vm3, %v3764_v0, -inf  ;;  %v4291_v40 = vmax.f32 %v4289_v6, %v13408_v61  ;;  %v9675_v53 = vcombine.low %v4931_v1, %v13460_v56 }
 0x386   :  { %v4292_v15 = vsel %vm3940_vm3, %v3757_v49, -inf  ;;  %v4297_v46 = vmax.f32 %v4295_v62, %v13425_v28  ;;  %v1871_v36 = vrot.slane %v1857_v54, %v11854_v44  ;;  %v1872_v48 = vcombine.high %v1864_v7, %v1864_v7 }
 0x387   :  { %v4294_v24 = vmax.f32 %v4292_v15, %v13422_v22  ;;  %v4298_v12 = vsel %vm3940_vm3, %v3771_v23, -inf  ;;  %v4611_v61 = vsel %vm4509_vm7, %v4291_v40, %v13431_v58  ;;  %v3884_v28 = vsel %vm2147_vm2, %v1864_v7, -inf  ;;  %10736 = vmatprep.mubr.msk.bf16.mxu1 %vm3940_vm3, %v9675_v53 }
 0x388   :  { %v4300_v43 = vmax.f32 %v4298_v12, %v13436_v8  ;;  %v1873_v47 = vcombine.high %v1871_v36, %v1871_v36  ;;  %v3885_v22 = vrot.slane %v3884_v28, 4  ;;  %v3898_v30 = vsel %vm2147_vm2, %v1871_v36, -inf }
 0x389   :  { %v4612_v51 = vsel %vm4511_vm8, %v4294_v24, %v4611_v61  ;;  %v3891_v3 = vsel %vm2147_vm2, %v1872_v48, -inf  ;;  %v3899_v13 = vrot.slane %v3898_v30, 4  ;;  %v1823_v8 = vcombine.high %v735_v26, %v735_v26 }
 0x38a   :  { %v4613_v60 = vsel %vm4513_vm9, %v4297_v46, %v4612_v51  ;;  %v3886_v58 = vmax.f32 %v3884_v28, %v3885_v22  ;;  %v3892_v34 = vrot.slane %v3891_v3, 4  ;;  %v3905_v50 = vsel %vm2147_vm2, %v1873_v47, -inf }
 0x38b   :  { %v4614_v9 = vsel %vm4515_vm10, %v4300_v43, %v4613_v60  ;;  %v3900_v25 = vmax.f32 %v3898_v30, %v3899_v13  ;;  %v3906_v1 = vrot.slane %v3905_v50, 4  ;;  %v1830_v42 = vrot.slane %v735_v26, %v11854_v44 }
 0x38c   :  { %4653 = vst.msk [vmem:[#allocation2 + $0x111] sm:$0xff] %vm3940_vm3, %v4614_v9  ;;  %v1837_v5 = vrot.slane %v1823_v8, %v11854_v44  ;;  %v3887_v63 = vrot.slane %v3886_v58, 2  ;;  %v3893_v0 = vmax.f32 %v3891_v3, %v3892_v34  ;;  %v672_v52 = vadd.f32 %v13235_v45, %v13192_v18 }
 0x38d   :  { %v664_v4 = vadd.f32 %v13235_v45, %v13204_v16  ;;  %v3901_v49 = vrot.slane %v3900_v25, 2  ;;  %v3907_v32 = vmax.f32 %v3905_v50, %v3906_v1  ;;  %v1838_v54 = vcombine.high %v1830_v42, %v1830_v42 }
 0x38e   :  { %v1839_v7 = vcombine.high %v1837_v5, %v1837_v5  ;;  %v3888_v23 = vmax.f32 %v3886_v58, %v3887_v63  ;;  %v3894_v6 = vrot.slane %v3893_v0, 2  ;;  %v3828_v62 = vsel %vm2147_vm2, %v1830_v42, -inf }
 0x38f   :  { %v3842_v26 = vsel %vm2147_vm2, %v1837_v5, -inf  ;;  %v3902_v40 = vmax.f32 %v3900_v25, %v3901_v49  ;;  %v3908_v15 = vrot.slane %v3907_v32, 2  ;;  %v3829_v46 = vrot.slane %v3828_v62, 4 }
 0x390   :  { %v3835_v24 = vsel %vm2147_vm2, %v1838_v54, -inf  ;;  %v3889_v12 = vrot.slane %v3888_v23, 1  ;;  %v3895_v18 = vmax.f32 %v3893_v0, %v3894_v6  ;;  %v3843_v36 = vrot.slane %v3842_v26, 4 }
 0x391   :  { %v3836_v53 = vrot.slane %v3835_v24, 4  ;;  %v3903_v16 = vrot.slane %v3902_v40, 1  ;;  %v3909_v45 = vmax.f32 %v3907_v32, %v3908_v15  ;;  %v3830_v43 = vmax.f32 %v3828_v62, %v3829_v46 }
 0x392   :  { %v3849_v61 = vsel %vm2147_vm2, %v1839_v7, -inf  ;;  %v3890_v48 = vmax.f32 %v3888_v23, %v3889_v12  ;;  %v3896_v28 = vrot.slane %v3895_v18, 1  ;;  %v3844_v47 = vmax.f32 %v3842_v26, %v3843_v36 }
 0x393   :  { %v3837_v51 = vmax.f32 %v3835_v24, %v3836_v53  ;;  %v3904_v22 = vmax.f32 %v3902_v40, %v3903_v16  ;;  %v3910_v30 = vrot.slane %v3909_v45, 1  ;;  %v3831_v60 = vrot.slane %v3830_v43, 2 }
 0x394   :  { %v3850_v3 = vrot.slane %v3849_v61, 4  ;;  %v3897_v13 = vmax.f32 %v3895_v18, %v3896_v28  ;;  %v4302_v8 = vsel %vm3940_vm3, %v3890_v48, -inf  ;;  %v3845_v58 = vrot.slane %v3844_v47, 2 }
 0x395   :  { %v3838_v9 = vrot.slane %v3837_v51, 2  ;;  %v3911_v34 = vmax.f32 %v3909_v45, %v3910_v30  ;;  %v4308_v50 = vsel %vm3940_vm3, %v3904_v22, -inf  ;;  %v3832_v25 = vmax.f32 %v3830_v43, %v3831_v60 }
 0x396   :  { %v3851_v1 = vmax.f32 %v3849_v61, %v3850_v3  ;;  %v4305_v42 = vsel %vm3940_vm3, %v3897_v13, -inf  ;;  %v3846_v63 = vmax.f32 %v3844_v47, %v3845_v58  ;;  %v738_v0 = vmax.f32 %v672_v52, 0.0 }
 0x397   :  { %v3839_v5 = vmax.f32 %v3837_v51, %v3838_v9  ;;  %v13492_v49 = vsel %vm3940_vm3, %v3911_v34, -inf  ;;  %v3833_v32 = vrot.slane %v3832_v25, 1  ;;  %v736_v7 = vmax.f32 %v664_v4, 0.0 }
 0x398   :  { %v3852_v54 = vrot.slane %v3851_v1, 2  ;;  %v3847_v6 = vrot.slane %v3846_v63, 1  ;;  %v1874_v62 = vcombine.high %v738_v0, %v738_v0  ;;  %v1881_v26 = vrot.slane %v738_v0, %v11854_v44 }
 0x399   :  { %v3840_v23 = vrot.slane %v3839_v5, 1  ;;  %v3834_v40 = vmax.f32 %v3832_v25, %v3833_v32  ;;  %v1840_v46 = vcombine.high %v736_v7, %v736_v7  ;;  %v1847_v24 = vrot.slane %v736_v7, %v11854_v44 }
 0x39a   :  { %v3853_v15 = vmax.f32 %v3851_v1, %v3852_v54  ;;  %v3848_v18 = vmax.f32 %v3846_v63, %v3847_v6  ;;  %v1888_v52 = vrot.slane %v1874_v62, %v11854_v44  ;;  %v1889_v53 = vcombine.high %v1881_v26, %v1881_v26 }
 0x39b   :  { %v3841_v12 = vmax.f32 %v3839_v5, %v3840_v23  ;;  %v4301_v16 = vsel %vm3940_vm3, %v3834_v40, -inf  ;;  %v3912_v4 = vsel %vm2147_vm2, %v1881_v26, -inf  ;;  %v1854_v45 = vrot.slane %v1840_v46, %v11854_v44 }
 0x39c   :  { %v3854_v36 = vrot.slane %v3853_v15, 1  ;;  %v4303_v43 = vmax.f32 %v4301_v16, %v4302_v8  ;;  %v4307_v48 = vsel %vm3940_vm3, %v3848_v18, -inf  ;;  %v1890_v28 = vcombine.high %v1888_v52, %v1888_v52 }
 0x39d   :  { %v4304_v61 = vsel %vm3940_vm3, %v3841_v12, -inf  ;;  %v4309_v22 = vmax.f32 %v4307_v48, %v4308_v50  ;;  %v3913_v30 = vrot.slane %v3912_v4, 4  ;;  %v3919_v60 = vsel %vm2147_vm2, %v1889_v53, -inf }
 0x39e   :  { %v3855_v51 = vmax.f32 %v3853_v15, %v3854_v36  ;;  %v4306_v47 = vmax.f32 %v4304_v61, %v4305_v42  ;;  %v3926_v3 = vsel %vm2147_vm2, %v1888_v52, -inf  ;;  %v3933_v13 = vsel %vm2147_vm2, %v1890_v28, -inf }
 0x39f   :  { %v1855_v9 = vcombine.high %v1847_v24, %v1847_v24  ;;  %v3914_v34 = vmax.f32 %v3912_v4, %v3913_v30  ;;  %v3920_v25 = vrot.slane %v3919_v60, 4  ;;  %v3927_v42 = vrot.slane %v3926_v3, 4 }
 0x3a0   :  { %v4310_v58 = vsel %vm3940_vm3, %v3855_v51, -inf  ;;  %v4615_v8 = vsel %vm4503_vm4, %v4306_v47, %v4303_v43  ;;  %v3934_v50 = vrot.slane %v3933_v13, 4  ;;  %v1856_v32 = vcombine.high %v1854_v45, %v1854_v45 }
 0x3a1   :  { %v4312_v1 = vmax.f32 %v4310_v58, %v13492_v49  ;;  %v4616_v5 = vsel %vm4505_vm5, %v4309_v22, %v4615_v8  ;;  %v3915_v63 = vrot.slane %v3914_v34, 2  ;;  %v3921_v0 = vmax.f32 %v3919_v60, %v3920_v25 }
 0x3a2   :  { %v3856_v54 = vsel %vm2147_vm2, %v1847_v24, -inf  ;;  %v3928_v7 = vmax.f32 %v3926_v3, %v3927_v42  ;;  %v3935_v23 = vmax.f32 %v3933_v13, %v3934_v50  ;;  %v3863_v62 = vsel %vm2147_vm2, %v1855_v9, -inf  ;;  %v13514_v50 = vld [vmem:[#allocation2 + $0xc0] sm:$0xff] }
 0x3a3   :  { %v3857_v6 = vrot.slane %v3856_v54, 4  ;;  %v3916_v26 = vmax.f32 %v3914_v34, %v3915_v63  ;;  %v3922_v40 = vrot.slane %v3921_v0, 2  ;;  %v3864_v15 = vrot.slane %v3863_v62, 4  ;;  %v4680_v63 = vld [vmem:[#allocation2 + $0xc8] sm:$0x3] }
 0x3a4   :  { %v3870_v46 = vsel %vm2147_vm2, %v1854_v45, -inf  ;;  %v3929_v49 = vrot.slane %v3928_v7, 2  ;;  %v3936_v12 = vrot.slane %v3935_v23, 2  ;;  %v3877_v4 = vsel %vm2147_vm2, %v1856_v32, -inf }
 0x3a5   :  { %v3858_v18 = vmax.f32 %v3856_v54, %v3857_v6  ;;  %v3871_v52 = vrot.slane %v3870_v46, 4  ;;  %v3917_v53 = vrot.slane %v3916_v26, 1  ;;  %v3923_v36 = vmax.f32 %v3921_v0, %v3922_v40  ;;  %v4682_v6 = vld [vmem:[#allocation2 + $0xd8] sm:$0x3] }
 0x3a6   :  { %v3865_v16 = vmax.f32 %v3863_v62, %v3864_v15  ;;  %v3930_v24 = vmax.f32 %v3928_v7, %v3929_v49  ;;  %v3937_v43 = vmax.f32 %v3935_v23, %v3936_v12  ;;  %v3878_v22 = vrot.slane %v3877_v4, 4  ;;  %v13517_v23 = vld [vmem:[#allocation2 + $0xd0] sm:$0xff] }
 0x3a7   :  { %v3859_v61 = vrot.slane %v3858_v18, 2  ;;  %v3872_v48 = vmax.f32 %v3870_v46, %v3871_v52  ;;  %v3918_v28 = vmax.f32 %v3916_v26, %v3917_v53  ;;  %v3924_v51 = vrot.slane %v3923_v36, 1 }
 0x3a8   :  { %v3866_v47 = vrot.slane %v3865_v16, 2  ;;  %v3931_v30 = vrot.slane %v3930_v24, 1  ;;  %v3938_v60 = vrot.slane %v3937_v43, 1  ;;  %v3879_v58 = vmax.f32 %v3877_v4, %v3878_v22 }
 0x3a9   :  { %v3860_v45 = vmax.f32 %v3858_v18, %v3859_v61  ;;  %v3873_v3 = vrot.slane %v3872_v48, 2  ;;  %v3925_v13 = vmax.f32 %v3923_v36, %v3924_v51  ;;  %v4314_v34 = vsel %vm3940_vm3, %v3918_v28, -inf }
 0x3aa   :  { %v3867_v9 = vmax.f32 %v3865_v16, %v3866_v47  ;;  %v3932_v8 = vmax.f32 %v3930_v24, %v3931_v30  ;;  %v3939_v0 = vmax.f32 %v3937_v43, %v3938_v60  ;;  %v3880_v54 = vrot.slane %v3879_v58, 2  ;;  %v13540_v60 = vld [vmem:[#allocation2 + $0xe0] sm:$0xff] }
 0x3ab   :  { %v3861_v25 = vrot.slane %v3860_v45, 1  ;;  %v3874_v42 = vmax.f32 %v3872_v48, %v3873_v3  ;;  %v4617_v7 = vsel %vm4507_vm6, %v4312_v1, %v4616_v5  ;;  %v4317_v62 = vsel %vm3940_vm3, %v3925_v13, -inf }
 0x3ac   :  { %v3868_v32 = vrot.slane %v3867_v9, 1  ;;  %v4320_v26 = vsel %vm3940_vm3, %v3932_v8, -inf  ;;  %v3881_v49 = vmax.f32 %v3879_v58, %v3880_v54  ;;  %v13523_v12 = vpack.c.bf16 %v13514_v50, %v13514_v50  ;;  %v4684_v58 = vld [vmem:[#allocation2 + $0xe8] sm:$0x3]  ;;  %v13545_v8 = vld [vmem:[#allocation2 + $0xf0] sm:$0xff] }
 0x3ad   :  { %v3862_v40 = vmax.f32 %v3860_v45, %v3861_v25  ;;  %v3875_v15 = vrot.slane %v3874_v42, 1  ;;  %v13525_v18 = vpack.c.bf16 %v4680_v63, %v4680_v63  ;;  %v13530_v5 = vpack.c.bf16 %v13517_v23, %v13517_v23 }
 0x3ae   :  { %v3869_v46 = vmax.f32 %v3867_v9, %v3868_v32  ;;  %v13532_v53 = vpack.c.bf16 %v4682_v6, %v4682_v6  ;;  %v3882_v36 = vrot.slane %v3881_v49, 1  ;;  %v4947_v24 = vshrl.u32 %v13523_v12, 16 }
 0x3af   :  { %v3876_v52 = vmax.f32 %v3874_v42, %v3875_v15  ;;  %v4313_v1 = vsel %vm3940_vm3, %v3862_v40, -inf  ;;  %v4323_v43 = vsel %vm3940_vm3, %v3939_v0, -inf  ;;  %v4950_v28 = vshll.u32 %v13523_v12, 16  ;;  %v4686_v0 = vld [vmem:[#allocation2 + $0xf8] sm:$0x3] }
 0x3b0   :  { %v4315_v16 = vmax.f32 %v4313_v1, %v4314_v34  ;;  %v4316_v4 = vsel %vm3940_vm3, %v3869_v46, -inf  ;;  %v3883_v51 = vmax.f32 %v3881_v49, %v3882_v36  ;;  %v4949_v30 = vrot.slane %v4947_v24, 4  ;;  %v13565_v1 = vld [vmem:[#allocation2 + $0x100] sm:$0xff] }
 0x3b1   :  { %v4318_v61 = vmax.f32 %v4316_v4, %v4317_v62  ;;  %v4319_v48 = vsel %vm3940_vm3, %v3876_v52, -inf  ;;  %v4952_v3 = vrot.slane %v4950_v28, 5  ;;  %v4956_v13 = vshll.u32 %v13525_v18, 16 }
 0x3b2   :  { %v4321_v47 = vmax.f32 %v4319_v48, %v4320_v26  ;;  %v4618_v22 = vsel %vm4509_vm7, %v4315_v16, %v4617_v7  ;;  %v4961_v9 = vshrl.u32 %v13530_v5, 16  ;;  %v4322_v34 = vsel %vm3940_vm3, %v3883_v51, -inf }
 0x3b3   :  { %v4619_v45 = vsel %vm4511_vm8, %v4318_v61, %v4618_v22  ;;  %v4964_v42 = vshll.u32 %v13530_v5, 16  ;;  %v4970_v63 = vshll.u32 %v13532_v53, 16  ;;  %v4324_v32 = vmax.f32 %v4322_v34, %v4323_v43  ;;  %v4688_v43 = vld [vmem:[#allocation2 + $0x108] sm:$0x3]  ;;  %v13570_v61 = vld [vmem:[#allocation2 + $0x110] sm:$0xff] }
 0x3b4   :  { %v4620_v25 = vsel %vm4513_vm9, %v4321_v47, %v4619_v45  ;;  %v4953_v54 = vor.u32 %v4952_v3, %v4949_v30  ;;  %v4963_v7 = vrot.slane %v4961_v9, 4  ;;  %v13553_v6 = vpack.c.bf16 %v13540_v60, %v13540_v60  ;;  %v4690_v22 = vld [vmem:[#allocation2 + $0x118] sm:$0x3] }
 0x3b5   :  { %v4966_v62 = vrot.slane %v4964_v42, 5  ;;  %v13555_v26 = vpack.c.bf16 %v4684_v58, %v4684_v58  ;;  %v13559_v40 = vpack.c.bf16 %v13545_v8, %v13545_v8  ;;  %v4621_v15 = vsel %vm4515_vm10, %v4324_v32, %v4620_v25 }
 0x3b6   :  { %v4954_v46 = vrot.slane %v4953_v54, 4  ;;  %v13562_v49 = vpack.c.bf16 %v4686_v0, %v4686_v0  ;;  %v4975_v52 = vshrl.u32 %v13553_v6, 16  ;;  %4654 = vst.msk [vmem:[#allocation2 + $0x121] sm:$0xff] %vm3940_vm3, %v4621_v15  ;;  %v4958_v36 = vrot.slane %v4956_v13, 5 }
 0x3b7   :  { %v4967_v16 = vor.u32 %v4966_v62, %v4963_v7  ;;  %v4978_v4 = vshll.u32 %v13553_v6, 16  ;;  %v4989_v24 = vshrl.u32 %v13559_v40, 16  ;;  %v4972_v48 = vrot.slane %v4970_v63, 5 }
 0x3b8   :  { %v4977_v28 = vrot.slane %v4975_v52, 4  ;;  %v4984_v51 = vshll.u32 %v13555_v26, 16  ;;  %v4992_v47 = vshll.u32 %v13559_v40, 16  ;;  %v13576_v30 = vsel %vm12680_vm0, %v4954_v46, %v4958_v36 }
 0x3b9   :  { %v4968_v45 = vrot.slane %v4967_v16, 4  ;;  %v4980_v3 = vrot.slane %v4978_v4, 5  ;;  %v4991_v13 = vrot.slane %v4989_v24, 4  ;;  %v4998_v58 = vshll.u32 %v13562_v49, 16 }
 0x3ba   :  { %v4994_v9 = vrot.slane %v4992_v47, 5  ;;  %v13581_v34 = vpack.c.bf16 %v13565_v1, %v13565_v1  ;;  %v13583_v25 = vpack.c.bf16 %v4688_v43, %v4688_v43  ;;  %v13591_v0 = vpack.c.bf16 %v13570_v61, %v13570_v61 }
 0x3bb   :  { %v13587_v42 = vsel %vm12680_vm0, %v4968_v45, %v4972_v48  ;;  %v4981_v63 = vor.u32 %v4980_v3, %v4977_v28  ;;  %v13593_v32 = vpack.c.bf16 %v4690_v22, %v4690_v22  ;;  %v4986_v52 = vrot.slane %v4984_v51, 5 }
 0x3bc   :  { %v13597_v54 = vcombine.low %v13576_v30, %v13587_v42  ;;  %v4995_v7 = vor.u32 %v4994_v9, %v4991_v13  ;;  %v5003_v62 = vshrl.u32 %v13581_v34, 16  ;;  %v5006_v15 = vshll.u32 %v13581_v34, 16 }
 0x3bd   :  { %v4982_v46 = vrot.slane %v4981_v63, 4  ;;  %v5017_v36 = vshrl.u32 %v13591_v0, 16  ;;  %v5020_v16 = vshll.u32 %v13591_v0, 16  ;;  %v5000_v24 = vrot.slane %v4998_v58, 5 }
 0x3be   :  { %10737 = vmatmul.mubr.msk.bf16.gmra.mrb[8].mxu1 %vm3940_vm3, %v13597_v54  ;;  %v4996_v4 = vrot.slane %v4995_v7, 4  ;;  %v5005_v43 = vrot.slane %v5003_v62, 4  ;;  %v5008_v48 = vrot.slane %v5006_v15, 5  ;;  %v5012_v28 = vshll.u32 %v13583_v25, 16 }
 0x3bf   :  { %v5019_v47 = vrot.slane %v5017_v36, 4  ;;  %v5022_v22 = vrot.slane %v5020_v16, 5  ;;  %v5026_v45 = vshll.u32 %v13593_v32, 16  ;;  %v13609_v51 = vsel %vm12680_vm0, %v4982_v46, %v4986_v52 }
 0x3c0   :  { %v13613_v3 = vsel %vm12680_vm0, %v4996_v4, %v5000_v24  ;;  %v5009_v13 = vor.u32 %v5008_v48, %v5005_v43  ;;  %v5366_v9 = vrot.slane %v12647_v38, 5  ;;  %v5370_v7 = vrot.slane %v12651_v14, 5  ;;  %v11620_v48 = vld [vmem:[#allocation2] sm:$0xff] }
 0x3c1   :  { %v13618_v58 = vcombine.low %v13609_v51, %v13613_v3  ;;  %v5023_v63 = vor.u32 %v5022_v22, %v5019_v47  ;;  %v5378_v62 = vrot.slane %v12657_v20, 5  ;;  %v5014_v46 = vrot.slane %v5012_v28, 5  ;;  %v13653_v28 = vld [vmem:[#allocation2 + $0x10] sm:$0xff] }
 0x3c2   :  { %v5010_v15 = vrot.slane %v5009_v13, 4  ;;  %v5028_v36 = vrot.slane %v5026_v45, 5  ;;  %v9711_v16 = vrot.slane %v12634_v55, 9  ;;  %v9712_v38 = vrot.slane %v12637_v2, 9 }
 0x3c3   :  { %10740 = vmatprep.mubr.msk.bf16.mxu1 %vm3940_vm3, %v13618_v58  ;;  %v5024_v52 = vrot.slane %v5023_v63, 4  ;;  %v9714_v4 = vrot.slane %v12655_v41, 9  ;;  %v9715_v24 = vrot.slane %v12663_v59, 9  ;;  %v5382_v55 = vrot.slane %v12668_v21, 5 }
 0x3c4   :  { %v13630_v14 = vsel %vm12680_vm0, %v5010_v15, %v5014_v46  ;;  %v13638_v43 = vsel %vm12707_vm11, %v9711_v16, %v5366_v9  ;;  %v13647_v41 = vsel %vm12707_vm11, %v9712_v38, %v5370_v7  ;;  %v10328_v47 = vpack.c.bf16 %v13653_v28, %v11620_v48  ;;  %v13676_v15 = vld [vmem:[#allocation2 + $0x30] sm:$0xff]  ;;  %v13684_v16 = vld [vmem:[#allocation2 + $0x40] sm:$0xff] }
 0x3c5   :  { %v13634_v20 = vsel %vm12680_vm0, %v5024_v52, %v5028_v36  ;;  %v13651_v59 = vsel %vm12707_vm11, %v9714_v4, %v5378_v62  ;;  %v9735_v21 = vcombine.low %v13638_v43, %v13647_v41  ;;  %v13664_v45 = vsel %vm12707_vm11, %v9715_v24, %v5382_v55  ;;  %v13674_v62 = vld [vmem:[#allocation2 + $0x20] sm:$0xff]  ;;  %v13686_v38 = vld [vmem:[#allocation2 + $0x50] sm:$0xff] }
 0x3c6   :  { %v13643_v2 = vcombine.low %v13630_v14, %v13634_v20  ;;  %v13660_v22 = vcombine.low %v12723_v33, %v13651_v59  ;;  %v9721_v9 = vrot.slane %v13523_v12, 9  ;;  %v5406_v63 = vrot.slane %v13525_v18, 5 }
 0x3c7   :  { %v9722_v7 = vrot.slane %v13530_v5, 9  ;;  %v13680_v46 = vpack.c.bf16 %v13676_v15, %v13674_v62  ;;  %v5410_v52 = vrot.slane %v13532_v53, 5  ;;  %v9723_v36 = vrot.slane %v13553_v6, 9  ;;  %v11453_v53 = vld [vmem:[%s15198_s3 + $0x48] sm:$0xff]  }
 0x3c8   :  { %10741 = vmatmul.mubr.msk.bf16.gmra.mrb[12].mxu1 %vm3940_vm3, %v13643_v2  ;;  %v13690_v12 = vpack.c.bf16 %v13686_v38, %v13684_v16  ;;  %v13694_v18 = vsel %vm12707_vm11, %v9721_v9, %v5406_v63  ;;  %v5414_v5 = vrot.slane %v13555_v26, 5  ;;  %v9724_v4 = vrot.slane %v13559_v40, 9 }
 0x3c9   :  { %10752 = vmatprep.mubr.msk.bf16.mxu1 %vm3940_vm3, %v10328_v47  ;;  %v13703_v6 = vsel %vm12707_vm11, %v9722_v7, %v5410_v52  ;;  %v5418_v24 = vrot.slane %v13562_v49, 5  ;;  %v9725_v55 = vrot.slane %v13581_v34, 9  ;;  %v5422_v48 = vrot.slane %v13583_v25, 5 }
 0x3ca   :  { %v13710_v47 = vcombine.low %v13694_v18, %v13703_v6  ;;  %v13714_v26 = vsel %vm12707_vm11, %v9723_v36, %v5414_v5  ;;  %v9726_v40 = vrot.slane %v13591_v0, 9  ;;  %v5426_v9 = vrot.slane %v13593_v32, 5  ;;  %v11626_v0 = vld [vmem:[%s15198_s3 + $0x40] sm:$0xff]   ;;  %v11454_v32 = vld [vmem:[%s15198_s3 + $0x50] sm:$0xff]  }
 0x3cb   :  { %v9717_v49 = vrot.slane %v13202_v29, 9  ;;  %v5390_v34 = vrot.slane %v13215_v31, 5  ;;  %v13724_v25 = vsel %vm12707_vm11, %v9724_v4, %v5418_v24  ;;  %v13728_v63 = vsel %vm12707_vm11, %v9725_v55, %v5422_v48 }
 0x3cc   :  { %v13737_v29 = vcombine.low %v13714_v26, %v13724_v25  ;;  %v13741_v31 = vsel %vm12707_vm11, %v9726_v40, %v5426_v9  ;;  %v9716_v7 = vrot.slane %v13049_v11, 9  ;;  %v5386_v52 = vrot.slane %v13051_v17, 5  ;;  %v13766_v40 = vld [vmem:[#allocation2 + $0x60] sm:$0xff]  ;;  %v13768_v9 = vld [vmem:[#allocation2 + $0x70] sm:$0xff] }
 0x3cd   :  { %v13750_v36 = vcombine.low %v13728_v63, %v13741_v31  ;;  %v10341_v5 = vpack.c.bf16 %v13540_v60, %v13517_v23  ;;  %v10342_v4 = vpack.c.bf16 %v13565_v1, %v13545_v8  ;;  %v13758_v24 = vsel %vm12707_vm11, %v9717_v49, %v5390_v34 }
 0x3ce   :  { %v9720_v55 = vrot.slane %v13389_v57, 9  ;;  %v5402_v11 = vrot.slane %v13433_v35, 5  ;;  %v9800_v17 = vcombine.low %v13587_v42, %v13609_v51  ;;  %v11455_v57 = vld [vmem:[%s15198_s3 + $0x58] sm:$0xff]   ;;  %v13779_v35 = vsel %vm12707_vm11, %v9716_v7, %v5386_v52  ;;  %v15243_v7 = vld [vmem:[#allocation14_spill] sm:$0xff] }
 0x3cf   :  { %v5394_v13 = vrot.slane %v15243_v7, 5  ;;  %v9719_v34 = vrot.slane %v13370_v39, 9  ;;  %v5398_v43 = vrot.slane %v13375_v27, 5  ;;  %v11459_v27 = vld [vmem:[%s15198_s3 + $0x78] sm:$0xff]   ;;  %v11480_v42 = vld [vmem:[%s15200_s5 + $0x40] sm:$0xff]   ;;  %v15253_v51 = vcombine.low %v13647_v41, %v12723_v33 }
 0x3d0   :  { %10753 = vmatmul.mubr.msk.bf16.vlgmr.msra.gmra.mrb[0].mxu1 %vm3940_vm3, %v13680_v46  ;;  %v13791_v48 = vsel %vm12707_vm11, %v9720_v55, %v5402_v11  ;;  %v13805_v55 = vpack.c.bf16 %v13517_v23, %v13514_v50  ;;  %v13817_v11 = vpack.c.bf16 %v13570_v61, %v13565_v1  ;;  %v15244_v23 = vld [vmem:[#allocation6_spill] sm:$0xff]  ;;  %10937 = vmatpush3.bf16.msra.mxu0 %v11480_v42  ;;  %vm11657_vm2 = vmmov 0  }
 0x3d1   :  { %10769 = vmatpush3.bf16.msra.mxu1 %v11626_v0  ;;  %10756 = vmatprep.mubr.msk.bf16.mxu1 %vm3940_vm3, %v13690_v12  ;;  %v13772_v0 = vpack.c.bf16 %v13768_v9, %v13766_v40  ;;  %v5399_v7 = vsel %vm12707_vm11, %v9719_v34, %v5398_v43  ;;  %v10336_v34 = vpack.c.bf16 %v13674_v62, %v13653_v28  ;;  %v11462_v28 = vld [vmem:[%s15198_s3 + $0x90] sm:$0xff]   ;;  %v13884_v62 = vld [vmem:[#allocation2 + $0x80] sm:$0xff] }
 0x3d2   :  { %10770 = vmatprep.subr.bf16.mxu1 %v11453_v53  ;;  %v10338_v43 = vpack.c.bf16 %v13766_v40, %v13686_v38  ;;  %v11629_v38 = vld [vmem:[#allocation2 + $0xb0] sm:$0xff] }
 0x3d3   :  { %v10340_v40 = vpack.c.bf16 %v13514_v50, %v11629_v38  ;;  %v13909_v50 = vld [vmem:[#allocation2 + $0x120] sm:$0xff]  ;;  %v15250_v38 = vld [vmem:[#allocation11_spill] sm:$0xff] }
 0x3d5   :  { %10771 = vmatpush3.bf16.msra.mxu1 %v11453_v53  ;;  %v15241_v53 = vld [vmem:[#allocation18_spill] sm:$0xff] }
 0x3d6   :  { %10772 = vmatprep.subr.bf16.mxu1 %v11454_v32  ;;  %v10332_v49 = vpack.c.bf16 %v15241_v53, %v13352_v37  ;;  %v11456_v37 = vld [vmem:[%s15198_s3 + $0x60] sm:$0xff]  }
 0x3d7   :  { %v15242_v53 = vld [vmem:[#allocation13_spill] sm:$0xff] }
 0x3d8   :  { %10757 = vmatmul.mubr.msk.bf16.gmra.mrb[4].mxu1 %vm3940_vm3, %v13772_v0  ;;  %v9718_v52 = vrot.slane %v15242_v53, 9 }
 0x3d9   :  { %10760 = vmatprep.mubr.msk.bf16.mxu1 %vm3940_vm3, %v10332_v49  ;;  %10773 = vmatpush3.bf16.msra.mxu1 %v11454_v32  ;;  %v13809_v32 = vpack.c.bf16 %v13545_v8, %v13540_v60  ;;  %v13830_v49 = vcombine.low %v13664_v45, %v13779_v35  ;;  %v15245_v60 = vld [vmem:[#allocation7_spill] sm:$0xff] }
 0x3da   :  { %10774 = vmatprep.subr.bf16.mxu1 %v11455_v57  ;;  %v13845_v53 = vsel %vm12707_vm11, %v9718_v52, %v5394_v13  ;;  %v11460_v13 = vld [vmem:[%s15198_s3 + $0x80] sm:$0xff]   ;;  %v10337_v52 = vpack.c.bf16 %v13684_v16, %v13676_v15  ;;  %v10339_v15 = vpack.c.bf16 %v13884_v62, %v13768_v9  ;;  %v11463_v16 = vld [vmem:[%s15198_s3 + $0x98] sm:$0xff]   ;;  %v13899_v9 = vpack.c.bf16 %v13884_v62, %v13884_v62 }
 0x3db   :  { %v13851_v39 = vcombine.low %v13758_v24, %v13845_v53 }
 0x3dc   :  { %v9815_v33 = vrot.slane %v13899_v9, 9 }
 0x3dd   :  { %10775 = vmatpush3.bf16.msra.mxu1 %v11455_v57  ;;  %v11457_v57 = vld [vmem:[%s15198_s3 + $0x68] sm:$0xff]  }
 0x3de   :  { %10792 = vmatprep.subr.bf16.mxu1 %v11456_v37 }
 0x3e0   :  { %10761 = vmatmul.mubr.msk.bf16.gmra.mrb[8].mxu1 %vm3940_vm3, %v13805_v55 }
 0x3e1   :  { %10764 = vmatprep.mubr.msk.bf16.mxu1 %vm3940_vm3, %v13809_v32 }
 0x3e8   :  { %10765 = vmatmul.mubr.msk.bf16.gmra.mrb[12].mxu1 %vm3940_vm3, %v13817_v11 }
 0x3e9   :  { %10776 = vmatprep.mubr.msk.bf16.mxu1 %vm3940_vm3, %v9735_v21  ;;  %v11458_v21 = vld [vmem:[%s15198_s3 + $0x70] sm:$0xff]  }
 0x3f0   :  { %10777 = vmatmul.mubr.msk.bf16.vlgmr.msra.gmra.mrb[0].mxu1 %vm3940_vm3, %v13660_v22 }
 0x3f1   :  { %10793 = vmatpush3.bf16.msra.mxu1 %v11456_v37  ;;  %10780 = vmatprep.mubr.msk.bf16.mxu1 %vm3940_vm3, %v13830_v49  ;;  %v9739_v37 = vcombine.low %v5399_v7, %v13791_v48  ;;  %v5811_v7 = vshrl.u32 %v13899_v9, 16 }
 0x3f2   :  { %10794 = vmatprep.subr.bf16.mxu1 %v11457_v57 }
 0x3f5   :  { %10795 = vmatpush3.bf16.msra.mxu1 %v11457_v57  ;;  %v11461_v57 = vld [vmem:[%s15198_s3 + $0x88] sm:$0xff]  }
 0x3f6   :  { %10796 = vmatprep.subr.bf16.mxu1 %v11458_v21 }
 0x3f8   :  { %10781 = vmatmul.mubr.msk.bf16.gmra.mrb[4].mxu1 %vm3940_vm3, %v13851_v39 }
 0x3f9   :  { %10784 = vmatprep.mubr.msk.bf16.mxu1 %vm3940_vm3, %v9739_v37  ;;  %10797 = vmatpush3.bf16.msra.mxu1 %v11458_v21  ;;  %v11464_v21 = vld [vmem:[%s15198_s3 + $0xa0] sm:$0xff]   ;;  %v10343_v37 = vpack.c.bf16 %v13909_v50, %v13570_v61  ;;  %v11465_v61 = vld [vmem:[%s15198_s3 + $0xa8] sm:$0xff]  }
 0x3fa   :  { %10798 = vmatprep.subr.bf16.mxu1 %v11459_v27 }
 0x3fd   :  { %10799 = vmatpush3.bf16.msra.mxu1 %v11459_v27  ;;  %v5814_v27 = vshll.u32 %v13899_v9, 16  ;;  %v11483_v9 = vld [vmem:[%s15200_s5 + $0x58] sm:$0xff]  }
 0x3fe   :  { %10816 = vmatprep.subr.bf16.mxu1 %v11460_v13 }
 0x400   :  { %10785 = vmatmul.mubr.msk.bf16.gmra.mrb[8].mxu1 %vm3940_vm3, %v13710_v47 }
 0x401   :  { %10788 = vmatprep.mubr.msk.bf16.mxu1 %vm3940_vm3, %v13737_v29 }
 0x408   :  { %10789 = vmatmul.mubr.msk.bf16.gmra.mrb[12].mxu1 %vm3940_vm3, %v13750_v36 }
 0x409   :  { %10800 = vmatprep.mubr.msk.bf16.mxu1 %vm3940_vm3, %v10336_v34  ;;  %v5813_v34 = vrot.slane %v5811_v7, 4 }
 0x410   :  { %10801 = vmatmul.mubr.msk.bf16.vlgmr.msra.gmra.mrb[0].mxu1 %vm3940_vm3, %v10337_v52  ;;  %v5816_v52 = vrot.slane %v5814_v27, 5 }
 0x411   :  { %10817 = vmatpush3.bf16.msra.mxu1 %v11460_v13  ;;  %10804 = vmatprep.mubr.msk.bf16.mxu1 %vm3940_vm3, %v10338_v43  ;;  %v4672_v13 = vld [vmem:[#allocation2 + $0x88] sm:$0x3]  ;;  %v15248_v43 = vld [vmem:[#allocation8_spill] sm:$0xff] }
 0x412   :  { %10818 = vmatprep.subr.bf16.mxu1 %v11461_v57  ;;  %v10345_v8 = vpack.c.bf16 %v4672_v13, %v4672_v13  ;;  %v5817_v1 = vor.u32 %v5816_v52, %v5813_v34 }
 0x414   :  { %v5818_v7 = vrot.slane %v5817_v1, 4  ;;  %v9799_v1 = vcombine.low %v13460_v56, %v13576_v30  ;;  %v15252_v56 = vcombine.low %v13613_v3, %v13630_v14  ;;  %v11481_v3 = vld [vmem:[%s15200_s5 + $0x48] sm:$0xff]   ;;  %v15254_v14 = vmov 0.0  }
 0x415   :  { %10819 = vmatpush3.bf16.msra.mxu1 %v11461_v57  ;;  %v15247_v57 = vld [vmem:[#allocation10_spill] sm:$0xff]  ;;  %10938 = vmatprep.subr.bf16.mxu0 %v15254_v14  ;;  %v6020_v41 = vrot.slane %v10345_v8, 5 }
 0x416   :  { %10820 = vmatprep.subr.bf16.mxu1 %v11462_v28  ;;  %10939 = vmatpush3.bf16.msra.mxu0 %v11481_v3  ;;  %v4694_v3 = vld [vmem:[#allocation2 + $0x138] sm:$0x3] }
 0x417   :  { %10940 = vmatprep.subr.bf16.mxu0 %v15254_v14  ;;  %10952 = vmatprep.mubr.msk.bf16.mxu0 %vm11657_vm2, %v15254_v14 }
 0x418   :  { %10805 = vmatmul.mubr.msk.bf16.gmra.mrb[4].mxu1 %vm3940_vm3, %v10339_v15  ;;  %v13927_v15 = vpack.c.bf16 %v13909_v50, %v13909_v50 }
 0x419   :  { %10808 = vmatprep.mubr.msk.bf16.mxu1 %vm3940_vm3, %v10340_v40  ;;  %10821 = vmatpush3.bf16.msra.mxu1 %v11462_v28  ;;  %v9796_v28 = vcombine.low %v15248_v43, %v15247_v57 }
 0x41a   :  { %10822 = vmatprep.subr.bf16.mxu1 %v11463_v16  ;;  %v5825_v34 = vshrl.u32 %v13927_v15, 16  ;;  %v5828_v52 = vshll.u32 %v13927_v15, 16 }
 0x41c   :  { %v5830_v57 = vrot.slane %v5828_v52, 5  ;;  %v9816_v52 = vrot.slane %v13927_v15, 9  ;;  %v4693_v15 = vld [vmem:[#allocation2 + $0x130] sm:$0xff] }
 0x41d   :  { %10823 = vmatpush3.bf16.msra.mxu1 %v11463_v16  ;;  %v15249_v16 = vld [vmem:[#allocation15_spill] sm:$0xff] }
 0x41e   :  { %10840 = vmatprep.subr.bf16.mxu1 %v11464_v21  ;;  %v9797_v40 = vcombine.low %v15250_v38, %v15249_v16 }
 0x420   :  { %10809 = vmatmul.mubr.msk.bf16.gmra.mrb[8].mxu1 %vm3940_vm3, %v10341_v5  ;;  %v15246_v5 = vcombine.low %v15244_v23, %v15245_v60  ;;  %v15251_v23 = vld [vmem:[#allocation16_spill] sm:$0xff] }
 0x421   :  { %10812 = vmatprep.mubr.msk.bf16.mxu1 %vm3940_vm3, %v10342_v4  ;;  %v5820_v4 = vshll.u32 %v10345_v8, 16  ;;  %v11467_v60 = vld [vmem:[%s15198_s3 + $0xb8] sm:$0xff]   ;;  %v15257_v8 = vcombine.low %v13791_v48, %v13694_v18  ;;  %v15259_v18 = vcombine.low %v13724_v25, %v13728_v63  ;;  %v4673_v25 = vld [vmem:[#allocation2 + $0x90] sm:$0xff] }
 0x422   :  { %v11475_v63 = vld [vmem:[%s15198_s3 + $0xf8] sm:$0xff]  }
 0x423   :  { %v5822_v27 = vrot.slane %v5820_v4, 5  ;;  %v5827_v4 = vrot.slane %v5825_v34, 4  ;;  %v11470_v34 = vld [vmem:[%s15198_s3 + $0xd0] sm:$0xff]  }
 0x425   :  { %v13938_v13 = vsel %vm12680_vm0, %v5818_v7, %v5822_v27  ;;  %v15255_v27 = vcombine.low %v13651_v59, %v13664_v45  ;;  %v14004_v59 = vsel %vm12707_vm11, %v9815_v33, %v6020_v41 }
 0x426   :  { %v9828_v45 = vcombine.low %v13845_v53, %v14004_v59  ;;  %v11472_v53 = vld [vmem:[%s15198_s3 + $0xe0] sm:$0xff]  }
 0x428   :  { %10813 = vmatmul.mubr.msk.bf16.gmra.mrb[12].mxu1 %vm3940_vm3, %v10343_v37  ;;  %v11466_v37 = vld [vmem:[%s15198_s3 + $0xb0] sm:$0xff]  }
 0x429   :  { %10824 = vmatprep.mubr.msk.bf16.mxu1 %vm3940_vm3, %v15246_v5  ;;  %v4692_v5 = vld [vmem:[#allocation2 + $0x128] sm:$0x3] }
 0x42a   :  { %v10347_v43 = vpack.c.bf16 %v4692_v5, %v4692_v5  ;;  %v4674_v5 = vld [vmem:[#allocation2 + $0x98] sm:$0x3] }
 0x42c   :  { %v5834_v16 = vshll.u32 %v10347_v43, 16 }
 0x430   :  { %10825 = vmatmul.mubr.msk.bf16.vlgmr.msra.gmra.mrb[0].mxu1 %vm3940_vm3, %v9796_v28  ;;  %v11468_v28 = vld [vmem:[%s15198_s3 + $0xc0] sm:$0xff]  }
 0x431   :  { %10841 = vmatpush3.bf16.msra.mxu1 %v11464_v21  ;;  %10828 = vmatprep.mubr.msk.bf16.mxu1 %vm3940_vm3, %v9797_v40  ;;  %v9798_v21 = vcombine.low %v15251_v23, %v13938_v13  ;;  %v5836_v40 = vrot.slane %v5834_v16, 5  ;;  %v6024_v23 = vrot.slane %v10347_v43, 5  ;;  %v10351_v43 = vpack.c.bf16 %v4674_v5, %v4674_v5 }
 0x432   :  { %10842 = vmatprep.subr.bf16.mxu1 %v11465_v61 }
 0x433   :  { %v14036_v48 = vsel %vm12707_vm11, %v9816_v52, %v6024_v23 }
 0x435   :  { %10843 = vmatpush3.bf16.msra.mxu1 %v11465_v61  ;;  %v5831_v61 = vor.u32 %v5830_v57, %v5827_v4  ;;  %v15260_v57 = vld [vmem:[#allocation9_spill] sm:$0xff] }
 0x436   :  { %10844 = vmatprep.subr.bf16.mxu1 %v11466_v37 }
 0x437   :  { %v5832_v38 = vrot.slane %v5831_v61, 4  ;;  %v6380_v61 = vshll.u32 %v10351_v43, 16 }
 0x438   :  { %10829 = vmatmul.mubr.msk.bf16.gmra.mrb[4].mxu1 %vm3940_vm3, %v9798_v21  ;;  %v15258_v21 = vcombine.low %v13703_v6, %v13714_v26  ;;  %v11473_v6 = vld [vmem:[%s15198_s3 + $0xe8] sm:$0xff]   ;;  %v11474_v26 = vld [vmem:[%s15198_s3 + $0xf0] sm:$0xff]  }
 0x439   :  { %10832 = vmatprep.mubr.msk.bf16.mxu1 %vm3940_vm3, %v9799_v1  ;;  %10845 = vmatpush3.bf16.msra.mxu1 %v11466_v37  ;;  %v13964_v30 = vsel %vm12680_vm0, %v5832_v38, %v5836_v40  ;;  %v15256_v37 = vcombine.low %v13779_v35, %v13758_v24  ;;  %v11471_v24 = vld [vmem:[%s15198_s3 + $0xd8] sm:$0xff]   ;;  %v11484_v35 = vld [vmem:[%s15200_s5 + $0x60] sm:$0xff]   ;;  %v6382_v38 = vrot.slane %v6380_v61, 5 }
 0x43a   :  { %10846 = vmatprep.subr.bf16.mxu1 %v11467_v60  ;;  %v9802_v7 = vcombine.low %v13634_v20, %v13964_v30  ;;  %v11469_v20 = vld [vmem:[%s15198_s3 + $0xc8] sm:$0xff]   ;;  %v15261_v40 = vld [vmem:[#allocation12_spill] sm:$0xff] }
 0x43d   :  { %10847 = vmatpush3.bf16.msra.mxu1 %v11467_v60  ;;  %v9832_v60 = vcombine.low %v13741_v31, %v14036_v48  ;;  %v10350_v31 = vpack.c.bf16 %v4673_v25, %v4673_v25 }
 0x43e   :  { %10864 = vmatprep.subr.bf16.mxu1 %v11468_v28 }
 0x440   :  { %10833 = vmatmul.mubr.msk.bf16.gmra.mrb[8].mxu1 %vm3940_vm3, %v9800_v17  ;;  %v11482_v17 = vld [vmem:[%s15200_s5 + $0x50] sm:$0xff]  }
 0x441   :  { %10836 = vmatprep.mubr.msk.bf16.mxu1 %vm3940_vm3, %v15252_v56  ;;  %10941 = vmatpush3.bf16.msra.mxu0 %v11482_v17  ;;  %v11478_v56 = vld [vmem:[%s15198_s3 + $0x110] sm:$0xff]   ;;  %v11479_v17 = vld [vmem:[%s15198_s3 + $0x118] sm:$0xff]  }
 0x442   :  { %10942 = vmatprep.subr.bf16.mxu0 %v15254_v14 }
 0x445   :  { %10943 = vmatpush3.bf16.msra.mxu0 %v11483_v9 }
 0x446   :  { %10944 = vmatprep.subr.bf16.mxu0 %v15254_v14 }
 0x448   :  { %10837 = vmatmul.mubr.msk.bf16.gmra.mrb[12].mxu1 %vm3940_vm3, %v9802_v7 }
 0x449   :  { %10848 = vmatprep.mubr.msk.bf16.mxu1 %vm3940_vm3, %v15253_v51  ;;  %10945 = vmatpush3.bf16.msra.mxu0 %v11484_v35  ;;  %v6556_v35 = vrot.slane %v10351_v43, 5 }
 0x44a   :  { %10946 = vmatprep.subr.bf16.mxu0 %v15254_v14 }
 0x450   :  { %10849 = vmatmul.mubr.msk.bf16.vlgmr.msra.gmra.mrb[0].mxu1 %vm3940_vm3, %v15255_v27  ;;  %v10353_v27 = vpack.c.bf16 %v4694_v3, %v4694_v3 }
 0x451   :  { %10865 = vmatpush3.bf16.msra.mxu1 %v11468_v28  ;;  %10852 = vmatprep.mubr.msk.bf16.mxu1 %vm3940_vm3, %v15256_v37 }
 0x452   :  { %10866 = vmatprep.subr.bf16.mxu1 %v11469_v20 }
 0x455   :  { %10867 = vmatpush3.bf16.msra.mxu1 %v11469_v20 }
 0x456   :  { %10868 = vmatprep.subr.bf16.mxu1 %v11470_v34 }
 0x458   :  { %10853 = vmatmul.mubr.msk.bf16.gmra.mrb[4].mxu1 %vm3940_vm3, %v9828_v45 }
 0x459   :  { %10856 = vmatprep.mubr.msk.bf16.mxu1 %vm3940_vm3, %v15257_v8  ;;  %10869 = vmatpush3.bf16.msra.mxu1 %v11470_v34  ;;  %v6394_v34 = vshll.u32 %v10353_v27, 16 }
 0x45a   :  { %10870 = vmatprep.subr.bf16.mxu1 %v11471_v24 }
 0x45b   :  { %v6396_v9 = vrot.slane %v6394_v34, 5 }
 0x45d   :  { %10871 = vmatpush3.bf16.msra.mxu1 %v11471_v24  ;;  %v9893_v24 = vrot.slane %v10350_v31, 9 }
 0x45e   :  { %10888 = vmatprep.subr.bf16.mxu1 %v11472_v53 }
 0x460   :  { %10857 = vmatmul.mubr.msk.bf16.gmra.mrb[8].mxu1 %vm3940_vm3, %v15258_v21 }
 0x461   :  { %10860 = vmatprep.mubr.msk.bf16.mxu1 %vm3940_vm3, %v15259_v18 }
 0x468   :  { %10861 = vmatmul.mubr.msk.bf16.gmra.mrb[12].mxu1 %vm3940_vm3, %v9832_v60 }
 0x469   :  { %10872 = vmatprep.mubr.msk.bf16.mxu1 %vm3940_vm3, %v13680_v46  ;;  %v10348_v46 = vpack.c.bf16 %v4673_v25, %v13884_v62  ;;  %v6374_v62 = vshll.u32 %v10350_v31, 16 }
 0x46b   :  { %v6376_v4 = vrot.slane %v6374_v62, 5 }
 0x470   :  { %10873 = vmatmul.mubr.msk.bf16.vlgmr.msra.gmra.mrb[0].mxu1 %vm3940_vm3, %v13690_v12  ;;  %v11476_v12 = vld [vmem:[%s15198_s3 + $0x100] sm:$0xff]  }
 0x471   :  { %10889 = vmatpush3.bf16.msra.mxu1 %v11472_v53  ;;  %10876 = vmatprep.mubr.msk.bf16.mxu1 %vm3940_vm3, %v13772_v0  ;;  %v6371_v0 = vshrl.u32 %v10350_v31, 16 }
 0x472   :  { %10890 = vmatprep.subr.bf16.mxu1 %v11473_v6 }
 0x473   :  { %v6373_v1 = vrot.slane %v6371_v0, 4 }
 0x475   :  { %10891 = vmatpush3.bf16.msra.mxu1 %v11473_v6  ;;  %v6377_v28 = vor.u32 %v6376_v4, %v6373_v1 }
 0x476   :  { %10892 = vmatprep.subr.bf16.mxu1 %v11474_v26 }
 0x477   :  { %v6378_v16 = vrot.slane %v6377_v28, 4 }
 0x478   :  { %10877 = vmatmul.mubr.msk.bf16.gmra.mrb[4].mxu1 %vm3940_vm3, %v10348_v46 }
 0x479   :  { %10880 = vmatprep.mubr.msk.bf16.mxu1 %vm3940_vm3, %v13805_v55  ;;  %10893 = vmatpush3.bf16.msra.mxu1 %v11474_v26  ;;  %v10349_v55 = vpack.c.bf16 %v4693_v15, %v13909_v50  ;;  %v15262_v50 = vld [vmem:[#allocation17_spill] sm:$0xff]  ;;  %v6383_v51 = vsel %vm12680_vm0, %v6378_v16, %v6382_v38 }
 0x47a   :  { %10894 = vmatprep.subr.bf16.mxu1 %v11475_v63  ;;  %v9879_v20 = vcombine.low %v13938_v13, %v6383_v51 }
 0x47d   :  { %10895 = vmatpush3.bf16.msra.mxu1 %v11475_v63 }
 0x47e   :  { %10912 = vmatprep.subr.bf16.mxu1 %v11476_v12 }
 0x480   :  { %10881 = vmatmul.mubr.msk.bf16.gmra.mrb[8].mxu1 %vm3940_vm3, %v13809_v32  ;;  %v11477_v32 = vld [vmem:[%s15198_s3 + $0x108] sm:$0xff]  }
 0x481   :  { %10884 = vmatprep.mubr.msk.bf16.mxu1 %vm3940_vm3, %v13817_v11  ;;  %v10352_v11 = vpack.c.bf16 %v4693_v15, %v4693_v15 }
 0x483   :  { %v6385_v7 = vshrl.u32 %v10352_v11, 16  ;;  %v6388_v42 = vshll.u32 %v10352_v11, 16 }
 0x485   :  { %v6387_v33 = vrot.slane %v6385_v7, 4  ;;  %v6390_v41 = vrot.slane %v6388_v42, 5 }
 0x487   :  { %v6391_v37 = vor.u32 %v6390_v41, %v6387_v33 }
 0x488   :  { %10885 = vmatmul.mubr.msk.bf16.gmra.mrb[12].mxu1 %vm3940_vm3, %v10349_v55 }
 0x489   :  { %10896 = vmatprep.mubr.msk.bf16.mxu1 %vm3940_vm3, %v15260_v57  ;;  %v6392_v13 = vrot.slane %v6391_v37, 4 }
 0x48b   :  { %v6397_v45 = vsel %vm12680_vm0, %v6392_v13, %v6396_v9 }
 0x490   :  { %10897 = vmatmul.mubr.msk.bf16.vlgmr.msra.gmra.mrb[0].mxu1 %vm3940_vm3, %v15261_v40 }
 0x491   :  { %10913 = vmatpush3.bf16.msra.mxu1 %v11476_v12  ;;  %10900 = vmatprep.mubr.msk.bf16.mxu1 %vm3940_vm3, %v15262_v50 }
 0x492   :  { %10914 = vmatprep.subr.bf16.mxu1 %v11477_v32 }
 0x495   :  { %10915 = vmatpush3.bf16.msra.mxu1 %v11477_v32 }
 0x496   :  { %10916 = vmatprep.subr.bf16.mxu1 %v11478_v56 }
 0x498   :  { %10901 = vmatmul.mubr.msk.bf16.gmra.mrb[4].mxu1 %vm3940_vm3, %v9879_v20 }
 0x499   :  { %10904 = vmatprep.mubr.msk.bf16.mxu1 %vm3940_vm3, %v13597_v54  ;;  %10917 = vmatpush3.bf16.msra.mxu1 %v11478_v56  ;;  %v9880_v54 = vcombine.low %v13964_v30, %v6397_v45  ;;  %v11485_v30 = vld [vmem:[%s15200_s5 + $0x68] sm:$0xff]  }
 0x49a   :  { %10918 = vmatprep.subr.bf16.mxu1 %v11479_v17  ;;  %10947 = vmatpush3.bf16.msra.mxu0 %v11485_v30 }
 0x49b   :  { %10948 = vmatprep.subr.bf16.mxu0 %v15254_v14 }
 0x49d   :  { %10919 = vmatpush3.bf16.msra.mxu1 %v11479_v17 }
 0x49e   :  { %11056 = vmatprep.subr.bf16.mxu1 %v15254_v14  ;;  %10949 = vmatpush3.bf16.msra.mxu0 %v11487_v19 }
 0x49f   :  { %10950 = vmatprep.subr.bf16.mxu0 %v15254_v14 }
 0x4a0   :  { %10905 = vmatmul.mubr.msk.bf16.gmra.mrb[8].mxu1 %vm3940_vm3, %v13618_v58  ;;  %v6557_v58 = vsel %vm12707_vm11, %v9893_v24, %v6556_v35 }
 0x4a1   :  { %10908 = vmatprep.mubr.msk.bf16.mxu1 %vm3940_vm3, %v13643_v2  ;;  %v9903_v10 = vcombine.low %v14004_v59, %v6557_v58  ;;  %v9894_v2 = vrot.slane %v10352_v11, 9 }
 0x4a8   :  { %10909 = vmatmul.mubr.msk.bf16.gmra.mrb[12].mxu1 %vm3940_vm3, %v9880_v54 }
 0x4a9   :  { %10920 = vmatprep.mubr.msk.bf16.mxu1 %vm3940_vm3, %v13660_v22  ;;  %v6560_v22 = vrot.slane %v10353_v27, 5  ;;  %v11489_v27 = vld [vmem:[%s15200_s5 + $0x190] sm:$0xff]  }
 0x4b0   :  { %10921 = vmatmul.mubr.msk.bf16.vlgmr.msra.gmra.mrb[0].mxu1 %vm3940_vm3, %v13830_v49  ;;  %v6561_v49 = vsel %vm12707_vm11, %v9894_v2, %v6560_v22 }
 0x4b1   :  { %10924 = vmatprep.mubr.msk.bf16.mxu1 %vm3940_vm3, %v13851_v39  ;;  %v9904_v39 = vcombine.low %v14036_v48, %v6561_v49 }
 0x4b8   :  { %10925 = vmatmul.mubr.msk.bf16.gmra.mrb[4].mxu1 %vm3940_vm3, %v9903_v10 }
 0x4b9   :  { %10928 = vmatprep.mubr.msk.bf16.mxu1 %vm3940_vm3, %v13710_v47  ;;  %v11486_v47 = vld [vmem:[%s15200_s5 + $0x180] sm:$0xff]  }
 0x4ba   :  { %11057 = vmatpush3.bf16.msra.mxu1 %v11486_v47 }
 0x4bb   :  { %11058 = vmatprep.subr.bf16.mxu1 %v15254_v14 }
 0x4c0   :  { %10929 = vmatmul.mubr.msk.bf16.gmra.mrb[8].mxu1 %vm3940_vm3, %v13737_v29  ;;  %v11488_v29 = vld [vmem:[%s15200_s5 + $0x188] sm:$0xff]  }
 0x4c1   :  { %10932 = vmatprep.mubr.msk.bf16.mxu1 %vm3940_vm3, %v13750_v36  ;;  %11059 = vmatpush3.bf16.msra.mxu1 %v11488_v29  ;;  %v14138_v36 = vld [vmem:[%s15199_s4] ss:$0 sm:$0xff] }
 0x4c2   :  { %11060 = vmatprep.subr.bf16.mxu1 %v15254_v14 }
 0x4c5   :  { %11061 = vmatpush3.bf16.msra.mxu1 %v11489_v27 }
 0x4c6   :  { %11062 = vmatprep.subr.bf16.mxu1 %v15254_v14 }
 0x4c8   :  { %10933 = vmatmul.mubr.msk.bf16.gmra.mrb[12].mxu1 %vm3940_vm3, %v9904_v39 }
 0x4c9   :  { %11072 = vmatprep.mubr.msk.bf16.mxu1 %vm11657_vm2, %v15254_v14 }
 0x583   :  { %v10922_v59 = vpop.f32.mrb[0].mxu1 }
 0x584   :  { %v6727_v8 = vadd.f32 %v10922_v59, %v14138_v36  ;;  %v6639_v53 = vpop.f32.mrb[1].mxu1 }
 0x585   :  { %v6725_v52 = vadd.f32 %v14138_v36, %v6639_v53  ;;  %v10923_v23 = vpop.f32.mrb[2].mxu1 }
 0x586   :  { %v6743_v21 = vmax.f32 %v6727_v8, 0.0  ;;  %v6728_v18 = vadd.f32 %v10923_v23, %v14138_v36  ;;  %v6642_v48 = vpop.f32.mrb[3].mxu1 }
 0x587   :  { %v6741_v60 = vmax.f32 %v6725_v52, 0.0  ;;  %v6726_v63 = vadd.f32 %v14138_v36, %v6642_v48 }
 0x588   :  { %v6807_v6 = vcombine.high %v6743_v21, %v6743_v21  ;;  %v6814_v26 = vrot.slane %v6743_v21, %v11854_v44  ;;  %v6744_v62 = vmax.f32 %v6728_v18, 0.0 }
 0x589   :  { %v6773_v25 = vcombine.high %v6741_v60, %v6741_v60  ;;  %v6780_v46 = vrot.slane %v6741_v60, %v11854_v44  ;;  %v6742_v53 = vmax.f32 %v6726_v63, 0.0 }
 0x58a   :  { %v6821_v12 = vrot.slane %v6807_v6, %v11854_v44  ;;  %v6822_v31 = vcombine.high %v6814_v26, %v6814_v26  ;;  %v7165_v0 = vsel %vm382_vm1, %v6814_v26, -inf  ;;  %v6824_v29 = vcombine.high %v6744_v62, %v6744_v62 }
 0x58b   :  { %v7166_v15 = vrot.slane %v7165_v0, 4  ;;  %v6787_v55 = vrot.slane %v6773_v25, %v11854_v44  ;;  %v6788_v5 = vcombine.high %v6780_v46, %v6780_v46  ;;  %v7109_v1 = vsel %vm382_vm1, %v6780_v46, -inf  ;;  %v14150_v4 = vpop.f32.mrb[4].mxu1 }
 0x58c   :  { %v6823_v57 = vcombine.high %v6821_v12, %v6821_v12  ;;  %v7172_v43 = vsel %vm382_vm1, %v6822_v31, -inf  ;;  %v7179_v28 = vsel %vm382_vm1, %v6821_v12, -inf  ;;  %v7110_v61 = vrot.slane %v7109_v1, 4  ;;  %v14154_v32 = vpop.f32.mrb[5].mxu1 }
 0x58d   :  { %v7167_v11 = vmax.f32 %v7165_v0, %v7166_v15  ;;  %v7173_v16 = vrot.slane %v7172_v43, 4  ;;  %v7180_v38 = vrot.slane %v7179_v28, 4  ;;  %v6789_v40 = vcombine.high %v6787_v55, %v6787_v55  ;;  %v14156_v50 = vpop.f32.mrb[6].mxu1 }
 0x58e   :  { %v7186_v56 = vsel %vm382_vm1, %v6823_v57, -inf  ;;  %v7111_v7 = vmax.f32 %v7109_v1, %v7110_v61  ;;  %v7116_v42 = vsel %vm382_vm1, %v6788_v5, -inf  ;;  %v7123_v51 = vsel %vm382_vm1, %v6787_v55, -inf  ;;  %v14161_v3 = vpop.f32.mrb[7].mxu1 }
 0x58f   :  { %v7168_v20 = vrot.slane %v7167_v11, 2  ;;  %v7174_v17 = vmax.f32 %v7172_v43, %v7173_v16  ;;  %v7181_v33 = vmax.f32 %v7179_v28, %v7180_v38  ;;  %v7187_v41 = vrot.slane %v7186_v56, 4 }
 0x590   :  { %v7112_v37 = vrot.slane %v7111_v7, 2  ;;  %v7117_v34 = vrot.slane %v7116_v42, 4  ;;  %v7124_v13 = vrot.slane %v7123_v51, 4  ;;  %v7130_v9 = vsel %vm382_vm1, %v6789_v40, -inf }
 0x591   :  { %v7169_v45 = vmax.f32 %v7167_v11, %v7168_v20  ;;  %v7175_v54 = vrot.slane %v7174_v17, 2  ;;  %v7182_v24 = vrot.slane %v7181_v33, 2  ;;  %v7188_v35 = vmax.f32 %v7186_v56, %v7187_v41  ;;  %v11490_v41 = vld [vmem:[%s15200_s5 + $0x198] sm:$0xff]  }
 0x592   :  { %v7113_v58 = vmax.f32 %v7111_v7, %v7112_v37  ;;  %v7118_v10 = vmax.f32 %v7116_v42, %v7117_v34  ;;  %v7125_v2 = vmax.f32 %v7123_v51, %v7124_v13  ;;  %v7131_v22 = vrot.slane %v7130_v9, 4  ;;  %11063 = vmatpush3.bf16.msra.mxu1 %v11490_v41  ;;  %v11494_v41 = vld [vmem:[%s15200_s5 + $0x1b0] sm:$0xff]  }
 0x593   :  { %v7170_v49 = vrot.slane %v7169_v45, 1  ;;  %v14168_v39 = vpop.f32.mrb[8].mxu1  ;;  %v7176_v30 = vmax.f32 %v7174_v17, %v7175_v54  ;;  %v7183_v47 = vmax.f32 %v7181_v33, %v7182_v24  ;;  %v7189_v19 = vrot.slane %v7188_v35, 2  ;;  %11064 = vmatprep.subr.bf16.mxu1 %v15254_v14 }
 0x594   :  { %v14170_v59 = vpop.f32.mrb[9].mxu1  ;;  %v7114_v8 = vrot.slane %v7113_v58, 1  ;;  %v7119_v23 = vrot.slane %v7118_v10, 2  ;;  %v7126_v21 = vrot.slane %v7125_v2, 2  ;;  %v14174_v18 = vmax.f32 %v7130_v9, %v7131_v22 }
 0x595   :  { %v14172_v52 = vpop.f32.mrb[10].mxu1  ;;  %v14178_v60 = vmax.f32 %v7169_v45, %v7170_v49  ;;  %v6831_v6 = vrot.slane %v6744_v62, %v11854_v44  ;;  %v7177_v26 = vrot.slane %v7176_v30, 1  ;;  %v7184_v25 = vrot.slane %v7183_v47, 1 }
 0x596   :  { %v14176_v48 = vpop.f32.mrb[11].mxu1  ;;  %v14181_v46 = vmax.f32 %v7188_v35, %v7189_v19  ;;  %v6838_v12 = vrot.slane %v6824_v29, %v11854_v44  ;;  %v14184_v31 = vmax.f32 %v7113_v58, %v7114_v8  ;;  %v6790_v15 = vcombine.high %v6742_v53, %v6742_v53  ;;  %v11491_v29 = vld [vmem:[%s15200_s5 + $0x1a0] sm:$0xff]   ;;  %v11492_v8 = vld [vmem:[%s15200_s5 + $0x78] sm:$0xff]  }
 0x597   :  { %v6839_v63 = vcombine.high %v6831_v6, %v6831_v6  ;;  %v7193_v0 = vsel %vm382_vm1, %v6831_v6, -inf  ;;  %v14187_v55 = vmax.f32 %v7118_v10, %v7119_v23  ;;  %v14189_v5 = vmax.f32 %v7125_v2, %v7126_v21  ;;  %11065 = vmatpush3.bf16.msra.mxu1 %v11491_v29  ;;  %10951 = vmatpush3.bf16.msra.mxu0 %v11492_v8 }
 0x598   :  { %v7133_v1 = vrot.slane %v14174_v18, 2  ;;  %v6840_v57 = vcombine.high %v6838_v12, %v6838_v12  ;;  %v7194_v62 = vrot.slane %v7193_v0, 4  ;;  %v7207_v28 = vsel %vm382_vm1, %v6838_v12, -inf  ;;  %11066 = vmatprep.subr.bf16.mxu1 %v15254_v14  ;;  %10956 = vmatprep.subr.bf16.mxu0 %v15254_v14 }
 0x599   :  { %v7200_v43 = vsel %vm382_vm1, %v6839_v63, -inf  ;;  %v6797_v61 = vrot.slane %v6742_v53, %v11854_v44  ;;  %v14197_v16 = vmax.f32 %v7176_v30, %v7177_v26  ;;  %v7208_v40 = vrot.slane %v7207_v28, 4 }
 0x59a   :  { %v7201_v38 = vrot.slane %v7200_v43, 4  ;;  %v7214_v56 = vsel %vm382_vm1, %v6840_v57, -inf  ;;  %v7195_v42 = vmax.f32 %v7193_v0, %v7194_v62  ;;  %v6804_v20 = vrot.slane %v6790_v15, %v11854_v44  ;;  %v11493_v0 = vld [vmem:[%s15200_s5 + $0x1a8] sm:$0xff]  }
 0x59b   :  { %v14195_v11 = vpop.f32.mrb[12].mxu1  ;;  %v7215_v51 = vrot.slane %v7214_v56, 4  ;;  %v6805_v17 = vcombine.high %v6797_v61, %v6797_v61  ;;  %v7185_v27 = vmax.f32 %v7183_v47, %v7184_v25  ;;  %v7209_v34 = vmax.f32 %v7207_v28, %v7208_v40  ;;  %11067 = vmatpush3.bf16.msra.mxu1 %v11493_v0 }
 0x59c   :  { %v14200_v7 = vpop.f32.mrb[13].mxu1  ;;  %v7202_v37 = vmax.f32 %v7200_v43, %v7201_v38  ;;  %v7137_v13 = vsel %vm382_vm1, %v6797_v61, -inf  ;;  %v7196_v45 = vrot.slane %v7195_v42, 2  ;;  %v6806_v24 = vcombine.high %v6804_v20, %v6804_v20  ;;  %11068 = vmatprep.subr.bf16.mxu1 %v15254_v14 }
 0x59d   :  { %v14203_v33 = vpop.f32.mrb[14].mxu1  ;;  %v7216_v54 = vmax.f32 %v7214_v56, %v7215_v51  ;;  %v7138_v35 = vrot.slane %v7137_v13, 4  ;;  %v7210_v10 = vrot.slane %v7209_v34, 2  ;;  %v7144_v2 = vsel %vm382_vm1, %v6805_v17, -inf }
 0x59e   :  { %v14209_v9 = vpop.f32.mrb[15].mxu1  ;;  %v7203_v58 = vrot.slane %v7202_v37, 2  ;;  %v7151_v22 = vsel %vm382_vm1, %v6804_v20, -inf  ;;  %v7197_v49 = vmax.f32 %v7195_v42, %v7196_v45  ;;  %v7145_v19 = vrot.slane %v7144_v2, 4 }
 0x59f   :  { %v7217_v30 = vrot.slane %v7216_v54, 2  ;;  %v7139_v47 = vmax.f32 %v7137_v13, %v7138_v35  ;;  %v7191_v53 = vrot.slane %v14181_v46, 1  ;;  %v7121_v23 = vrot.slane %v14187_v55, 1  ;;  %11069 = vmatpush3.bf16.msra.mxu1 %v11494_v41 }
 0x5a0   :  { %v7211_v21 = vmax.f32 %v7209_v34, %v7210_v10  ;;  %v7152_v6 = vrot.slane %v7151_v22, 4  ;;  %v7198_v26 = vrot.slane %v7197_v49, 1  ;;  %v7146_v12 = vmax.f32 %v7144_v2, %v7145_v19  ;;  %11070 = vmatprep.subr.bf16.mxu1 %v15254_v14 }
 0x5a1   :  { %v7140_v25 = vrot.slane %v7139_v47, 2  ;;  %v7158_v63 = vsel %vm382_vm1, %v6806_v24, -inf  ;;  %v7134_v15 = vmax.f32 %v14174_v18, %v7133_v1  ;;  %v7204_v57 = vmax.f32 %v7202_v37, %v7203_v58 }
 0x5a2   :  { %v7212_v62 = vrot.slane %v7211_v21, 1  ;;  %v6731_v43 = vadd.f32 %v14150_v4, %v14138_v36  ;;  %v7199_v28 = vmax.f32 %v7197_v49, %v7198_v26  ;;  %v7218_v61 = vmax.f32 %v7216_v54, %v7217_v30 }
 0x5a3   :  { %v7141_v38 = vmax.f32 %v7139_v47, %v7140_v25  ;;  %v7147_v40 = vrot.slane %v7146_v12, 2  ;;  %v7128_v56 = vrot.slane %v14189_v5, 1  ;;  %v7153_v51 = vmax.f32 %v7151_v22, %v7152_v6  ;;  %v11495_v47 = vld [vmem:[%s15200_s5 + $0x1b8] sm:$0xff]  }
 0x5a4   :  { %v7213_v42 = vmax.f32 %v7211_v21, %v7212_v62  ;;  %v7159_v20 = vrot.slane %v7158_v63, 4  ;;  %v14233_v18 = vmax.f32 %v14181_v46, %v7191_v53  ;;  %v14236_v1 = vmax.f32 %v14178_v60, %v7199_v28  ;;  %11071 = vmatpush3.bf16.msra.mxu1 %v11495_v47 }
 0x5a5   :  { %v7142_v4 = vrot.slane %v7141_v38, 1  ;;  %v7148_v17 = vmax.f32 %v7146_v12, %v7147_v40  ;;  %v7135_v37 = vrot.slane %v7134_v15, 1  ;;  %v7205_v34 = vrot.slane %v7204_v57, 1  ;;  %11096 = vmatprep.subr.bf16.mxu1 %v15254_v14 }
 0x5a6   :  { %15263 = vst [vmem:[#allocation18_spill] sm:$0xff] %v14233_v18  ;;  %v14241_v13 = vmax.f32 %v7185_v27, %v7213_v42  ;;  %v6747_v45 = vmax.f32 %v6731_v43, 0.0  ;;  %v7219_v54 = vrot.slane %v7218_v61, 1  ;;  %v6729_v60 = vadd.f32 %v14138_v36, %v14154_v32 }
 0x5a7   :  { %v7143_v46 = vmax.f32 %v7141_v38, %v7142_v4  ;;  %v7149_v24 = vrot.slane %v7148_v17, 1  ;;  %v7122_v35 = vmax.f32 %v14187_v55, %v7121_v23  ;;  %v7154_v58 = vrot.slane %v7153_v51, 2 }
 0x5a8   :  { %v7160_v10 = vmax.f32 %v7158_v63, %v7159_v20  ;;  %v6875_v2 = vcombine.high %v6747_v45, %v6747_v45  ;;  %v6882_v27 = vrot.slane %v6747_v45, %v11854_v44  ;;  %v6745_v30 = vmax.f32 %v6729_v60, 0.0 }
 0x5a9   :  { %v7150_v22 = vmax.f32 %v7148_v17, %v7149_v24  ;;  %v14248_v49 = vmax.f32 %v14184_v31, %v7143_v46  ;;  %v14255_v19 = vmax.f32 %v14189_v5, %v7128_v56  ;;  %v14257_v32 = vmax.f32 %v7134_v15, %v7135_v37 }
 0x5aa   :  { %v14259_v55 = vmax.f32 %v7204_v57, %v7205_v34  ;;  %v6889_v29 = vrot.slane %v6875_v2, %v11854_v44  ;;  %v14263_v31 = vmax.f32 %v7218_v61, %v7219_v54  ;;  %v6890_v53 = vcombine.high %v6882_v27, %v6882_v27 }
 0x5ab   :  { %v7558_v8 = vmax.f32 %v7122_v35, %v7150_v22  ;;  %v7277_v23 = vsel %vm382_vm1, %v6882_v27, -inf  ;;  %v7155_v21 = vmax.f32 %v7153_v51, %v7154_v58  ;;  %v7161_v25 = vrot.slane %v7160_v10, 2 }
 0x5ac   :  { %15264 = vst [vmem:[#allocation13_spill] sm:$0xff] %v14263_v31  ;;  %v6891_v6 = vcombine.high %v6889_v29, %v6889_v29  ;;  %v7278_v26 = vrot.slane %v7277_v23, 4  ;;  %v7291_v5 = vsel %vm382_vm1, %v6889_v29, -inf  ;;  %v7284_v12 = vsel %vm382_vm1, %v6890_v53, -inf }
 0x5ad   :  { %v7292_v63 = vrot.slane %v7291_v5, 4  ;;  %v6841_v0 = vcombine.high %v6745_v30, %v6745_v30  ;;  %v7285_v57 = vrot.slane %v7284_v12, 4  ;;  %v6848_v43 = vrot.slane %v6745_v30, %v11854_v44 }
 0x5ae   :  { %v7279_v15 = vmax.f32 %v7277_v23, %v7278_v26  ;;  %v7298_v62 = vsel %vm382_vm1, %v6891_v6, -inf  ;;  %v7595_v28 = vpack.c.bf16 %v14241_v13, %v14241_v13  ;;  %v7162_v34 = vmax.f32 %v7160_v10, %v7161_v25 }
 0x5af   :  { %v7293_v61 = vmax.f32 %v7291_v5, %v7292_v63  ;;  %v7299_v38 = vrot.slane %v7298_v62, 4  ;;  %v6855_v40 = vrot.slane %v6841_v0, %v11854_v44  ;;  %v7286_v42 = vmax.f32 %v7284_v12, %v7285_v57 }
 0x5b0   :  { %v7280_v56 = vrot.slane %v7279_v15, 2  ;;  %v6856_v51 = vcombine.high %v6848_v43, %v6848_v43  ;;  %v7221_v20 = vsel %vm382_vm1, %v6848_v43, -inf  ;;  %v7156_v58 = vrot.slane %v7155_v21, 1 }
 0x5b1   :  { %v7294_v4 = vrot.slane %v7293_v61, 2  ;;  %v7300_v17 = vmax.f32 %v7298_v62, %v7299_v38  ;;  %v6857_v41 = vcombine.high %v6855_v40, %v6855_v40  ;;  %v7222_v37 = vrot.slane %v7221_v20, 4 }
 0x5b2   :  { %v7281_v45 = vmax.f32 %v7279_v15, %v7280_v56  ;;  %v7228_v54 = vsel %vm382_vm1, %v6856_v51, -inf  ;;  %v7235_v46 = vsel %vm382_vm1, %v6855_v40, -inf  ;;  %v7287_v13 = vrot.slane %v7286_v42, 2 }
 0x5b3   :  { %v7295_v24 = vmax.f32 %v7293_v61, %v7294_v4  ;;  %v7223_v60 = vmax.f32 %v7221_v20, %v7222_v37  ;;  %v7229_v35 = vrot.slane %v7228_v54, 4  ;;  %v7301_v2 = vrot.slane %v7300_v17, 2 }
 0x5b4   :  { %v7236_v22 = vrot.slane %v7235_v46, 4  ;;  %v7242_v27 = vsel %vm382_vm1, %v6857_v41, -inf  ;;  %v14280_v47 = vunpack.c.l.b16 %v7595_v28  ;;  %v7163_v53 = vrot.slane %v7162_v34, 1 }
 0x5b5   :  { %v7224_v10 = vrot.slane %v7223_v60, 2  ;;  %v7230_v29 = vmax.f32 %v7228_v54, %v7229_v35  ;;  %v7590_v23 = vpack.c.bf16 %v7558_v8, %v7558_v8  ;;  %v7243_v26 = vrot.slane %v7242_v27, 4 }
 0x5b6   :  { %v7237_v6 = vmax.f32 %v7235_v46, %v7236_v22  ;;  %v7282_v5 = vrot.slane %v7281_v45, 1  ;;  %v14282_v25 = vmax.f32 %v7286_v42, %v7287_v13  ;;  %v7296_v12 = vrot.slane %v7295_v24, 1 }
 0x5b7   :  { %v7225_v63 = vmax.f32 %v7223_v60, %v7224_v10  ;;  %v14284_v0 = vmax.f32 %v7155_v21, %v7156_v58  ;;  %v14286_v15 = vmax.f32 %v7300_v17, %v7301_v2  ;;  %v7244_v57 = vmax.f32 %v7242_v27, %v7243_v26 }
 0x5b8   :  { %v6732_v62 = vadd.f32 %v14156_v50, %v14138_v36  ;;  %v7231_v28 = vrot.slane %v7230_v29, 2  ;;  %v7238_v8 = vrot.slane %v7237_v6, 2  ;;  %v6730_v61 = vadd.f32 %v14138_v36, %v14161_v3 }
 0x5b9   :  { %15265 = vst [vmem:[#allocation14_spill] sm:$0xff] %v14286_v15  ;;  %v14294_v38 = vmax.f32 %v7162_v34, %v7163_v53  ;;  %v14296_v40 = vunpack.c.l.b16 %v7590_v23  ;;  %v7226_v21 = vrot.slane %v7225_v63, 1  ;;  %v14298_v42 = vmax.f32 %v7281_v45, %v7282_v5 }
 0x5ba   :  { %v6748_v56 = vmax.f32 %v6732_v62, 0.0  ;;  %v7289_v51 = vrot.slane %v14282_v25, 1  ;;  %v14301_v20 = vmax.f32 %v7295_v24, %v7296_v12  ;;  %v6746_v50 = vmax.f32 %v6730_v61, 0.0 }
 0x5bb   :  { %v7245_v17 = vrot.slane %v7244_v57, 2  ;;  %v14305_v3 = vmax.f32 %v7230_v29, %v7231_v28  ;;  %v14307_v34 = vmax.f32 %v7237_v6, %v7238_v8  ;;  %v7227_v45 = vmax.f32 %v7225_v63, %v7226_v21 }
 0x5bc   :  { %v6892_v41 = vcombine.high %v6748_v56, %v6748_v56  ;;  %v6899_v37 = vrot.slane %v6748_v56, %v11854_v44  ;;  %v6858_v54 = vcombine.high %v6746_v50, %v6746_v50  ;;  %v6865_v46 = vrot.slane %v6746_v50, %v11854_v44 }
 0x5bd   :  { %v6735_v24 = vadd.f32 %v14168_v39, %v14138_v36  ;;  %v7246_v27 = vmax.f32 %v7244_v57, %v7245_v17 }
 0x5be   :  { %v6906_v13 = vrot.slane %v6892_v41, %v11854_v44  ;;  %v6907_v60 = vcombine.high %v6899_v37, %v6899_v37  ;;  %v7305_v35 = vsel %vm382_vm1, %v6899_v37, -inf  ;;  %v6872_v58 = vrot.slane %v6858_v54, %v11854_v44 }
 0x5bf   :  { %v6873_v2 = vcombine.high %v6865_v46, %v6865_v46  ;;  %v7249_v22 = vsel %vm382_vm1, %v6865_v46, -inf  ;;  %v7306_v29 = vrot.slane %v7305_v35, 4 }
 0x5c0   :  { %v6908_v10 = vcombine.high %v6906_v13, %v6906_v13  ;;  %v7312_v53 = vsel %vm382_vm1, %v6907_v60, -inf  ;;  %v7319_v6 = vsel %vm382_vm1, %v6906_v13, -inf  ;;  %v6874_v26 = vcombine.high %v6872_v58, %v6872_v58 }
 0x5c1   :  { %v7313_v23 = vrot.slane %v7312_v53, 4  ;;  %v7250_v5 = vrot.slane %v7249_v22, 4  ;;  %v7307_v12 = vmax.f32 %v7305_v35, %v7306_v29  ;;  %v7320_v63 = vrot.slane %v7319_v6, 4 }
 0x5c2   :  { %v7326_v39 = vsel %vm382_vm1, %v6908_v10, -inf  ;;  %v7256_v62 = vsel %vm382_vm1, %v6873_v2, -inf  ;;  %v7263_v50 = vsel %vm382_vm1, %v6872_v58, -inf  ;;  %v7270_v17 = vsel %vm382_vm1, %v6874_v26, -inf }
 0x5c3   :  { %v7314_v28 = vmax.f32 %v7312_v53, %v7313_v23  ;;  %v7327_v8 = vrot.slane %v7326_v39, 4  ;;  %v7251_v61 = vmax.f32 %v7249_v22, %v7250_v5  ;;  %v7257_v21 = vrot.slane %v7256_v62, 4 }
 0x5c4   :  { %v7308_v57 = vrot.slane %v7307_v12, 2  ;;  %v7321_v56 = vmax.f32 %v7319_v6, %v7320_v63  ;;  %v7264_v35 = vrot.slane %v7263_v50, 4  ;;  %v7271_v10 = vrot.slane %v7270_v17, 4 }
 0x5c5   :  { %v7315_v41 = vrot.slane %v7314_v28, 2  ;;  %v7328_v37 = vmax.f32 %v7326_v39, %v7327_v8  ;;  %v7252_v54 = vrot.slane %v7251_v61, 2  ;;  %v7258_v46 = vmax.f32 %v7256_v62, %v7257_v21 }
 0x5c6   :  { %v7309_v13 = vmax.f32 %v7307_v12, %v7308_v57  ;;  %v7322_v60 = vrot.slane %v7321_v56, 2  ;;  %v7233_v22 = vrot.slane %v14305_v3, 1  ;;  %v7265_v6 = vmax.f32 %v7263_v50, %v7264_v35 }
 0x5c7   :  { %v7316_v29 = vmax.f32 %v7314_v28, %v7315_v41  ;;  %v7329_v2 = vrot.slane %v7328_v37, 2  ;;  %v7253_v53 = vmax.f32 %v7251_v61, %v7252_v54  ;;  %v7259_v23 = vrot.slane %v7258_v46, 2 }
 0x5c8   :  { %v7310_v5 = vrot.slane %v7309_v13, 1  ;;  %v7272_v63 = vmax.f32 %v7270_v17, %v7271_v10  ;;  %v7240_v58 = vrot.slane %v14307_v34, 1  ;;  %v7247_v26 = vrot.slane %v7246_v27, 1 }
 0x5c9   :  { %v7254_v4 = vrot.slane %v7253_v53, 1  ;;  %v6751_v39 = vmax.f32 %v6735_v24, 0.0  ;;  %v7317_v62 = vrot.slane %v7316_v29, 1  ;;  %v7323_v12 = vmax.f32 %v7321_v56, %v7322_v60 }
 0x5ca   :  { %v7311_v8 = vmax.f32 %v7309_v13, %v7310_v5  ;;  %v7266_v21 = vrot.slane %v7265_v6, 2  ;;  %v14324_v57 = vmax.f32 %v7328_v37, %v7329_v2  ;;  %v14326_v41 = vmax.f32 %v7258_v46, %v7259_v23 }
 0x5cb   :  { %v7255_v28 = vmax.f32 %v7253_v53, %v7254_v4  ;;  %v6733_v61 = vadd.f32 %v14138_v36, %v14170_v59  ;;  %v14333_v50 = vmax.f32 %v14282_v25, %v7289_v51  ;;  %v7273_v56 = vrot.slane %v7272_v63, 2 }
 0x5cc   :  { %v14336_v17 = vmax.f32 %v14298_v42, %v7311_v8  ;;  %v14338_v24 = vmax.f32 %v7265_v6, %v7266_v21  ;;  %v14341_v37 = vmax.f32 %v14305_v3, %v7233_v22  ;;  %v14344_v4 = vmax.f32 %v14307_v34, %v7240_v58 }
 0x5cd   :  { %15266 = vst [vmem:[#allocation6_spill] sm:$0xff] %v14333_v50  ;;  %v14346_v54 = vmax.f32 %v7227_v45, %v7255_v28  ;;  %v6943_v59 = vcombine.high %v6751_v39, %v6751_v39  ;;  %v14348_v46 = vmax.f32 %v7246_v27, %v7247_v26  ;;  %v14350_v13 = vmax.f32 %v7316_v29, %v7317_v62 }
 0x5ce   :  { %15267 = vst [vmem:[#allocation7_spill] sm:$0xff] %v14341_v37  ;;  %v7324_v25 = vrot.slane %v7323_v12, 1  ;;  %v6950_v42 = vrot.slane %v6751_v39, %v11854_v44  ;;  %v7331_v51 = vrot.slane %v14324_v57, 1  ;;  %v7261_v60 = vrot.slane %v14326_v41, 1 }
 0x5cf   :  { %15268 = vst [vmem:[#allocation10_spill] sm:$0xff] %v14348_v46  ;;  %15269 = vst [vmem:[#allocation8_spill] sm:$0xff] %v14350_v13  ;;  %v6957_v3 = vrot.slane %v6943_v59, %v11854_v44  ;;  %v6749_v35 = vmax.f32 %v6733_v61, 0.0  ;;  %v7268_v34 = vrot.slane %v14338_v24, 1  ;;  %v7274_v10 = vmax.f32 %v7272_v63, %v7273_v56 }
 0x5d0   :  { %v6958_v45 = vcombine.high %v6950_v42, %v6950_v42  ;;  %v7389_v2 = vsel %vm382_vm1, %v6950_v42, -inf  ;;  %v6736_v58 = vadd.f32 %v14172_v52, %v14138_v36  ;;  %v14369_v13 = vmax.f32 %v7323_v12, %v7324_v25 }
 0x5d1   :  { %v6959_v27 = vcombine.high %v6957_v3, %v6957_v3  ;;  %v7390_v53 = vrot.slane %v7389_v2, 4  ;;  %v7403_v29 = vsel %vm382_vm1, %v6957_v3, -inf  ;;  %v6909_v23 = vcombine.high %v6749_v35, %v6749_v35 }
 0x5d2   :  { %v7396_v22 = vsel %vm382_vm1, %v6958_v45, -inf  ;;  %v7404_v5 = vrot.slane %v7403_v29, 4  ;;  %v6916_v6 = vrot.slane %v6749_v35, %v11854_v44 }
 0x5d3   :  { %v7391_v26 = vmax.f32 %v7389_v2, %v7390_v53  ;;  %v7397_v39 = vrot.slane %v7396_v22, 4  ;;  %v7410_v63 = vsel %vm382_vm1, %v6959_v27, -inf  ;;  %v6923_v8 = vrot.slane %v6909_v23, %v11854_v44 }
 0x5d4   :  { %v7405_v62 = vmax.f32 %v7403_v29, %v7404_v5  ;;  %v7411_v21 = vrot.slane %v7410_v63, 4  ;;  %v6924_v28 = vcombine.high %v6916_v6, %v6916_v6  ;;  %v7333_v61 = vsel %vm382_vm1, %v6916_v6, -inf }
 0x5d5   :  { %v7392_v56 = vrot.slane %v7391_v26, 2  ;;  %v7398_v59 = vmax.f32 %v7396_v22, %v7397_v39  ;;  %v6925_v42 = vcombine.high %v6923_v8, %v6923_v8  ;;  %v7334_v3 = vrot.slane %v7333_v61, 4 }
 0x5d6   :  { %v7406_v45 = vrot.slane %v7405_v62, 2  ;;  %v7412_v35 = vmax.f32 %v7410_v63, %v7411_v21  ;;  %v7340_v30 = vsel %vm382_vm1, %v6924_v28, -inf  ;;  %v7347_v52 = vsel %vm382_vm1, %v6923_v8, -inf }
 0x5d7   :  { %v7393_v2 = vmax.f32 %v7391_v26, %v7392_v56  ;;  %v7399_v53 = vrot.slane %v7398_v59, 2  ;;  %v7335_v27 = vmax.f32 %v7333_v61, %v7334_v3  ;;  %v7341_v43 = vrot.slane %v7340_v30, 4 }
 0x5d8   :  { %v7275_v23 = vrot.slane %v7274_v10, 1  ;;  %v7407_v29 = vmax.f32 %v7405_v62, %v7406_v45  ;;  %v7413_v5 = vrot.slane %v7412_v35, 2  ;;  %v7348_v15 = vrot.slane %v7347_v52, 4 }
 0x5d9   :  { %v7400_v50 = vmax.f32 %v7398_v59, %v7399_v53  ;;  %v7342_v6 = vmax.f32 %v7340_v30, %v7341_v43  ;;  %v7354_v22 = vsel %vm382_vm1, %v6925_v42, -inf  ;;  %v6752_v39 = vmax.f32 %v6736_v58, 0.0 }
 0x5da   :  { %v7394_v63 = vrot.slane %v7393_v2, 1  ;;  %v7336_v21 = vrot.slane %v7335_v27, 2  ;;  %v7349_v28 = vmax.f32 %v7347_v52, %v7348_v15  ;;  %v14372_v8 = vmax.f32 %v14324_v57, %v7331_v51 }
 0x5db   :  { %v14375_v26 = vmax.f32 %v14326_v41, %v7261_v60  ;;  %v7408_v61 = vrot.slane %v7407_v29, 1  ;;  %v14377_v62 = vmax.f32 %v7412_v35, %v7413_v5  ;;  %v7401_v12 = vrot.slane %v7400_v50, 1 }
 0x5dc   :  { %15270 = vst [vmem:[#allocation15_spill] sm:$0xff] %v14372_v8  ;;  %v7355_v25 = vrot.slane %v7354_v22, 4  ;;  %v14384_v58 = vmax.f32 %v14338_v24, %v7268_v34  ;;  %v14386_v15 = vmax.f32 %v7274_v10, %v7275_v23  ;;  %v7343_v57 = vrot.slane %v7342_v6, 2 }
 0x5dd   :  { %15271 = vst [vmem:[#allocation11_spill] sm:$0xff] %v14375_v26  ;;  %v6960_v51 = vcombine.high %v6752_v39, %v6752_v39  ;;  %v7395_v41 = vmax.f32 %v7393_v2, %v7394_v63  ;;  %v7337_v60 = vmax.f32 %v7335_v27, %v7336_v21  ;;  %v7350_v56 = vrot.slane %v7349_v28, 2 }
 0x5de   :  { %15272 = vst [vmem:[#allocation16_spill] sm:$0xff] %v14386_v15  ;;  %v6967_v59 = vrot.slane %v6752_v39, %v11854_v44  ;;  %v7409_v42 = vmax.f32 %v7407_v29, %v7408_v61  ;;  %v6734_v35 = vadd.f32 %v14138_v36, %v14176_v48  ;;  %v14393_v52 = vmax.f32 %v7400_v50, %v7401_v12 }
 0x5df   :  { %v6974_v45 = vrot.slane %v6960_v51, %v11854_v44  ;;  %v7356_v24 = vmax.f32 %v7354_v22, %v7355_v25  ;;  %v7344_v53 = vmax.f32 %v7342_v6, %v7343_v57  ;;  %v7338_v5 = vrot.slane %v7337_v60, 1 }
 0x5e0   :  { %15273 = vst [vmem:[#allocation9_spill] sm:$0xff] %v14393_v52  ;;  %v6975_v34 = vcombine.high %v6967_v59, %v6967_v59  ;;  %v7417_v10 = vsel %vm382_vm1, %v6967_v59, -inf  ;;  %v14397_v29 = vmax.f32 %v7349_v28, %v7350_v56  ;;  %v6750_v50 = vmax.f32 %v6734_v35, 0.0 }
 0x5e1   :  { %v6976_v2 = vcombine.high %v6974_v45, %v6974_v45  ;;  %v7418_v27 = vrot.slane %v7417_v10, 4  ;;  %v7431_v23 = vsel %vm382_vm1, %v6974_v45, -inf  ;;  %v7357_v22 = vrot.slane %v7356_v24, 2 }
 0x5e2   :  { %v7424_v39 = vsel %vm382_vm1, %v6975_v34, -inf  ;;  %v7432_v63 = vrot.slane %v7431_v23, 4  ;;  %v6739_v6 = vadd.f32 %v14195_v11, %v14138_v36  ;;  %v7345_v57 = vrot.slane %v7344_v53, 1 }
 0x5e3   :  { %v7419_v21 = vmax.f32 %v7417_v10, %v7418_v27  ;;  %v7425_v61 = vrot.slane %v7424_v39, 4  ;;  %v7438_v48 = vsel %vm382_vm1, %v6976_v2, -inf  ;;  %v6926_v59 = vcombine.high %v6750_v50, %v6750_v50 }
 0x5e4   :  { %v7433_v12 = vmax.f32 %v7431_v23, %v7432_v63  ;;  %v7439_v25 = vrot.slane %v7438_v48, 4  ;;  %v6933_v28 = vrot.slane %v6750_v50, %v11854_v44  ;;  %v7339_v56 = vmax.f32 %v7337_v60, %v7338_v5 }
 0x5e5   :  { %v7420_v51 = vrot.slane %v7419_v21, 2  ;;  %v7426_v34 = vmax.f32 %v7424_v39, %v7425_v61  ;;  %v6940_v35 = vrot.slane %v6926_v59, %v11854_v44  ;;  %v14406_v23 = vmax.f32 %v7356_v24, %v7357_v22 }
 0x5e6   :  { %v7434_v10 = vrot.slane %v7433_v12, 2  ;;  %v7440_v43 = vmax.f32 %v7438_v48, %v7439_v25  ;;  %v6941_v2 = vcombine.high %v6933_v28, %v6933_v28  ;;  %v7361_v11 = vsel %vm382_vm1, %v6933_v28, -inf }
 0x5e7   :  { %v7421_v27 = vmax.f32 %v7419_v21, %v7420_v51  ;;  %v6755_v30 = vmax.f32 %v6739_v6, 0.0  ;;  %v7346_v3 = vmax.f32 %v7344_v53, %v7345_v57  ;;  %v6942_v46 = vcombine.high %v6940_v35, %v6940_v35 }
 0x5e8   :  { %v7435_v63 = vmax.f32 %v7433_v12, %v7434_v10  ;;  %v7362_v50 = vrot.slane %v7361_v11, 4  ;;  %v7427_v60 = vrot.slane %v7426_v34, 2  ;;  %v7368_v39 = vsel %vm382_vm1, %v6941_v2, -inf }
 0x5e9   :  { %v7422_v8 = vrot.slane %v7421_v27, 1  ;;  %v7375_v21 = vsel %vm382_vm1, %v6940_v35, -inf  ;;  %v7441_v48 = vrot.slane %v7440_v43, 2  ;;  %v7369_v51 = vrot.slane %v7368_v39, 4 }
 0x5ea   :  { %v7436_v5 = vrot.slane %v7435_v63, 1  ;;  %v7363_v25 = vmax.f32 %v7361_v11, %v7362_v50  ;;  %v7376_v22 = vrot.slane %v7375_v21, 4  ;;  %v7382_v12 = vsel %vm382_vm1, %v6942_v46, -inf }
 0x5eb   :  { %v7423_v61 = vmax.f32 %v7421_v27, %v7422_v8  ;;  %v7011_v59 = vcombine.high %v6755_v30, %v6755_v30  ;;  %v7359_v53 = vrot.slane %v14406_v23, 1  ;;  %v7370_v28 = vmax.f32 %v7368_v39, %v7369_v51 }
 0x5ec   :  { %v7437_v24 = vmax.f32 %v7435_v63, %v7436_v5  ;;  %v7364_v57 = vrot.slane %v7363_v25, 2  ;;  %v7428_v10 = vmax.f32 %v7426_v34, %v7427_v60  ;;  %v7377_v2 = vmax.f32 %v7375_v21, %v7376_v22 }
 0x5ed   :  { %v14413_v6 = vmax.f32 %v7395_v41, %v7423_v61  ;;  %v7383_v15 = vrot.slane %v7382_v12, 4  ;;  %v7371_v8 = vrot.slane %v7370_v28, 2  ;;  %v7018_v27 = vrot.slane %v6755_v30, %v11854_v44 }
 0x5ee   :  { %v7579_v45 = vmax.f32 %v7409_v42, %v7437_v24  ;;  %v7365_v35 = vmax.f32 %v7363_v25, %v7364_v57  ;;  %v6737_v63 = vadd.f32 %v14138_v36, %v14200_v7  ;;  %v7442_v11 = vmax.f32 %v7440_v43, %v7441_v48 }
 0x5ef   :  { %v7378_v46 = vrot.slane %v7377_v2, 2  ;;  %v7384_v50 = vmax.f32 %v7382_v12, %v7383_v15  ;;  %v7025_v5 = vrot.slane %v7011_v59, %v11854_v44  ;;  %v7372_v61 = vmax.f32 %v7370_v28, %v7371_v8 }
 0x5f0   :  { %v7366_v41 = vrot.slane %v7365_v35, 1  ;;  %v7026_v37 = vcombine.high %v7018_v27, %v7018_v27  ;;  %v7501_v34 = vsel %vm382_vm1, %v7018_v27, -inf  ;;  %v7429_v42 = vrot.slane %v7428_v10, 1 }
 0x5f1   :  { %v7379_v60 = vmax.f32 %v7377_v2, %v7378_v46  ;;  %v7385_v39 = vrot.slane %v7384_v50, 2  ;;  %v7027_v21 = vcombine.high %v7025_v5, %v7025_v5  ;;  %v7373_v51 = vrot.slane %v7372_v61, 1 }
 0x5f2   :  { %v7367_v25 = vmax.f32 %v7365_v35, %v7366_v41  ;;  %v7502_v30 = vrot.slane %v7501_v34, 4  ;;  %v7508_v24 = vsel %vm382_vm1, %v7026_v37, -inf  ;;  %v7443_v7 = vrot.slane %v7442_v11, 1 }
 0x5f3   :  { %v7386_v43 = vmax.f32 %v7384_v50, %v7385_v39  ;;  %v7509_v48 = vrot.slane %v7508_v24, 4  ;;  %v7515_v15 = vsel %vm382_vm1, %v7025_v5, -inf  ;;  %v7374_v22 = vmax.f32 %v7372_v61, %v7373_v51 }
 0x5f4   :  { %v14422_v12 = vmax.f32 %v7339_v56, %v7367_v25  ;;  %v7503_v59 = vmax.f32 %v7501_v34, %v7502_v30  ;;  %v7516_v57 = vrot.slane %v7515_v15, 4  ;;  %v15274_v28 = vrot.slane %v14377_v62, 1 }
 0x5f5   :  { %v15276_v35 = vrot.slane %v14397_v29, 1  ;;  %v7611_v37 = vpack.c.bf16 %v7579_v45, %v7579_v45  ;;  %v7510_v27 = vmax.f32 %v7508_v24, %v7509_v48  ;;  %v7380_v46 = vrot.slane %v7379_v60, 1 }
 0x5f6   :  { %v14427_v2 = vmax.f32 %v14377_v62, %v15274_v28  ;;  %v14434_v50 = vmax.f32 %v7346_v3, %v7374_v22  ;;  %v7504_v5 = vrot.slane %v7503_v59, 2  ;;  %v7522_v56 = vsel %vm382_vm1, %v7027_v21, -inf }
 0x5f7   :  { %v14432_v8 = vmax.f32 %v14397_v29, %v15276_v35  ;;  %v14438_v41 = vmax.f32 %v14406_v23, %v7359_v53  ;;  %v14440_v61 = vmax.f32 %v7428_v10, %v7429_v42  ;;  %v7517_v62 = vmax.f32 %v7515_v15, %v7516_v57 }
 0x5f8   :  { %15275 = vst [vmem:[#allocation12_spill] sm:$0xff] %v14427_v2  ;;  %v6753_v34 = vmax.f32 %v6737_v63, 0.0  ;;  %v14442_v39 = vmax.f32 %v7442_v11, %v7443_v7  ;;  %v7387_v45 = vrot.slane %v7386_v43, 1  ;;  %v6740_v3 = vadd.f32 %v14203_v33, %v14138_v36 }
 0x5f9   :  { %15277 = vst [vmem:[#allocation17_spill] sm:$0xff] %v14440_v61  ;;  %v7511_v25 = vrot.slane %v7510_v27, 2  ;;  %v7523_v51 = vrot.slane %v7522_v56, 4  ;;  %v14449_v23 = vunpack.c.l.b16 %v7611_v37  ;;  %v14451_v53 = vmax.f32 %v7379_v60, %v7380_v46 }
 0x5fa   :  { %15278 = vst [vmem:[#allocation19_spill] sm:$0xff] %v14442_v39  ;;  %v6977_v30 = vcombine.high %v6753_v34, %v6753_v34  ;;  %v6984_v21 = vrot.slane %v6753_v34, %v11854_v44  ;;  %v7505_v10 = vmax.f32 %v7503_v59, %v7504_v5  ;;  %v6756_v63 = vmax.f32 %v6740_v3, 0.0 }
 0x5fb   :  { %v7518_v42 = vrot.slane %v7517_v62, 2  ;;  %v14456_v48 = vmax.f32 %v7386_v43, %v7387_v45  ;;  %v7606_v36 = vpack.c.bf16 %v14434_v50, %v14434_v50  ;;  %v7512_v22 = vmax.f32 %v7510_v27, %v7511_v25 }
 0x5fc   :  { %v6991_v24 = vrot.slane %v6977_v30, %v11854_v44  ;;  %v6992_v7 = vcombine.high %v6984_v21, %v6984_v21  ;;  %v7445_v33 = vsel %vm382_vm1, %v6984_v21, -inf  ;;  %v7028_v15 = vcombine.high %v6756_v63, %v6756_v63 }
 0x5fd   :  { %v7524_v60 = vmax.f32 %v7522_v56, %v7523_v51  ;;  %v7446_v59 = vrot.slane %v7445_v33, 4  ;;  %v7506_v28 = vrot.slane %v7505_v10, 1  ;;  %v7035_v46 = vrot.slane %v6756_v63, %v11854_v44 }
 0x5fe   :  { %v6993_v57 = vcombine.high %v6991_v24, %v6991_v24  ;;  %v7452_v35 = vsel %vm382_vm1, %v6992_v7, -inf  ;;  %v7459_v37 = vsel %vm382_vm1, %v6991_v24, -inf  ;;  %v7519_v5 = vmax.f32 %v7517_v62, %v7518_v42 }
 0x5ff   :  { %v7447_v43 = vmax.f32 %v7445_v33, %v7446_v59  ;;  %v7453_v34 = vrot.slane %v7452_v35, 4  ;;  %v7460_v45 = vrot.slane %v7459_v37, 4  ;;  %v7042_v3 = vrot.slane %v7028_v15, %v11854_v44 }
 0x600   :  { %v7466_v50 = vsel %vm382_vm1, %v6993_v57, -inf  ;;  %v7043_v30 = vcombine.high %v7035_v46, %v7035_v46  ;;  %v7529_v27 = vsel %vm382_vm1, %v7035_v46, -inf  ;;  %v7525_v56 = vrot.slane %v7524_v60, 2 }
 0x601   :  { %v7448_v25 = vrot.slane %v7447_v43, 2  ;;  %v7454_v51 = vmax.f32 %v7452_v35, %v7453_v34  ;;  %v7461_v21 = vmax.f32 %v7459_v37, %v7460_v45  ;;  %v7467_v7 = vrot.slane %v7466_v50, 4 }
 0x602   :  { %v7044_v29 = vcombine.high %v7042_v3, %v7042_v3  ;;  %v7530_v24 = vrot.slane %v7529_v27, 4  ;;  %v7536_v63 = vsel %vm382_vm1, %v7043_v30, -inf  ;;  %v7513_v11 = vrot.slane %v7512_v22, 1 }
 0x603   :  { %v7449_v62 = vmax.f32 %v7447_v43, %v7448_v25  ;;  %v7455_v42 = vrot.slane %v7454_v51, 2  ;;  %v7462_v33 = vrot.slane %v7461_v21, 2  ;;  %v7537_v59 = vrot.slane %v7536_v63, 4 }
 0x604   :  { %v7468_v57 = vmax.f32 %v7466_v50, %v7467_v7  ;;  %v7531_v26 = vmax.f32 %v7529_v27, %v7530_v24  ;;  %v7543_v15 = vsel %vm382_vm1, %v7042_v3, -inf  ;;  %v7520_v2 = vrot.slane %v7519_v5, 1 }
 0x605   :  { %v14469_v46 = vmax.f32 %v7524_v60, %v7525_v56  ;;  %v7538_v39 = vmax.f32 %v7536_v63, %v7537_v59  ;;  %v7550_v35 = vsel %vm382_vm1, %v7044_v29, -inf  ;;  %v7456_v37 = vmax.f32 %v7454_v51, %v7455_v42  ;;  %v11630_v29 = vld [vmem:[%s15199_s4] ss:$0 sm:$0xff] }
 0x606   :  { %v7463_v34 = vmax.f32 %v7461_v21, %v7462_v33  ;;  %v7532_v45 = vrot.slane %v7531_v26, 2  ;;  %v7544_v18 = vrot.slane %v7543_v15, 4  ;;  %v7657_v30 = vunpack.c.l.b16 %v7606_v36 }
 0x607   :  { %v7507_v43 = vmax.f32 %v7505_v10, %v7506_v28  ;;  %v7450_v25 = vrot.slane %v7449_v62, 1  ;;  %v7469_v31 = vrot.slane %v7468_v57, 2  ;;  %v7539_v61 = vrot.slane %v7538_v39, 2 }
 0x608   :  { %v7533_v52 = vmax.f32 %v7531_v26, %v7532_v45  ;;  %v7545_v50 = vmax.f32 %v7543_v15, %v7544_v18  ;;  %v7551_v27 = vrot.slane %v7550_v35, 4  ;;  %v14472_v7 = vmax.f32 %v7512_v22, %v7513_v11 }
 0x609   :  { %v14474_v3 = vmax.f32 %v7519_v5, %v7520_v2  ;;  %v7527_v60 = vrot.slane %v14469_v46, 1  ;;  %v6738_v56 = vadd.f32 %v11630_v29, %v14209_v9  ;;  %v7457_v36 = vrot.slane %v7456_v37, 1  ;;  %v11496_v9 = vld [vmem:[%s15200_s5 + $0x200] sm:$0xff]   ;;  %v11499_v29 = vld [vmem:[%s15200_s5 + $0x8] sm:$0xff]  }
 0x60a   :  { %v7464_v10 = vrot.slane %v7463_v34, 1  ;;  %v7534_v28 = vrot.slane %v7533_v52, 1  ;;  %v7546_v51 = vrot.slane %v7545_v50, 2  ;;  %v14481_v26 = vmax.f32 %v7449_v62, %v7450_v25 }
 0x60b   :  { %v6754_v18 = vmax.f32 %v6738_v56, 0.0  ;;  %v8317_v2 = vsel %vm4503_vm4, %v14449_v23, %v14280_v47  ;;  %v14486_v11 = vmax.f32 %v7468_v57, %v7469_v31  ;;  %v14488_v5 = vmax.f32 %v7538_v39, %v7539_v61  ;;  %v11497_v23 = vld [vmem:[%s15200_s5] sm:$0xff]  }
 0x60c   :  { %v7535_v22 = vmax.f32 %v7533_v52, %v7534_v28  ;;  %v7552_v21 = vmax.f32 %v7550_v35, %v7551_v27  ;;  %v14495_v24 = vmax.f32 %v7545_v50, %v7546_v51  ;;  %v8318_v31 = vpack.c.b16 %v8317_v2, %v8317_v2 }
 0x60d   :  { %v6994_v63 = vcombine.high %v6754_v18, %v6754_v18  ;;  %v7001_v62 = vrot.slane %v6754_v18, %v11854_v44  ;;  %v14500_v47 = vmax.f32 %v7456_v37, %v7457_v36  ;;  %v14502_v52 = vmax.f32 %v7463_v34, %v7464_v10 }
 0x60e   :  { %v14504_v61 = vmax.f32 %v7507_v43, %v7535_v22  ;;  %v7658_v39 = vsel %vm4503_vm4, %v7657_v30, %v14296_v40  ;;  %11073 = vmatmul.mubr.bf16.vlgmr.msra.gmra.mrb[16].mxu1 %v8318_v31  ;;  %v7471_v15 = vrot.slane %v14486_v11, 1  ;;  %v7541_v35 = vrot.slane %v14488_v5, 1  ;;  %v11498_v40 = vld [vmem:[%s15200_s5 + $0x208] sm:$0xff]  }
 0x60f   :  { %v7008_v42 = vrot.slane %v6994_v63, %v11854_v44  ;;  %v7009_v33 = vcombine.high %v7001_v62, %v7001_v62  ;;  %v7473_v59 = vsel %vm382_vm1, %v7001_v62, -inf  ;;  %v7659_v57 = vpack.c.b16 %v7658_v39, %v7658_v39  ;;  %11097 = vmatpush3.bf16.msra.mxu1 %v11496_v9  ;;  %11112 = vmatprep.mubr.msk.bf16.mxu1 %vm11657_vm2, %v15254_v14  ;;  %v11500_v62 = vld [vmem:[%s15200_s5 + $0x210] sm:$0xff]  }
 0x610   :  { %v7553_v37 = vrot.slane %v7552_v21, 2  ;;  %v7474_v34 = vrot.slane %v7473_v59, 4  ;;  %v7548_v44 = vrot.slane %v14495_v24, 1  ;;  %11098 = vmatprep.subr.bf16.mxu1 %v15254_v14  ;;  %v15279_v56 = vpack.c.bf16 %v14248_v49, %v14248_v49 }
 0x611   :  { %v7010_v45 = vcombine.high %v7008_v42, %v7008_v42  ;;  %v7480_v30 = vsel %vm382_vm1, %v7009_v33, -inf  ;;  %v7487_v43 = vsel %vm382_vm1, %v7008_v42, -inf  ;;  %10953 = vmatmul.mubr.bf16.vlgmr.msra.gmra.mrb[64].mxu0 %v7659_v57  ;;  %v15280_v28 = vpack.c.bf16 %v14422_v12, %v14422_v12  ;;  %v11501_v42 = vld [vmem:[%s15200_s5 + $0x10] sm:$0xff]  }
 0x612   :  { %v7475_v25 = vmax.f32 %v7473_v59, %v7474_v34  ;;  %v7481_v50 = vrot.slane %v7480_v30, 4  ;;  %v7488_v27 = vrot.slane %v7487_v43, 4  ;;  %10957 = vmatpush3.bf16.msra.mxu0 %v11497_v23  ;;  %10972 = vmatprep.mubr.msk.bf16.mxu0 %vm11657_vm2, %v15254_v14  ;;  %v7751_v36 = vunpack.c.l.b16 %v15279_v56 }
 0x613   :  { %v7494_v10 = vsel %vm382_vm1, %v7010_v45, -inf  ;;  %10958 = vmatprep.subr.bf16.mxu0 %v15254_v14  ;;  %v7752_v51 = vunpack.c.l.b16 %v15280_v28  ;;  %v14539_v18 = vmax.f32 %v14344_v4, %v14384_v58  ;;  %v7559_v2 = vmax.f32 %v14255_v19, %v14284_v0  ;;  %11099 = vmatpush3.bf16.msra.mxu1 %v11498_v40  ;;  %v11502_v45 = vld [vmem:[%s15200_s5 + $0x218] sm:$0xff]  }
 0x614   :  { %v7476_v22 = vrot.slane %v7475_v25, 2  ;;  %v7482_v9 = vmax.f32 %v7480_v30, %v7481_v50  ;;  %v7489_v63 = vmax.f32 %v7487_v43, %v7488_v27  ;;  %v7495_v49 = vrot.slane %v7494_v10, 4  ;;  %11100 = vmatprep.subr.bf16.mxu1 %v15254_v14 }
 0x615   :  { %v7617_v12 = vpack.c.bf16 %v14504_v61, %v14504_v61  ;;  %v14550_v4 = vsel %vm4503_vm4, %v7752_v51, %v7751_v36  ;;  %v7575_v19 = vmax.f32 %v14432_v8, %v14451_v53  ;;  %v7591_v0 = vpack.c.bf16 %v7559_v2, %v7559_v2 }
 0x616   :  { %v7477_v58 = vmax.f32 %v7475_v25, %v7476_v22  ;;  %v7483_v31 = vrot.slane %v7482_v9, 2  ;;  %v7490_v39 = vrot.slane %v7489_v63, 2  ;;  %v7496_v23 = vmax.f32 %v7494_v10, %v7495_v49  ;;  %10959 = vmatpush3.bf16.msra.mxu0 %v11499_v29  ;;  %v11503_v29 = vld [vmem:[%s15200_s5 + $0x18] sm:$0xff]   ;;  %v11504_v10 = vld [vmem:[%s15200_s5 + $0x220] sm:$0xff]  }
 0x617   :  { %v14558_v61 = vmax.f32 %v14486_v11, %v7471_v15  ;;  %v14560_v33 = vmax.f32 %v7552_v21, %v7553_v37  ;;  %10960 = vmatprep.subr.bf16.mxu0 %v15254_v14  ;;  %v7607_v59 = vpack.c.bf16 %v7575_v19, %v7575_v19  ;;  %v7863_v57 = vunpack.c.l.b16 %v7591_v0  ;;  %11101 = vmatpush3.bf16.msra.mxu1 %v11500_v62 }
 0x618   :  { %v7478_v8 = vrot.slane %v7477_v58, 1  ;;  %v7484_v53 = vmax.f32 %v7482_v9, %v7483_v31  ;;  %v7491_v34 = vmax.f32 %v7489_v63, %v7490_v39  ;;  %v7497_v40 = vrot.slane %v7496_v23, 2  ;;  %11102 = vmatprep.subr.bf16.mxu1 %v15254_v14 }
 0x619   :  { %v7864_v30 = vunpack.c.l.b16 %v7607_v59  ;;  %v15281_v11 = vpack.c.bf16 %v14336_v17, %v14336_v17  ;;  %v8994_v15 = vunpack.c.l.b16 %v7617_v12  ;;  %v7560_v37 = vmax.f32 %v14257_v32, %v14294_v38 }
 0x61a   :  { %v7549_v43 = vmax.f32 %v14495_v24, %v7548_v44  ;;  %v7479_v25 = vmax.f32 %v7477_v58, %v7478_v8  ;;  %v7492_v50 = vrot.slane %v7491_v34, 1  ;;  %v7498_v27 = vmax.f32 %v7496_v23, %v7497_v40  ;;  %10961 = vmatpush3.bf16.msra.mxu0 %v11501_v42  ;;  %v15285_v23 = vld [vmem:[#allocation17_spill] sm:$0xff]  ;;  %v11507_v8 = vld [vmem:[%s15200_s5 + $0x28] sm:$0xff]  }
 0x61b   :  { %v8993_v21 = vunpack.c.l.b16 %v15281_v11  ;;  %10962 = vmatprep.subr.bf16.mxu0 %v15254_v14  ;;  %v14578_v56 = vsel %vm4503_vm4, %v7864_v30, %v7863_v57  ;;  %v7576_v32 = vmax.f32 %v14438_v41, %v14456_v48  ;;  %v7592_v38 = vpack.c.bf16 %v7560_v37, %v7560_v37  ;;  %11103 = vmatpush3.bf16.msra.mxu1 %v11502_v45  ;;  %v15286_v42 = vld [vmem:[#allocation9_spill] sm:$0xff] }
 0x61c   :  { %v7555_v24 = vrot.slane %v14560_v33, 1  ;;  %v7493_v44 = vmax.f32 %v7491_v34, %v7492_v50  ;;  %v7581_v36 = vmax.f32 %v14481_v26, %v7479_v25  ;;  %v15282_v28 = vpack.c.bf16 %v14346_v54, %v14346_v54  ;;  %11104 = vmatprep.subr.bf16.mxu1 %v15254_v14  ;;  %v11505_v26 = vld [vmem:[%s15200_s5 + $0x20] sm:$0xff]   ;;  %v15289_v50 = vld [vmem:[#allocation19_spill] sm:$0xff] }
 0x61d   :  { %v14581_v17 = vsel %vm4503_vm4, %v8994_v15, %v8993_v21  ;;  %v7485_v2 = vrot.slane %v7484_v53, 1  ;;  %v7499_v22 = vrot.slane %v7498_v27, 1  ;;  %v7599_v41 = vpack.c.bf16 %v14539_v18, %v14539_v18  ;;  %v15287_v37 = vld [vmem:[#allocation13_spill] sm:$0xff] }
 0x61e   :  { %v8541_v51 = vunpack.c.l.b16 %v15282_v28  ;;  %v7608_v48 = vpack.c.bf16 %v7576_v32, %v7576_v32  ;;  %v7613_v9 = vpack.c.bf16 %v7581_v36, %v7581_v36  ;;  %10963 = vmatpush3.bf16.msra.mxu0 %v11503_v29  ;;  %v7583_v63 = vmax.f32 %v14502_v52, %v7493_v44  ;;  %v11506_v52 = vld [vmem:[%s15200_s5 + $0x228] sm:$0xff]   ;;  %v15290_v29 = vld [vmem:[#allocation12_spill] sm:$0xff] }
 0x61f   :  { %v7976_v49 = vunpack.c.l.b16 %v7592_v38  ;;  %v7571_v54 = vmax.f32 %v14301_v20, %v14369_v13  ;;  %10964 = vmatprep.subr.bf16.mxu0 %v15254_v14  ;;  %v7587_v12 = vmax.f32 %v14474_v3, %v7549_v43  ;;  %v15283_v18 = vpack.c.bf16 %v14236_v1, %v14236_v1  ;;  %11105 = vmatpush3.bf16.msra.mxu1 %v11504_v10  ;;  %v15288_v43 = vld [vmem:[#allocation18_spill] sm:$0xff]  ;;  %v15291_v36 = vld [vmem:[#allocation11_spill] sm:$0xff] }
 0x620   :  { %v7977_v62 = vunpack.c.l.b16 %v7608_v48  ;;  %v15284_v0 = vpack.c.bf16 %v14413_v6, %v14413_v6  ;;  %v8542_v31 = vunpack.c.l.b16 %v7613_v9  ;;  %v7615_v20 = vpack.c.bf16 %v7583_v63, %v7583_v63  ;;  %11106 = vmatprep.subr.bf16.mxu1 %v15254_v14  ;;  %v15292_v10 = vld [vmem:[#allocation7_spill] sm:$0xff]  ;;  %v11510_v63 = vld [vmem:[%s15200_s5 + $0x238] sm:$0xff]  }
 0x621   :  { %v8089_v19 = vunpack.c.l.b16 %v15283_v18  ;;  %v7603_v13 = vpack.c.bf16 %v7571_v54, %v7571_v54  ;;  %v7562_v39 = vmax.f32 %v14197_v16, %v14259_v55  ;;  %v7619_v3 = vpack.c.bf16 %v7587_v12, %v7587_v12  ;;  %v15295_v12 = vld [vmem:[#allocation8_spill] sm:$0xff]  ;;  %v15296_v18 = vld [vmem:[#allocation6_spill] sm:$0xff] }
 0x622   :  { %v8090_v58 = vunpack.c.l.b16 %v15284_v0  ;;  %v14617_v1 = vsel %vm4503_vm4, %v7977_v62, %v7976_v49  ;;  %v7578_v59 = vmax.f32 %v15286_v42, %v15285_v23  ;;  %v7486_v57 = vmax.f32 %v7484_v53, %v7485_v2  ;;  %10965 = vmatpush3.bf16.msra.mxu0 %v11505_v26  ;;  %v11508_v53 = vld [vmem:[%s15200_s5 + $0x230] sm:$0xff]  }
 0x623   :  { %v14628_v16 = vsel %vm4503_vm4, %v8542_v31, %v8541_v51  ;;  %v8767_v55 = vunpack.c.l.b16 %v7599_v41  ;;  %v8768_v34 = vunpack.c.l.b16 %v7615_v20  ;;  %v7500_v40 = vmax.f32 %v7498_v27, %v7499_v22  ;;  %10966 = vmatprep.subr.bf16.mxu0 %v15254_v14  ;;  %11107 = vmatpush3.bf16.msra.mxu1 %v11506_v52  ;;  %v11509_v51 = vld [vmem:[%s15200_s5 + $0x30] sm:$0xff]   ;;  %v11511_v20 = vld [vmem:[%s15200_s5 + $0x38] sm:$0xff]  }
 0x624   :  { %v14620_v6 = vsel %vm4503_vm4, %v8090_v58, %v8089_v19  ;;  %v9219_v45 = vunpack.c.l.b16 %v7603_v13  ;;  %v9220_v30 = vunpack.c.l.b16 %v7619_v3  ;;  %v7594_v11 = vpack.c.bf16 %v7562_v39, %v7562_v39  ;;  %11108 = vmatprep.subr.bf16.mxu1 %v15254_v14 }
 0x625   :  { %v14635_v21 = vsel %vm4503_vm4, %v8768_v34, %v8767_v55  ;;  %v7610_v15 = vpack.c.bf16 %v7578_v59, %v7578_v59  ;;  %v7564_v25 = vmax.f32 %v15288_v43, %v15287_v37  ;;  %v7580_v27 = vmax.f32 %v15290_v29, %v15289_v50 }
 0x626   :  { %v7542_v32 = vmax.f32 %v14488_v5, %v7541_v35  ;;  %v7556_v38 = vmax.f32 %v14560_v33, %v7555_v24  ;;  %v14647_v44 = vsel %vm4503_vm4, %v9220_v30, %v9219_v45  ;;  %v7566_v28 = vmax.f32 %v15292_v10, %v15291_v36  ;;  %10967 = vmatpush3.bf16.msra.mxu0 %v11507_v8  ;;  %v15293_v33 = vld [vmem:[#allocation16_spill] sm:$0xff]  ;;  %v15294_v24 = vld [vmem:[#allocation10_spill] sm:$0xff] }
 0x627   :  { %v8202_v2 = vunpack.c.l.b16 %v7594_v11  ;;  %v8203_v22 = vunpack.c.l.b16 %v7610_v15  ;;  %v7596_v41 = vpack.c.bf16 %v7564_v25, %v7564_v25  ;;  %v7612_v48 = vpack.c.bf16 %v7580_v27, %v7580_v27  ;;  %10968 = vmatprep.subr.bf16.mxu0 %v15254_v14  ;;  %11109 = vmatpush3.bf16.msra.mxu1 %v11508_v53  ;;  %v11513_v11 = vld [vmem:[%s15200_s5 + $0x80] sm:$0xff]   ;;  %v11514_v25 = vld [vmem:[%s15200_s5 + $0x288] sm:$0xff]   ;;  %v11517_v36 = vld [vmem:[%s15200_s5 + $0x90] sm:$0xff]  }
 0x628   :  { %v7582_v5 = vmax.f32 %v14500_v47, %v7486_v57  ;;  %v7598_v35 = vpack.c.bf16 %v7566_v28, %v7566_v28  ;;  %v7568_v9 = vmax.f32 %v15294_v24, %v15293_v33  ;;  %v7584_v26 = vmax.f32 %v14558_v61, %v7500_v40  ;;  %v15297_v47 = vld [vmem:[#allocation14_spill] sm:$0xff]  ;;  %11110 = vmatprep.subr.bf16.mxu1 %v15254_v14  ;;  %v11518_v10 = vld [vmem:[%s15200_s5 + $0x298] sm:$0xff]  }
 0x629   :  { %v14663_v49 = vsel %vm4503_vm4, %v8203_v22, %v8202_v2  ;;  %v8428_v54 = vunpack.c.l.b16 %v7596_v41  ;;  %v8429_v62 = vunpack.c.l.b16 %v7612_v48  ;;  %v7570_v19 = vmax.f32 %v15296_v18, %v15295_v12  ;;  %v11512_v57 = vld [vmem:[%s15200_s5 + $0x280] sm:$0xff]   ;;  %v11519_v28 = vld [vmem:[%s15200_s5 + $0x98] sm:$0xff]   ;;  %v11522_v22 = vld [vmem:[%s15200_s5 + $0x2a8] sm:$0xff]  }
 0x62a   :  { %v15298_v0 = vrot.slane %v15297_v47, 1  ;;  %v7528_v61 = vmax.f32 %v14469_v46, %v7527_v60  ;;  %v7614_v52 = vpack.c.bf16 %v7582_v5, %v7582_v5  ;;  %v7600_v31 = vpack.c.bf16 %v7568_v9, %v7568_v9  ;;  %10969 = vmatpush3.bf16.msra.mxu0 %v11509_v51  ;;  %v15299_v60 = vld [vmem:[#allocation15_spill] sm:$0xff]  ;;  %v11520_v51 = vld [vmem:[%s15200_s5 + $0x2a0] sm:$0xff]   ;;  %v11527_v33 = vld [vmem:[%s15200_s5 + $0xb8] sm:$0xff]  }
 0x62b   :  { %v14678_v13 = vsel %vm4503_vm4, %v8429_v62, %v8428_v54  ;;  %v7616_v39 = vpack.c.bf16 %v7584_v26, %v7584_v26  ;;  %v7586_v3 = vmax.f32 %v14472_v7, %v7542_v32  ;;  %v7602_v23 = vpack.c.bf16 %v7570_v19, %v7570_v19  ;;  %10970 = vmatprep.subr.bf16.mxu0 %v15254_v14  ;;  %v11521_v2 = vld [vmem:[%s15200_s5 + $0xa0] sm:$0xff]   ;;  %v11523_v41 = vld [vmem:[%s15200_s5 + $0xa8] sm:$0xff]   ;;  %v11524_v48 = vld [vmem:[%s15200_s5 + $0x2b0] sm:$0xff]  }
 0x62c   :  { %v7304_v58 = vmax.f32 %v15297_v47, %v15298_v0  ;;  %v8654_v42 = vunpack.c.l.b16 %v7598_v35  ;;  %v8655_v46 = vunpack.c.l.b16 %v7614_v52  ;;  %11111 = vmatpush3.bf16.msra.mxu1 %v11510_v63  ;;  %v8880_v8 = vunpack.c.l.b16 %v7600_v31  ;;  %v11525_v5 = vld [vmem:[%s15200_s5 + $0xb0] sm:$0xff]   ;;  %v11526_v35 = vld [vmem:[%s15200_s5 + $0x2b8] sm:$0xff]   ;;  %v11528_v24 = vld [vmem:[%s15200_s5 + $0x300] sm:$0xff]  }
 0x62d   :  { %v8881_v55 = vunpack.c.l.b16 %v7616_v39  ;;  %v7618_v34 = vpack.c.bf16 %v7586_v3, %v7586_v3  ;;  %v7588_v40 = vmax.f32 %v7528_v61, %v7556_v38  ;;  %v8544_v45 = vpack.c.b16 %v14628_v16, %v14628_v16  ;;  %11136 = vmatprep.subr.bf16.mxu1 %v15254_v14  ;;  %v11516_v38 = vld [vmem:[%s15200_s5 + $0x290] sm:$0xff]   ;;  %v11529_v26 = vld [vmem:[%s15200_s5 + $0xc0] sm:$0xff]   ;;  %v11530_v54 = vld [vmem:[%s15200_s5 + $0x308] sm:$0xff]  }
 0x62e   :  { %v7572_v59 = vmax.f32 %v7304_v58, %v15299_v60  ;;  %v14690_v7 = vsel %vm4503_vm4, %v8655_v46, %v8654_v42  ;;  %10971 = vmatpush3.bf16.msra.mxu0 %v11511_v20  ;;  %v9106_v15 = vunpack.c.l.b16 %v7602_v23  ;;  %v7754_v16 = vpack.c.b16 %v14550_v4, %v14550_v4  ;;  %v11515_v4 = vld [vmem:[%s15200_s5 + $0x88] sm:$0xff]   ;;  %v11533_v62 = vld [vmem:[%s15200_s5 + $0xd0] sm:$0xff]   ;;  %v11534_v12 = vld [vmem:[%s15200_s5 + $0x318] sm:$0xff]  }
 0x62f   :  { %v14696_v53 = vsel %vm4503_vm4, %v8881_v55, %v8880_v8  ;;  %v9107_v37 = vunpack.c.l.b16 %v7618_v34  ;;  %v7620_v43 = vpack.c.bf16 %v7588_v40, %v7588_v40  ;;  %11113 = vmatmul.mubr.bf16.vlgmr.msra.gmra.mrb[20].mxu1 %v8544_v45  ;;  %10976 = vmatprep.subr.bf16.mxu0 %v15254_v14  ;;  %v8770_v9 = vpack.c.b16 %v14635_v21, %v14635_v21  ;;  %v11531_v21 = vld [vmem:[%s15200_s5 + $0xc8] sm:$0xff]   ;;  %v11535_v18 = vld [vmem:[%s15200_s5 + $0xd8] sm:$0xff]   ;;  %v11536_v19 = vld [vmem:[%s15200_s5 + $0x320] sm:$0xff]  }
 0x630   :  { %v7604_v30 = vpack.c.bf16 %v7572_v59, %v7572_v59  ;;  %11137 = vmatpush3.bf16.msra.mxu1 %v11512_v57  ;;  %11152 = vmatprep.mubr.msk.bf16.mxu1 %vm11657_vm2, %v15254_v14  ;;  %v7866_v63 = vpack.c.b16 %v14578_v56, %v14578_v56  ;;  %v11532_v56 = vld [vmem:[%s15200_s5 + $0x310] sm:$0xff]   ;;  %v11537_v47 = vld [vmem:[%s15200_s5 + $0xe0] sm:$0xff]   ;;  %v11538_v0 = vld [vmem:[%s15200_s5 + $0x328] sm:$0xff]   ;;  %v8996_v3 = vpack.c.b16 %v14581_v17, %v14581_v17  ;;  %vm9547_vm1 = vcmask 74752  }
 0x631   :  { %v14707_v50 = vsel %vm4503_vm4, %v9107_v37, %v9106_v15  ;;  %v9333_v27 = vunpack.c.l.b16 %v7620_v43  ;;  %10973 = vmatmul.mubr.bf16.vlgmr.msra.gmra.mrb[68].mxu0 %v7754_v16  ;;  %11138 = vmatprep.subr.bf16.mxu1 %v15254_v14  ;;  %v11539_v58 = vld [vmem:[%s15200_s5 + $0xe8] sm:$0xff]   ;;  %v11540_v61 = vld [vmem:[%s15200_s5 + $0x330] sm:$0xff]   ;;  %v11542_v31 = vld [vmem:[%s15200_s5 + $0x338] sm:$0xff]   ;;  %v7979_v42 = vpack.c.b16 %v14617_v1, %v14617_v1  ;;  %v9222_v37 = vpack.c.b16 %v14647_v44, %v14647_v44 }
 0x632   :  { %v9332_v29 = vunpack.c.l.b16 %v7604_v30  ;;  %10977 = vmatpush3.bf16.msra.mxu0 %v11513_v11  ;;  %10992 = vmatprep.mubr.msk.bf16.mxu0 %vm11657_vm2, %v15254_v14  ;;  %v11541_v52 = vld [vmem:[%s15200_s5 + $0xf0] sm:$0xff]   ;;  %v11543_v20 = vld [vmem:[%s15200_s5 + $0xf8] sm:$0xff]   ;;  %v11544_v39 = vld [vmem:[%s15200_s5 + $0x380] sm:$0xff]   ;;  %v8092_v16 = vpack.c.b16 %v14620_v6, %v14620_v6 }
 0x633   :  { %10978 = vmatprep.subr.bf16.mxu0 %v15254_v14  ;;  %v11545_v23 = vld [vmem:[%s15200_s5 + $0x100] sm:$0xff]   ;;  %v11546_v46 = vld [vmem:[%s15200_s5 + $0x388] sm:$0xff]   ;;  %v11548_v1 = vld [vmem:[%s15200_s5 + $0x390] sm:$0xff]  }
 0x634   :  { %v14716_v32 = vsel %vm4503_vm4, %v9333_v27, %v9332_v29  ;;  %11139 = vmatpush3.bf16.msra.mxu1 %v11514_v25  ;;  %v11547_v17 = vld [vmem:[%s15200_s5 + $0x108] sm:$0xff]   ;;  %v11549_v60 = vld [vmem:[%s15200_s5 + $0x110] sm:$0xff]   ;;  %v11550_v59 = vld [vmem:[%s15200_s5 + $0x398] sm:$0xff]  }
 0x635   :  { %11140 = vmatprep.subr.bf16.mxu1 %v15254_v14  ;;  %v11551_v57 = vld [vmem:[%s15200_s5 + $0x118] sm:$0xff]   ;;  %v11552_v8 = vld [vmem:[%s15200_s5 + $0x3a0] sm:$0xff]   ;;  %v11554_v34 = vld [vmem:[%s15200_s5 + $0x3a8] sm:$0xff]  }
 0x636   :  { %10979 = vmatpush3.bf16.msra.mxu0 %v11515_v4  ;;  %v11553_v55 = vld [vmem:[%s15200_s5 + $0x120] sm:$0xff]   ;;  %v11555_v40 = vld [vmem:[%s15200_s5 + $0x128] sm:$0xff]   ;;  %v11556_v45 = vld [vmem:[%s15200_s5 + $0x3b0] sm:$0xff]  }
 0x637   :  { %10980 = vmatprep.subr.bf16.mxu0 %v15254_v14  ;;  %v11557_v30 = vld [vmem:[%s15200_s5 + $0x130] sm:$0xff]   ;;  %v11558_v11 = vld [vmem:[%s15200_s5 + $0x3b8] sm:$0xff]   ;;  %v11560_v43 = vld [vmem:[%s15200_s5 + $0x140] sm:$0xff]  }
 0x638   :  { %11141 = vmatpush3.bf16.msra.mxu1 %v11516_v38  ;;  %v11559_v15 = vld [vmem:[%s15200_s5 + $0x138] sm:$0xff]   ;;  %v11561_v44 = vld [vmem:[%s15200_s5 + $0x148] sm:$0xff]   ;;  %v11562_v6 = vld [vmem:[%s15200_s5 + $0x150] sm:$0xff]  }
 0x639   :  { %11142 = vmatprep.subr.bf16.mxu1 %v15254_v14  ;;  %v11563_v25 = vld [vmem:[%s15200_s5 + $0x158] sm:$0xff]   ;;  %v11564_v29 = vld [vmem:[%s15200_s5 + $0x160] sm:$0xff]   ;;  %v11565_v27 = vld [vmem:[%s15200_s5 + $0x168] sm:$0xff]  }
 0x63a   :  { %10981 = vmatpush3.bf16.msra.mxu0 %v11517_v36  ;;  %v11566_v4 = vld [vmem:[%s15200_s5 + $0x170] sm:$0xff]   ;;  %v11567_v38 = vld [vmem:[%s15200_s5 + $0x178] sm:$0xff]   ;;  %v11568_v36 = vld [vmem:[%s15200_s5 + $0x1c0] sm:$0xff]  }
 0x63b   :  { %10982 = vmatprep.subr.bf16.mxu0 %v15254_v14 }
 0x63c   :  { %11143 = vmatpush3.bf16.msra.mxu1 %v11518_v10  ;;  %v8205_v10 = vpack.c.b16 %v14663_v49, %v14663_v49  ;;  %v11571_v49 = vld [vmem:[%s15200_s5 + $0x1d8] sm:$0xff]  }
 0x63d   :  { %11144 = vmatprep.subr.bf16.mxu1 %v15254_v14 }
 0x63e   :  { %10983 = vmatpush3.bf16.msra.mxu0 %v11519_v28  ;;  %v11569_v28 = vld [vmem:[%s15200_s5 + $0x1c8] sm:$0xff]  }
 0x63f   :  { %10984 = vmatprep.subr.bf16.mxu0 %v15254_v14 }
 0x640   :  { %11145 = vmatpush3.bf16.msra.mxu1 %v11520_v51  ;;  %v11570_v51 = vld [vmem:[%s15200_s5 + $0x1d0] sm:$0xff]  }
 0x641   :  { %11146 = vmatprep.subr.bf16.mxu1 %v15254_v14 }
 0x642   :  { %10985 = vmatpush3.bf16.msra.mxu0 %v11521_v2  ;;  %v11572_v2 = vld [vmem:[%s15200_s5 + $0x1e0] sm:$0xff]  }
 0x643   :  { %10986 = vmatprep.subr.bf16.mxu0 %v15254_v14 }
 0x644   :  { %11147 = vmatpush3.bf16.msra.mxu1 %v11522_v22  ;;  %v11573_v22 = vld [vmem:[%s15200_s5 + $0x1e8] sm:$0xff]  }
 0x645   :  { %11148 = vmatprep.subr.bf16.mxu1 %v15254_v14 }
 0x646   :  { %10987 = vmatpush3.bf16.msra.mxu0 %v11523_v41  ;;  %v11574_v41 = vld [vmem:[%s15200_s5 + $0x1f0] sm:$0xff]  }
 0x647   :  { %10988 = vmatprep.subr.bf16.mxu0 %v15254_v14 }
 0x648   :  { %11149 = vmatpush3.bf16.msra.mxu1 %v11524_v48  ;;  %v11575_v48 = vld [vmem:[%s15200_s5 + $0x1f8] sm:$0xff]  }
 0x649   :  { %11150 = vmatprep.subr.bf16.mxu1 %v15254_v14 }
 0x64a   :  { %10989 = vmatpush3.bf16.msra.mxu0 %v11525_v5  ;;  %v11576_v5 = vld [vmem:[%s15200_s5 + $0x240] sm:$0xff]  }
 0x64b   :  { %10990 = vmatprep.subr.bf16.mxu0 %v15254_v14 }
 0x64c   :  { %11151 = vmatpush3.bf16.msra.mxu1 %v11526_v35  ;;  %v8431_v35 = vpack.c.b16 %v14678_v13, %v14678_v13  ;;  %v11579_v13 = vld [vmem:[%s15200_s5 + $0x258] sm:$0xff]  }
 0x64d   :  { %11176 = vmatprep.subr.bf16.mxu1 %v15254_v14 }
 0x64e   :  { %10991 = vmatpush3.bf16.msra.mxu0 %v11527_v33  ;;  %v11577_v33 = vld [vmem:[%s15200_s5 + $0x248] sm:$0xff]  }
 0x64f   :  { %11153 = vmatmul.mubr.bf16.vlgmr.msra.gmra.mrb[24].mxu1 %v8770_v9  ;;  %10996 = vmatprep.subr.bf16.mxu0 %v15254_v14  ;;  %v11580_v9 = vld [vmem:[%s15200_s5 + $0x260] sm:$0xff]  }
 0x650   :  { %11177 = vmatpush3.bf16.msra.mxu1 %v11528_v24  ;;  %11192 = vmatprep.mubr.msk.bf16.mxu1 %vm11657_vm2, %v15254_v14  ;;  %v11578_v24 = vld [vmem:[%s15200_s5 + $0x250] sm:$0xff]  }
 0x651   :  { %10993 = vmatmul.mubr.bf16.vlgmr.msra.gmra.mrb[72].mxu0 %v7866_v63  ;;  %11178 = vmatprep.subr.bf16.mxu1 %v15254_v14  ;;  %v11581_v63 = vld [vmem:[%s15200_s5 + $0x268] sm:$0xff]  }
 0x652   :  { %10997 = vmatpush3.bf16.msra.mxu0 %v11529_v26  ;;  %11012 = vmatprep.mubr.msk.bf16.mxu0 %vm11657_vm2, %v15254_v14 }
 0x653   :  { %10998 = vmatprep.subr.bf16.mxu0 %v15254_v14 }
 0x654   :  { %11179 = vmatpush3.bf16.msra.mxu1 %v11530_v54 }
 0x655   :  { %11180 = vmatprep.subr.bf16.mxu1 %v15254_v14 }
 0x656   :  { %10999 = vmatpush3.bf16.msra.mxu0 %v11531_v21 }
 0x657   :  { %11000 = vmatprep.subr.bf16.mxu0 %v15254_v14 }
 0x658   :  { %11181 = vmatpush3.bf16.msra.mxu1 %v11532_v56 }
 0x659   :  { %11182 = vmatprep.subr.bf16.mxu1 %v15254_v14 }
 0x65a   :  { %11001 = vmatpush3.bf16.msra.mxu0 %v11533_v62 }
 0x65b   :  { %11002 = vmatprep.subr.bf16.mxu0 %v15254_v14 }
 0x65c   :  { %11183 = vmatpush3.bf16.msra.mxu1 %v11534_v12 }
 0x65d   :  { %11184 = vmatprep.subr.bf16.mxu1 %v15254_v14 }
 0x65e   :  { %11003 = vmatpush3.bf16.msra.mxu0 %v11535_v18 }
 0x65f   :  { %11004 = vmatprep.subr.bf16.mxu0 %v15254_v14 }
 0x660   :  { %11185 = vmatpush3.bf16.msra.mxu1 %v11536_v19  ;;  %v11582_v19 = vld [vmem:[%s15200_s5 + $0x270] sm:$0xff]  }
 0x661   :  { %11186 = vmatprep.subr.bf16.mxu1 %v15254_v14 }
 0x662   :  { %11005 = vmatpush3.bf16.msra.mxu0 %v11537_v47 }
 0x663   :  { %11006 = vmatprep.subr.bf16.mxu0 %v15254_v14 }
 0x664   :  { %11187 = vmatpush3.bf16.msra.mxu1 %v11538_v0  ;;  %v11583_v0 = vld [vmem:[%s15200_s5 + $0x278] sm:$0xff]  }
 0x665   :  { %11188 = vmatprep.subr.bf16.mxu1 %v15254_v14 }
 0x666   :  { %11007 = vmatpush3.bf16.msra.mxu0 %v11539_v58  ;;  %v11584_v58 = vld [vmem:[%s15200_s5 + $0x2c0] sm:$0xff]  }
 0x667   :  { %11008 = vmatprep.subr.bf16.mxu0 %v15254_v14 }
 0x668   :  { %11189 = vmatpush3.bf16.msra.mxu1 %v11540_v61  ;;  %v8657_v61 = vpack.c.b16 %v14690_v7, %v14690_v7  ;;  %v11587_v7 = vld [vmem:[%s15200_s5 + $0x2d8] sm:$0xff]  }
 0x669   :  { %11190 = vmatprep.subr.bf16.mxu1 %v15254_v14 }
 0x66a   :  { %11009 = vmatpush3.bf16.msra.mxu0 %v11541_v52  ;;  %v11585_v52 = vld [vmem:[%s15200_s5 + $0x2c8] sm:$0xff]  }
 0x66b   :  { %11010 = vmatprep.subr.bf16.mxu0 %v15254_v14 }
 0x66c   :  { %11191 = vmatpush3.bf16.msra.mxu1 %v11542_v31  ;;  %v11586_v31 = vld [vmem:[%s15200_s5 + $0x2d0] sm:$0xff]  }
 0x66d   :  { %11216 = vmatprep.subr.bf16.mxu1 %v15254_v14 }
 0x66e   :  { %11011 = vmatpush3.bf16.msra.mxu0 %v11543_v20  ;;  %v11588_v20 = vld [vmem:[%s15200_s5 + $0x2e0] sm:$0xff]  }
 0x66f   :  { %11193 = vmatmul.mubr.bf16.vlgmr.msra.gmra.mrb[28].mxu1 %v8996_v3  ;;  %11016 = vmatprep.subr.bf16.mxu0 %v15254_v14  ;;  %v11589_v3 = vld [vmem:[%s15200_s5 + $0x2e8] sm:$0xff]  }
 0x670   :  { %11217 = vmatpush3.bf16.msra.mxu1 %v11544_v39  ;;  %11232 = vmatprep.mubr.msk.bf16.mxu1 %vm11657_vm2, %v15254_v14 }
 0x671   :  { %11013 = vmatmul.mubr.bf16.vlgmr.msra.gmra.mrb[76].mxu0 %v7979_v42  ;;  %11218 = vmatprep.subr.bf16.mxu1 %v15254_v14 }
 0x672   :  { %11017 = vmatpush3.bf16.msra.mxu0 %v11545_v23  ;;  %11032 = vmatprep.mubr.msk.bf16.mxu0 %vm11657_vm2, %v15254_v14 }
 0x673   :  { %11018 = vmatprep.subr.bf16.mxu0 %v15254_v14 }
 0x674   :  { %11219 = vmatpush3.bf16.msra.mxu1 %v11546_v46 }
 0x675   :  { %11220 = vmatprep.subr.bf16.mxu1 %v15254_v14 }
 0x676   :  { %11019 = vmatpush3.bf16.msra.mxu0 %v11547_v17 }
 0x677   :  { %11020 = vmatprep.subr.bf16.mxu0 %v15254_v14 }
 0x678   :  { %11221 = vmatpush3.bf16.msra.mxu1 %v11548_v1 }
 0x679   :  { %11222 = vmatprep.subr.bf16.mxu1 %v15254_v14 }
 0x67a   :  { %11021 = vmatpush3.bf16.msra.mxu0 %v11549_v60 }
 0x67b   :  { %11022 = vmatprep.subr.bf16.mxu0 %v15254_v14 }
 0x67c   :  { %11223 = vmatpush3.bf16.msra.mxu1 %v11550_v59 }
 0x67d   :  { %11224 = vmatprep.subr.bf16.mxu1 %v15254_v14 }
 0x67e   :  { %11023 = vmatpush3.bf16.msra.mxu0 %v11551_v57  ;;  %v11590_v57 = vld [vmem:[%s15200_s5 + $0x2f0] sm:$0xff]  }
 0x67f   :  { %11024 = vmatprep.subr.bf16.mxu0 %v15254_v14 }
 0x680   :  { %11225 = vmatpush3.bf16.msra.mxu1 %v11552_v8 }
 0x681   :  { %11226 = vmatprep.subr.bf16.mxu1 %v15254_v14 }
 0x682   :  { %11025 = vmatpush3.bf16.msra.mxu0 %v11553_v55  ;;  %v11591_v55 = vld [vmem:[%s15200_s5 + $0x2f8] sm:$0xff]  }
 0x683   :  { %11026 = vmatprep.subr.bf16.mxu0 %v15254_v14 }
 0x684   :  { %11227 = vmatpush3.bf16.msra.mxu1 %v11554_v34  ;;  %v11592_v34 = vld [vmem:[%s15200_s5 + $0x340] sm:$0xff]  }
 0x685   :  { %11228 = vmatprep.subr.bf16.mxu1 %v15254_v14 }
 0x686   :  { %11027 = vmatpush3.bf16.msra.mxu0 %v11555_v40  ;;  %v8883_v40 = vpack.c.b16 %v14696_v53, %v14696_v53  ;;  %v11595_v53 = vld [vmem:[%s15200_s5 + $0x358] sm:$0xff]  }
 0x687   :  { %11028 = vmatprep.subr.bf16.mxu0 %v15254_v14 }
 0x688   :  { %11229 = vmatpush3.bf16.msra.mxu1 %v11556_v45  ;;  %v11593_v45 = vld [vmem:[%s15200_s5 + $0x348] sm:$0xff]  }
 0x689   :  { %11230 = vmatprep.subr.bf16.mxu1 %v15254_v14 }
 0x68a   :  { %11029 = vmatpush3.bf16.msra.mxu0 %v11557_v30  ;;  %v11594_v30 = vld [vmem:[%s15200_s5 + $0x350] sm:$0xff]  }
 0x68b   :  { %11030 = vmatprep.subr.bf16.mxu0 %v15254_v14 }
 0x68c   :  { %11231 = vmatpush3.bf16.msra.mxu1 %v11558_v11  ;;  %v11596_v11 = vld [vmem:[%s15200_s5 + $0x360] sm:$0xff]  }
 0x68d   :  { %11256 = vmatprep.subr.bf16.mxu1 %v15254_v14 }
 0x68e   :  { %11031 = vmatpush3.bf16.msra.mxu0 %v11559_v15 }
 0x68f   :  { %11233 = vmatmul.mubr.bf16.vlgmr.msra.gmra.mrb[32].mxu1 %v9222_v37  ;;  %11036 = vmatprep.subr.bf16.mxu0 %v15254_v14  ;;  %v11597_v37 = vld [vmem:[%s15200_s5 + $0x368] sm:$0xff]  }
 0x690   :  { %11272 = vmatprep.mubr.msk.bf16.mxu1 %vm11657_vm2, %v15254_v14 }
 0x691   :  { %11033 = vmatmul.mubr.bf16.vlgmr.msra.gmra.mrb[80].mxu0 %v8092_v16 }
 0x692   :  { %11037 = vmatpush3.bf16.msra.mxu0 %v11560_v43  ;;  %11052 = vmatprep.mubr.msk.bf16.mxu0 %vm11657_vm2, %v15254_v14 }
 0x693   :  { %11038 = vmatprep.subr.bf16.mxu0 %v15254_v14 }
 0x696   :  { %11039 = vmatpush3.bf16.msra.mxu0 %v11561_v44 }
 0x697   :  { %11040 = vmatprep.subr.bf16.mxu0 %v15254_v14 }
 0x69a   :  { %11041 = vmatpush3.bf16.msra.mxu0 %v11562_v6 }
 0x69b   :  { %11042 = vmatprep.subr.bf16.mxu0 %v15254_v14 }
 0x69e   :  { %11043 = vmatpush3.bf16.msra.mxu0 %v11563_v25 }
 0x69f   :  { %11044 = vmatprep.subr.bf16.mxu0 %v15254_v14 }
 0x6a2   :  { %11045 = vmatpush3.bf16.msra.mxu0 %v11564_v29 }
 0x6a3   :  { %11046 = vmatprep.subr.bf16.mxu0 %v15254_v14 }
 0x6a6   :  { %11047 = vmatpush3.bf16.msra.mxu0 %v11565_v27 }
 0x6a7   :  { %11048 = vmatprep.subr.bf16.mxu0 %v15254_v14 }
 0x6aa   :  { %11049 = vmatpush3.bf16.msra.mxu0 %v11566_v4  ;;  %v11598_v4 = vld [vmem:[%s15200_s5 + $0x370] sm:$0xff]  }
 0x6ab   :  { %11050 = vmatprep.subr.bf16.mxu0 %v15254_v14 }
 0x6ae   :  { %11051 = vmatpush3.bf16.msra.mxu0 %v11567_v38 }
 0x6af   :  { %11076 = vmatprep.subr.bf16.mxu0 %v15254_v14 }
 0x6b1   :  { %11053 = vmatmul.mubr.bf16.vlgmr.msra.gmra.mrb[84].mxu0 %v8205_v10  ;;  %v11600_v10 = vld [vmem:[%s15200_s5 + $0x3c0] sm:$0xff]  }
 0x6b2   :  { %11077 = vmatpush3.bf16.msra.mxu0 %v11568_v36  ;;  %11092 = vmatprep.mubr.msk.bf16.mxu0 %vm11657_vm2, %v15254_v14  ;;  %v11599_v36 = vld [vmem:[%s15200_s5 + $0x378] sm:$0xff]  }
 0x6b3   :  { %11078 = vmatprep.subr.bf16.mxu0 %v15254_v14 }
 0x6b6   :  { %11079 = vmatpush3.bf16.msra.mxu0 %v11569_v28  ;;  %v9109_v28 = vpack.c.b16 %v14707_v50, %v14707_v50  ;;  %v11603_v50 = vld [vmem:[%s15200_s5 + $0x3d8] sm:$0xff]  }
 0x6b7   :  { %11080 = vmatprep.subr.bf16.mxu0 %v15254_v14 }
 0x6ba   :  { %11081 = vmatpush3.bf16.msra.mxu0 %v11570_v51  ;;  %v11601_v51 = vld [vmem:[%s15200_s5 + $0x3c8] sm:$0xff]  }
 0x6bb   :  { %11082 = vmatprep.subr.bf16.mxu0 %v15254_v14 }
 0x6be   :  { %11083 = vmatpush3.bf16.msra.mxu0 %v11571_v49  ;;  %v11602_v49 = vld [vmem:[%s15200_s5 + $0x3d0] sm:$0xff]  }
 0x6bf   :  { %11084 = vmatprep.subr.bf16.mxu0 %v15254_v14 }
 0x6c2   :  { %11085 = vmatpush3.bf16.msra.mxu0 %v11572_v2  ;;  %v11604_v2 = vld [vmem:[%s15200_s5 + $0x3e0] sm:$0xff]  }
 0x6c3   :  { %11086 = vmatprep.subr.bf16.mxu0 %v15254_v14 }
 0x6c6   :  { %11087 = vmatpush3.bf16.msra.mxu0 %v11573_v22 }
 0x6c7   :  { %11088 = vmatprep.subr.bf16.mxu0 %v15254_v14 }
 0x6ca   :  { %11089 = vmatpush3.bf16.msra.mxu0 %v11574_v41  ;;  %v11605_v41 = vld [vmem:[%s15200_s5 + $0x3e8] sm:$0xff]  }
 0x6cb   :  { %11090 = vmatprep.subr.bf16.mxu0 %v15254_v14 }
 0x6ce   :  { %11091 = vmatpush3.bf16.msra.mxu0 %v11575_v48 }
 0x6cf   :  { %11116 = vmatprep.subr.bf16.mxu0 %v15254_v14 }
 0x6d1   :  { %11093 = vmatmul.mubr.bf16.vlgmr.msra.gmra.mrb[88].mxu0 %v8431_v35 }
 0x6d2   :  { %11117 = vmatpush3.bf16.msra.mxu0 %v11576_v5  ;;  %11132 = vmatprep.mubr.msk.bf16.mxu0 %vm11657_vm2, %v15254_v14 }
 0x6d3   :  { %11118 = vmatprep.subr.bf16.mxu0 %v15254_v14 }
 0x6d6   :  { %11119 = vmatpush3.bf16.msra.mxu0 %v11577_v33 }
 0x6d7   :  { %11120 = vmatprep.subr.bf16.mxu0 %v15254_v14 }
 0x6da   :  { %11121 = vmatpush3.bf16.msra.mxu0 %v11578_v24 }
 0x6db   :  { %11122 = vmatprep.subr.bf16.mxu0 %v15254_v14 }
 0x6de   :  { %11123 = vmatpush3.bf16.msra.mxu0 %v11579_v13 }
 0x6df   :  { %11124 = vmatprep.subr.bf16.mxu0 %v15254_v14 }
 0x6e1   :  { %v15012_v26 = vpop.f32.mrb[16].mxu1 }
 0x6e2   :  { %11125 = vmatpush3.bf16.msra.mxu0 %v11580_v9  ;;  %v11074_v54 = vpop.f32.mrb[17].mxu1 }
 0x6e3   :  { %11126 = vmatprep.subr.bf16.mxu0 %v15254_v14  ;;  %v8405_v56 = vpop.f32.mrb[18].mxu1 }
 0x6e4   :  { %v7743_v21 = vpop.f32.mrb[64].mxu0  ;;  %v11075_v12 = vpop.f32.mrb[19].mxu1  ;;  %v9335_v56 = vpack.c.b16 %v14716_v32, %v14716_v32  ;;  %v11608_v32 = vld [vmem:[%s15202_s7] sm:$0xff]  }
 0x6e5   :  { %v10954_v62 = vpop.f32.mrb[65].mxu0  ;;  %11257 = vmatpush3.bf16.msra.mxu1 %v11608_v32 }
 0x6e6   :  { %11127 = vmatpush3.bf16.msra.mxu0 %v11581_v63  ;;  %v7746_v18 = vpop.f32.mrb[66].mxu0  ;;  %v11606_v63 = vld [vmem:[%s15200_s5 + $0x3f0] sm:$0xff]   ;;  %11258 = vmatprep.subr.bf16.mxu1 %v15254_v14 }
 0x6e7   :  { %v10955_v47 = vpop.f32.mrb[67].mxu0  ;;  %11128 = vmatprep.subr.bf16.mxu0 %v15254_v14 }
 0x6ea   :  { %11129 = vmatpush3.bf16.msra.mxu0 %v11582_v19 }
 0x6eb   :  { %11130 = vmatprep.subr.bf16.mxu0 %v15254_v14 }
 0x6ee   :  { %11131 = vmatpush3.bf16.msra.mxu0 %v11583_v0 }
 0x6ef   :  { %11156 = vmatprep.subr.bf16.mxu0 %v15254_v14 }
 0x6f1   :  { %11133 = vmatmul.mubr.bf16.vlgmr.msra.gmra.mrb[92].mxu0 %v8657_v61 }
 0x6f2   :  { %11157 = vmatpush3.bf16.msra.mxu0 %v11584_v58  ;;  %11172 = vmatprep.mubr.msk.bf16.mxu0 %vm11657_vm2, %v15254_v14 }
 0x6f3   :  { %11158 = vmatprep.subr.bf16.mxu0 %v15254_v14 }
 0x6f6   :  { %11159 = vmatpush3.bf16.msra.mxu0 %v11585_v52 }
 0x6f7   :  { %11160 = vmatprep.subr.bf16.mxu0 %v15254_v14 }
 0x6fa   :  { %11161 = vmatpush3.bf16.msra.mxu0 %v11586_v31 }
 0x6fb   :  { %11162 = vmatprep.subr.bf16.mxu0 %v15254_v14 }
 0x6fe   :  { %11163 = vmatpush3.bf16.msra.mxu0 %v11587_v7 }
 0x6ff   :  { %11164 = vmatprep.subr.bf16.mxu0 %v15254_v14 }
 0x702   :  { %11165 = vmatpush3.bf16.msra.mxu0 %v11588_v20  ;;  %v15050_v39 = vpop.f32.mrb[20].mxu1 }
 0x703   :  { %v11114_v23 = vpop.f32.mrb[21].mxu1  ;;  %11166 = vmatprep.subr.bf16.mxu0 %v15254_v14 }
 0x704   :  { %v7838_v42 = vpop.f32.mrb[68].mxu0  ;;  %v8631_v46 = vpop.f32.mrb[22].mxu1 }
 0x705   :  { %v7839_v17 = vadd.f32 %v7838_v42, %v7743_v21  ;;  %v10974_v1 = vpop.f32.mrb[69].mxu0  ;;  %v11115_v60 = vpop.f32.mrb[23].mxu1  ;;  %v11607_v21 = vld [vmem:[%s15200_s5 + $0x3f8] sm:$0xff]   ;;  %v11609_v46 = vld [vmem:[%s15202_s7 + $0x8] sm:$0xff]  }
 0x706   :  { %v7841_v59 = vpop.f32.mrb[70].mxu0  ;;  %11167 = vmatpush3.bf16.msra.mxu0 %v11589_v3  ;;  %11259 = vmatpush3.bf16.msra.mxu1 %v11609_v46  ;;  %v11612_v1 = vld [vmem:[%s15202_s7 + $0x20] sm:$0xff]   ;;  %v11613_v60 = vld [vmem:[%s15202_s7 + $0x28] sm:$0xff]  }
 0x707   :  { %v10975_v8 = vpop.f32.mrb[71].mxu0  ;;  %11168 = vmatprep.subr.bf16.mxu0 %v15254_v14  ;;  %11260 = vmatprep.subr.bf16.mxu1 %v15254_v14 }
 0x70a   :  { %11169 = vmatpush3.bf16.msra.mxu0 %v11590_v57 }
 0x70b   :  { %11170 = vmatprep.subr.bf16.mxu0 %v15254_v14 }
 0x70e   :  { %11171 = vmatpush3.bf16.msra.mxu0 %v11591_v55 }
 0x70f   :  { %11196 = vmatprep.subr.bf16.mxu0 %v15254_v14 }
 0x711   :  { %11173 = vmatmul.mubr.bf16.vlgmr.msra.gmra.mrb[96].mxu0 %v8883_v40 }
 0x712   :  { %11197 = vmatpush3.bf16.msra.mxu0 %v11592_v34  ;;  %11212 = vmatprep.mubr.msk.bf16.mxu0 %vm11657_vm2, %v15254_v14 }
 0x713   :  { %11198 = vmatprep.subr.bf16.mxu0 %v15254_v14 }
 0x716   :  { %11199 = vmatpush3.bf16.msra.mxu0 %v11593_v45  ;;  %v11614_v45 = vld [vmem:[%s15202_s7 + $0x30] sm:$0xff]  }
 0x717   :  { %11200 = vmatprep.subr.bf16.mxu0 %v15254_v14 }
 0x71a   :  { %11201 = vmatpush3.bf16.msra.mxu0 %v11594_v30  ;;  %v11615_v30 = vld [vmem:[%s15202_s7 + $0x38] sm:$0xff]  }
 0x71b   :  { %11202 = vmatprep.subr.bf16.mxu0 %v15254_v14 }
 0x71e   :  { %11203 = vmatpush3.bf16.msra.mxu0 %v11595_v53 }
 0x71f   :  { %11204 = vmatprep.subr.bf16.mxu0 %v15254_v14 }
 0x722   :  { %11205 = vmatpush3.bf16.msra.mxu0 %v11596_v11  ;;  %v15088_v15 = vpop.f32.mrb[24].mxu1 }
 0x723   :  { %v11154_v43 = vpop.f32.mrb[25].mxu1  ;;  %11206 = vmatprep.subr.bf16.mxu0 %v15254_v14 }
 0x724   :  { %v7950_v16 = vpop.f32.mrb[72].mxu0  ;;  %v8857_v44 = vpop.f32.mrb[26].mxu1 }
 0x725   :  { %v7956_v6 = vadd.f32 %v7950_v16, %v7839_v17  ;;  %v10994_v25 = vpop.f32.mrb[73].mxu0  ;;  %v11155_v29 = vpop.f32.mrb[27].mxu1  ;;  %v11610_v17 = vld [vmem:[%s15202_s7 + $0x10] sm:$0xff]  }
 0x726   :  { %v7953_v27 = vpop.f32.mrb[74].mxu0  ;;  %11207 = vmatpush3.bf16.msra.mxu0 %v11597_v37  ;;  %11261 = vmatpush3.bf16.msra.mxu1 %v11610_v17 }
 0x727   :  { %v10995_v38 = vpop.f32.mrb[75].mxu0  ;;  %11208 = vmatprep.subr.bf16.mxu0 %v15254_v14  ;;  %11262 = vmatprep.subr.bf16.mxu1 %v15254_v14 }
 0x72a   :  { %11209 = vmatpush3.bf16.msra.mxu0 %v11598_v4 }
 0x72b   :  { %11210 = vmatprep.subr.bf16.mxu0 %v15254_v14 }
 0x72e   :  { %11211 = vmatpush3.bf16.msra.mxu0 %v11599_v36 }
 0x72f   :  { %11236 = vmatprep.subr.bf16.mxu0 %v15254_v14 }
 0x731   :  { %11213 = vmatmul.mubr.bf16.vlgmr.msra.gmra.mrb[100].mxu0 %v9109_v28 }
 0x732   :  { %11237 = vmatpush3.bf16.msra.mxu0 %v11600_v10  ;;  %11252 = vmatprep.mubr.msk.bf16.mxu0 %vm11657_vm2, %v15254_v14 }
 0x733   :  { %11238 = vmatprep.subr.bf16.mxu0 %v15254_v14 }
 0x736   :  { %11239 = vmatpush3.bf16.msra.mxu0 %v11601_v51 }
 0x737   :  { %11240 = vmatprep.subr.bf16.mxu0 %v15254_v14 }
 0x73a   :  { %11241 = vmatpush3.bf16.msra.mxu0 %v11602_v49 }
 0x73b   :  { %11242 = vmatprep.subr.bf16.mxu0 %v15254_v14 }
 0x73e   :  { %11243 = vmatpush3.bf16.msra.mxu0 %v11603_v50  ;;  %v10286_v50 = vld [vmem:[%s15201_s6] ss:$0 sm:$0xff]  ;;  %s11631_s6 = scalar_lea.vmem %s9556_s18, 32 }
 0x73f   :  { %11244 = vmatprep.subr.bf16.mxu0 %v15254_v14  ;;  %p11632_p0 = scmp.ne.s32.totalorder %s9556_s18, %s11631_s6  ;;  %p11637_p2 = scmp.lt.s32.totalorder %s11631_s6, %s11631_s6 }
 0x741   :  { %p11638_p3 = por %p11637_p2, %p11636_p1 }
 0x742   :  { %11245 = vmatpush3.bf16.msra.mxu0 %v11604_v2  ;;  %v15126_v22 = vpop.f32.mrb[28].mxu1 }
 0x743   :  { %v11194_v48 = vpop.f32.mrb[29].mxu1  ;;  %11246 = vmatprep.subr.bf16.mxu0 %v15254_v14  ;;  %p11639_p4 = pnand %p11638_p3, %p11632_p0 }
 0x744   :  { %v8063_v5 = vpop.f32.mrb[76].mxu0  ;;  %v9083_v35 = vpop.f32.mrb[30].mxu1 }
 0x745   :  { %v8069_v33 = vadd.f32 %v8063_v5, %v7956_v6  ;;  %v11014_v24 = vpop.f32.mrb[77].mxu0  ;;  %v11195_v13 = vpop.f32.mrb[31].mxu1 }
 0x746   :  { %v8066_v9 = vpop.f32.mrb[78].mxu0  ;;  %11247 = vmatpush3.bf16.msra.mxu0 %v11605_v41 }
 0x747   :  { %v11015_v54 = vpop.f32.mrb[79].mxu0  ;;  %11248 = vmatprep.subr.bf16.mxu0 %v15254_v14 }
 0x74a   :  { %11249 = vmatpush3.bf16.msra.mxu0 %v11606_v63 }
 0x74b   :  { %11250 = vmatprep.subr.bf16.mxu0 %v15254_v14 }
 0x74e   :  { %11251 = vmatpush3.bf16.msra.mxu0 %v11607_v21 }
 0x751   :  { %11253 = vmatmul.mubr.bf16.vlgmr.msra.gmra.mrb[104].mxu0 %v9335_v56 }
 0x762   :  { %v9306_v62 = vpop.f32.mrb[32].mxu1 }
 0x763   :  { %v11234_v12 = vpop.f32.mrb[33].mxu1 }
 0x764   :  { %v8176_v18 = vpop.f32.mrb[80].mxu0  ;;  %v9309_v19 = vpop.f32.mrb[34].mxu1 }
 0x765   :  { %v8182_v47 = vadd.f32 %v8176_v18, %v8069_v33  ;;  %v11034_v0 = vpop.f32.mrb[81].mxu0  ;;  %v11235_v58 = vpop.f32.mrb[35].mxu1 }
 0x766   :  { %v8179_v61 = vpop.f32.mrb[82].mxu0 }
 0x767   :  { %v11035_v52 = vpop.f32.mrb[83].mxu0 }
 0x784   :  { %v8289_v31 = vpop.f32.mrb[84].mxu0 }
 0x785   :  { %v8295_v7 = vadd.f32 %v8289_v31, %v8182_v47  ;;  %v11054_v20 = vpop.f32.mrb[85].mxu0 }
 0x786   :  { %v8292_v3 = vpop.f32.mrb[86].mxu0 }
 0x787   :  { %v11055_v23 = vpop.f32.mrb[87].mxu0  ;;  %v8408_v42 = vadd.f32 %v15012_v26, %v8295_v7  ;;  %v11611_v26 = vld [vmem:[%s15202_s7 + $0x18] sm:$0xff]  }
 0x788   :  { %11263 = vmatpush3.bf16.msra.mxu1 %v11611_v26 }
 0x789   :  { %11264 = vmatprep.subr.bf16.mxu1 %v15254_v14 }
 0x78c   :  { %11265 = vmatpush3.bf16.msra.mxu1 %v11612_v1 }
 0x78d   :  { %11266 = vmatprep.subr.bf16.mxu1 %v15254_v14 }
 0x790   :  { %11267 = vmatpush3.bf16.msra.mxu1 %v11613_v60 }
 0x791   :  { %11268 = vmatprep.subr.bf16.mxu1 %v15254_v14 }
 0x794   :  { %11269 = vmatpush3.bf16.msra.mxu1 %v11614_v45 }
 0x795   :  { %11270 = vmatprep.subr.bf16.mxu1 %v15254_v14 }
 0x798   :  { %11271 = vmatpush3.bf16.msra.mxu1 %v11615_v30 }
 0x7a4   :  { %v8515_v59 = vpop.f32.mrb[88].mxu0 }
 0x7a5   :  { %v8521_v57 = vadd.f32 %v8515_v59, %v8408_v42  ;;  %v11094_v8 = vpop.f32.mrb[89].mxu0 }
 0x7a6   :  { %v8518_v55 = vpop.f32.mrb[90].mxu0 }
 0x7a7   :  { %v11095_v34 = vpop.f32.mrb[91].mxu0  ;;  %v8634_v40 = vadd.f32 %v15050_v39, %v8521_v57 }
 0x7c4   :  { %v8741_v53 = vpop.f32.mrb[92].mxu0 }
 0x7c5   :  { %v8747_v11 = vadd.f32 %v8741_v53, %v8634_v40  ;;  %v11134_v37 = vpop.f32.mrb[93].mxu0 }
 0x7c6   :  { %v8744_v43 = vpop.f32.mrb[94].mxu0 }
 0x7c7   :  { %v11135_v16 = vpop.f32.mrb[95].mxu0  ;;  %v8860_v44 = vadd.f32 %v15088_v15, %v8747_v11 }
 0x7e4   :  { %v8967_v39 = vpop.f32.mrb[96].mxu0 }
 0x7e5   :  { %v8973_v6 = vadd.f32 %v8967_v39, %v8860_v44  ;;  %v11174_v25 = vpop.f32.mrb[97].mxu0 }
 0x7e6   :  { %v8970_v29 = vpop.f32.mrb[98].mxu0 }
 0x7e7   :  { %v11175_v27 = vpop.f32.mrb[99].mxu0  ;;  %v9086_v4 = vadd.f32 %v15126_v22, %v8973_v6  ;;  %v10287_v22 = vld [vmem:[%s15203_s8] ss:$0 sm:$0xff] }
 0x804   :  { %v9193_v38 = vpop.f32.mrb[100].mxu0 }
 0x805   :  { %v9199_v36 = vadd.f32 %v9193_v38, %v9086_v4  ;;  %v11214_v10 = vpop.f32.mrb[101].mxu0 }
 0x806   :  { %v9196_v28 = vpop.f32.mrb[102].mxu0 }
 0x807   :  { %v11215_v14 = vpop.f32.mrb[103].mxu0  ;;  %v9312_v51 = vadd.f32 %v9306_v62, %v9199_v36 }
 0x824   :  { %v9419_v49 = vpop.f32.mrb[104].mxu0 }
 0x825   :  { %v9425_v2 = vadd.f32 %v9419_v49, %v9312_v51  ;;  %v11254_v15 = vpop.f32.mrb[105].mxu0 }
 0x826   :  { %v9422_v41 = vpop.f32.mrb[106].mxu0 }
 0x827   :  { %v9433_v48 = vadd.f32 %v10286_v50, %v9425_v2  ;;  %v11255_v5 = vpop.f32.mrb[107].mxu0 }
 0x829   :  { %v9434_v35 = vmax.f32 %v9433_v48, 0.0 }
 0x82b   :  { %v9435_v33 = vpack.c.bf16 %v9434_v35, %v9434_v35 }
 0x82d   :  { %11273 = vmatmul.mubr.bf16.vlgmr.msra.gmra.mrb[36].mxu1 %v9435_v33 }
 0x900   :  { %v9541_v24 = vpop.f32.mrb[36].mxu1 }
 0x901   :  { %v9542_v13 = vadd.f32 %v10287_v22, %v9541_v24  ;;  %v11274_v9 = vpop.f32.mrb[37].mxu1 }
 0x902   :  { %v9544_v63 = vpop.f32.mrb[38].mxu1 }
 0x903   :  { %v11275_v54 = vpop.f32.mrb[39].mxu1  ;;  %9548 = vst.msk [vmem:[#allocation3] sm:$0x3] %vm9547_vm1, %v9542_v13 }
 0x904   :  { %11642 = shalt.err (!%p11639_p4)
}
 0x905   :  { %s11643_s8 = scalar_lea.hbm %s15204_s9, 32 }
 0x906   :  { %p11644_p5 = scmp.ne.s32.totalorder %s15204_s9, %s11643_s8  ;;  %p11647_p6 = scmp.lt.u32.totalorder %s11643_s8, %s15204_s9 }
 0x908   :  { %p11649_p7 = pnand %p11647_p6, %p11644_p5 }
 0x90a   :  { %11652 = shalt.err (!%p11649_p7)
}
 0x90b   :  { %9558 = dma.vmem_to_hbm [thread:$0]  %s9556_s18, 32, %s15204_s9, [#allocation4]  }
 0x90c   :  { %11653 = dma.done.wait [#allocation4], 32  }
 0x90d   :  { %11654 = vsyncadd [#allocation4], 4294967264 }
 0x90e   :  { %9562 = vsyncpa [#allocation4], 1 }

</bundles_post_ra>
